<compile_context>
chip_gen: v6e
topology: v6e:2x2x1
jax: 0.10.0
libtpu: 0.0.40
codegen_flags: <defaults>
</compile_context>

<pallas_src>
import jax
import jax.numpy as jnp
from jax.experimental import pallas as pl
from jax.experimental.pallas import tpu as pltpu

IN_FEATURES = 256 * 256     # 65536
HIDDEN = 512
OUT_FEATURES = 2

TK = 4096                        # K tile: 8 MiB f32 / 4 MiB bf16 of W1 per step
_NK_TOTAL = IN_FEATURES // TK    # 16
_NK_HALF = _NK_TOTAL // 2        # 8 reduction steps per K-half
VMEM_LIMIT = 24 << 20            # fits f32 double-buffered W1 tiles everywhere


def _layer1_kernel(x_ref, w1_ref, p_ref):
    """Partial x @ W1 for one half of the K reduction.

    grid = (2, _NK_HALF):
      axis 0 ("parallel"): splits the K range in two -> on v7x each TensorCore
        streams half of W1; on 1-TC v5e/v6e it simply serializes.
      axis 1 ("arbitrary"): K reduction within the half; the output block is the
        f32 accumulator, resident in VMEM across the reduction.
    """
    @pl.when(pl.program_id(1) == 0)
    def _():
        p_ref[...] = jnp.zeros_like(p_ref)

    p_ref[...] += jnp.dot(x_ref[...], w1_ref[...],
                          preferred_element_type=jnp.float32)


@jax.jit
def neural_network_forward(x, w1, b1, w2, b2, w3, b3):
    """x: (B, 256, 256) -> logits (B, 2) f32.

    W1 is streamed from HBM in the dtype it is passed in (pre-cast it to bf16
    once, outside this function, for ~2x less HBM traffic).  The layer-1
    accumulation and everything downstream stay f32.
    """
    B = x.shape[0]
    # nn.Flatten (row-major); matching x's dtype to W1's is a ~0.5 MiB cast.
    x_flat = x.reshape(B, -1).astype(w1.dtype)

    # --- Layer 1: stream W1 from HBM; K split across two parallel grid blocks.
    partials = pl.pallas_call(
        _layer1_kernel,
        out_shape=jax.ShapeDtypeStruct((B, 2 * HIDDEN), jnp.float32),
        grid_spec=pltpu.PrefetchScalarGridSpec(
            num_scalar_prefetch=0,
            grid=(2, _NK_HALF),
            in_specs=[
                pl.BlockSpec((B, TK), lambda j, k: (0, j * _NK_HALF + k)),       # x tile
                pl.BlockSpec((TK, HIDDEN), lambda j, k: (j * _NK_HALF + k, 0)),  # W1 tile
            ],
            out_specs=pl.BlockSpec((B, HIDDEN), lambda j, k: (0, j)),            # partial j
        ),
        compiler_params=pltpu.CompilerParams(
            dimension_semantics=("parallel", "arbitrary"),
            vmem_limit_bytes=VMEM_LIMIT,
        ),
    )(x_flat, w1)

    # --- Tail: <2 MiB of work; plain XLA ops (no second pallas_call, no padded
    # logits round-trip).  Correct regardless of which core produced each half.
    h1 = jnp.maximum(partials[:, :HIDDEN] + partials[:, HIDDEN:] + b1, 0.0)
    h2 = jnp.maximum(h1 @ w2 + b2, 0.0)
    return h2 @ w3 + b3


def init_params(key):
    """Deterministic init matching PyTorch Linear default (U[-1/sqrt(fan_in), +])."""
    ks = jax.random.split(key, 6)

    def lin(kw, kb, fan_in, fan_out):
        bound = 1.0 / jnp.sqrt(fan_in)
        w = jax.random.uniform(kw, (fan_in, fan_out), jnp.float32, -bound, bound)
        b = jax.random.uniform(kb, (fan_out,), jnp.float32, -bound, bound)
        return w, b

    w1, b1 = lin(ks[0], ks[1], IN_FEATURES, HIDDEN)
    w2, b2 = lin(ks[2], ks[3], HIDDEN, HIDDEN)
    w3, b3 = lin(ks[4], ks[5], HIDDEN, OUT_FEATURES)
    return w1, b1, w2, b2, w3, b3


def reference_forward(x, w1, b1, w2, b2, w3, b3):
    h = x.reshape(x.shape[0], -1)
    h = jnp.maximum(h @ w1 + b1, 0.0)
    h = jnp.maximum(h @ w2 + b2, 0.0)
    return h @ w3 + b3


if __name__ == "__main__":
    key = jax.random.PRNGKey(0)
    k_x, k_p = jax.random.split(key)

    B = 2
    x = jax.random.normal(k_x, (B, 256, 256), jnp.float32)
    w1, b1, w2, b2, w3, b3 = init_params(k_p)

    ref = reference_forward(x, w1, b1, w2, b2, w3, b3)

    # Full-precision path (exact PyTorch f32 semantics).
    logits_f32 = neural_network_forward(x, w1, b1, w2, b2, w3, b3)
    jax.block_until_ready(logits_f32)
    assert logits_f32.shape == (B, OUT_FEATURES)
    assert jnp.allclose(logits_f32, ref, atol=1e-3, rtol=1e-3), "f32 mismatch vs reference"

    # Recommended default fast path: W1 pre-cast to bf16 ONCE, outside the jitted
    # forward, so every call streams half the bytes (no per-call astype pass over
    # W1).  Logits can shift by ~1e-2 because the 65536-term layer-1 reduction is
    # fed bf16-rounded operands; accumulation remains f32.
    w1_bf16 = jax.device_put(w1.astype(jnp.bfloat16))
    jax.block_until_ready(w1_bf16)
    logits_bf16 = neural_network_forward(x, w1_bf16, b1, w2, b2, w3, b3)
    jax.block_until_ready(logits_bf16)
    assert logits_bf16.shape == (B, OUT_FEATURES)
    assert jnp.allclose(logits_bf16, ref, atol=5e-2, rtol=5e-2), "bf16 mismatch vs reference"

    print("KERNEL_OK")
</pallas_src>

<mosaic_0001>
module attributes {stable_mosaic.version = 11 : i64} {
  func.func @_layer1_kernel(%arg0: i32, %arg1: i32, %arg2: memref<2x4096xf32, #tpu.memory_space<vmem>>, %arg3: memref<4096x512xf32, #tpu.memory_space<vmem>>, %arg4: memref<2x512xf32, #tpu.memory_space<vmem>>) attributes {dimension_semantics = [#tpu.dimension_semantics<parallel>, #tpu.dimension_semantics<arbitrary>], iteration_bounds = array<i64: 2, 8>, scalar_prefetch = 0 : i64, scratch_operands = 0 : i64, tpu.core_type = #tpu.core_type<tc>, window_params = [{transform_indices = @transform_0, window_bounds = array<i64: 2, 4096>}, {transform_indices = @transform_1, window_bounds = array<i64: 4096, 512>}, {transform_indices = @transform_2, window_bounds = array<i64: 2, 512>}]} {
    %c0_i32 = arith.constant 0 : i32
    %0 = arith.cmpi eq, %arg1, %c0_i32 : i32
    %1 = arith.extui %0 : i1 to i32
    %c0_i32_0 = arith.constant 0 : i32
    %2 = arith.cmpi ne, %1, %c0_i32_0 : i32
    scf.if %2 {
      %cst_8 = arith.constant 0.000000e+00 : f32
      %9 = vector.broadcast %cst_8 : f32 to vector<2x512xf32>
      %c0_9 = arith.constant 0 : index
      %c0_10 = arith.constant 0 : index
      %10 = vector.load %arg4[%c0_9, %c0_10] : memref<2x512xf32, #tpu.memory_space<vmem>>, vector<2x512xf32>
      tpu.vector_store %arg4[%c0_9, %c0_10], %9 {strides = array<i32>} : memref<2x512xf32, #tpu.memory_space<vmem>>, vector<2x512xf32>,
    } else {
    }
    %c0 = arith.constant 0 : index
    %c0_1 = arith.constant 0 : index
    %3 = vector.load %arg4[%c0, %c0_1] : memref<2x512xf32, #tpu.memory_space<vmem>>, vector<2x512xf32>
    %c0_2 = arith.constant 0 : index
    %c0_3 = arith.constant 0 : index
    %4 = vector.load %arg2[%c0_2, %c0_3] : memref<2x4096xf32, #tpu.memory_space<vmem>>, vector<2x4096xf32>
    %c0_4 = arith.constant 0 : index
    %c0_5 = arith.constant 0 : index
    %5 = vector.load %arg3[%c0_4, %c0_5] : memref<4096x512xf32, #tpu.memory_space<vmem>>, vector<4096x512xf32>
    %cst = arith.constant dense<0.000000e+00> : vector<2x512xf32>
    %6 = tpu.matmul %4, %5, %cst {dimension_numbers = #tpu.dot_dimension_numbers<[1], [0], [0], [1], [0, 0, 1, 1], [], []>} : vector<2x4096xf32>, vector<4096x512xf32>, vector<2x512xf32> -> vector<2x512xf32>
    %7 = arith.addf %3, %6 : vector<2x512xf32>
    %c0_6 = arith.constant 0 : index
    %c0_7 = arith.constant 0 : index
    %8 = vector.load %arg4[%c0_6, %c0_7] : memref<2x512xf32, #tpu.memory_space<vmem>>, vector<2x512xf32>
    tpu.vector_store %arg4[%c0_6, %c0_7], %7 {strides = array<i32>} : memref<2x512xf32, #tpu.memory_space<vmem>>, vector<2x512xf32>,
    return
  }
  func.func @transform_0(%arg0: i32, %arg1: i32) -> (i32, i32) {
    %c8_i32 = arith.constant 8 : i32
    %0 = arith.muli %arg0, %c8_i32 : i32
    %1 = arith.addi %0, %arg1 : i32
    %c0_i32 = arith.constant 0 : i32
    %c0_i32_0 = arith.constant 0 : i32
    return %c0_i32, %1 : i32, i32
  }
  func.func @transform_1(%arg0: i32, %arg1: i32) -> (i32, i32) {
    %c8_i32 = arith.constant 8 : i32
    %0 = arith.muli %arg0, %c8_i32 : i32
    %1 = arith.addi %0, %arg1 : i32
    %c0_i32 = arith.constant 0 : i32
    %c0_i32_0 = arith.constant 0 : i32
    return %1, %c0_i32 : i32, i32
  }
  func.func @transform_2(%arg0: i32, %arg1: i32) -> (i32, i32) {
    %c0_i32 = arith.constant 0 : i32
    %c0_i32_0 = arith.constant 0 : i32
    return %c0_i32, %arg0 : i32, i32
  }
}

</mosaic_0001>

<bundles_post_ra>
// kernel: neural_network_forward.1
= control target key start
LH: loop header
LB: loop body
LE: loop exit
PB: predicated region body
PF: predicated region fallthrough
CT: control target
= control target key end

     0   :  { %7 = vsyncpa [#allocation3], 0  ;;  %s7480_s0 = inlined_call_operand.vmem [shape: f32[2,65536], index: 0, kind: input, shape index: {}]   ;;  %s7481_s1 = inlined_call_operand.hbm [shape: f32[65536,512], index: 1, kind: input, shape index: {}]   ;;  %s7482_s2 = inlined_call_operand.vmem [shape: f32[2,1024], index: 2, kind: output, shape index: {}]  }
   0x1   :  { %9 = vsyncpa [#allocation3 + $0x1], 0  ;;  %s5074_s9 = smov 0   ;;  %s5076_s10 = smov 0  }
   0x2   :  { %s5078_s11 = smov 0   ;;  %s5080_s12 = smov 0  }
   0x3   :  { %s5082_s13 = smov 0   ;;  %s5084_s14 = smov 0  }
   0x4   :  { %s5086_s15 = smov 0   ;;  %s5088_s16 = smov 0  }
   0x5 LB: > { %s4850_s17 = sadd.s32 4294967295, %s5052_s16   ;;  %s24_s18 = sadd.s32 1, %s5044_s14  ;;  %s5052_s16 = sphi %s5088_s16, %s15_s16   ;;  %s5048_s15 = sphi %s5086_s15, %s7492_s15   ;;  %s5044_s14 = sphi %s5084_s14, %s7491_s14   ;;  %s5040_s13 = sphi %s5082_s13, %s7490_s13   ;;  %s5036_s12 = sphi %s5080_s12, %s7489_s12   ;;  %s5032_s11 = sphi %s5078_s11, %s7488_s11   ;;  %s5028_s10 = sphi %s5076_s10, %s7487_s10   ;;  %s5024_s9 = sphi %s5074_s9, %s7486_s9  }
   0x6   : > { %p25_p0 = scmp.ge.s32.totalorder %s24_s18, 8  ;;  %s27_s19 = sadd.s32 1, %s5048_s15 }
   0x7   : > { %s4854_s20 = sshll.u32 %s5048_s15, 3  ;;  %s68_s21 = sadd.s32 1, %s5032_s11 }
   0x8   : > { %s7494_s18 = smov (%p25_p0, %s24_s18), 0  ;;  %s7496_s19 = smov (!%p25_p0, %s27_s19), %s5048_s15 }
   0x9   : > { %s62_s22 = sadd.s32 %s5044_s14, %s4854_s20  ;;  %p75_p1 = scmp.ne.s32.totalorder %s5032_s11, %s5028_s10 }
   0xa   : > { %p29_p2 = scmp.ge.s32.totalorder %s7496_s19, 2  ;;  %p76_p3 = scmp.eq.s32.totalorder %s5052_s16, 0 }
   0xb   : > { %p81_p4 = scmp.ne.s32.totalorder %s5028_s10, %s5024_s9  ;;  %p82_p5 = scmp.eq.s32.totalorder %s4850_s17, 0 }
   0xc   : > { %s7498_s19 = smov (%p29_p2, %s7496_s19), 0  ;;  %p5127_p6 = por %p76_p3, %p75_p1 }
   0xd   : > { %p5131_p7 = por %p82_p5, %p81_p4  ;;  %s4855_s25 = sshll.u32 %s7498_s19, 3 }
   0xe   : > { %s64_s26 = sadd.s32 %s4855_s25, %s7494_s18  ;;  %p4881_p8 = scmp.lt.s32.totalorder %s5052_s16, 16 }
   0xf   : > { %s65_s27 = ssub.s32 %s62_s22, %s64_s26  ;;  %s144_s28 = sand.u32 1, %s5032_s11  }
  0x10   : > { %p66_p9 = scmp.eq.s32.totalorder %s65_s27, 0  ;;  %s4858_s29 = sshll.u32 %s144_s28, 14 }
  0x11   : > { %s4874_s30 = sshll.u32 %s62_s22, 18  ;;  %s148_s7 = scalar_lea.vmem [#allocation2], %s4858_s29 }
  0x12   : > { %s5140_s3 = scalar_select %p66_p9, %s5032_s11, %s68_s21  }
  0x13   : > { %s157_s6 = scalar_lea.hbm %s7481_s1, %s4874_s30  ;;  %s158_s8 = sshll.u32 %s148_s7, 4  ;;  %s159_s8 = int_to_ptr.vmem [resolvable:$true] %s158_s8 }
  0x14   : > { %p5147_p10 = pnand %p4881_p8, %p5127_p6  ;;  %s145_s17 = scalar_lea.sflag [#allocation3], %s144_s28 }
  0x15   : > { %s4971_s20 = scalar_lea.vmem %s159_s8, 262144  ;;  %s5054_s21 = smov [#allocation2]  }
  0x16   : > { %p4960_p11 = pneg %p5147_p10  ;;  %p4972_p12 = scmp.ne.s32.totalorder %s159_s8, %s4971_s20 }
  0x17   : > { %s4976_s22 = sshll.u32 %s5054_s21, 4  ;;  %s4977_s22 = int_to_ptr.vmem [resolvable:$false] %s4976_s22 }
  0x18   : > { %p4974_p13 = pnand %p4972_p12, %p4960_p11  ;;  %s4978_s25 = scalar_lea.vmem %s4977_s22, 524288 }
  0x19   : > { %p4979_p1 = scmp.lt.s32.totalorder %s159_s8, %s4977_s22  ;;  %p4980_p2 = scmp.lt.s32.totalorder %s4978_s25, %s4971_s20 }
  0x1a   : > { %p4975_p0 = pneg %p4974_p13 }
  0x1b   : > { %p4981_p3 = por %p4980_p2, %p4979_p1 }
  0x1d   : > { %p4982_p4 = pnand %p4981_p3, %p4975_p0 }
  0x1f   : > { %4985 = shalt.err (!%p4982_p4)
}
  0x20   : > { %s5055_s23 = smov 512   ;;  %s5056_s26 = smov 32  }
  0x21   : > { %4880 = dma.hbm_to_vmem [thread:$0]  (!%p5147_p10), %s157_s6, 262144, %s159_s8, %s145_s17, %s5055_s23, %s5055_s23, %s5056_s26  }
  0x22   : > { %p4863_p5 = scmp.ge.s32.totalorder %s5052_s16, 1  ;;  %p166_p6 = scmp.lt.s32.totalorder %s5052_s16, 17 }
  0x24   : > { %p167_p8 = pnand %p4863_p5, %p166_p6 }
  0x25   : > { %s172_s27 = sand.u32 (!%p167_p8), 1, %s5028_s10  }
  0x26   : > { %170 = sbr.rel (%p167_p8) target bundleno = 1319 (0x527), region = 28  ;;  %s4864_s28 = sshll.u32 (!%p167_p8), %s172_s27, 14 }
  0x27   : > { %s173_s29 = scalar_lea.sflag (!%p167_p8), [#allocation3], %s172_s27  ;;  %s5158_s30 = scalar_lea.vmem (!%p167_p8), [#allocation2], %s4864_s28 }
  0x2b   : > { %5019 = dma.done.wait (%p5131_p7), %s173_s29, 262144  }
  0x2c   : > { %5021 = vsyncadd (%p5131_p7), %s173_s29, 4294705152  ;;  %s4865_s4 = sshll.u32 %s5040_s13, 3  ;;  %s4868_s5 = sshll.u32 %s5040_s13, 2 }
  0x2d   : > { %s205_s6 = sadd.s32 %s5036_s12, %s4865_s4  ;;  %p218_p9 = scmp.lt.s32.totalorder %s4868_s5, 7 }
  0x2e   : > { %s4866_s7 = sshll.u32 %s205_s6, 5  ;;  %p4870_p7 = scmp.ne.s32.totalorder %s5036_s12, 0 }
  0x2f   : > { %p207_p10 = scmp.lt.s32.totalorder %s4866_s7, 511  ;;  %s7500_s5 = smov (!%p218_p9, %s4868_s5), 7 }
  0x30   : > { %s4869_s8 = sshll.u32 %s7500_s5, 1  ;;  %226 = sbr.rel (%p4870_p7) target bundleno = 55 (0x37), region = 36 }
  0x31   : > { %s7502_s7 = smov (!%p207_p10, %s4866_s7), 511  ;;  %s5170_s21 = scalar_lea.vmem %s7482_s2, %s4869_s8 }
  0x32   : > { %s4867_s9 = sshll.u32 %s7502_s7, 1 }
  0x33   : > { %s5175_s25 = scalar_lea.vmem %s7480_s0, %s4867_s9 }
  0x35   : > { %v5057_v0 = vmov 0.0  }
  0x36   : > { %227 = vst [vmem:[%s5170_s21] sm:$0xff] %v5057_v0 }
  0x37 PF: > { %v298_v1 = vld [vmem:[%s5158_s30 + $0x1e8] sm:$0xff]  ;;  %v297_v3 = vld [vmem:[%s5158_s30 + $0x1e0] sm:$0xff] }
  0x38   : > { %v426_v2 = vld [vmem:[%s5158_s30 + $0x5e8] sm:$0xff]  ;;  %2461 = vmatprep.subr.mxu0 %v298_v1  ;;  %v425_v4 = vld [vmem:[%s5158_s30 + $0x5e0] sm:$0xff] }
  0x39   : > { %2532 = vmatprep.subr.mxu1 %v426_v2  ;;  %v294_v5 = vld [vmem:[%s5158_s30 + $0x1c8] sm:$0xff]  ;;  %2462 = vmatpush1.msra.mxu0 %v297_v3  ;;  %v293_v7 = vld [vmem:[%s5158_s30 + $0x1c0] sm:$0xff] }
  0x3a   : > { %v422_v6 = vld [vmem:[%s5158_s30 + $0x5c8] sm:$0xff]  ;;  %2533 = vmatpush1.msra.mxu1 %v425_v4  ;;  %v421_v8 = vld [vmem:[%s5158_s30 + $0x5c0] sm:$0xff]  ;;  %2463 = vmatprep.subr.mxu0 %v294_v5 }
  0x3b   : > { %v290_v9 = vld [vmem:[%s5158_s30 + $0x1a8] sm:$0xff]  ;;  %2534 = vmatprep.subr.mxu1 %v422_v6  ;;  %v289_v11 = vld [vmem:[%s5158_s30 + $0x1a0] sm:$0xff]  ;;  %2464 = vmatpush1.msra.mxu0 %v293_v7 }
  0x3c   : > { %v418_v10 = vld [vmem:[%s5158_s30 + $0x5a8] sm:$0xff]  ;;  %v417_v12 = vld [vmem:[%s5158_s30 + $0x5a0] sm:$0xff]  ;;  %2535 = vmatpush1.msra.mxu1 %v421_v8  ;;  %2465 = vmatprep.subr.mxu0 %v290_v9 }
  0x3d   : > { %v286_v13 = vld [vmem:[%s5158_s30 + $0x188] sm:$0xff]  ;;  %2536 = vmatprep.subr.mxu1 %v418_v10  ;;  %v285_v15 = vld [vmem:[%s5158_s30 + $0x180] sm:$0xff]  ;;  %2466 = vmatpush1.msra.mxu0 %v289_v11 }
  0x3e   : > { %v414_v14 = vld [vmem:[%s5158_s30 + $0x588] sm:$0xff]  ;;  %v413_v16 = vld [vmem:[%s5158_s30 + $0x580] sm:$0xff]  ;;  %2537 = vmatpush1.msra.mxu1 %v417_v12  ;;  %2467 = vmatprep.subr.mxu0 %v286_v13 }
  0x3f   : > { %v282_v17 = vld [vmem:[%s5158_s30 + $0x168] sm:$0xff]  ;;  %2538 = vmatprep.subr.mxu1 %v414_v14  ;;  %v281_v19 = vld [vmem:[%s5158_s30 + $0x160] sm:$0xff]  ;;  %2468 = vmatpush1.msra.mxu0 %v285_v15 }
  0x40   : > { %v410_v18 = vld [vmem:[%s5158_s30 + $0x568] sm:$0xff]  ;;  %v409_v20 = vld [vmem:[%s5158_s30 + $0x560] sm:$0xff]  ;;  %2539 = vmatpush1.msra.mxu1 %v413_v16  ;;  %2469 = vmatprep.subr.mxu0 %v282_v17 }
  0x41   : > { %v278_v21 = vld [vmem:[%s5158_s30 + $0x148] sm:$0xff]  ;;  %2540 = vmatprep.subr.mxu1 %v410_v18  ;;  %v277_v23 = vld [vmem:[%s5158_s30 + $0x140] sm:$0xff]  ;;  %2470 = vmatpush1.msra.mxu0 %v281_v19 }
  0x42   : > { %v406_v22 = vld [vmem:[%s5158_s30 + $0x548] sm:$0xff]  ;;  %v405_v24 = vld [vmem:[%s5158_s30 + $0x540] sm:$0xff]  ;;  %2541 = vmatpush1.msra.mxu1 %v409_v20  ;;  %2471 = vmatprep.subr.mxu0 %v278_v21 }
  0x43   : > { %v274_v25 = vld [vmem:[%s5158_s30 + $0x128] sm:$0xff]  ;;  %2542 = vmatprep.subr.mxu1 %v406_v22  ;;  %v273_v27 = vld [vmem:[%s5158_s30 + $0x120] sm:$0xff]  ;;  %2472 = vmatpush1.msra.mxu0 %v277_v23 }
  0x44   : > { %v402_v26 = vld [vmem:[%s5158_s30 + $0x528] sm:$0xff]  ;;  %v401_v28 = vld [vmem:[%s5158_s30 + $0x520] sm:$0xff]  ;;  %2543 = vmatpush1.msra.mxu1 %v405_v24  ;;  %2473 = vmatprep.subr.mxu0 %v274_v25 }
  0x45   : > { %v270_v29 = vld [vmem:[%s5158_s30 + $0x108] sm:$0xff]  ;;  %2544 = vmatprep.subr.mxu1 %v402_v26  ;;  %v269_v31 = vld [vmem:[%s5158_s30 + $0x100] sm:$0xff]  ;;  %2474 = vmatpush1.msra.mxu0 %v273_v27 }
  0x46   : > { %v398_v30 = vld [vmem:[%s5158_s30 + $0x508] sm:$0xff]  ;;  %v397_v32 = vld [vmem:[%s5158_s30 + $0x500] sm:$0xff]  ;;  %2545 = vmatpush1.msra.mxu1 %v401_v28  ;;  %2475 = vmatprep.subr.mxu0 %v270_v29 }
  0x47   : > { %v266_v33 = vld [vmem:[%s5158_s30 + $0xe8] sm:$0xff]  ;;  %2546 = vmatprep.subr.mxu1 %v398_v30  ;;  %v265_v35 = vld [vmem:[%s5158_s30 + $0xe0] sm:$0xff]  ;;  %2476 = vmatpush1.msra.mxu0 %v269_v31  ;;  %v5058_v31 = vmov 1983009808  }
  0x48   : > { %v394_v34 = vld [vmem:[%s5158_s30 + $0x4e8] sm:$0xff]  ;;  %v393_v36 = vld [vmem:[%s5158_s30 + $0x4e0] sm:$0xff]  ;;  %2547 = vmatpush1.msra.mxu1 %v397_v32  ;;  %2477 = vmatprep.subr.mxu0 %v266_v33  ;;  %v2295_v32 = vunpack.c.l.s4 %v5058_v31  ;;  %v2297_v33 = vlaneseq }
  0x49   : > { %v262_v37 = vld [vmem:[%s5158_s30 + $0xc8] sm:$0xff]  ;;  %2548 = vmatprep.subr.mxu1 %v394_v34  ;;  %v261_v39 = vld [vmem:[%s5158_s30 + $0xc0] sm:$0xff]  ;;  %2478 = vmatpush1.msra.mxu0 %v265_v35 }
  0x4a   : > { %v390_v38 = vld [vmem:[%s5158_s30 + $0x4c8] sm:$0xff]  ;;  %v389_v40 = vld [vmem:[%s5158_s30 + $0x4c0] sm:$0xff]  ;;  %2549 = vmatpush1.msra.mxu1 %v393_v36  ;;  %2479 = vmatprep.subr.mxu0 %v262_v37 }
  0x4b   : > { %v258_v41 = vld [vmem:[%s5158_s30 + $0xa8] sm:$0xff]  ;;  %2550 = vmatprep.subr.mxu1 %v390_v38  ;;  %v257_v43 = vld [vmem:[%s5158_s30 + $0xa0] sm:$0xff]  ;;  %2480 = vmatpush1.msra.mxu0 %v261_v39 }
  0x4c   : > { %v386_v42 = vld [vmem:[%s5158_s30 + $0x4a8] sm:$0xff]  ;;  %v385_v44 = vld [vmem:[%s5158_s30 + $0x4a0] sm:$0xff]  ;;  %2551 = vmatpush1.msra.mxu1 %v389_v40  ;;  %2481 = vmatprep.subr.mxu0 %v258_v41 }
  0x4d   : > { %v254_v45 = vld [vmem:[%s5158_s30 + $0x88] sm:$0xff]  ;;  %2552 = vmatprep.subr.mxu1 %v386_v42  ;;  %v253_v47 = vld [vmem:[%s5158_s30 + $0x80] sm:$0xff]  ;;  %2482 = vmatpush1.msra.mxu0 %v257_v43  ;;  %v2296_v42 = vunpack.c.0.s8 %v2295_v32  ;;  %v2298_v43 = vshrl.u32 %v2297_v33, 7 }
  0x4e   : > { %v382_v46 = vld [vmem:[%s5158_s30 + $0x488] sm:$0xff]  ;;  %v381_v48 = vld [vmem:[%s5158_s30 + $0x480] sm:$0xff]  ;;  %2553 = vmatpush1.msra.mxu1 %v385_v44  ;;  %2483 = vmatprep.subr.mxu0 %v254_v45 }
  0x4f   : > { %v250_v49 = vld [vmem:[%s5158_s30 + $0x68] sm:$0xff]  ;;  %2554 = vmatprep.subr.mxu1 %v382_v46  ;;  %v249_v51 = vld [vmem:[%s5158_s30 + $0x60] sm:$0xff]  ;;  %2484 = vmatpush1.msra.mxu0 %v253_v47 }
  0x50   : > { %v378_v50 = vld [vmem:[%s5158_s30 + $0x468] sm:$0xff]  ;;  %v377_v52 = vld [vmem:[%s5158_s30 + $0x460] sm:$0xff]  ;;  %2555 = vmatpush1.msra.mxu1 %v381_v48  ;;  %2485 = vmatprep.subr.mxu0 %v250_v49 }
  0x51   : > { %v246_v53 = vld [vmem:[%s5158_s30 + $0x48] sm:$0xff]  ;;  %2556 = vmatprep.subr.mxu1 %v378_v50  ;;  %v245_v55 = vld [vmem:[%s5158_s30 + $0x40] sm:$0xff]  ;;  %2486 = vmatpush1.msra.mxu0 %v249_v51 }
  0x52   : > { %v374_v54 = vld [vmem:[%s5158_s30 + $0x448] sm:$0xff]  ;;  %v373_v56 = vld [vmem:[%s5158_s30 + $0x440] sm:$0xff]  ;;  %2557 = vmatpush1.msra.mxu1 %v377_v52  ;;  %2487 = vmatprep.subr.mxu0 %v246_v53  ;;  %v5290_v53 = vsub.s32 %v2296_v42, %v2298_v43 }
  0x53   : > { %v242_v57 = vld [vmem:[%s5158_s30 + $0x28] sm:$0xff]  ;;  %2558 = vmatprep.subr.mxu1 %v374_v54  ;;  %v241_v59 = vld [vmem:[%s5158_s30 + $0x20] sm:$0xff]  ;;  %2488 = vmatpush1.msra.mxu0 %v245_v55 }
  0x54   : > { %v370_v58 = vld [vmem:[%s5158_s30 + $0x428] sm:$0xff]  ;;  %v369_v60 = vld [vmem:[%s5158_s30 + $0x420] sm:$0xff]  ;;  %2559 = vmatpush1.msra.mxu1 %v373_v56  ;;  %2489 = vmatprep.subr.mxu0 %v242_v57 }
  0x55   : > { %v238_v61 = vld [vmem:[%s5158_s30 + $0x8] sm:$0xff]  ;;  %2560 = vmatprep.subr.mxu1 %v370_v58  ;;  %v237_v63 = vld [vmem:[%s5158_s30] sm:$0xff]  ;;  %2490 = vmatpush1.msra.mxu0 %v241_v59 }
  0x56   : > { %v366_v62 = vld [vmem:[%s5158_s30 + $0x408] sm:$0xff]  ;;  %v365_v0 = vld [vmem:[%s5158_s30 + $0x400] sm:$0xff]  ;;  %2561 = vmatpush1.msra.mxu1 %v369_v60  ;;  %2491 = vmatprep.subr.mxu0 %v238_v61 }
  0x57   : > { %v362_v1 = vld [vmem:[%s5158_s30 + $0x3e8] sm:$0xff]  ;;  %2562 = vmatprep.subr.mxu1 %v366_v62  ;;  %v361_v3 = vld [vmem:[%s5158_s30 + $0x3e0] sm:$0xff]  ;;  %2492 = vmatpush1.msra.mxu0 %v237_v63 }
  0x58   : > { %v490_v2 = vld [vmem:[%s5158_s30 + $0x7e8] sm:$0xff]  ;;  %v489_v4 = vld [vmem:[%s5158_s30 + $0x7e0] sm:$0xff]  ;;  %2563 = vmatpush1.msra.mxu1 %v365_v0  ;;  %2493 = vmatprep.subr.mxu0 %v362_v1 }
  0x59   : > { %v358_v5 = vld [vmem:[%s5158_s30 + $0x3c8] sm:$0xff]  ;;  %2564 = vmatprep.subr.mxu1 %v490_v2  ;;  %v357_v7 = vld [vmem:[%s5158_s30 + $0x3c0] sm:$0xff]  ;;  %2494 = vmatpush2.msra.mxu0 %v361_v3 }
  0x5a   : > { %v486_v6 = vld [vmem:[%s5158_s30 + $0x7c8] sm:$0xff]  ;;  %v485_v8 = vld [vmem:[%s5158_s30 + $0x7c0] sm:$0xff]  ;;  %2565 = vmatpush2.msra.mxu1 %v489_v4  ;;  %2495 = vmatprep.subr.mxu0 %v358_v5 }
  0x5b   : > { %v354_v9 = vld [vmem:[%s5158_s30 + $0x3a8] sm:$0xff]  ;;  %2566 = vmatprep.subr.mxu1 %v486_v6  ;;  %v353_v11 = vld [vmem:[%s5158_s30 + $0x3a0] sm:$0xff]  ;;  %2496 = vmatpush2.msra.mxu0 %v357_v7 }
  0x5c   : > { %v482_v10 = vld [vmem:[%s5158_s30 + $0x7a8] sm:$0xff]  ;;  %v481_v12 = vld [vmem:[%s5158_s30 + $0x7a0] sm:$0xff]  ;;  %2567 = vmatpush2.msra.mxu1 %v485_v8  ;;  %2497 = vmatprep.subr.mxu0 %v354_v9 }
  0x5d   : > { %v350_v13 = vld [vmem:[%s5158_s30 + $0x388] sm:$0xff]  ;;  %2568 = vmatprep.subr.mxu1 %v482_v10  ;;  %v349_v15 = vld [vmem:[%s5158_s30 + $0x380] sm:$0xff]  ;;  %2498 = vmatpush2.msra.mxu0 %v353_v11 }
  0x5e   : > { %v478_v14 = vld [vmem:[%s5158_s30 + $0x788] sm:$0xff]  ;;  %v477_v16 = vld [vmem:[%s5158_s30 + $0x780] sm:$0xff]  ;;  %2569 = vmatpush2.msra.mxu1 %v481_v12  ;;  %2499 = vmatprep.subr.mxu0 %v350_v13 }
  0x5f   : > { %v346_v17 = vld [vmem:[%s5158_s30 + $0x368] sm:$0xff]  ;;  %2570 = vmatprep.subr.mxu1 %v478_v14  ;;  %v345_v19 = vld [vmem:[%s5158_s30 + $0x360] sm:$0xff]  ;;  %2500 = vmatpush2.msra.mxu0 %v349_v15 }
  0x60   : > { %v474_v18 = vld [vmem:[%s5158_s30 + $0x768] sm:$0xff]  ;;  %v473_v20 = vld [vmem:[%s5158_s30 + $0x760] sm:$0xff]  ;;  %2571 = vmatpush2.msra.mxu1 %v477_v16  ;;  %2501 = vmatprep.subr.mxu0 %v346_v17 }
  0x61   : > { %v342_v21 = vld [vmem:[%s5158_s30 + $0x348] sm:$0xff]  ;;  %2572 = vmatprep.subr.mxu1 %v474_v18  ;;  %v341_v23 = vld [vmem:[%s5158_s30 + $0x340] sm:$0xff]  ;;  %2502 = vmatpush2.msra.mxu0 %v345_v19 }
  0x62   : > { %v470_v22 = vld [vmem:[%s5158_s30 + $0x748] sm:$0xff]  ;;  %v469_v24 = vld [vmem:[%s5158_s30 + $0x740] sm:$0xff]  ;;  %2573 = vmatpush2.msra.mxu1 %v473_v20  ;;  %2503 = vmatprep.subr.mxu0 %v342_v21 }
  0x63   : > { %v338_v25 = vld [vmem:[%s5158_s30 + $0x328] sm:$0xff]  ;;  %2574 = vmatprep.subr.mxu1 %v470_v22  ;;  %v337_v27 = vld [vmem:[%s5158_s30 + $0x320] sm:$0xff]  ;;  %2504 = vmatpush2.msra.mxu0 %v341_v23 }
  0x64   : > { %v466_v26 = vld [vmem:[%s5158_s30 + $0x728] sm:$0xff]  ;;  %v465_v28 = vld [vmem:[%s5158_s30 + $0x720] sm:$0xff]  ;;  %2575 = vmatpush2.msra.mxu1 %v469_v24  ;;  %2505 = vmatprep.subr.mxu0 %v338_v25 }
  0x65   : > { %v334_v29 = vld [vmem:[%s5158_s30 + $0x308] sm:$0xff]  ;;  %2576 = vmatprep.subr.mxu1 %v466_v26  ;;  %v333_v34 = vld [vmem:[%s5158_s30 + $0x300] sm:$0xff]  ;;  %2506 = vmatpush2.msra.mxu0 %v337_v27 }
  0x66   : > { %v462_v30 = vld [vmem:[%s5158_s30 + $0x708] sm:$0xff]  ;;  %v461_v35 = vld [vmem:[%s5158_s30 + $0x700] sm:$0xff]  ;;  %2577 = vmatpush2.msra.mxu1 %v465_v28  ;;  %2507 = vmatprep.subr.mxu0 %v334_v29 }
  0x67   : > { %v330_v36 = vld [vmem:[%s5158_s30 + $0x2e8] sm:$0xff]  ;;  %2578 = vmatprep.subr.mxu1 %v462_v30  ;;  %v329_v38 = vld [vmem:[%s5158_s30 + $0x2e0] sm:$0xff]  ;;  %2508 = vmatpush2.msra.mxu0 %v333_v34 }
  0x68   : > { %v458_v37 = vld [vmem:[%s5158_s30 + $0x6e8] sm:$0xff]  ;;  %v457_v39 = vld [vmem:[%s5158_s30 + $0x6e0] sm:$0xff]  ;;  %2579 = vmatpush2.msra.mxu1 %v461_v35  ;;  %2509 = vmatprep.subr.mxu0 %v330_v36 }
  0x69   : > { %v326_v40 = vld [vmem:[%s5158_s30 + $0x2c8] sm:$0xff]  ;;  %2580 = vmatprep.subr.mxu1 %v458_v37  ;;  %v325_v44 = vld [vmem:[%s5158_s30 + $0x2c0] sm:$0xff]  ;;  %2510 = vmatpush2.msra.mxu0 %v329_v38 }
  0x6a   : > { %v454_v41 = vld [vmem:[%s5158_s30 + $0x6c8] sm:$0xff]  ;;  %v453_v45 = vld [vmem:[%s5158_s30 + $0x6c0] sm:$0xff]  ;;  %2581 = vmatpush2.msra.mxu1 %v457_v39  ;;  %2511 = vmatprep.subr.mxu0 %v326_v40 }
  0x6b   : > { %v322_v46 = vld [vmem:[%s5158_s30 + $0x2a8] sm:$0xff]  ;;  %v229_v48 = vld [vmem:[%s5175_s25] sm:$0xff]  ;;  %2582 = vmatprep.subr.mxu1 %v454_v41  ;;  %2512 = vmatpush2.msra.mxu0 %v325_v44 }
  0x6c   : > { %v450_v47 = vld [vmem:[%s5158_s30 + $0x6a8] sm:$0xff]  ;;  %v321_v49 = vld [vmem:[%s5158_s30 + $0x2a0] sm:$0xff]  ;;  %2583 = vmatpush2.msra.mxu1 %v453_v45  ;;  %2513 = vmatprep.subr.mxu0 %v322_v46  ;;  %v2293_v56 = vcombine.high %v229_v48, %v229_v48  ;;  %v5301_v63 = vrot.slane %v229_v48, %v5290_v53 }
  0x6d   : > { %v449_v50 = vld [vmem:[%s5158_s30 + $0x6a0] sm:$0xff]  ;;  %v318_v51 = vld [vmem:[%s5158_s30 + $0x288] sm:$0xff]  ;;  %2584 = vmatprep.subr.mxu1 %v450_v47  ;;  %2514 = vmatpush2.msra.mxu0 %v321_v49 }
  0x6e   : > { %v446_v52 = vld [vmem:[%s5158_s30 + $0x688] sm:$0xff]  ;;  %v317_v54 = vld [vmem:[%s5158_s30 + $0x280] sm:$0xff]  ;;  %2585 = vmatpush2.msra.mxu1 %v449_v50  ;;  %2515 = vmatprep.subr.mxu0 %v318_v51  ;;  %v5306_v2 = vrot.slane %v2293_v56, %v5290_v53  ;;  %v5316_v9 = vcombine.high %v5301_v63, %v5301_v63 }
  0x6f   : > { %v445_v55 = vld [vmem:[%s5158_s30 + $0x680] sm:$0xff]  ;;  %v314_v57 = vld [vmem:[%s5158_s30 + $0x268] sm:$0xff]  ;;  %2586 = vmatprep.subr.mxu1 %v446_v52  ;;  %2516 = vmatpush2.msra.mxu0 %v317_v54 }
  0x70   : > { %v442_v58 = vld [vmem:[%s5158_s30 + $0x668] sm:$0xff]  ;;  %v313_v59 = vld [vmem:[%s5158_s30 + $0x260] sm:$0xff]  ;;  %2587 = vmatpush2.msra.mxu1 %v445_v55  ;;  %2517 = vmatprep.subr.mxu0 %v314_v57  ;;  %v5321_v11 = vcombine.high %v5306_v2, %v5306_v2 }
  0x71   : > { %v441_v60 = vld [vmem:[%s5158_s30 + $0x660] sm:$0xff]  ;;  %v310_v61 = vld [vmem:[%s5158_s30 + $0x248] sm:$0xff]  ;;  %2588 = vmatprep.subr.mxu1 %v442_v58  ;;  %2518 = vmatpush2.msra.mxu0 %v313_v59 }
  0x72   : > { %v438_v62 = vld [vmem:[%s5158_s30 + $0x648] sm:$0xff]  ;;  %v309_v0 = vld [vmem:[%s5158_s30 + $0x240] sm:$0xff]  ;;  %2589 = vmatpush2.msra.mxu1 %v441_v60  ;;  %2519 = vmatprep.subr.mxu0 %v310_v61 }
  0x73   : > { %v437_v1 = vld [vmem:[%s5158_s30 + $0x640] sm:$0xff]  ;;  %v306_v3 = vld [vmem:[%s5158_s30 + $0x228] sm:$0xff]  ;;  %2590 = vmatprep.subr.mxu1 %v438_v62  ;;  %2520 = vmatpush2.msra.mxu0 %v309_v0 }
  0x74   : > { %v434_v4 = vld [vmem:[%s5158_s30 + $0x628] sm:$0xff]  ;;  %v305_v5 = vld [vmem:[%s5158_s30 + $0x220] sm:$0xff]  ;;  %2591 = vmatpush2.msra.mxu1 %v437_v1  ;;  %2521 = vmatprep.subr.mxu0 %v306_v3 }
  0x75   : > { %v433_v6 = vld [vmem:[%s5158_s30 + $0x620] sm:$0xff]  ;;  %v302_v7 = vld [vmem:[%s5158_s30 + $0x208] sm:$0xff]  ;;  %2592 = vmatprep.subr.mxu1 %v434_v4  ;;  %2522 = vmatpush2.msra.mxu0 %v305_v5 }
  0x76   : > { %v430_v8 = vld [vmem:[%s5158_s30 + $0x608] sm:$0xff]  ;;  %v301_v10 = vld [vmem:[%s5158_s30 + $0x200] sm:$0xff]  ;;  %2593 = vmatpush2.msra.mxu1 %v433_v6  ;;  %2523 = vmatprep.subr.mxu0 %v302_v7 }
  0x77   : > { %v429_v12 = vld [vmem:[%s5158_s30 + $0x600] sm:$0xff]  ;;  %2594 = vmatprep.subr.mxu1 %v430_v8  ;;  %2524 = vmatpush2.msra.mxu0 %v301_v10  ;;  %v554_v13 = vld [vmem:[%s5158_s30 + $0x9e8] sm:$0xff] }
  0x78   : > { %2525 = vmatprep.mubr.f32.mxu0 %v5316_v9  ;;  %v682_v14 = vld [vmem:[%s5158_s30 + $0xde8] sm:$0xff]  ;;  %2595 = vmatpush2.msra.mxu1 %v429_v12  ;;  %v553_v15 = vld [vmem:[%s5158_s30 + $0x9e0] sm:$0xff] }
  0x79   : > { %2596 = vmatprep.mubr.f32.mxu1 %v5321_v11  ;;  %v681_v16 = vld [vmem:[%s5158_s30 + $0xde0] sm:$0xff]  ;;  %2526 = vmatmul.mubr.f32.vlgmr.msra.gmra.mxu0 %v5301_v63  ;;  %v550_v17 = vld [vmem:[%s5158_s30 + $0x9c8] sm:$0xff] }
  0x7a   : > { %2597 = vmatmul.mubr.f32.vlgmr.msra.gmra.mxu1 %v5306_v2  ;;  %v678_v18 = vld [vmem:[%s5158_s30 + $0xdc8] sm:$0xff]  ;;  %2603 = vmatprep.subr.mxu0 %v554_v13  ;;  %v549_v19 = vld [vmem:[%s5158_s30 + $0x9c0] sm:$0xff] }
  0x7b   : > { %2674 = vmatprep.subr.mxu1 %v682_v14  ;;  %v677_v20 = vld [vmem:[%s5158_s30 + $0xdc0] sm:$0xff]  ;;  %2604 = vmatpush1.msra.mxu0 %v553_v15  ;;  %v546_v21 = vld [vmem:[%s5158_s30 + $0x9a8] sm:$0xff] }
  0x7c   : > { %2675 = vmatpush1.msra.mxu1 %v681_v16  ;;  %v674_v22 = vld [vmem:[%s5158_s30 + $0xda8] sm:$0xff]  ;;  %2605 = vmatprep.subr.mxu0 %v550_v17  ;;  %v545_v23 = vld [vmem:[%s5158_s30 + $0x9a0] sm:$0xff] }
  0x7d   : > { %2676 = vmatprep.subr.mxu1 %v678_v18  ;;  %v673_v24 = vld [vmem:[%s5158_s30 + $0xda0] sm:$0xff]  ;;  %2606 = vmatpush1.msra.mxu0 %v549_v19  ;;  %v542_v25 = vld [vmem:[%s5158_s30 + $0x988] sm:$0xff] }
  0x7e   : > { %2677 = vmatpush1.msra.mxu1 %v677_v20  ;;  %v670_v26 = vld [vmem:[%s5158_s30 + $0xd88] sm:$0xff]  ;;  %2607 = vmatprep.subr.mxu0 %v546_v21  ;;  %v541_v27 = vld [vmem:[%s5158_s30 + $0x980] sm:$0xff] }
  0x7f   : > { %2678 = vmatprep.subr.mxu1 %v674_v22  ;;  %v669_v28 = vld [vmem:[%s5158_s30 + $0xd80] sm:$0xff]  ;;  %2608 = vmatpush1.msra.mxu0 %v545_v23  ;;  %v538_v29 = vld [vmem:[%s5158_s30 + $0x968] sm:$0xff] }
  0x80   : > { %2679 = vmatpush1.msra.mxu1 %v673_v24  ;;  %v666_v30 = vld [vmem:[%s5158_s30 + $0xd68] sm:$0xff]  ;;  %2609 = vmatprep.subr.mxu0 %v542_v25  ;;  %v537_v31 = vld [vmem:[%s5158_s30 + $0x960] sm:$0xff] }
  0x81   : > { %2680 = vmatprep.subr.mxu1 %v670_v26  ;;  %v665_v32 = vld [vmem:[%s5158_s30 + $0xd60] sm:$0xff]  ;;  %2610 = vmatpush1.msra.mxu0 %v541_v27  ;;  %v534_v33 = vld [vmem:[%s5158_s30 + $0x948] sm:$0xff] }
  0x82   : > { %2681 = vmatpush1.msra.mxu1 %v669_v28  ;;  %v662_v34 = vld [vmem:[%s5158_s30 + $0xd48] sm:$0xff]  ;;  %2611 = vmatprep.subr.mxu0 %v538_v29  ;;  %v533_v35 = vld [vmem:[%s5158_s30 + $0x940] sm:$0xff] }
  0x83   : > { %2682 = vmatprep.subr.mxu1 %v666_v30  ;;  %v661_v36 = vld [vmem:[%s5158_s30 + $0xd40] sm:$0xff]  ;;  %2612 = vmatpush1.msra.mxu0 %v537_v31  ;;  %v530_v37 = vld [vmem:[%s5158_s30 + $0x928] sm:$0xff] }
  0x84   : > { %2683 = vmatpush1.msra.mxu1 %v665_v32  ;;  %v658_v38 = vld [vmem:[%s5158_s30 + $0xd28] sm:$0xff]  ;;  %2613 = vmatprep.subr.mxu0 %v534_v33  ;;  %v529_v39 = vld [vmem:[%s5158_s30 + $0x920] sm:$0xff] }
  0x85   : > { %2684 = vmatprep.subr.mxu1 %v662_v34  ;;  %v657_v40 = vld [vmem:[%s5158_s30 + $0xd20] sm:$0xff]  ;;  %2614 = vmatpush1.msra.mxu0 %v533_v35  ;;  %v526_v41 = vld [vmem:[%s5158_s30 + $0x908] sm:$0xff] }
  0x86   : > { %2685 = vmatpush1.msra.mxu1 %v661_v36  ;;  %v654_v42 = vld [vmem:[%s5158_s30 + $0xd08] sm:$0xff]  ;;  %2615 = vmatprep.subr.mxu0 %v530_v37  ;;  %v525_v43 = vld [vmem:[%s5158_s30 + $0x900] sm:$0xff] }
  0x87   : > { %2686 = vmatprep.subr.mxu1 %v658_v38  ;;  %v653_v44 = vld [vmem:[%s5158_s30 + $0xd00] sm:$0xff]  ;;  %2616 = vmatpush1.msra.mxu0 %v529_v39  ;;  %v522_v45 = vld [vmem:[%s5158_s30 + $0x8e8] sm:$0xff] }
  0x88   : > { %2687 = vmatpush1.msra.mxu1 %v657_v40  ;;  %v650_v46 = vld [vmem:[%s5158_s30 + $0xce8] sm:$0xff]  ;;  %2617 = vmatprep.subr.mxu0 %v526_v41  ;;  %v521_v47 = vld [vmem:[%s5158_s30 + $0x8e0] sm:$0xff] }
  0x89   : > { %2688 = vmatprep.subr.mxu1 %v654_v42  ;;  %v649_v48 = vld [vmem:[%s5158_s30 + $0xce0] sm:$0xff]  ;;  %2618 = vmatpush1.msra.mxu0 %v525_v43  ;;  %v518_v49 = vld [vmem:[%s5158_s30 + $0x8c8] sm:$0xff] }
  0x8a   : > { %2689 = vmatpush1.msra.mxu1 %v653_v44  ;;  %v646_v50 = vld [vmem:[%s5158_s30 + $0xcc8] sm:$0xff]  ;;  %2619 = vmatprep.subr.mxu0 %v522_v45  ;;  %v517_v51 = vld [vmem:[%s5158_s30 + $0x8c0] sm:$0xff] }
  0x8b   : > { %2690 = vmatprep.subr.mxu1 %v650_v46  ;;  %v645_v52 = vld [vmem:[%s5158_s30 + $0xcc0] sm:$0xff]  ;;  %2620 = vmatpush1.msra.mxu0 %v521_v47  ;;  %v514_v54 = vld [vmem:[%s5158_s30 + $0x8a8] sm:$0xff] }
  0x8c   : > { %2691 = vmatpush1.msra.mxu1 %v649_v48  ;;  %v642_v55 = vld [vmem:[%s5158_s30 + $0xca8] sm:$0xff]  ;;  %2621 = vmatprep.subr.mxu0 %v518_v49  ;;  %v513_v56 = vld [vmem:[%s5158_s30 + $0x8a0] sm:$0xff] }
  0x8d   : > { %2692 = vmatprep.subr.mxu1 %v646_v50  ;;  %v641_v57 = vld [vmem:[%s5158_s30 + $0xca0] sm:$0xff]  ;;  %2622 = vmatpush1.msra.mxu0 %v517_v51  ;;  %v510_v58 = vld [vmem:[%s5158_s30 + $0x888] sm:$0xff] }
  0x8e   : > { %2693 = vmatpush1.msra.mxu1 %v645_v52  ;;  %v638_v59 = vld [vmem:[%s5158_s30 + $0xc88] sm:$0xff]  ;;  %2623 = vmatprep.subr.mxu0 %v514_v54  ;;  %v509_v60 = vld [vmem:[%s5158_s30 + $0x880] sm:$0xff] }
  0x8f   : > { %2694 = vmatprep.subr.mxu1 %v642_v55  ;;  %v637_v61 = vld [vmem:[%s5158_s30 + $0xc80] sm:$0xff]  ;;  %2624 = vmatpush1.msra.mxu0 %v513_v56  ;;  %v506_v62 = vld [vmem:[%s5158_s30 + $0x868] sm:$0xff] }
  0x90   : > { %2695 = vmatpush1.msra.mxu1 %v641_v57  ;;  %v634_v0 = vld [vmem:[%s5158_s30 + $0xc68] sm:$0xff]  ;;  %2625 = vmatprep.subr.mxu0 %v510_v58  ;;  %v505_v1 = vld [vmem:[%s5158_s30 + $0x860] sm:$0xff] }
  0x91   : > { %2696 = vmatprep.subr.mxu1 %v638_v59  ;;  %v633_v3 = vld [vmem:[%s5158_s30 + $0xc60] sm:$0xff]  ;;  %2626 = vmatpush1.msra.mxu0 %v509_v60  ;;  %v502_v4 = vld [vmem:[%s5158_s30 + $0x848] sm:$0xff] }
  0x92   : > { %2697 = vmatpush1.msra.mxu1 %v637_v61  ;;  %v630_v5 = vld [vmem:[%s5158_s30 + $0xc48] sm:$0xff]  ;;  %2627 = vmatprep.subr.mxu0 %v506_v62  ;;  %v501_v6 = vld [vmem:[%s5158_s30 + $0x840] sm:$0xff] }
  0x93   : > { %2698 = vmatprep.subr.mxu1 %v634_v0  ;;  %v629_v7 = vld [vmem:[%s5158_s30 + $0xc40] sm:$0xff]  ;;  %2628 = vmatpush1.msra.mxu0 %v505_v1  ;;  %v498_v8 = vld [vmem:[%s5158_s30 + $0x828] sm:$0xff] }
  0x94   : > { %2699 = vmatpush1.msra.mxu1 %v633_v3  ;;  %v626_v10 = vld [vmem:[%s5158_s30 + $0xc28] sm:$0xff]  ;;  %2629 = vmatprep.subr.mxu0 %v502_v4  ;;  %v497_v12 = vld [vmem:[%s5158_s30 + $0x820] sm:$0xff] }
  0x95   : > { %2700 = vmatprep.subr.mxu1 %v630_v5  ;;  %v625_v13 = vld [vmem:[%s5158_s30 + $0xc20] sm:$0xff]  ;;  %2630 = vmatpush1.msra.mxu0 %v501_v6  ;;  %v494_v14 = vld [vmem:[%s5158_s30 + $0x808] sm:$0xff] }
  0x96   : > { %2701 = vmatpush1.msra.mxu1 %v629_v7  ;;  %v622_v15 = vld [vmem:[%s5158_s30 + $0xc08] sm:$0xff]  ;;  %2631 = vmatprep.subr.mxu0 %v498_v8  ;;  %v493_v16 = vld [vmem:[%s5158_s30 + $0x800] sm:$0xff] }
  0x97   : > { %2702 = vmatprep.subr.mxu1 %v626_v10  ;;  %v621_v17 = vld [vmem:[%s5158_s30 + $0xc00] sm:$0xff]  ;;  %2632 = vmatpush1.msra.mxu0 %v497_v12  ;;  %v618_v18 = vld [vmem:[%s5158_s30 + $0xbe8] sm:$0xff] }
  0x98   : > { %2703 = vmatpush1.msra.mxu1 %v625_v13  ;;  %v746_v19 = vld [vmem:[%s5158_s30 + $0xfe8] sm:$0xff]  ;;  %2633 = vmatprep.subr.mxu0 %v494_v14  ;;  %v617_v20 = vld [vmem:[%s5158_s30 + $0xbe0] sm:$0xff] }
  0x99   : > { %2704 = vmatprep.subr.mxu1 %v622_v15  ;;  %v745_v21 = vld [vmem:[%s5158_s30 + $0xfe0] sm:$0xff]  ;;  %2634 = vmatpush1.msra.mxu0 %v493_v16  ;;  %v614_v22 = vld [vmem:[%s5158_s30 + $0xbc8] sm:$0xff] }
  0x9a   : > { %2705 = vmatpush1.msra.mxu1 %v621_v17  ;;  %v742_v23 = vld [vmem:[%s5158_s30 + $0xfc8] sm:$0xff]  ;;  %2635 = vmatprep.subr.mxu0 %v618_v18  ;;  %v613_v24 = vld [vmem:[%s5158_s30 + $0xbc0] sm:$0xff] }
  0x9b   : > { %2706 = vmatprep.subr.mxu1 %v746_v19  ;;  %v741_v25 = vld [vmem:[%s5158_s30 + $0xfc0] sm:$0xff]  ;;  %2636 = vmatpush2.msra.mxu0 %v617_v20  ;;  %v610_v26 = vld [vmem:[%s5158_s30 + $0xba8] sm:$0xff] }
  0x9c   : > { %2707 = vmatpush2.msra.mxu1 %v745_v21  ;;  %v738_v27 = vld [vmem:[%s5158_s30 + $0xfa8] sm:$0xff]  ;;  %2637 = vmatprep.subr.mxu0 %v614_v22  ;;  %v609_v28 = vld [vmem:[%s5158_s30 + $0xba0] sm:$0xff] }
  0x9d   : > { %2708 = vmatprep.subr.mxu1 %v742_v23  ;;  %v737_v29 = vld [vmem:[%s5158_s30 + $0xfa0] sm:$0xff]  ;;  %2638 = vmatpush2.msra.mxu0 %v613_v24  ;;  %v606_v30 = vld [vmem:[%s5158_s30 + $0xb88] sm:$0xff] }
  0x9e   : > { %2709 = vmatpush2.msra.mxu1 %v741_v25  ;;  %v734_v31 = vld [vmem:[%s5158_s30 + $0xf88] sm:$0xff]  ;;  %2639 = vmatprep.subr.mxu0 %v610_v26  ;;  %v605_v32 = vld [vmem:[%s5158_s30 + $0xb80] sm:$0xff] }
  0x9f   : > { %2710 = vmatprep.subr.mxu1 %v738_v27  ;;  %v733_v33 = vld [vmem:[%s5158_s30 + $0xf80] sm:$0xff]  ;;  %2640 = vmatpush2.msra.mxu0 %v609_v28  ;;  %v602_v34 = vld [vmem:[%s5158_s30 + $0xb68] sm:$0xff] }
  0xa0   : > { %2711 = vmatpush2.msra.mxu1 %v737_v29  ;;  %v730_v35 = vld [vmem:[%s5158_s30 + $0xf68] sm:$0xff]  ;;  %2641 = vmatprep.subr.mxu0 %v606_v30  ;;  %v601_v36 = vld [vmem:[%s5158_s30 + $0xb60] sm:$0xff] }
  0xa1   : > { %2712 = vmatprep.subr.mxu1 %v734_v31  ;;  %v729_v37 = vld [vmem:[%s5158_s30 + $0xf60] sm:$0xff]  ;;  %2642 = vmatpush2.msra.mxu0 %v605_v32  ;;  %v598_v38 = vld [vmem:[%s5158_s30 + $0xb48] sm:$0xff] }
  0xa2   : > { %2713 = vmatpush2.msra.mxu1 %v733_v33  ;;  %v726_v39 = vld [vmem:[%s5158_s30 + $0xf48] sm:$0xff]  ;;  %2643 = vmatprep.subr.mxu0 %v602_v34  ;;  %v597_v40 = vld [vmem:[%s5158_s30 + $0xb40] sm:$0xff] }
  0xa3   : > { %2714 = vmatprep.subr.mxu1 %v730_v35  ;;  %v725_v41 = vld [vmem:[%s5158_s30 + $0xf40] sm:$0xff]  ;;  %2644 = vmatpush2.msra.mxu0 %v601_v36  ;;  %v594_v42 = vld [vmem:[%s5158_s30 + $0xb28] sm:$0xff] }
  0xa4   : > { %2715 = vmatpush2.msra.mxu1 %v729_v37  ;;  %v722_v43 = vld [vmem:[%s5158_s30 + $0xf28] sm:$0xff]  ;;  %2645 = vmatprep.subr.mxu0 %v598_v38  ;;  %v593_v44 = vld [vmem:[%s5158_s30 + $0xb20] sm:$0xff] }
  0xa5   : > { %2716 = vmatprep.subr.mxu1 %v726_v39  ;;  %v721_v45 = vld [vmem:[%s5158_s30 + $0xf20] sm:$0xff]  ;;  %2646 = vmatpush2.msra.mxu0 %v597_v40  ;;  %v590_v46 = vld [vmem:[%s5158_s30 + $0xb08] sm:$0xff] }
  0xa6   : > { %2717 = vmatpush2.msra.mxu1 %v725_v41  ;;  %v718_v47 = vld [vmem:[%s5158_s30 + $0xf08] sm:$0xff]  ;;  %2647 = vmatprep.subr.mxu0 %v594_v42  ;;  %v589_v48 = vld [vmem:[%s5158_s30 + $0xb00] sm:$0xff] }
  0xa7   : > { %2718 = vmatprep.subr.mxu1 %v722_v43  ;;  %v717_v49 = vld [vmem:[%s5158_s30 + $0xf00] sm:$0xff]  ;;  %2648 = vmatpush2.msra.mxu0 %v593_v44  ;;  %v586_v50 = vld [vmem:[%s5158_s30 + $0xae8] sm:$0xff] }
  0xa8   : > { %2719 = vmatpush2.msra.mxu1 %v721_v45  ;;  %v714_v51 = vld [vmem:[%s5158_s30 + $0xee8] sm:$0xff]  ;;  %2649 = vmatprep.subr.mxu0 %v590_v46  ;;  %v585_v52 = vld [vmem:[%s5158_s30 + $0xae0] sm:$0xff] }
  0xa9   : > { %2720 = vmatprep.subr.mxu1 %v718_v47  ;;  %v713_v54 = vld [vmem:[%s5158_s30 + $0xee0] sm:$0xff]  ;;  %2650 = vmatpush2.msra.mxu0 %v589_v48  ;;  %v582_v55 = vld [vmem:[%s5158_s30 + $0xac8] sm:$0xff] }
  0xaa   : > { %2721 = vmatpush2.msra.mxu1 %v717_v49  ;;  %v710_v56 = vld [vmem:[%s5158_s30 + $0xec8] sm:$0xff]  ;;  %2651 = vmatprep.subr.mxu0 %v586_v50  ;;  %v581_v57 = vld [vmem:[%s5158_s30 + $0xac0] sm:$0xff] }
  0xab   : > { %2722 = vmatprep.subr.mxu1 %v714_v51  ;;  %v709_v58 = vld [vmem:[%s5158_s30 + $0xec0] sm:$0xff]  ;;  %2652 = vmatpush2.msra.mxu0 %v585_v52  ;;  %v578_v59 = vld [vmem:[%s5158_s30 + $0xaa8] sm:$0xff] }
  0xac   : > { %2723 = vmatpush2.msra.mxu1 %v713_v54  ;;  %v706_v60 = vld [vmem:[%s5158_s30 + $0xea8] sm:$0xff]  ;;  %2653 = vmatprep.subr.mxu0 %v582_v55  ;;  %v577_v61 = vld [vmem:[%s5158_s30 + $0xaa0] sm:$0xff] }
  0xad   : > { %2724 = vmatprep.subr.mxu1 %v710_v56  ;;  %v705_v62 = vld [vmem:[%s5158_s30 + $0xea0] sm:$0xff]  ;;  %v230_v0 = vld [vmem:[%s5175_s25 + $0x8] sm:$0xff]  ;;  %2654 = vmatpush2.msra.mxu0 %v581_v57 }
  0xae   : > { %2725 = vmatpush2.msra.mxu1 %v709_v58  ;;  %v574_v1 = vld [vmem:[%s5158_s30 + $0xa88] sm:$0xff]  ;;  %2655 = vmatprep.subr.mxu0 %v578_v59  ;;  %v573_v4 = vld [vmem:[%s5158_s30 + $0xa80] sm:$0xff]  ;;  %v2310_v8 = vcombine.high %v230_v0, %v230_v0  ;;  %v5448_v15 = vrot.slane %v230_v0, %v5290_v53 }
  0xaf   : > { %v702_v3 = vld [vmem:[%s5158_s30 + $0xe88] sm:$0xff]  ;;  %2726 = vmatprep.subr.mxu1 %v706_v60  ;;  %v701_v5 = vld [vmem:[%s5158_s30 + $0xe80] sm:$0xff]  ;;  %2656 = vmatpush2.msra.mxu0 %v577_v61 }
  0xb0   : > { %2727 = vmatpush2.msra.mxu1 %v705_v62  ;;  %v570_v6 = vld [vmem:[%s5158_s30 + $0xa68] sm:$0xff]  ;;  %2657 = vmatprep.subr.mxu0 %v574_v1  ;;  %v569_v10 = vld [vmem:[%s5158_s30 + $0xa60] sm:$0xff]  ;;  %v5455_v20 = vrot.slane %v2310_v8, %v5290_v53  ;;  %v5463_v25 = vcombine.high %v5448_v15, %v5448_v15 }
  0xb1   : > { %v698_v7 = vld [vmem:[%s5158_s30 + $0xe68] sm:$0xff]  ;;  %2728 = vmatprep.subr.mxu1 %v702_v3  ;;  %v697_v12 = vld [vmem:[%s5158_s30 + $0xe60] sm:$0xff]  ;;  %2658 = vmatpush2.msra.mxu0 %v573_v4 }
  0xb2   : > { %2729 = vmatpush2.msra.mxu1 %v701_v5  ;;  %v566_v13 = vld [vmem:[%s5158_s30 + $0xa48] sm:$0xff]  ;;  %2659 = vmatprep.subr.mxu0 %v570_v6  ;;  %v565_v16 = vld [vmem:[%s5158_s30 + $0xa40] sm:$0xff]  ;;  %v5469_v28 = vcombine.high %v5455_v20, %v5455_v20 }
  0xb3   : > { %v694_v14 = vld [vmem:[%s5158_s30 + $0xe48] sm:$0xff]  ;;  %2730 = vmatprep.subr.mxu1 %v698_v7  ;;  %v693_v17 = vld [vmem:[%s5158_s30 + $0xe40] sm:$0xff]  ;;  %2660 = vmatpush2.msra.mxu0 %v569_v10 }
  0xb4   : > { %2731 = vmatpush2.msra.mxu1 %v697_v12  ;;  %v562_v18 = vld [vmem:[%s5158_s30 + $0xa28] sm:$0xff]  ;;  %2661 = vmatprep.subr.mxu0 %v566_v13  ;;  %v561_v21 = vld [vmem:[%s5158_s30 + $0xa20] sm:$0xff] }
  0xb5   : > { %v690_v19 = vld [vmem:[%s5158_s30 + $0xe28] sm:$0xff]  ;;  %2732 = vmatprep.subr.mxu1 %v694_v14  ;;  %v689_v22 = vld [vmem:[%s5158_s30 + $0xe20] sm:$0xff]  ;;  %2662 = vmatpush2.msra.mxu0 %v565_v16 }
  0xb6   : > { %2733 = vmatpush2.msra.mxu1 %v693_v17  ;;  %v558_v23 = vld [vmem:[%s5158_s30 + $0xa08] sm:$0xff]  ;;  %2663 = vmatprep.subr.mxu0 %v562_v18  ;;  %v557_v26 = vld [vmem:[%s5158_s30 + $0xa00] sm:$0xff] }
  0xb7   : > { %v686_v24 = vld [vmem:[%s5158_s30 + $0xe08] sm:$0xff]  ;;  %2734 = vmatprep.subr.mxu1 %v690_v19  ;;  %2664 = vmatpush2.msra.mxu0 %v561_v21  ;;  %v685_v27 = vld [vmem:[%s5158_s30 + $0xe00] sm:$0xff] }
  0xb8   : > { %2735 = vmatpush2.msra.mxu1 %v689_v22  ;;  %2665 = vmatprep.subr.mxu0 %v558_v23  ;;  %v810_v29 = vld [vmem:[%s5158_s30 + $0x11e8] sm:$0xff]  ;;  %v809_v31 = vld [vmem:[%s5158_s30 + $0x11e0] sm:$0xff] }
  0xb9   : > { %2736 = vmatprep.subr.mxu1 %v686_v24  ;;  %2666 = vmatpush2.msra.mxu0 %v557_v26  ;;  %v938_v30 = vld [vmem:[%s5158_s30 + $0x15e8] sm:$0xff]  ;;  %v937_v32 = vld [vmem:[%s5158_s30 + $0x15e0] sm:$0xff] }
  0xba   : > { %2667 = vmatprep.mubr.f32.mxu0 %v5463_v25  ;;  %2737 = vmatpush2.msra.mxu1 %v685_v27  ;;  %v806_v33 = vld [vmem:[%s5158_s30 + $0x11c8] sm:$0xff]  ;;  %v805_v35 = vld [vmem:[%s5158_s30 + $0x11c0] sm:$0xff] }
  0xbb   : > { %2668 = vmatmul.mubr.f32.vlgmr.msra.gmra.mxu0 %v5448_v15  ;;  %2738 = vmatprep.mubr.f32.mxu1 %v5469_v28  ;;  %v934_v34 = vld [vmem:[%s5158_s30 + $0x15c8] sm:$0xff]  ;;  %v933_v36 = vld [vmem:[%s5158_s30 + $0x15c0] sm:$0xff] }
  0xbc   : > { %2745 = vmatprep.subr.mxu0 %v810_v29  ;;  %2816 = vmatprep.subr.mxu1 %v938_v30  ;;  %v802_v37 = vld [vmem:[%s5158_s30 + $0x11a8] sm:$0xff]  ;;  %v801_v39 = vld [vmem:[%s5158_s30 + $0x11a0] sm:$0xff] }
  0xbd   : > { %2739 = vmatmul.mubr.f32.vlgmr.msra.gmra.mxu1 %v5455_v20  ;;  %2746 = vmatpush1.msra.mxu0 %v809_v31  ;;  %v930_v38 = vld [vmem:[%s5158_s30 + $0x15a8] sm:$0xff]  ;;  %v929_v40 = vld [vmem:[%s5158_s30 + $0x15a0] sm:$0xff] }
  0xbe   : > { %2817 = vmatpush1.msra.mxu1 %v937_v32  ;;  %2747 = vmatprep.subr.mxu0 %v806_v33  ;;  %v798_v41 = vld [vmem:[%s5158_s30 + $0x1188] sm:$0xff]  ;;  %v797_v43 = vld [vmem:[%s5158_s30 + $0x1180] sm:$0xff] }
  0xbf   : > { %2818 = vmatprep.subr.mxu1 %v934_v34  ;;  %2748 = vmatpush1.msra.mxu0 %v805_v35  ;;  %v926_v42 = vld [vmem:[%s5158_s30 + $0x1588] sm:$0xff]  ;;  %v925_v44 = vld [vmem:[%s5158_s30 + $0x1580] sm:$0xff] }
  0xc0   : > { %2819 = vmatpush1.msra.mxu1 %v933_v36  ;;  %2749 = vmatprep.subr.mxu0 %v802_v37  ;;  %v794_v45 = vld [vmem:[%s5158_s30 + $0x1168] sm:$0xff]  ;;  %v793_v47 = vld [vmem:[%s5158_s30 + $0x1160] sm:$0xff] }
  0xc1   : > { %2820 = vmatprep.subr.mxu1 %v930_v38  ;;  %2750 = vmatpush1.msra.mxu0 %v801_v39  ;;  %v922_v46 = vld [vmem:[%s5158_s30 + $0x1568] sm:$0xff]  ;;  %v921_v48 = vld [vmem:[%s5158_s30 + $0x1560] sm:$0xff] }
  0xc2   : > { %2821 = vmatpush1.msra.mxu1 %v929_v40  ;;  %2751 = vmatprep.subr.mxu0 %v798_v41  ;;  %v790_v49 = vld [vmem:[%s5158_s30 + $0x1148] sm:$0xff]  ;;  %v789_v51 = vld [vmem:[%s5158_s30 + $0x1140] sm:$0xff] }
  0xc3   : > { %2822 = vmatprep.subr.mxu1 %v926_v42  ;;  %2752 = vmatpush1.msra.mxu0 %v797_v43  ;;  %v918_v50 = vld [vmem:[%s5158_s30 + $0x1548] sm:$0xff]  ;;  %v917_v52 = vld [vmem:[%s5158_s30 + $0x1540] sm:$0xff] }
  0xc4   : > { %2823 = vmatpush1.msra.mxu1 %v925_v44  ;;  %2753 = vmatprep.subr.mxu0 %v794_v45  ;;  %v786_v54 = vld [vmem:[%s5158_s30 + $0x1128] sm:$0xff]  ;;  %v785_v56 = vld [vmem:[%s5158_s30 + $0x1120] sm:$0xff] }
  0xc5   : > { %2824 = vmatprep.subr.mxu1 %v922_v46  ;;  %2754 = vmatpush1.msra.mxu0 %v793_v47  ;;  %v914_v55 = vld [vmem:[%s5158_s30 + $0x1528] sm:$0xff]  ;;  %v913_v57 = vld [vmem:[%s5158_s30 + $0x1520] sm:$0xff] }
  0xc6   : > { %2825 = vmatpush1.msra.mxu1 %v921_v48  ;;  %2755 = vmatprep.subr.mxu0 %v790_v49  ;;  %v782_v58 = vld [vmem:[%s5158_s30 + $0x1108] sm:$0xff]  ;;  %v781_v60 = vld [vmem:[%s5158_s30 + $0x1100] sm:$0xff] }
  0xc7   : > { %2826 = vmatprep.subr.mxu1 %v918_v50  ;;  %2756 = vmatpush1.msra.mxu0 %v789_v51  ;;  %v910_v59 = vld [vmem:[%s5158_s30 + $0x1508] sm:$0xff]  ;;  %v909_v61 = vld [vmem:[%s5158_s30 + $0x1500] sm:$0xff] }
  0xc8   : > { %2827 = vmatpush1.msra.mxu1 %v917_v52  ;;  %2757 = vmatprep.subr.mxu0 %v786_v54  ;;  %v778_v62 = vld [vmem:[%s5158_s30 + $0x10e8] sm:$0xff]  ;;  %v777_v1 = vld [vmem:[%s5158_s30 + $0x10e0] sm:$0xff] }
  0xc9   : > { %2828 = vmatprep.subr.mxu1 %v914_v55  ;;  %2758 = vmatpush1.msra.mxu0 %v785_v56  ;;  %v906_v0 = vld [vmem:[%s5158_s30 + $0x14e8] sm:$0xff]  ;;  %v905_v3 = vld [vmem:[%s5158_s30 + $0x14e0] sm:$0xff] }
  0xca   : > { %2829 = vmatpush1.msra.mxu1 %v913_v57  ;;  %2759 = vmatprep.subr.mxu0 %v782_v58  ;;  %v774_v4 = vld [vmem:[%s5158_s30 + $0x10c8] sm:$0xff]  ;;  %v773_v6 = vld [vmem:[%s5158_s30 + $0x10c0] sm:$0xff] }
  0xcb   : > { %2830 = vmatprep.subr.mxu1 %v910_v59  ;;  %2760 = vmatpush1.msra.mxu0 %v781_v60  ;;  %v902_v5 = vld [vmem:[%s5158_s30 + $0x14c8] sm:$0xff]  ;;  %v901_v7 = vld [vmem:[%s5158_s30 + $0x14c0] sm:$0xff] }
  0xcc   : > { %2831 = vmatpush1.msra.mxu1 %v909_v61  ;;  %2761 = vmatprep.subr.mxu0 %v778_v62  ;;  %v770_v8 = vld [vmem:[%s5158_s30 + $0x10a8] sm:$0xff]  ;;  %v769_v12 = vld [vmem:[%s5158_s30 + $0x10a0] sm:$0xff] }
  0xcd   : > { %2832 = vmatprep.subr.mxu1 %v906_v0  ;;  %2762 = vmatpush1.msra.mxu0 %v777_v1  ;;  %v898_v10 = vld [vmem:[%s5158_s30 + $0x14a8] sm:$0xff]  ;;  %v897_v13 = vld [vmem:[%s5158_s30 + $0x14a0] sm:$0xff] }
  0xce   : > { %2833 = vmatpush1.msra.mxu1 %v905_v3  ;;  %2763 = vmatprep.subr.mxu0 %v774_v4  ;;  %v766_v14 = vld [vmem:[%s5158_s30 + $0x1088] sm:$0xff]  ;;  %v765_v17 = vld [vmem:[%s5158_s30 + $0x1080] sm:$0xff] }
  0xcf   : > { %2834 = vmatprep.subr.mxu1 %v902_v5  ;;  %2764 = vmatpush1.msra.mxu0 %v773_v6  ;;  %v894_v16 = vld [vmem:[%s5158_s30 + $0x1488] sm:$0xff]  ;;  %v893_v18 = vld [vmem:[%s5158_s30 + $0x1480] sm:$0xff] }
  0xd0   : > { %2835 = vmatpush1.msra.mxu1 %v901_v7  ;;  %2765 = vmatprep.subr.mxu0 %v770_v8  ;;  %v762_v19 = vld [vmem:[%s5158_s30 + $0x1068] sm:$0xff]  ;;  %v761_v22 = vld [vmem:[%s5158_s30 + $0x1060] sm:$0xff] }
  0xd1   : > { %2836 = vmatprep.subr.mxu1 %v898_v10  ;;  %2766 = vmatpush1.msra.mxu0 %v769_v12  ;;  %v890_v21 = vld [vmem:[%s5158_s30 + $0x1468] sm:$0xff]  ;;  %v889_v23 = vld [vmem:[%s5158_s30 + $0x1460] sm:$0xff] }
  0xd2   : > { %2837 = vmatpush1.msra.mxu1 %v897_v13  ;;  %2767 = vmatprep.subr.mxu0 %v766_v14  ;;  %v758_v24 = vld [vmem:[%s5158_s30 + $0x1048] sm:$0xff]  ;;  %v757_v27 = vld [vmem:[%s5158_s30 + $0x1040] sm:$0xff] }
  0xd3   : > { %2838 = vmatprep.subr.mxu1 %v894_v16  ;;  %2768 = vmatpush1.msra.mxu0 %v765_v17  ;;  %v886_v26 = vld [vmem:[%s5158_s30 + $0x1448] sm:$0xff]  ;;  %v885_v29 = vld [vmem:[%s5158_s30 + $0x1440] sm:$0xff] }
  0xd4   : > { %2839 = vmatpush1.msra.mxu1 %v893_v18  ;;  %2769 = vmatprep.subr.mxu0 %v762_v19  ;;  %v754_v30 = vld [vmem:[%s5158_s30 + $0x1028] sm:$0xff]  ;;  %v753_v32 = vld [vmem:[%s5158_s30 + $0x1020] sm:$0xff] }
  0xd5   : > { %2840 = vmatprep.subr.mxu1 %v890_v21  ;;  %2770 = vmatpush1.msra.mxu0 %v761_v22  ;;  %v882_v31 = vld [vmem:[%s5158_s30 + $0x1428] sm:$0xff]  ;;  %v881_v33 = vld [vmem:[%s5158_s30 + $0x1420] sm:$0xff] }
  0xd6   : > { %2841 = vmatpush1.msra.mxu1 %v889_v23  ;;  %2771 = vmatprep.subr.mxu0 %v758_v24  ;;  %v750_v34 = vld [vmem:[%s5158_s30 + $0x1008] sm:$0xff]  ;;  %v749_v36 = vld [vmem:[%s5158_s30 + $0x1000] sm:$0xff] }
  0xd7   : > { %2842 = vmatprep.subr.mxu1 %v886_v26  ;;  %2772 = vmatpush1.msra.mxu0 %v757_v27  ;;  %v878_v35 = vld [vmem:[%s5158_s30 + $0x1408] sm:$0xff]  ;;  %v877_v37 = vld [vmem:[%s5158_s30 + $0x1400] sm:$0xff]  ;;  %v231_v26 = vld [vmem:[%s5175_s25 + $0x10] sm:$0xff] }
  0xd8   : > { %2843 = vmatpush1.msra.mxu1 %v885_v29  ;;  %2773 = vmatprep.subr.mxu0 %v754_v30  ;;  %v874_v38 = vld [vmem:[%s5158_s30 + $0x13e8] sm:$0xff]  ;;  %v873_v40 = vld [vmem:[%s5158_s30 + $0x13e0] sm:$0xff] }
  0xd9   : > { %2844 = vmatprep.subr.mxu1 %v882_v31  ;;  %2774 = vmatpush1.msra.mxu0 %v753_v32  ;;  %v1002_v39 = vld [vmem:[%s5158_s30 + $0x17e8] sm:$0xff]  ;;  %v1001_v41 = vld [vmem:[%s5158_s30 + $0x17e0] sm:$0xff] }
  0xda   : > { %2845 = vmatpush1.msra.mxu1 %v881_v33  ;;  %2775 = vmatprep.subr.mxu0 %v750_v34  ;;  %v870_v42 = vld [vmem:[%s5158_s30 + $0x13c8] sm:$0xff]  ;;  %v869_v44 = vld [vmem:[%s5158_s30 + $0x13c0] sm:$0xff]  ;;  %v2327_v34 = vcombine.high %v231_v26, %v231_v26 }
  0xdb   : > { %2846 = vmatprep.subr.mxu1 %v878_v35  ;;  %2776 = vmatpush1.msra.mxu0 %v749_v36  ;;  %v998_v43 = vld [vmem:[%s5158_s30 + $0x17c8] sm:$0xff]  ;;  %v997_v45 = vld [vmem:[%s5158_s30 + $0x17c0] sm:$0xff] }
  0xdc   : > { %2847 = vmatpush1.msra.mxu1 %v877_v37  ;;  %2777 = vmatprep.subr.mxu0 %v874_v38  ;;  %v866_v46 = vld [vmem:[%s5158_s30 + $0x13a8] sm:$0xff]  ;;  %v865_v48 = vld [vmem:[%s5158_s30 + $0x13a0] sm:$0xff] }
  0xdd   : > { %2848 = vmatprep.subr.mxu1 %v1002_v39  ;;  %2778 = vmatpush2.msra.mxu0 %v873_v40  ;;  %v994_v47 = vld [vmem:[%s5158_s30 + $0x17a8] sm:$0xff]  ;;  %v993_v49 = vld [vmem:[%s5158_s30 + $0x17a0] sm:$0xff]  ;;  %v5595_v39 = vrot.slane %v231_v26, %v5290_v53 }
  0xde   : > { %2849 = vmatpush2.msra.mxu1 %v1001_v41  ;;  %2779 = vmatprep.subr.mxu0 %v870_v42  ;;  %v862_v50 = vld [vmem:[%s5158_s30 + $0x1388] sm:$0xff]  ;;  %v861_v52 = vld [vmem:[%s5158_s30 + $0x1380] sm:$0xff] }
  0xdf   : > { %2850 = vmatprep.subr.mxu1 %v998_v43  ;;  %2780 = vmatpush2.msra.mxu0 %v869_v44  ;;  %v990_v51 = vld [vmem:[%s5158_s30 + $0x1788] sm:$0xff]  ;;  %v989_v54 = vld [vmem:[%s5158_s30 + $0x1780] sm:$0xff]  ;;  %v5602_v44 = vrot.slane %v2327_v34, %v5290_v53 }
  0xe0   : > { %2851 = vmatpush2.msra.mxu1 %v997_v45  ;;  %2781 = vmatprep.subr.mxu0 %v866_v46  ;;  %v858_v55 = vld [vmem:[%s5158_s30 + $0x1368] sm:$0xff]  ;;  %v857_v57 = vld [vmem:[%s5158_s30 + $0x1360] sm:$0xff] }
  0xe1   : > { %2852 = vmatprep.subr.mxu1 %v994_v47  ;;  %2782 = vmatpush2.msra.mxu0 %v865_v48  ;;  %v986_v56 = vld [vmem:[%s5158_s30 + $0x1768] sm:$0xff]  ;;  %v985_v58 = vld [vmem:[%s5158_s30 + $0x1760] sm:$0xff] }
  0xe2   : > { %2853 = vmatpush2.msra.mxu1 %v993_v49  ;;  %2783 = vmatprep.subr.mxu0 %v862_v50  ;;  %v854_v59 = vld [vmem:[%s5158_s30 + $0x1348] sm:$0xff]  ;;  %v853_v61 = vld [vmem:[%s5158_s30 + $0x1340] sm:$0xff]  ;;  %v5610_v49 = vcombine.high %v5595_v39, %v5595_v39 }
  0xe3   : > { %2854 = vmatprep.subr.mxu1 %v990_v51  ;;  %2784 = vmatpush2.msra.mxu0 %v861_v52  ;;  %v982_v60 = vld [vmem:[%s5158_s30 + $0x1748] sm:$0xff]  ;;  %v981_v62 = vld [vmem:[%s5158_s30 + $0x1740] sm:$0xff]  ;;  %v5616_v52 = vcombine.high %v5602_v44, %v5602_v44 }
  0xe4   : > { %2855 = vmatpush2.msra.mxu1 %v989_v54  ;;  %2785 = vmatprep.subr.mxu0 %v858_v55  ;;  %v850_v0 = vld [vmem:[%s5158_s30 + $0x1328] sm:$0xff]  ;;  %v849_v3 = vld [vmem:[%s5158_s30 + $0x1320] sm:$0xff] }
  0xe5   : > { %2856 = vmatprep.subr.mxu1 %v986_v56  ;;  %2786 = vmatpush2.msra.mxu0 %v857_v57  ;;  %v978_v1 = vld [vmem:[%s5158_s30 + $0x1728] sm:$0xff]  ;;  %v977_v4 = vld [vmem:[%s5158_s30 + $0x1720] sm:$0xff] }
  0xe6   : > { %2857 = vmatpush2.msra.mxu1 %v985_v58  ;;  %2787 = vmatprep.subr.mxu0 %v854_v59  ;;  %v846_v5 = vld [vmem:[%s5158_s30 + $0x1308] sm:$0xff]  ;;  %v845_v7 = vld [vmem:[%s5158_s30 + $0x1300] sm:$0xff] }
  0xe7   : > { %2858 = vmatprep.subr.mxu1 %v982_v60  ;;  %2788 = vmatpush2.msra.mxu0 %v853_v61  ;;  %v974_v6 = vld [vmem:[%s5158_s30 + $0x1708] sm:$0xff]  ;;  %v973_v8 = vld [vmem:[%s5158_s30 + $0x1700] sm:$0xff] }
  0xe8   : > { %2859 = vmatpush2.msra.mxu1 %v981_v62  ;;  %2789 = vmatprep.subr.mxu0 %v850_v0  ;;  %v842_v10 = vld [vmem:[%s5158_s30 + $0x12e8] sm:$0xff]  ;;  %v841_v13 = vld [vmem:[%s5158_s30 + $0x12e0] sm:$0xff] }
  0xe9   : > { %2860 = vmatprep.subr.mxu1 %v978_v1  ;;  %2790 = vmatpush2.msra.mxu0 %v849_v3  ;;  %v970_v12 = vld [vmem:[%s5158_s30 + $0x16e8] sm:$0xff]  ;;  %v969_v14 = vld [vmem:[%s5158_s30 + $0x16e0] sm:$0xff] }
  0xea   : > { %2861 = vmatpush2.msra.mxu1 %v977_v4  ;;  %2791 = vmatprep.subr.mxu0 %v846_v5  ;;  %v838_v16 = vld [vmem:[%s5158_s30 + $0x12c8] sm:$0xff]  ;;  %v837_v18 = vld [vmem:[%s5158_s30 + $0x12c0] sm:$0xff] }
  0xeb   : > { %2862 = vmatprep.subr.mxu1 %v974_v6  ;;  %2792 = vmatpush2.msra.mxu0 %v845_v7  ;;  %v966_v17 = vld [vmem:[%s5158_s30 + $0x16c8] sm:$0xff]  ;;  %v965_v19 = vld [vmem:[%s5158_s30 + $0x16c0] sm:$0xff] }
  0xec   : > { %2863 = vmatpush2.msra.mxu1 %v973_v8  ;;  %2793 = vmatprep.subr.mxu0 %v842_v10  ;;  %v834_v21 = vld [vmem:[%s5158_s30 + $0x12a8] sm:$0xff]  ;;  %v833_v23 = vld [vmem:[%s5158_s30 + $0x12a0] sm:$0xff] }
  0xed   : > { %2864 = vmatprep.subr.mxu1 %v970_v12  ;;  %2794 = vmatpush2.msra.mxu0 %v841_v13  ;;  %v962_v22 = vld [vmem:[%s5158_s30 + $0x16a8] sm:$0xff]  ;;  %v961_v24 = vld [vmem:[%s5158_s30 + $0x16a0] sm:$0xff] }
  0xee   : > { %2865 = vmatpush2.msra.mxu1 %v969_v14  ;;  %2795 = vmatprep.subr.mxu0 %v838_v16  ;;  %v830_v27 = vld [vmem:[%s5158_s30 + $0x1288] sm:$0xff]  ;;  %v829_v30 = vld [vmem:[%s5158_s30 + $0x1280] sm:$0xff] }
  0xef   : > { %2866 = vmatprep.subr.mxu1 %v966_v17  ;;  %2796 = vmatpush2.msra.mxu0 %v837_v18  ;;  %v958_v29 = vld [vmem:[%s5158_s30 + $0x1688] sm:$0xff]  ;;  %v957_v31 = vld [vmem:[%s5158_s30 + $0x1680] sm:$0xff] }
  0xf0   : > { %2867 = vmatpush2.msra.mxu1 %v965_v19  ;;  %2797 = vmatprep.subr.mxu0 %v834_v21  ;;  %v826_v32 = vld [vmem:[%s5158_s30 + $0x1268] sm:$0xff]  ;;  %v825_v35 = vld [vmem:[%s5158_s30 + $0x1260] sm:$0xff] }
  0xf1   : > { %2868 = vmatprep.subr.mxu1 %v962_v22  ;;  %2798 = vmatpush2.msra.mxu0 %v833_v23  ;;  %v954_v33 = vld [vmem:[%s5158_s30 + $0x1668] sm:$0xff]  ;;  %v953_v36 = vld [vmem:[%s5158_s30 + $0x1660] sm:$0xff] }
  0xf2   : > { %2869 = vmatpush2.msra.mxu1 %v961_v24  ;;  %2799 = vmatprep.subr.mxu0 %v830_v27  ;;  %v822_v37 = vld [vmem:[%s5158_s30 + $0x1248] sm:$0xff]  ;;  %v821_v40 = vld [vmem:[%s5158_s30 + $0x1240] sm:$0xff] }
  0xf3   : > { %2870 = vmatprep.subr.mxu1 %v958_v29  ;;  %2800 = vmatpush2.msra.mxu0 %v829_v30  ;;  %v950_v38 = vld [vmem:[%s5158_s30 + $0x1648] sm:$0xff]  ;;  %v949_v41 = vld [vmem:[%s5158_s30 + $0x1640] sm:$0xff] }
  0xf4   : > { %2871 = vmatpush2.msra.mxu1 %v957_v31  ;;  %2801 = vmatprep.subr.mxu0 %v826_v32  ;;  %v818_v42 = vld [vmem:[%s5158_s30 + $0x1228] sm:$0xff]  ;;  %v817_v45 = vld [vmem:[%s5158_s30 + $0x1220] sm:$0xff] }
  0xf5   : > { %2872 = vmatprep.subr.mxu1 %v954_v33  ;;  %2802 = vmatpush2.msra.mxu0 %v825_v35  ;;  %v946_v43 = vld [vmem:[%s5158_s30 + $0x1628] sm:$0xff]  ;;  %v945_v46 = vld [vmem:[%s5158_s30 + $0x1620] sm:$0xff] }
  0xf6   : > { %2873 = vmatpush2.msra.mxu1 %v953_v36  ;;  %2803 = vmatprep.subr.mxu0 %v822_v37  ;;  %v814_v47 = vld [vmem:[%s5158_s30 + $0x1208] sm:$0xff]  ;;  %v813_v50 = vld [vmem:[%s5158_s30 + $0x1200] sm:$0xff] }
  0xf7   : > { %2874 = vmatprep.subr.mxu1 %v950_v38  ;;  %2804 = vmatpush2.msra.mxu0 %v821_v40  ;;  %v942_v48 = vld [vmem:[%s5158_s30 + $0x1608] sm:$0xff]  ;;  %v941_v51 = vld [vmem:[%s5158_s30 + $0x1600] sm:$0xff] }
  0xf8   : > { %2875 = vmatpush2.msra.mxu1 %v949_v41  ;;  %2805 = vmatprep.subr.mxu0 %v818_v42  ;;  %v1066_v54 = vld [vmem:[%s5158_s30 + $0x19e8] sm:$0xff]  ;;  %v1065_v56 = vld [vmem:[%s5158_s30 + $0x19e0] sm:$0xff] }
  0xf9   : > { %2876 = vmatprep.subr.mxu1 %v946_v43  ;;  %2806 = vmatpush2.msra.mxu0 %v817_v45  ;;  %v1194_v55 = vld [vmem:[%s5158_s30 + $0x1de8] sm:$0xff]  ;;  %v1193_v57 = vld [vmem:[%s5158_s30 + $0x1de0] sm:$0xff] }
  0xfa   : > { %2877 = vmatpush2.msra.mxu1 %v945_v46  ;;  %2807 = vmatprep.subr.mxu0 %v814_v47  ;;  %v1062_v58 = vld [vmem:[%s5158_s30 + $0x19c8] sm:$0xff]  ;;  %v1061_v60 = vld [vmem:[%s5158_s30 + $0x19c0] sm:$0xff] }
  0xfb   : > { %2878 = vmatprep.subr.mxu1 %v942_v48  ;;  %2808 = vmatpush2.msra.mxu0 %v813_v50  ;;  %v1190_v59 = vld [vmem:[%s5158_s30 + $0x1dc8] sm:$0xff]  ;;  %v1189_v61 = vld [vmem:[%s5158_s30 + $0x1dc0] sm:$0xff] }
  0xfc   : > { %2809 = vmatprep.mubr.f32.mxu0 %v5610_v49  ;;  %2879 = vmatpush2.msra.mxu1 %v941_v51  ;;  %v1058_v62 = vld [vmem:[%s5158_s30 + $0x19a8] sm:$0xff]  ;;  %v1057_v1 = vld [vmem:[%s5158_s30 + $0x19a0] sm:$0xff] }
  0xfd   : > { %2810 = vmatmul.mubr.f32.vlgmr.msra.gmra.mxu0 %v5595_v39  ;;  %2880 = vmatprep.mubr.f32.mxu1 %v5616_v52  ;;  %v1186_v0 = vld [vmem:[%s5158_s30 + $0x1da8] sm:$0xff]  ;;  %v1185_v3 = vld [vmem:[%s5158_s30 + $0x1da0] sm:$0xff] }
  0xfe   : > { %2887 = vmatprep.subr.mxu0 %v1066_v54  ;;  %2958 = vmatprep.subr.mxu1 %v1194_v55  ;;  %v1054_v4 = vld [vmem:[%s5158_s30 + $0x1988] sm:$0xff]  ;;  %v1053_v6 = vld [vmem:[%s5158_s30 + $0x1980] sm:$0xff] }
  0xff   : > { %2881 = vmatmul.mubr.f32.vlgmr.msra.gmra.mxu1 %v5602_v44  ;;  %2888 = vmatpush1.msra.mxu0 %v1065_v56  ;;  %v1182_v5 = vld [vmem:[%s5158_s30 + $0x1d88] sm:$0xff]  ;;  %v1181_v7 = vld [vmem:[%s5158_s30 + $0x1d80] sm:$0xff] }
 0x100   : > { %2959 = vmatpush1.msra.mxu1 %v1193_v57  ;;  %2889 = vmatprep.subr.mxu0 %v1062_v58  ;;  %v1050_v8 = vld [vmem:[%s5158_s30 + $0x1968] sm:$0xff]  ;;  %v1049_v12 = vld [vmem:[%s5158_s30 + $0x1960] sm:$0xff] }
 0x101   : > { %2960 = vmatprep.subr.mxu1 %v1190_v59  ;;  %2890 = vmatpush1.msra.mxu0 %v1061_v60  ;;  %v1178_v10 = vld [vmem:[%s5158_s30 + $0x1d68] sm:$0xff]  ;;  %v1177_v13 = vld [vmem:[%s5158_s30 + $0x1d60] sm:$0xff] }
 0x102   : > { %2961 = vmatpush1.msra.mxu1 %v1189_v61  ;;  %2891 = vmatprep.subr.mxu0 %v1058_v62  ;;  %v1046_v14 = vld [vmem:[%s5158_s30 + $0x1948] sm:$0xff]  ;;  %v1045_v17 = vld [vmem:[%s5158_s30 + $0x1940] sm:$0xff] }
 0x103   : > { %2962 = vmatprep.subr.mxu1 %v1186_v0  ;;  %2892 = vmatpush1.msra.mxu0 %v1057_v1  ;;  %v1174_v16 = vld [vmem:[%s5158_s30 + $0x1d48] sm:$0xff]  ;;  %v1173_v18 = vld [vmem:[%s5158_s30 + $0x1d40] sm:$0xff] }
 0x104   : > { %2963 = vmatpush1.msra.mxu1 %v1185_v3  ;;  %2893 = vmatprep.subr.mxu0 %v1054_v4  ;;  %v1042_v19 = vld [vmem:[%s5158_s30 + $0x1928] sm:$0xff]  ;;  %v1041_v22 = vld [vmem:[%s5158_s30 + $0x1920] sm:$0xff] }
 0x105   : > { %2964 = vmatprep.subr.mxu1 %v1182_v5  ;;  %2894 = vmatpush1.msra.mxu0 %v1053_v6  ;;  %v1170_v21 = vld [vmem:[%s5158_s30 + $0x1d28] sm:$0xff]  ;;  %v1169_v23 = vld [vmem:[%s5158_s30 + $0x1d20] sm:$0xff] }
 0x106   : > { %2965 = vmatpush1.msra.mxu1 %v1181_v7  ;;  %2895 = vmatprep.subr.mxu0 %v1050_v8  ;;  %v1038_v24 = vld [vmem:[%s5158_s30 + $0x1908] sm:$0xff]  ;;  %v1037_v27 = vld [vmem:[%s5158_s30 + $0x1900] sm:$0xff] }
 0x107   : > { %2966 = vmatprep.subr.mxu1 %v1178_v10  ;;  %2896 = vmatpush1.msra.mxu0 %v1049_v12  ;;  %v1166_v26 = vld [vmem:[%s5158_s30 + $0x1d08] sm:$0xff]  ;;  %v1165_v29 = vld [vmem:[%s5158_s30 + $0x1d00] sm:$0xff] }
 0x108   : > { %2967 = vmatpush1.msra.mxu1 %v1177_v13  ;;  %2897 = vmatprep.subr.mxu0 %v1046_v14  ;;  %v1034_v30 = vld [vmem:[%s5158_s30 + $0x18e8] sm:$0xff]  ;;  %v1033_v32 = vld [vmem:[%s5158_s30 + $0x18e0] sm:$0xff] }
 0x109   : > { %2968 = vmatprep.subr.mxu1 %v1174_v16  ;;  %2898 = vmatpush1.msra.mxu0 %v1045_v17  ;;  %v1162_v31 = vld [vmem:[%s5158_s30 + $0x1ce8] sm:$0xff]  ;;  %v1161_v33 = vld [vmem:[%s5158_s30 + $0x1ce0] sm:$0xff] }
 0x10a   : > { %2969 = vmatpush1.msra.mxu1 %v1173_v18  ;;  %2899 = vmatprep.subr.mxu0 %v1042_v19  ;;  %v1030_v34 = vld [vmem:[%s5158_s30 + $0x18c8] sm:$0xff]  ;;  %v1029_v36 = vld [vmem:[%s5158_s30 + $0x18c0] sm:$0xff] }
 0x10b   : > { %2970 = vmatprep.subr.mxu1 %v1170_v21  ;;  %2900 = vmatpush1.msra.mxu0 %v1041_v22  ;;  %v1158_v35 = vld [vmem:[%s5158_s30 + $0x1cc8] sm:$0xff]  ;;  %v1157_v37 = vld [vmem:[%s5158_s30 + $0x1cc0] sm:$0xff] }
 0x10c   : > { %2971 = vmatpush1.msra.mxu1 %v1169_v23  ;;  %2901 = vmatprep.subr.mxu0 %v1038_v24  ;;  %v1026_v38 = vld [vmem:[%s5158_s30 + $0x18a8] sm:$0xff]  ;;  %v1025_v41 = vld [vmem:[%s5158_s30 + $0x18a0] sm:$0xff] }
 0x10d   : > { %2972 = vmatprep.subr.mxu1 %v1166_v26  ;;  %2902 = vmatpush1.msra.mxu0 %v1037_v27  ;;  %v1154_v40 = vld [vmem:[%s5158_s30 + $0x1ca8] sm:$0xff]  ;;  %v1153_v42 = vld [vmem:[%s5158_s30 + $0x1ca0] sm:$0xff] }
 0x10e   : > { %2973 = vmatpush1.msra.mxu1 %v1165_v29  ;;  %2903 = vmatprep.subr.mxu0 %v1034_v30  ;;  %v1022_v43 = vld [vmem:[%s5158_s30 + $0x1888] sm:$0xff]  ;;  %v1021_v46 = vld [vmem:[%s5158_s30 + $0x1880] sm:$0xff] }
 0x10f   : > { %2974 = vmatprep.subr.mxu1 %v1162_v31  ;;  %2904 = vmatpush1.msra.mxu0 %v1033_v32  ;;  %v1150_v45 = vld [vmem:[%s5158_s30 + $0x1c88] sm:$0xff]  ;;  %v1149_v47 = vld [vmem:[%s5158_s30 + $0x1c80] sm:$0xff] }
 0x110   : > { %2975 = vmatpush1.msra.mxu1 %v1161_v33  ;;  %2905 = vmatprep.subr.mxu0 %v1030_v34  ;;  %v1018_v48 = vld [vmem:[%s5158_s30 + $0x1868] sm:$0xff]  ;;  %v1017_v51 = vld [vmem:[%s5158_s30 + $0x1860] sm:$0xff] }
 0x111   : > { %2976 = vmatprep.subr.mxu1 %v1158_v35  ;;  %2906 = vmatpush1.msra.mxu0 %v1029_v36  ;;  %v1146_v50 = vld [vmem:[%s5158_s30 + $0x1c68] sm:$0xff]  ;;  %v1145_v54 = vld [vmem:[%s5158_s30 + $0x1c60] sm:$0xff] }
 0x112   : > { %2977 = vmatpush1.msra.mxu1 %v1157_v37  ;;  %2907 = vmatprep.subr.mxu0 %v1026_v38  ;;  %v1014_v55 = vld [vmem:[%s5158_s30 + $0x1848] sm:$0xff]  ;;  %v1013_v57 = vld [vmem:[%s5158_s30 + $0x1840] sm:$0xff] }
 0x113   : > { %2978 = vmatprep.subr.mxu1 %v1154_v40  ;;  %2908 = vmatpush1.msra.mxu0 %v1025_v41  ;;  %v1142_v56 = vld [vmem:[%s5158_s30 + $0x1c48] sm:$0xff]  ;;  %v1141_v58 = vld [vmem:[%s5158_s30 + $0x1c40] sm:$0xff] }
 0x114   : > { %2979 = vmatpush1.msra.mxu1 %v1153_v42  ;;  %2909 = vmatprep.subr.mxu0 %v1022_v43  ;;  %v1010_v59 = vld [vmem:[%s5158_s30 + $0x1828] sm:$0xff]  ;;  %v1009_v61 = vld [vmem:[%s5158_s30 + $0x1820] sm:$0xff] }
 0x115   : > { %2980 = vmatprep.subr.mxu1 %v1150_v45  ;;  %2910 = vmatpush1.msra.mxu0 %v1021_v46  ;;  %v1138_v60 = vld [vmem:[%s5158_s30 + $0x1c28] sm:$0xff]  ;;  %v1137_v62 = vld [vmem:[%s5158_s30 + $0x1c20] sm:$0xff] }
 0x116   : > { %2981 = vmatpush1.msra.mxu1 %v1149_v47  ;;  %2911 = vmatprep.subr.mxu0 %v1018_v48  ;;  %v1006_v0 = vld [vmem:[%s5158_s30 + $0x1808] sm:$0xff]  ;;  %v1005_v3 = vld [vmem:[%s5158_s30 + $0x1800] sm:$0xff] }
 0x117   : > { %2982 = vmatprep.subr.mxu1 %v1146_v50  ;;  %2912 = vmatpush1.msra.mxu0 %v1017_v51  ;;  %v1134_v1 = vld [vmem:[%s5158_s30 + $0x1c08] sm:$0xff]  ;;  %v1133_v4 = vld [vmem:[%s5158_s30 + $0x1c00] sm:$0xff] }
 0x118   : > { %2983 = vmatpush1.msra.mxu1 %v1145_v54  ;;  %2913 = vmatprep.subr.mxu0 %v1014_v55  ;;  %v1130_v5 = vld [vmem:[%s5158_s30 + $0x1be8] sm:$0xff]  ;;  %v1129_v7 = vld [vmem:[%s5158_s30 + $0x1be0] sm:$0xff] }
 0x119   : > { %2984 = vmatprep.subr.mxu1 %v1142_v56  ;;  %2914 = vmatpush1.msra.mxu0 %v1013_v57  ;;  %v1258_v6 = vld [vmem:[%s5158_s30 + $0x1fe8] sm:$0xff]  ;;  %v1257_v8 = vld [vmem:[%s5158_s30 + $0x1fe0] sm:$0xff] }
 0x11a   : > { %2985 = vmatpush1.msra.mxu1 %v1141_v58  ;;  %2915 = vmatprep.subr.mxu0 %v1010_v59  ;;  %v1126_v10 = vld [vmem:[%s5158_s30 + $0x1bc8] sm:$0xff]  ;;  %v1125_v13 = vld [vmem:[%s5158_s30 + $0x1bc0] sm:$0xff] }
 0x11b   : > { %2986 = vmatprep.subr.mxu1 %v1138_v60  ;;  %2916 = vmatpush1.msra.mxu0 %v1009_v61  ;;  %v1254_v12 = vld [vmem:[%s5158_s30 + $0x1fc8] sm:$0xff]  ;;  %v1253_v14 = vld [vmem:[%s5158_s30 + $0x1fc0] sm:$0xff]  ;;  %v232_v60 = vld [vmem:[%s5175_s25 + $0x18] sm:$0xff] }
 0x11c   : > { %2987 = vmatpush1.msra.mxu1 %v1137_v62  ;;  %2917 = vmatprep.subr.mxu0 %v1006_v0  ;;  %v1122_v16 = vld [vmem:[%s5158_s30 + $0x1ba8] sm:$0xff]  ;;  %v1121_v18 = vld [vmem:[%s5158_s30 + $0x1ba0] sm:$0xff] }
 0x11d   : > { %2988 = vmatprep.subr.mxu1 %v1134_v1  ;;  %2918 = vmatpush1.msra.mxu0 %v1005_v3  ;;  %v1250_v17 = vld [vmem:[%s5158_s30 + $0x1fa8] sm:$0xff]  ;;  %v1249_v19 = vld [vmem:[%s5158_s30 + $0x1fa0] sm:$0xff] }
 0x11e   : > { %2989 = vmatpush1.msra.mxu1 %v1133_v4  ;;  %2919 = vmatprep.subr.mxu0 %v1130_v5  ;;  %v1118_v21 = vld [vmem:[%s5158_s30 + $0x1b88] sm:$0xff]  ;;  %v1117_v23 = vld [vmem:[%s5158_s30 + $0x1b80] sm:$0xff]  ;;  %v2344_v5 = vcombine.high %v232_v60, %v232_v60 }
 0x11f   : > { %2990 = vmatprep.subr.mxu1 %v1258_v6  ;;  %2920 = vmatpush2.msra.mxu0 %v1129_v7  ;;  %v1246_v22 = vld [vmem:[%s5158_s30 + $0x1f88] sm:$0xff]  ;;  %v1245_v24 = vld [vmem:[%s5158_s30 + $0x1f80] sm:$0xff] }
 0x120   : > { %2991 = vmatpush2.msra.mxu1 %v1257_v8  ;;  %2921 = vmatprep.subr.mxu0 %v1126_v10  ;;  %v1114_v26 = vld [vmem:[%s5158_s30 + $0x1b68] sm:$0xff]  ;;  %v1113_v29 = vld [vmem:[%s5158_s30 + $0x1b60] sm:$0xff] }
 0x121   : > { %2992 = vmatprep.subr.mxu1 %v1254_v12  ;;  %2922 = vmatpush2.msra.mxu0 %v1125_v13  ;;  %v1242_v27 = vld [vmem:[%s5158_s30 + $0x1f68] sm:$0xff]  ;;  %v1241_v30 = vld [vmem:[%s5158_s30 + $0x1f60] sm:$0xff]  ;;  %v5742_v12 = vrot.slane %v232_v60, %v5290_v53 }
 0x122   : > { %2993 = vmatpush2.msra.mxu1 %v1253_v14  ;;  %2923 = vmatprep.subr.mxu0 %v1122_v16  ;;  %v1110_v31 = vld [vmem:[%s5158_s30 + $0x1b48] sm:$0xff]  ;;  %v1109_v33 = vld [vmem:[%s5158_s30 + $0x1b40] sm:$0xff] }
 0x123   : > { %2994 = vmatprep.subr.mxu1 %v1250_v17  ;;  %2924 = vmatpush2.msra.mxu0 %v1121_v18  ;;  %v1238_v32 = vld [vmem:[%s5158_s30 + $0x1f48] sm:$0xff]  ;;  %v1237_v34 = vld [vmem:[%s5158_s30 + $0x1f40] sm:$0xff]  ;;  %v5749_v18 = vrot.slane %v2344_v5, %v5290_v53 }
 0x124   : > { %2995 = vmatpush2.msra.mxu1 %v1249_v19  ;;  %2925 = vmatprep.subr.mxu0 %v1118_v21  ;;  %v1106_v35 = vld [vmem:[%s5158_s30 + $0x1b28] sm:$0xff]  ;;  %v1105_v37 = vld [vmem:[%s5158_s30 + $0x1b20] sm:$0xff] }
 0x125   : > { %2996 = vmatprep.subr.mxu1 %v1246_v22  ;;  %2926 = vmatpush2.msra.mxu0 %v1117_v23  ;;  %v1234_v36 = vld [vmem:[%s5158_s30 + $0x1f28] sm:$0xff]  ;;  %v1233_v38 = vld [vmem:[%s5158_s30 + $0x1f20] sm:$0xff] }
 0x126   : > { %2997 = vmatpush2.msra.mxu1 %v1245_v24  ;;  %2927 = vmatprep.subr.mxu0 %v1114_v26  ;;  %v1102_v40 = vld [vmem:[%s5158_s30 + $0x1b08] sm:$0xff]  ;;  %v1101_v42 = vld [vmem:[%s5158_s30 + $0x1b00] sm:$0xff]  ;;  %v5757_v24 = vcombine.high %v5742_v12, %v5742_v12 }
 0x127   : > { %2998 = vmatprep.subr.mxu1 %v1242_v27  ;;  %2928 = vmatpush2.msra.mxu0 %v1113_v29  ;;  %v1230_v41 = vld [vmem:[%s5158_s30 + $0x1f08] sm:$0xff]  ;;  %v1229_v43 = vld [vmem:[%s5158_s30 + $0x1f00] sm:$0xff]  ;;  %v5763_v29 = vcombine.high %v5749_v18, %v5749_v18 }
 0x128   : > { %2999 = vmatpush2.msra.mxu1 %v1241_v30  ;;  %2929 = vmatprep.subr.mxu0 %v1110_v31  ;;  %v1098_v45 = vld [vmem:[%s5158_s30 + $0x1ae8] sm:$0xff]  ;;  %v1097_v47 = vld [vmem:[%s5158_s30 + $0x1ae0] sm:$0xff] }
 0x129   : > { %3000 = vmatprep.subr.mxu1 %v1238_v32  ;;  %2930 = vmatpush2.msra.mxu0 %v1109_v33  ;;  %v1226_v46 = vld [vmem:[%s5158_s30 + $0x1ee8] sm:$0xff]  ;;  %v1225_v48 = vld [vmem:[%s5158_s30 + $0x1ee0] sm:$0xff] }
 0x12a   : > { %3001 = vmatpush2.msra.mxu1 %v1237_v34  ;;  %2931 = vmatprep.subr.mxu0 %v1106_v35  ;;  %v1094_v50 = vld [vmem:[%s5158_s30 + $0x1ac8] sm:$0xff]  ;;  %v1093_v54 = vld [vmem:[%s5158_s30 + $0x1ac0] sm:$0xff] }
 0x12b   : > { %3002 = vmatprep.subr.mxu1 %v1234_v36  ;;  %2932 = vmatpush2.msra.mxu0 %v1105_v37  ;;  %v1222_v51 = vld [vmem:[%s5158_s30 + $0x1ec8] sm:$0xff]  ;;  %v1221_v55 = vld [vmem:[%s5158_s30 + $0x1ec0] sm:$0xff] }
 0x12c   : > { %3003 = vmatpush2.msra.mxu1 %v1233_v38  ;;  %2933 = vmatprep.subr.mxu0 %v1102_v40  ;;  %v1090_v56 = vld [vmem:[%s5158_s30 + $0x1aa8] sm:$0xff]  ;;  %v1089_v58 = vld [vmem:[%s5158_s30 + $0x1aa0] sm:$0xff] }
 0x12d   : > { %3004 = vmatprep.subr.mxu1 %v1230_v41  ;;  %2934 = vmatpush2.msra.mxu0 %v1101_v42  ;;  %v1218_v57 = vld [vmem:[%s5158_s30 + $0x1ea8] sm:$0xff]  ;;  %v1217_v59 = vld [vmem:[%s5158_s30 + $0x1ea0] sm:$0xff] }
 0x12e   : > { %3005 = vmatpush2.msra.mxu1 %v1229_v43  ;;  %2935 = vmatprep.subr.mxu0 %v1098_v45  ;;  %v1086_v61 = vld [vmem:[%s5158_s30 + $0x1a88] sm:$0xff]  ;;  %v1085_v0 = vld [vmem:[%s5158_s30 + $0x1a80] sm:$0xff] }
 0x12f   : > { %3006 = vmatprep.subr.mxu1 %v1226_v46  ;;  %2936 = vmatpush2.msra.mxu0 %v1097_v47  ;;  %v1214_v62 = vld [vmem:[%s5158_s30 + $0x1e88] sm:$0xff]  ;;  %v1213_v1 = vld [vmem:[%s5158_s30 + $0x1e80] sm:$0xff] }
 0x130   : > { %3007 = vmatpush2.msra.mxu1 %v1225_v48  ;;  %2937 = vmatprep.subr.mxu0 %v1094_v50  ;;  %v1082_v3 = vld [vmem:[%s5158_s30 + $0x1a68] sm:$0xff]  ;;  %v1081_v6 = vld [vmem:[%s5158_s30 + $0x1a60] sm:$0xff] }
 0x131   : > { %3008 = vmatprep.subr.mxu1 %v1222_v51  ;;  %2938 = vmatpush2.msra.mxu0 %v1093_v54  ;;  %v1210_v4 = vld [vmem:[%s5158_s30 + $0x1e68] sm:$0xff]  ;;  %v1209_v7 = vld [vmem:[%s5158_s30 + $0x1e60] sm:$0xff] }
 0x132   : > { %3009 = vmatpush2.msra.mxu1 %v1221_v55  ;;  %2939 = vmatprep.subr.mxu0 %v1090_v56  ;;  %v1078_v8 = vld [vmem:[%s5158_s30 + $0x1a48] sm:$0xff]  ;;  %v1077_v13 = vld [vmem:[%s5158_s30 + $0x1a40] sm:$0xff] }
 0x133   : > { %3010 = vmatprep.subr.mxu1 %v1218_v57  ;;  %2940 = vmatpush2.msra.mxu0 %v1089_v58  ;;  %v1206_v10 = vld [vmem:[%s5158_s30 + $0x1e48] sm:$0xff]  ;;  %v1205_v14 = vld [vmem:[%s5158_s30 + $0x1e40] sm:$0xff] }
 0x134   : > { %3011 = vmatpush2.msra.mxu1 %v1217_v59  ;;  %2941 = vmatprep.subr.mxu0 %v1086_v61  ;;  %v1074_v16 = vld [vmem:[%s5158_s30 + $0x1a28] sm:$0xff]  ;;  %v1073_v19 = vld [vmem:[%s5158_s30 + $0x1a20] sm:$0xff] }
 0x135   : > { %3012 = vmatprep.subr.mxu1 %v1214_v62  ;;  %2942 = vmatpush2.msra.mxu0 %v1085_v0  ;;  %v1202_v17 = vld [vmem:[%s5158_s30 + $0x1e28] sm:$0xff]  ;;  %v1201_v21 = vld [vmem:[%s5158_s30 + $0x1e20] sm:$0xff] }
 0x136   : > { %3013 = vmatpush2.msra.mxu1 %v1213_v1  ;;  %2943 = vmatprep.subr.mxu0 %v1082_v3  ;;  %v1070_v22 = vld [vmem:[%s5158_s30 + $0x1a08] sm:$0xff]  ;;  %v1069_v26 = vld [vmem:[%s5158_s30 + $0x1a00] sm:$0xff] }
 0x137   : > { %3014 = vmatprep.subr.mxu1 %v1210_v4  ;;  %2944 = vmatpush2.msra.mxu0 %v1081_v6  ;;  %v1198_v23 = vld [vmem:[%s5158_s30 + $0x1e08] sm:$0xff]  ;;  %v1197_v27 = vld [vmem:[%s5158_s30 + $0x1e00] sm:$0xff] }
 0x138   : > { %3015 = vmatpush2.msra.mxu1 %v1209_v7  ;;  %2945 = vmatprep.subr.mxu0 %v1078_v8  ;;  %v1322_v30 = vld [vmem:[%s5158_s30 + $0x21e8] sm:$0xff]  ;;  %v1321_v32 = vld [vmem:[%s5158_s30 + $0x21e0] sm:$0xff] }
 0x139   : > { %3016 = vmatprep.subr.mxu1 %v1206_v10  ;;  %2946 = vmatpush2.msra.mxu0 %v1077_v13  ;;  %v1450_v31 = vld [vmem:[%s5158_s30 + $0x25e8] sm:$0xff]  ;;  %v1449_v33 = vld [vmem:[%s5158_s30 + $0x25e0] sm:$0xff] }
 0x13a   : > { %3017 = vmatpush2.msra.mxu1 %v1205_v14  ;;  %2947 = vmatprep.subr.mxu0 %v1074_v16  ;;  %v1318_v34 = vld [vmem:[%s5158_s30 + $0x21c8] sm:$0xff]  ;;  %v1317_v36 = vld [vmem:[%s5158_s30 + $0x21c0] sm:$0xff] }
 0x13b   : > { %3018 = vmatprep.subr.mxu1 %v1202_v17  ;;  %2948 = vmatpush2.msra.mxu0 %v1073_v19  ;;  %v1446_v35 = vld [vmem:[%s5158_s30 + $0x25c8] sm:$0xff]  ;;  %v1445_v37 = vld [vmem:[%s5158_s30 + $0x25c0] sm:$0xff] }
 0x13c   : > { %3019 = vmatpush2.msra.mxu1 %v1201_v21  ;;  %2949 = vmatprep.subr.mxu0 %v1070_v22  ;;  %v1314_v38 = vld [vmem:[%s5158_s30 + $0x21a8] sm:$0xff]  ;;  %v1313_v41 = vld [vmem:[%s5158_s30 + $0x21a0] sm:$0xff] }
 0x13d   : > { %3020 = vmatprep.subr.mxu1 %v1198_v23  ;;  %2950 = vmatpush2.msra.mxu0 %v1069_v26  ;;  %v1442_v40 = vld [vmem:[%s5158_s30 + $0x25a8] sm:$0xff]  ;;  %v1441_v42 = vld [vmem:[%s5158_s30 + $0x25a0] sm:$0xff] }
 0x13e   : > { %2951 = vmatprep.mubr.f32.mxu0 %v5757_v24  ;;  %3021 = vmatpush2.msra.mxu1 %v1197_v27  ;;  %v1310_v43 = vld [vmem:[%s5158_s30 + $0x2188] sm:$0xff]  ;;  %v1309_v46 = vld [vmem:[%s5158_s30 + $0x2180] sm:$0xff] }
 0x13f   : > { %2952 = vmatmul.mubr.f32.vlgmr.msra.gmra.mxu0 %v5742_v12  ;;  %3022 = vmatprep.mubr.f32.mxu1 %v5763_v29  ;;  %v1438_v45 = vld [vmem:[%s5158_s30 + $0x2588] sm:$0xff]  ;;  %v1437_v47 = vld [vmem:[%s5158_s30 + $0x2580] sm:$0xff] }
 0x140   : > { %3029 = vmatprep.subr.mxu0 %v1322_v30  ;;  %3100 = vmatprep.subr.mxu1 %v1450_v31  ;;  %v1306_v48 = vld [vmem:[%s5158_s30 + $0x2168] sm:$0xff]  ;;  %v1305_v51 = vld [vmem:[%s5158_s30 + $0x2160] sm:$0xff] }
 0x141   : > { %3023 = vmatmul.mubr.f32.vlgmr.msra.gmra.mxu1 %v5749_v18  ;;  %3030 = vmatpush1.msra.mxu0 %v1321_v32  ;;  %v1434_v50 = vld [vmem:[%s5158_s30 + $0x2568] sm:$0xff]  ;;  %v1433_v54 = vld [vmem:[%s5158_s30 + $0x2560] sm:$0xff] }
 0x142   : > { %3101 = vmatpush1.msra.mxu1 %v1449_v33  ;;  %3031 = vmatprep.subr.mxu0 %v1318_v34  ;;  %v1302_v55 = vld [vmem:[%s5158_s30 + $0x2148] sm:$0xff]  ;;  %v1301_v57 = vld [vmem:[%s5158_s30 + $0x2140] sm:$0xff] }
 0x143   : > { %3102 = vmatprep.subr.mxu1 %v1446_v35  ;;  %3032 = vmatpush1.msra.mxu0 %v1317_v36  ;;  %v1430_v56 = vld [vmem:[%s5158_s30 + $0x2548] sm:$0xff]  ;;  %v1429_v58 = vld [vmem:[%s5158_s30 + $0x2540] sm:$0xff] }
 0x144   : > { %3103 = vmatpush1.msra.mxu1 %v1445_v37  ;;  %3033 = vmatprep.subr.mxu0 %v1314_v38  ;;  %v1298_v59 = vld [vmem:[%s5158_s30 + $0x2128] sm:$0xff]  ;;  %v1297_v61 = vld [vmem:[%s5158_s30 + $0x2120] sm:$0xff] }
 0x145   : > { %3104 = vmatprep.subr.mxu1 %v1442_v40  ;;  %3034 = vmatpush1.msra.mxu0 %v1313_v41  ;;  %v1426_v60 = vld [vmem:[%s5158_s30 + $0x2528] sm:$0xff]  ;;  %v1425_v62 = vld [vmem:[%s5158_s30 + $0x2520] sm:$0xff] }
 0x146   : > { %3105 = vmatpush1.msra.mxu1 %v1441_v42  ;;  %3035 = vmatprep.subr.mxu0 %v1310_v43  ;;  %v1294_v0 = vld [vmem:[%s5158_s30 + $0x2108] sm:$0xff]  ;;  %v1293_v3 = vld [vmem:[%s5158_s30 + $0x2100] sm:$0xff] }
 0x147   : > { %3106 = vmatprep.subr.mxu1 %v1438_v45  ;;  %3036 = vmatpush1.msra.mxu0 %v1309_v46  ;;  %v1422_v1 = vld [vmem:[%s5158_s30 + $0x2508] sm:$0xff]  ;;  %v1421_v4 = vld [vmem:[%s5158_s30 + $0x2500] sm:$0xff] }
 0x148   : > { %3107 = vmatpush1.msra.mxu1 %v1437_v47  ;;  %3037 = vmatprep.subr.mxu0 %v1306_v48  ;;  %v1290_v5 = vld [vmem:[%s5158_s30 + $0x20e8] sm:$0xff]  ;;  %v1289_v7 = vld [vmem:[%s5158_s30 + $0x20e0] sm:$0xff] }
 0x149   : > { %3108 = vmatprep.subr.mxu1 %v1434_v50  ;;  %3038 = vmatpush1.msra.mxu0 %v1305_v51  ;;  %v1418_v6 = vld [vmem:[%s5158_s30 + $0x24e8] sm:$0xff]  ;;  %v1417_v8 = vld [vmem:[%s5158_s30 + $0x24e0] sm:$0xff] }
 0x14a   : > { %3109 = vmatpush1.msra.mxu1 %v1433_v54  ;;  %3039 = vmatprep.subr.mxu0 %v1302_v55  ;;  %v1286_v10 = vld [vmem:[%s5158_s30 + $0x20c8] sm:$0xff]  ;;  %v1285_v14 = vld [vmem:[%s5158_s30 + $0x20c0] sm:$0xff] }
 0x14b   : > { %3110 = vmatprep.subr.mxu1 %v1430_v56  ;;  %3040 = vmatpush1.msra.mxu0 %v1301_v57  ;;  %v1414_v13 = vld [vmem:[%s5158_s30 + $0x24c8] sm:$0xff]  ;;  %v1413_v16 = vld [vmem:[%s5158_s30 + $0x24c0] sm:$0xff] }
 0x14c   : > { %3111 = vmatpush1.msra.mxu1 %v1429_v58  ;;  %3041 = vmatprep.subr.mxu0 %v1298_v59  ;;  %v1282_v17 = vld [vmem:[%s5158_s30 + $0x20a8] sm:$0xff]  ;;  %v1281_v21 = vld [vmem:[%s5158_s30 + $0x20a0] sm:$0xff] }
 0x14d   : > { %3112 = vmatprep.subr.mxu1 %v1426_v60  ;;  %3042 = vmatpush1.msra.mxu0 %v1297_v61  ;;  %v1410_v19 = vld [vmem:[%s5158_s30 + $0x24a8] sm:$0xff]  ;;  %v1409_v22 = vld [vmem:[%s5158_s30 + $0x24a0] sm:$0xff] }
 0x14e   : > { %3113 = vmatpush1.msra.mxu1 %v1425_v62  ;;  %3043 = vmatprep.subr.mxu0 %v1294_v0  ;;  %v1278_v23 = vld [vmem:[%s5158_s30 + $0x2088] sm:$0xff]  ;;  %v1277_v27 = vld [vmem:[%s5158_s30 + $0x2080] sm:$0xff] }
 0x14f   : > { %3114 = vmatprep.subr.mxu1 %v1422_v1  ;;  %3044 = vmatpush1.msra.mxu0 %v1293_v3  ;;  %v1406_v26 = vld [vmem:[%s5158_s30 + $0x2488] sm:$0xff]  ;;  %v1405_v30 = vld [vmem:[%s5158_s30 + $0x2480] sm:$0xff] }
 0x150   : > { %3115 = vmatpush1.msra.mxu1 %v1421_v4  ;;  %3045 = vmatprep.subr.mxu0 %v1290_v5  ;;  %v1274_v31 = vld [vmem:[%s5158_s30 + $0x2068] sm:$0xff]  ;;  %v1273_v33 = vld [vmem:[%s5158_s30 + $0x2060] sm:$0xff] }
 0x151   : > { %3116 = vmatprep.subr.mxu1 %v1418_v6  ;;  %3046 = vmatpush1.msra.mxu0 %v1289_v7  ;;  %v1402_v32 = vld [vmem:[%s5158_s30 + $0x2468] sm:$0xff]  ;;  %v1401_v34 = vld [vmem:[%s5158_s30 + $0x2460] sm:$0xff] }
 0x152   : > { %3117 = vmatpush1.msra.mxu1 %v1417_v8  ;;  %3047 = vmatprep.subr.mxu0 %v1286_v10  ;;  %v1270_v35 = vld [vmem:[%s5158_s30 + $0x2048] sm:$0xff]  ;;  %v1269_v37 = vld [vmem:[%s5158_s30 + $0x2040] sm:$0xff] }
 0x153   : > { %3118 = vmatprep.subr.mxu1 %v1414_v13  ;;  %3048 = vmatpush1.msra.mxu0 %v1285_v14  ;;  %v1398_v36 = vld [vmem:[%s5158_s30 + $0x2448] sm:$0xff]  ;;  %v1397_v38 = vld [vmem:[%s5158_s30 + $0x2440] sm:$0xff] }
 0x154   : > { %3119 = vmatpush1.msra.mxu1 %v1413_v16  ;;  %3049 = vmatprep.subr.mxu0 %v1282_v17  ;;  %v1266_v40 = vld [vmem:[%s5158_s30 + $0x2028] sm:$0xff]  ;;  %v1265_v42 = vld [vmem:[%s5158_s30 + $0x2020] sm:$0xff] }
 0x155   : > { %3120 = vmatprep.subr.mxu1 %v1410_v19  ;;  %3050 = vmatpush1.msra.mxu0 %v1281_v21  ;;  %v1394_v41 = vld [vmem:[%s5158_s30 + $0x2428] sm:$0xff]  ;;  %v1393_v43 = vld [vmem:[%s5158_s30 + $0x2420] sm:$0xff] }
 0x156   : > { %3121 = vmatpush1.msra.mxu1 %v1409_v22  ;;  %3051 = vmatprep.subr.mxu0 %v1278_v23  ;;  %v1262_v45 = vld [vmem:[%s5158_s30 + $0x2008] sm:$0xff]  ;;  %v1261_v47 = vld [vmem:[%s5158_s30 + $0x2000] sm:$0xff] }
 0x157   : > { %3122 = vmatprep.subr.mxu1 %v1406_v26  ;;  %3052 = vmatpush1.msra.mxu0 %v1277_v27  ;;  %v1390_v46 = vld [vmem:[%s5158_s30 + $0x2408] sm:$0xff]  ;;  %v1389_v48 = vld [vmem:[%s5158_s30 + $0x2400] sm:$0xff] }
 0x158   : > { %3123 = vmatpush1.msra.mxu1 %v1405_v30  ;;  %3053 = vmatprep.subr.mxu0 %v1274_v31  ;;  %v1386_v50 = vld [vmem:[%s5158_s30 + $0x23e8] sm:$0xff]  ;;  %v1385_v54 = vld [vmem:[%s5158_s30 + $0x23e0] sm:$0xff] }
 0x159   : > { %3124 = vmatprep.subr.mxu1 %v1402_v32  ;;  %3054 = vmatpush1.msra.mxu0 %v1273_v33  ;;  %v1514_v51 = vld [vmem:[%s5158_s30 + $0x27e8] sm:$0xff]  ;;  %v1513_v55 = vld [vmem:[%s5158_s30 + $0x27e0] sm:$0xff] }
 0x15a   : > { %3125 = vmatpush1.msra.mxu1 %v1401_v34  ;;  %3055 = vmatprep.subr.mxu0 %v1270_v35  ;;  %v1382_v56 = vld [vmem:[%s5158_s30 + $0x23c8] sm:$0xff]  ;;  %v1381_v58 = vld [vmem:[%s5158_s30 + $0x23c0] sm:$0xff] }
 0x15b   : > { %3126 = vmatprep.subr.mxu1 %v1398_v36  ;;  %3056 = vmatpush1.msra.mxu0 %v1269_v37  ;;  %v1510_v57 = vld [vmem:[%s5158_s30 + $0x27c8] sm:$0xff]  ;;  %v1509_v59 = vld [vmem:[%s5158_s30 + $0x27c0] sm:$0xff] }
 0x15c   : > { %3127 = vmatpush1.msra.mxu1 %v1397_v38  ;;  %3057 = vmatprep.subr.mxu0 %v1266_v40  ;;  %v1378_v60 = vld [vmem:[%s5158_s30 + $0x23a8] sm:$0xff]  ;;  %v1377_v62 = vld [vmem:[%s5158_s30 + $0x23a0] sm:$0xff] }
 0x15d   : > { %3128 = vmatprep.subr.mxu1 %v1394_v41  ;;  %3058 = vmatpush1.msra.mxu0 %v1265_v42  ;;  %v1506_v61 = vld [vmem:[%s5158_s30 + $0x27a8] sm:$0xff]  ;;  %v1505_v0 = vld [vmem:[%s5158_s30 + $0x27a0] sm:$0xff] }
 0x15e   : > { %3129 = vmatpush1.msra.mxu1 %v1393_v43  ;;  %3059 = vmatprep.subr.mxu0 %v1262_v45  ;;  %v1374_v1 = vld [vmem:[%s5158_s30 + $0x2388] sm:$0xff]  ;;  %v1373_v4 = vld [vmem:[%s5158_s30 + $0x2380] sm:$0xff] }
 0x15f   : > { %3130 = vmatprep.subr.mxu1 %v1390_v46  ;;  %3060 = vmatpush1.msra.mxu0 %v1261_v47  ;;  %v1502_v3 = vld [vmem:[%s5158_s30 + $0x2788] sm:$0xff]  ;;  %v1501_v5 = vld [vmem:[%s5158_s30 + $0x2780] sm:$0xff] }
 0x160   : > { %3131 = vmatpush1.msra.mxu1 %v1389_v48  ;;  %3061 = vmatprep.subr.mxu0 %v1386_v50  ;;  %v1370_v6 = vld [vmem:[%s5158_s30 + $0x2368] sm:$0xff]  ;;  %v1369_v8 = vld [vmem:[%s5158_s30 + $0x2360] sm:$0xff] }
 0x161   : > { %3132 = vmatprep.subr.mxu1 %v1514_v51  ;;  %3062 = vmatpush2.msra.mxu0 %v1385_v54  ;;  %v1498_v7 = vld [vmem:[%s5158_s30 + $0x2768] sm:$0xff]  ;;  %v1497_v10 = vld [vmem:[%s5158_s30 + $0x2760] sm:$0xff] }
 0x162   : > { %3133 = vmatpush2.msra.mxu1 %v1513_v55  ;;  %3063 = vmatprep.subr.mxu0 %v1382_v56  ;;  %v1366_v13 = vld [vmem:[%s5158_s30 + $0x2348] sm:$0xff]  ;;  %v1365_v16 = vld [vmem:[%s5158_s30 + $0x2340] sm:$0xff] }
 0x163   : > { %3134 = vmatprep.subr.mxu1 %v1510_v57  ;;  %3064 = vmatpush2.msra.mxu0 %v1381_v58  ;;  %v1494_v14 = vld [vmem:[%s5158_s30 + $0x2748] sm:$0xff]  ;;  %v1493_v17 = vld [vmem:[%s5158_s30 + $0x2740] sm:$0xff] }
 0x164   : > { %3135 = vmatpush2.msra.mxu1 %v1509_v59  ;;  %3065 = vmatprep.subr.mxu0 %v1378_v60  ;;  %v1362_v19 = vld [vmem:[%s5158_s30 + $0x2328] sm:$0xff]  ;;  %v1361_v22 = vld [vmem:[%s5158_s30 + $0x2320] sm:$0xff] }
 0x165   : > { %3136 = vmatprep.subr.mxu1 %v1506_v61  ;;  %3066 = vmatpush2.msra.mxu0 %v1377_v62  ;;  %v1490_v21 = vld [vmem:[%s5158_s30 + $0x2728] sm:$0xff]  ;;  %v1489_v23 = vld [vmem:[%s5158_s30 + $0x2720] sm:$0xff] }
 0x166   : > { %3137 = vmatpush2.msra.mxu1 %v1505_v0  ;;  %3067 = vmatprep.subr.mxu0 %v1374_v1  ;;  %v1358_v26 = vld [vmem:[%s5158_s30 + $0x2308] sm:$0xff]  ;;  %v1357_v30 = vld [vmem:[%s5158_s30 + $0x2300] sm:$0xff] }
 0x167   : > { %3138 = vmatprep.subr.mxu1 %v1502_v3  ;;  %3068 = vmatpush2.msra.mxu0 %v1373_v4  ;;  %v1486_v27 = vld [vmem:[%s5158_s30 + $0x2708] sm:$0xff]  ;;  %v1485_v31 = vld [vmem:[%s5158_s30 + $0x2700] sm:$0xff] }
 0x168   : > { %3139 = vmatpush2.msra.mxu1 %v1501_v5  ;;  %3069 = vmatprep.subr.mxu0 %v1370_v6  ;;  %v1354_v32 = vld [vmem:[%s5158_s30 + $0x22e8] sm:$0xff]  ;;  %v1353_v34 = vld [vmem:[%s5158_s30 + $0x22e0] sm:$0xff] }
 0x169   : > { %3140 = vmatprep.subr.mxu1 %v1498_v7  ;;  %3070 = vmatpush2.msra.mxu0 %v1369_v8  ;;  %v1482_v33 = vld [vmem:[%s5158_s30 + $0x26e8] sm:$0xff]  ;;  %v1481_v35 = vld [vmem:[%s5158_s30 + $0x26e0] sm:$0xff] }
 0x16a   : > { %3141 = vmatpush2.msra.mxu1 %v1497_v10  ;;  %3071 = vmatprep.subr.mxu0 %v1366_v13  ;;  %v1350_v36 = vld [vmem:[%s5158_s30 + $0x22c8] sm:$0xff]  ;;  %v1349_v38 = vld [vmem:[%s5158_s30 + $0x22c0] sm:$0xff] }
 0x16b   : > { %3142 = vmatprep.subr.mxu1 %v1494_v14  ;;  %3072 = vmatpush2.msra.mxu0 %v1365_v16  ;;  %v1478_v37 = vld [vmem:[%s5158_s30 + $0x26c8] sm:$0xff]  ;;  %v1477_v40 = vld [vmem:[%s5158_s30 + $0x26c0] sm:$0xff] }
 0x16c   : > { %3143 = vmatpush2.msra.mxu1 %v1493_v17  ;;  %3073 = vmatprep.subr.mxu0 %v1362_v19  ;;  %v1346_v41 = vld [vmem:[%s5158_s30 + $0x22a8] sm:$0xff]  ;;  %v1345_v43 = vld [vmem:[%s5158_s30 + $0x22a0] sm:$0xff] }
 0x16d   : > { %3144 = vmatprep.subr.mxu1 %v1490_v21  ;;  %3074 = vmatpush2.msra.mxu0 %v1361_v22  ;;  %v1474_v42 = vld [vmem:[%s5158_s30 + $0x26a8] sm:$0xff]  ;;  %v1473_v45 = vld [vmem:[%s5158_s30 + $0x26a0] sm:$0xff] }
 0x16e   : > { %3145 = vmatpush2.msra.mxu1 %v1489_v23  ;;  %3075 = vmatprep.subr.mxu0 %v1358_v26  ;;  %v233_v46 = vld [vmem:[%s5175_s25 + $0x20] sm:$0xff]  ;;  %v1342_v47 = vld [vmem:[%s5158_s30 + $0x2288] sm:$0xff] }
 0x16f   : > { %3146 = vmatprep.subr.mxu1 %v1486_v27  ;;  %3076 = vmatpush2.msra.mxu0 %v1357_v30  ;;  %v1470_v48 = vld [vmem:[%s5158_s30 + $0x2688] sm:$0xff]  ;;  %v1341_v50 = vld [vmem:[%s5158_s30 + $0x2280] sm:$0xff]  ;;  %v2361_v56 = vcombine.high %v233_v46, %v233_v46  ;;  %v5889_v61 = vrot.slane %v233_v46, %v5290_v53 }
 0x170   : > { %3147 = vmatpush2.msra.mxu1 %v1485_v31  ;;  %3077 = vmatprep.subr.mxu0 %v1354_v32  ;;  %v1469_v51 = vld [vmem:[%s5158_s30 + $0x2680] sm:$0xff]  ;;  %v1338_v54 = vld [vmem:[%s5158_s30 + $0x2268] sm:$0xff] }
 0x171   : > { %3148 = vmatprep.subr.mxu1 %v1482_v33  ;;  %3078 = vmatpush2.msra.mxu0 %v1353_v34  ;;  %v1466_v55 = vld [vmem:[%s5158_s30 + $0x2668] sm:$0xff]  ;;  %v1337_v57 = vld [vmem:[%s5158_s30 + $0x2260] sm:$0xff]  ;;  %v5896_v4 = vrot.slane %v2361_v56, %v5290_v53  ;;  %v5904_v10 = vcombine.high %v5889_v61, %v5889_v61 }
 0x172   : > { %3149 = vmatpush2.msra.mxu1 %v1481_v35  ;;  %3079 = vmatprep.subr.mxu0 %v1350_v36  ;;  %v1465_v58 = vld [vmem:[%s5158_s30 + $0x2660] sm:$0xff]  ;;  %v1334_v59 = vld [vmem:[%s5158_s30 + $0x2248] sm:$0xff] }
 0x173   : > { %3150 = vmatprep.subr.mxu1 %v1478_v37  ;;  %3080 = vmatpush2.msra.mxu0 %v1349_v38  ;;  %v1462_v60 = vld [vmem:[%s5158_s30 + $0x2648] sm:$0xff]  ;;  %v1333_v62 = vld [vmem:[%s5158_s30 + $0x2240] sm:$0xff]  ;;  %v5910_v16 = vcombine.high %v5896_v4, %v5896_v4 }
 0x174   : > { %3151 = vmatpush2.msra.mxu1 %v1477_v40  ;;  %3081 = vmatprep.subr.mxu0 %v1346_v41  ;;  %v1461_v0 = vld [vmem:[%s5158_s30 + $0x2640] sm:$0xff]  ;;  %v1330_v1 = vld [vmem:[%s5158_s30 + $0x2228] sm:$0xff] }
 0x175   : > { %3152 = vmatprep.subr.mxu1 %v1474_v42  ;;  %3082 = vmatpush2.msra.mxu0 %v1345_v43  ;;  %v1458_v3 = vld [vmem:[%s5158_s30 + $0x2628] sm:$0xff]  ;;  %v1329_v5 = vld [vmem:[%s5158_s30 + $0x2220] sm:$0xff] }
 0x176   : > { %3153 = vmatpush2.msra.mxu1 %v1473_v45  ;;  %3083 = vmatprep.subr.mxu0 %v1342_v47  ;;  %v1457_v6 = vld [vmem:[%s5158_s30 + $0x2620] sm:$0xff]  ;;  %v1326_v7 = vld [vmem:[%s5158_s30 + $0x2208] sm:$0xff] }
 0x177   : > { %3154 = vmatprep.subr.mxu1 %v1470_v48  ;;  %3084 = vmatpush2.msra.mxu0 %v1341_v50  ;;  %v1454_v8 = vld [vmem:[%s5158_s30 + $0x2608] sm:$0xff]  ;;  %v1325_v13 = vld [vmem:[%s5158_s30 + $0x2200] sm:$0xff] }
 0x178   : > { %3155 = vmatpush2.msra.mxu1 %v1469_v51  ;;  %3085 = vmatprep.subr.mxu0 %v1338_v54  ;;  %v1453_v14 = vld [vmem:[%s5158_s30 + $0x2600] sm:$0xff]  ;;  %v1578_v17 = vld [vmem:[%s5158_s30 + $0x29e8] sm:$0xff] }
 0x179   : > { %3156 = vmatprep.subr.mxu1 %v1466_v55  ;;  %3086 = vmatpush2.msra.mxu0 %v1337_v57  ;;  %v1706_v19 = vld [vmem:[%s5158_s30 + $0x2de8] sm:$0xff]  ;;  %v1577_v21 = vld [vmem:[%s5158_s30 + $0x29e0] sm:$0xff] }
 0x17a   : > { %3157 = vmatpush2.msra.mxu1 %v1465_v58  ;;  %3087 = vmatprep.subr.mxu0 %v1334_v59  ;;  %v1705_v22 = vld [vmem:[%s5158_s30 + $0x2de0] sm:$0xff]  ;;  %v1574_v23 = vld [vmem:[%s5158_s30 + $0x29c8] sm:$0xff] }
 0x17b   : > { %3158 = vmatprep.subr.mxu1 %v1462_v60  ;;  %3088 = vmatpush2.msra.mxu0 %v1333_v62  ;;  %v1702_v26 = vld [vmem:[%s5158_s30 + $0x2dc8] sm:$0xff]  ;;  %v1573_v27 = vld [vmem:[%s5158_s30 + $0x29c0] sm:$0xff] }
 0x17c   : > { %3159 = vmatpush2.msra.mxu1 %v1461_v0  ;;  %3089 = vmatprep.subr.mxu0 %v1330_v1  ;;  %v1701_v30 = vld [vmem:[%s5158_s30 + $0x2dc0] sm:$0xff]  ;;  %v1570_v31 = vld [vmem:[%s5158_s30 + $0x29a8] sm:$0xff] }
 0x17d   : > { %3160 = vmatprep.subr.mxu1 %v1458_v3  ;;  %3090 = vmatpush2.msra.mxu0 %v1329_v5  ;;  %v1698_v32 = vld [vmem:[%s5158_s30 + $0x2da8] sm:$0xff]  ;;  %v1569_v33 = vld [vmem:[%s5158_s30 + $0x29a0] sm:$0xff] }
 0x17e   : > { %3161 = vmatpush2.msra.mxu1 %v1457_v6  ;;  %3091 = vmatprep.subr.mxu0 %v1326_v7  ;;  %v1697_v34 = vld [vmem:[%s5158_s30 + $0x2da0] sm:$0xff]  ;;  %v1566_v35 = vld [vmem:[%s5158_s30 + $0x2988] sm:$0xff] }
 0x17f   : > { %3162 = vmatprep.subr.mxu1 %v1454_v8  ;;  %3092 = vmatpush2.msra.mxu0 %v1325_v13  ;;  %v1694_v36 = vld [vmem:[%s5158_s30 + $0x2d88] sm:$0xff]  ;;  %v1565_v37 = vld [vmem:[%s5158_s30 + $0x2980] sm:$0xff] }
 0x180   : > { %3093 = vmatprep.mubr.f32.mxu0 %v5904_v10  ;;  %3163 = vmatpush2.msra.mxu1 %v1453_v14  ;;  %v1693_v38 = vld [vmem:[%s5158_s30 + $0x2d80] sm:$0xff]  ;;  %v1562_v40 = vld [vmem:[%s5158_s30 + $0x2968] sm:$0xff] }
 0x181   : > { %3094 = vmatmul.mubr.f32.vlgmr.msra.gmra.mxu0 %v5889_v61  ;;  %3164 = vmatprep.mubr.f32.mxu1 %v5910_v16  ;;  %v1690_v41 = vld [vmem:[%s5158_s30 + $0x2d68] sm:$0xff]  ;;  %v1561_v42 = vld [vmem:[%s5158_s30 + $0x2960] sm:$0xff] }
 0x182   : > { %3171 = vmatprep.subr.mxu0 %v1578_v17  ;;  %3242 = vmatprep.subr.mxu1 %v1706_v19  ;;  %v1689_v43 = vld [vmem:[%s5158_s30 + $0x2d60] sm:$0xff]  ;;  %v1558_v45 = vld [vmem:[%s5158_s30 + $0x2948] sm:$0xff] }
 0x183   : > { %3165 = vmatmul.mubr.f32.vlgmr.msra.gmra.mxu1 %v5896_v4  ;;  %3172 = vmatpush1.msra.mxu0 %v1577_v21  ;;  %v1686_v46 = vld [vmem:[%s5158_s30 + $0x2d48] sm:$0xff]  ;;  %v1557_v47 = vld [vmem:[%s5158_s30 + $0x2940] sm:$0xff] }
 0x184   : > { %3243 = vmatpush1.msra.mxu1 %v1705_v22  ;;  %3173 = vmatprep.subr.mxu0 %v1574_v23  ;;  %v1685_v48 = vld [vmem:[%s5158_s30 + $0x2d40] sm:$0xff]  ;;  %v1554_v50 = vld [vmem:[%s5158_s30 + $0x2928] sm:$0xff] }
 0x185   : > { %3244 = vmatprep.subr.mxu1 %v1702_v26  ;;  %3174 = vmatpush1.msra.mxu0 %v1573_v27  ;;  %v1682_v51 = vld [vmem:[%s5158_s30 + $0x2d28] sm:$0xff]  ;;  %v1553_v54 = vld [vmem:[%s5158_s30 + $0x2920] sm:$0xff] }
 0x186   : > { %3245 = vmatpush1.msra.mxu1 %v1701_v30  ;;  %3175 = vmatprep.subr.mxu0 %v1570_v31  ;;  %v1681_v55 = vld [vmem:[%s5158_s30 + $0x2d20] sm:$0xff]  ;;  %v1550_v56 = vld [vmem:[%s5158_s30 + $0x2908] sm:$0xff] }
 0x187   : > { %3246 = vmatprep.subr.mxu1 %v1698_v32  ;;  %3176 = vmatpush1.msra.mxu0 %v1569_v33  ;;  %v1678_v57 = vld [vmem:[%s5158_s30 + $0x2d08] sm:$0xff]  ;;  %v1549_v58 = vld [vmem:[%s5158_s30 + $0x2900] sm:$0xff] }
 0x188   : > { %3247 = vmatpush1.msra.mxu1 %v1697_v34  ;;  %3177 = vmatprep.subr.mxu0 %v1566_v35  ;;  %v1677_v59 = vld [vmem:[%s5158_s30 + $0x2d00] sm:$0xff]  ;;  %v1546_v60 = vld [vmem:[%s5158_s30 + $0x28e8] sm:$0xff] }
 0x189   : > { %3248 = vmatprep.subr.mxu1 %v1694_v36  ;;  %3178 = vmatpush1.msra.mxu0 %v1565_v37  ;;  %v1674_v62 = vld [vmem:[%s5158_s30 + $0x2ce8] sm:$0xff]  ;;  %v1545_v0 = vld [vmem:[%s5158_s30 + $0x28e0] sm:$0xff] }
 0x18a   : > { %3249 = vmatpush1.msra.mxu1 %v1693_v38  ;;  %3179 = vmatprep.subr.mxu0 %v1562_v40  ;;  %v1673_v1 = vld [vmem:[%s5158_s30 + $0x2ce0] sm:$0xff]  ;;  %v1542_v3 = vld [vmem:[%s5158_s30 + $0x28c8] sm:$0xff] }
 0x18b   : > { %3250 = vmatprep.subr.mxu1 %v1690_v41  ;;  %3180 = vmatpush1.msra.mxu0 %v1561_v42  ;;  %v1670_v5 = vld [vmem:[%s5158_s30 + $0x2cc8] sm:$0xff]  ;;  %v1541_v6 = vld [vmem:[%s5158_s30 + $0x28c0] sm:$0xff] }
 0x18c   : > { %3251 = vmatpush1.msra.mxu1 %v1689_v43  ;;  %3181 = vmatprep.subr.mxu0 %v1558_v45  ;;  %v1669_v7 = vld [vmem:[%s5158_s30 + $0x2cc0] sm:$0xff]  ;;  %v1538_v8 = vld [vmem:[%s5158_s30 + $0x28a8] sm:$0xff] }
 0x18d   : > { %3252 = vmatprep.subr.mxu1 %v1686_v46  ;;  %3182 = vmatpush1.msra.mxu0 %v1557_v47  ;;  %v1666_v13 = vld [vmem:[%s5158_s30 + $0x2ca8] sm:$0xff]  ;;  %v1537_v14 = vld [vmem:[%s5158_s30 + $0x28a0] sm:$0xff] }
 0x18e   : > { %3253 = vmatpush1.msra.mxu1 %v1685_v48  ;;  %3183 = vmatprep.subr.mxu0 %v1554_v50  ;;  %v1665_v17 = vld [vmem:[%s5158_s30 + $0x2ca0] sm:$0xff]  ;;  %v1534_v19 = vld [vmem:[%s5158_s30 + $0x2888] sm:$0xff] }
 0x18f   : > { %3254 = vmatprep.subr.mxu1 %v1682_v51  ;;  %3184 = vmatpush1.msra.mxu0 %v1553_v54  ;;  %v1662_v21 = vld [vmem:[%s5158_s30 + $0x2c88] sm:$0xff]  ;;  %v1533_v22 = vld [vmem:[%s5158_s30 + $0x2880] sm:$0xff] }
 0x190   : > { %3255 = vmatpush1.msra.mxu1 %v1681_v55  ;;  %3185 = vmatprep.subr.mxu0 %v1550_v56  ;;  %v1661_v23 = vld [vmem:[%s5158_s30 + $0x2c80] sm:$0xff]  ;;  %v1530_v26 = vld [vmem:[%s5158_s30 + $0x2868] sm:$0xff] }
 0x191   : > { %3256 = vmatprep.subr.mxu1 %v1678_v57  ;;  %3186 = vmatpush1.msra.mxu0 %v1549_v58  ;;  %v1658_v27 = vld [vmem:[%s5158_s30 + $0x2c68] sm:$0xff]  ;;  %v1529_v30 = vld [vmem:[%s5158_s30 + $0x2860] sm:$0xff] }
 0x192   : > { %3257 = vmatpush1.msra.mxu1 %v1677_v59  ;;  %3187 = vmatprep.subr.mxu0 %v1546_v60  ;;  %v1657_v31 = vld [vmem:[%s5158_s30 + $0x2c60] sm:$0xff]  ;;  %v1526_v32 = vld [vmem:[%s5158_s30 + $0x2848] sm:$0xff] }
 0x193   : > { %3258 = vmatprep.subr.mxu1 %v1674_v62  ;;  %3188 = vmatpush1.msra.mxu0 %v1545_v0  ;;  %v1654_v33 = vld [vmem:[%s5158_s30 + $0x2c48] sm:$0xff]  ;;  %v1525_v34 = vld [vmem:[%s5158_s30 + $0x2840] sm:$0xff] }
 0x194   : > { %3259 = vmatpush1.msra.mxu1 %v1673_v1  ;;  %3189 = vmatprep.subr.mxu0 %v1542_v3  ;;  %v1653_v35 = vld [vmem:[%s5158_s30 + $0x2c40] sm:$0xff]  ;;  %v1522_v36 = vld [vmem:[%s5158_s30 + $0x2828] sm:$0xff] }
 0x195   : > { %3260 = vmatprep.subr.mxu1 %v1670_v5  ;;  %3190 = vmatpush1.msra.mxu0 %v1541_v6  ;;  %v1650_v37 = vld [vmem:[%s5158_s30 + $0x2c28] sm:$0xff]  ;;  %v1521_v38 = vld [vmem:[%s5158_s30 + $0x2820] sm:$0xff] }
 0x196   : > { %3261 = vmatpush1.msra.mxu1 %v1669_v7  ;;  %3191 = vmatprep.subr.mxu0 %v1538_v8  ;;  %v1649_v40 = vld [vmem:[%s5158_s30 + $0x2c20] sm:$0xff]  ;;  %v1518_v41 = vld [vmem:[%s5158_s30 + $0x2808] sm:$0xff] }
 0x197   : > { %3262 = vmatprep.subr.mxu1 %v1666_v13  ;;  %3192 = vmatpush1.msra.mxu0 %v1537_v14  ;;  %v1646_v42 = vld [vmem:[%s5158_s30 + $0x2c08] sm:$0xff]  ;;  %v1517_v43 = vld [vmem:[%s5158_s30 + $0x2800] sm:$0xff] }
 0x198   : > { %3263 = vmatpush1.msra.mxu1 %v1665_v17  ;;  %3193 = vmatprep.subr.mxu0 %v1534_v19  ;;  %v1645_v45 = vld [vmem:[%s5158_s30 + $0x2c00] sm:$0xff]  ;;  %v1642_v46 = vld [vmem:[%s5158_s30 + $0x2be8] sm:$0xff] }
 0x199   : > { %3264 = vmatprep.subr.mxu1 %v1662_v21  ;;  %3194 = vmatpush1.msra.mxu0 %v1533_v22  ;;  %v1770_v47 = vld [vmem:[%s5158_s30 + $0x2fe8] sm:$0xff]  ;;  %v1641_v48 = vld [vmem:[%s5158_s30 + $0x2be0] sm:$0xff] }
 0x19a   : > { %3265 = vmatpush1.msra.mxu1 %v1661_v23  ;;  %3195 = vmatprep.subr.mxu0 %v1530_v26  ;;  %v1769_v50 = vld [vmem:[%s5158_s30 + $0x2fe0] sm:$0xff]  ;;  %v1638_v51 = vld [vmem:[%s5158_s30 + $0x2bc8] sm:$0xff] }
 0x19b   : > { %3266 = vmatprep.subr.mxu1 %v1658_v27  ;;  %3196 = vmatpush1.msra.mxu0 %v1529_v30  ;;  %v1766_v54 = vld [vmem:[%s5158_s30 + $0x2fc8] sm:$0xff]  ;;  %v1637_v55 = vld [vmem:[%s5158_s30 + $0x2bc0] sm:$0xff] }
 0x19c   : > { %3267 = vmatpush1.msra.mxu1 %v1657_v31  ;;  %3197 = vmatprep.subr.mxu0 %v1526_v32  ;;  %v1765_v56 = vld [vmem:[%s5158_s30 + $0x2fc0] sm:$0xff]  ;;  %v1634_v57 = vld [vmem:[%s5158_s30 + $0x2ba8] sm:$0xff] }
 0x19d   : > { %3268 = vmatprep.subr.mxu1 %v1654_v33  ;;  %3198 = vmatpush1.msra.mxu0 %v1525_v34  ;;  %v1762_v58 = vld [vmem:[%s5158_s30 + $0x2fa8] sm:$0xff]  ;;  %v1633_v59 = vld [vmem:[%s5158_s30 + $0x2ba0] sm:$0xff] }
 0x19e   : > { %3269 = vmatpush1.msra.mxu1 %v1653_v35  ;;  %3199 = vmatprep.subr.mxu0 %v1522_v36  ;;  %v1761_v60 = vld [vmem:[%s5158_s30 + $0x2fa0] sm:$0xff]  ;;  %v1630_v62 = vld [vmem:[%s5158_s30 + $0x2b88] sm:$0xff] }
 0x19f   : > { %3270 = vmatprep.subr.mxu1 %v1650_v37  ;;  %3200 = vmatpush1.msra.mxu0 %v1521_v38  ;;  %v1758_v0 = vld [vmem:[%s5158_s30 + $0x2f88] sm:$0xff]  ;;  %v1629_v1 = vld [vmem:[%s5158_s30 + $0x2b80] sm:$0xff] }
 0x1a0   : > { %3271 = vmatpush1.msra.mxu1 %v1649_v40  ;;  %3201 = vmatprep.subr.mxu0 %v1518_v41  ;;  %v1757_v3 = vld [vmem:[%s5158_s30 + $0x2f80] sm:$0xff]  ;;  %v1626_v5 = vld [vmem:[%s5158_s30 + $0x2b68] sm:$0xff] }
 0x1a1   : > { %3272 = vmatprep.subr.mxu1 %v1646_v42  ;;  %3202 = vmatpush1.msra.mxu0 %v1517_v43  ;;  %v1754_v6 = vld [vmem:[%s5158_s30 + $0x2f68] sm:$0xff]  ;;  %v1625_v7 = vld [vmem:[%s5158_s30 + $0x2b60] sm:$0xff] }
 0x1a2   : > { %3273 = vmatpush1.msra.mxu1 %v1645_v45  ;;  %3203 = vmatprep.subr.mxu0 %v1642_v46  ;;  %v1753_v8 = vld [vmem:[%s5158_s30 + $0x2f60] sm:$0xff]  ;;  %v1622_v13 = vld [vmem:[%s5158_s30 + $0x2b48] sm:$0xff] }
 0x1a3   : > { %3274 = vmatprep.subr.mxu1 %v1770_v47  ;;  %3204 = vmatpush2.msra.mxu0 %v1641_v48  ;;  %v1750_v14 = vld [vmem:[%s5158_s30 + $0x2f48] sm:$0xff]  ;;  %v1621_v17 = vld [vmem:[%s5158_s30 + $0x2b40] sm:$0xff] }
 0x1a4   : > { %3275 = vmatpush2.msra.mxu1 %v1769_v50  ;;  %3205 = vmatprep.subr.mxu0 %v1638_v51  ;;  %v1749_v19 = vld [vmem:[%s5158_s30 + $0x2f40] sm:$0xff]  ;;  %v1618_v21 = vld [vmem:[%s5158_s30 + $0x2b28] sm:$0xff] }
 0x1a5   : > { %3276 = vmatprep.subr.mxu1 %v1766_v54  ;;  %3206 = vmatpush2.msra.mxu0 %v1637_v55  ;;  %v1746_v22 = vld [vmem:[%s5158_s30 + $0x2f28] sm:$0xff]  ;;  %v1617_v23 = vld [vmem:[%s5158_s30 + $0x2b20] sm:$0xff] }
 0x1a6   : > { %3277 = vmatpush2.msra.mxu1 %v1765_v56  ;;  %3207 = vmatprep.subr.mxu0 %v1634_v57  ;;  %v1745_v26 = vld [vmem:[%s5158_s30 + $0x2f20] sm:$0xff]  ;;  %v1614_v27 = vld [vmem:[%s5158_s30 + $0x2b08] sm:$0xff] }
 0x1a7   : > { %3278 = vmatprep.subr.mxu1 %v1762_v58  ;;  %3208 = vmatpush2.msra.mxu0 %v1633_v59  ;;  %v1742_v30 = vld [vmem:[%s5158_s30 + $0x2f08] sm:$0xff]  ;;  %v1613_v31 = vld [vmem:[%s5158_s30 + $0x2b00] sm:$0xff] }
 0x1a8   : > { %3279 = vmatpush2.msra.mxu1 %v1761_v60  ;;  %3209 = vmatprep.subr.mxu0 %v1630_v62  ;;  %v1741_v32 = vld [vmem:[%s5158_s30 + $0x2f00] sm:$0xff]  ;;  %v1610_v33 = vld [vmem:[%s5158_s30 + $0x2ae8] sm:$0xff] }
 0x1a9   : > { %3280 = vmatprep.subr.mxu1 %v1758_v0  ;;  %3210 = vmatpush2.msra.mxu0 %v1629_v1  ;;  %v1738_v34 = vld [vmem:[%s5158_s30 + $0x2ee8] sm:$0xff]  ;;  %v1609_v35 = vld [vmem:[%s5158_s30 + $0x2ae0] sm:$0xff] }
 0x1aa   : > { %3281 = vmatpush2.msra.mxu1 %v1757_v3  ;;  %3211 = vmatprep.subr.mxu0 %v1626_v5  ;;  %v1737_v36 = vld [vmem:[%s5158_s30 + $0x2ee0] sm:$0xff]  ;;  %v1606_v37 = vld [vmem:[%s5158_s30 + $0x2ac8] sm:$0xff] }
 0x1ab   : > { %3282 = vmatprep.subr.mxu1 %v1754_v6  ;;  %3212 = vmatpush2.msra.mxu0 %v1625_v7  ;;  %v1734_v38 = vld [vmem:[%s5158_s30 + $0x2ec8] sm:$0xff]  ;;  %v1605_v40 = vld [vmem:[%s5158_s30 + $0x2ac0] sm:$0xff] }
 0x1ac   : > { %3283 = vmatpush2.msra.mxu1 %v1753_v8  ;;  %3213 = vmatprep.subr.mxu0 %v1622_v13  ;;  %v1733_v41 = vld [vmem:[%s5158_s30 + $0x2ec0] sm:$0xff]  ;;  %v1602_v42 = vld [vmem:[%s5158_s30 + $0x2aa8] sm:$0xff] }
 0x1ad   : > { %3284 = vmatprep.subr.mxu1 %v1750_v14  ;;  %3214 = vmatpush2.msra.mxu0 %v1621_v17  ;;  %v1730_v43 = vld [vmem:[%s5158_s30 + $0x2ea8] sm:$0xff]  ;;  %v1601_v45 = vld [vmem:[%s5158_s30 + $0x2aa0] sm:$0xff] }
 0x1ae   : > { %3285 = vmatpush2.msra.mxu1 %v1749_v19  ;;  %3215 = vmatprep.subr.mxu0 %v1618_v21  ;;  %v1729_v46 = vld [vmem:[%s5158_s30 + $0x2ea0] sm:$0xff]  ;;  %v234_v47 = vld [vmem:[%s5175_s25 + $0x28] sm:$0xff] }
 0x1af   : > { %3286 = vmatprep.subr.mxu1 %v1746_v22  ;;  %3216 = vmatpush2.msra.mxu0 %v1617_v23  ;;  %v1598_v48 = vld [vmem:[%s5158_s30 + $0x2a88] sm:$0xff]  ;;  %v1597_v51 = vld [vmem:[%s5158_s30 + $0x2a80] sm:$0xff]  ;;  %v2378_v57 = vcombine.high %v234_v47, %v234_v47  ;;  %v6036_v0 = vrot.slane %v234_v47, %v5290_v53 }
 0x1b0   : > { %3287 = vmatpush2.msra.mxu1 %v1745_v26  ;;  %3217 = vmatprep.subr.mxu0 %v1614_v27  ;;  %v1726_v50 = vld [vmem:[%s5158_s30 + $0x2e88] sm:$0xff]  ;;  %v1725_v54 = vld [vmem:[%s5158_s30 + $0x2e80] sm:$0xff] }
 0x1b1   : > { %3288 = vmatprep.subr.mxu1 %v1742_v30  ;;  %3218 = vmatpush2.msra.mxu0 %v1613_v31  ;;  %v1594_v55 = vld [vmem:[%s5158_s30 + $0x2a68] sm:$0xff]  ;;  %v1593_v58 = vld [vmem:[%s5158_s30 + $0x2a60] sm:$0xff]  ;;  %v6043_v7 = vrot.slane %v2378_v57, %v5290_v53  ;;  %v6051_v19 = vcombine.high %v6036_v0, %v6036_v0 }
 0x1b2   : > { %3289 = vmatpush2.msra.mxu1 %v1741_v32  ;;  %3219 = vmatprep.subr.mxu0 %v1610_v33  ;;  %v1722_v56 = vld [vmem:[%s5158_s30 + $0x2e68] sm:$0xff]  ;;  %v1721_v59 = vld [vmem:[%s5158_s30 + $0x2e60] sm:$0xff] }
 0x1b3   : > { %3290 = vmatprep.subr.mxu1 %v1738_v34  ;;  %3220 = vmatpush2.msra.mxu0 %v1609_v35  ;;  %v1590_v60 = vld [vmem:[%s5158_s30 + $0x2a48] sm:$0xff]  ;;  %v1589_v1 = vld [vmem:[%s5158_s30 + $0x2a40] sm:$0xff]  ;;  %v6057_v23 = vcombine.high %v6043_v7, %v6043_v7 }
 0x1b4   : > { %3291 = vmatpush2.msra.mxu1 %v1737_v36  ;;  %3221 = vmatprep.subr.mxu0 %v1606_v37  ;;  %v1718_v62 = vld [vmem:[%s5158_s30 + $0x2e48] sm:$0xff]  ;;  %v1717_v3 = vld [vmem:[%s5158_s30 + $0x2e40] sm:$0xff] }
 0x1b5   : > { %3292 = vmatprep.subr.mxu1 %v1734_v38  ;;  %3222 = vmatpush2.msra.mxu0 %v1605_v40  ;;  %v1586_v5 = vld [vmem:[%s5158_s30 + $0x2a28] sm:$0xff]  ;;  %v1585_v8 = vld [vmem:[%s5158_s30 + $0x2a20] sm:$0xff] }
 0x1b6   : > { %3293 = vmatpush2.msra.mxu1 %v1733_v41  ;;  %3223 = vmatprep.subr.mxu0 %v1602_v42  ;;  %v1714_v6 = vld [vmem:[%s5158_s30 + $0x2e28] sm:$0xff]  ;;  %v1713_v13 = vld [vmem:[%s5158_s30 + $0x2e20] sm:$0xff] }
 0x1b7   : > { %3294 = vmatprep.subr.mxu1 %v1730_v43  ;;  %3224 = vmatpush2.msra.mxu0 %v1601_v45  ;;  %v1582_v14 = vld [vmem:[%s5158_s30 + $0x2a08] sm:$0xff]  ;;  %v1581_v21 = vld [vmem:[%s5158_s30 + $0x2a00] sm:$0xff] }
 0x1b8   : > { %3295 = vmatpush2.msra.mxu1 %v1729_v46  ;;  %3225 = vmatprep.subr.mxu0 %v1598_v48  ;;  %v1710_v17 = vld [vmem:[%s5158_s30 + $0x2e08] sm:$0xff]  ;;  %v1709_v22 = vld [vmem:[%s5158_s30 + $0x2e00] sm:$0xff] }
 0x1b9   : > { %3296 = vmatprep.subr.mxu1 %v1726_v50  ;;  %3226 = vmatpush2.msra.mxu0 %v1597_v51  ;;  %v1834_v26 = vld [vmem:[%s5158_s30 + $0x31e8] sm:$0xff]  ;;  %v1833_v30 = vld [vmem:[%s5158_s30 + $0x31e0] sm:$0xff] }
 0x1ba   : > { %3297 = vmatpush2.msra.mxu1 %v1725_v54  ;;  %3227 = vmatprep.subr.mxu0 %v1594_v55  ;;  %v1962_v27 = vld [vmem:[%s5158_s30 + $0x35e8] sm:$0xff]  ;;  %v1961_v31 = vld [vmem:[%s5158_s30 + $0x35e0] sm:$0xff] }
 0x1bb   : > { %3298 = vmatprep.subr.mxu1 %v1722_v56  ;;  %3228 = vmatpush2.msra.mxu0 %v1593_v58  ;;  %v1830_v32 = vld [vmem:[%s5158_s30 + $0x31c8] sm:$0xff]  ;;  %v1829_v34 = vld [vmem:[%s5158_s30 + $0x31c0] sm:$0xff] }
 0x1bc   : > { %3299 = vmatpush2.msra.mxu1 %v1721_v59  ;;  %3229 = vmatprep.subr.mxu0 %v1590_v60  ;;  %v1958_v33 = vld [vmem:[%s5158_s30 + $0x35c8] sm:$0xff]  ;;  %v1957_v35 = vld [vmem:[%s5158_s30 + $0x35c0] sm:$0xff] }
 0x1bd   : > { %3300 = vmatprep.subr.mxu1 %v1718_v62  ;;  %3230 = vmatpush2.msra.mxu0 %v1589_v1  ;;  %v1826_v36 = vld [vmem:[%s5158_s30 + $0x31a8] sm:$0xff]  ;;  %v1825_v38 = vld [vmem:[%s5158_s30 + $0x31a0] sm:$0xff] }
 0x1be   : > { %3301 = vmatpush2.msra.mxu1 %v1717_v3  ;;  %3231 = vmatprep.subr.mxu0 %v1586_v5  ;;  %v1954_v37 = vld [vmem:[%s5158_s30 + $0x35a8] sm:$0xff]  ;;  %v1953_v40 = vld [vmem:[%s5158_s30 + $0x35a0] sm:$0xff] }
 0x1bf   : > { %3302 = vmatprep.subr.mxu1 %v1714_v6  ;;  %3232 = vmatpush2.msra.mxu0 %v1585_v8  ;;  %v1822_v41 = vld [vmem:[%s5158_s30 + $0x3188] sm:$0xff]  ;;  %v1821_v43 = vld [vmem:[%s5158_s30 + $0x3180] sm:$0xff] }
 0x1c0   : > { %3303 = vmatpush2.msra.mxu1 %v1713_v13  ;;  %3233 = vmatprep.subr.mxu0 %v1582_v14  ;;  %v1950_v42 = vld [vmem:[%s5158_s30 + $0x3588] sm:$0xff]  ;;  %v1949_v45 = vld [vmem:[%s5158_s30 + $0x3580] sm:$0xff] }
 0x1c1   : > { %3304 = vmatprep.subr.mxu1 %v1710_v17  ;;  %3234 = vmatpush2.msra.mxu0 %v1581_v21  ;;  %v1818_v46 = vld [vmem:[%s5158_s30 + $0x3168] sm:$0xff]  ;;  %v1817_v48 = vld [vmem:[%s5158_s30 + $0x3160] sm:$0xff] }
 0x1c2   : > { %3235 = vmatprep.mubr.f32.mxu0 %v6051_v19  ;;  %3305 = vmatpush2.msra.mxu1 %v1709_v22  ;;  %v1946_v47 = vld [vmem:[%s5158_s30 + $0x3568] sm:$0xff]  ;;  %v1945_v50 = vld [vmem:[%s5158_s30 + $0x3560] sm:$0xff] }
 0x1c3   : > { %3236 = vmatmul.mubr.f32.vlgmr.msra.gmra.mxu0 %v6036_v0  ;;  %3306 = vmatprep.mubr.f32.mxu1 %v6057_v23  ;;  %v1814_v51 = vld [vmem:[%s5158_s30 + $0x3148] sm:$0xff]  ;;  %v1813_v55 = vld [vmem:[%s5158_s30 + $0x3140] sm:$0xff] }
 0x1c4   : > { %3313 = vmatprep.subr.mxu0 %v1834_v26  ;;  %3384 = vmatprep.subr.mxu1 %v1962_v27  ;;  %v1942_v54 = vld [vmem:[%s5158_s30 + $0x3548] sm:$0xff]  ;;  %v1941_v56 = vld [vmem:[%s5158_s30 + $0x3540] sm:$0xff] }
 0x1c5   : > { %3307 = vmatmul.mubr.f32.vlgmr.msra.gmra.mxu1 %v6043_v7  ;;  %3314 = vmatpush1.msra.mxu0 %v1833_v30  ;;  %v1810_v57 = vld [vmem:[%s5158_s30 + $0x3128] sm:$0xff]  ;;  %v1809_v59 = vld [vmem:[%s5158_s30 + $0x3120] sm:$0xff] }
 0x1c6   : > { %3385 = vmatpush1.msra.mxu1 %v1961_v31  ;;  %3315 = vmatprep.subr.mxu0 %v1830_v32  ;;  %v1938_v58 = vld [vmem:[%s5158_s30 + $0x3528] sm:$0xff]  ;;  %v1937_v60 = vld [vmem:[%s5158_s30 + $0x3520] sm:$0xff] }
 0x1c7   : > { %3386 = vmatprep.subr.mxu1 %v1958_v33  ;;  %3316 = vmatpush1.msra.mxu0 %v1829_v34  ;;  %v1806_v62 = vld [vmem:[%s5158_s30 + $0x3108] sm:$0xff]  ;;  %v1805_v3 = vld [vmem:[%s5158_s30 + $0x3100] sm:$0xff] }
 0x1c8   : > { %3387 = vmatpush1.msra.mxu1 %v1957_v35  ;;  %3317 = vmatprep.subr.mxu0 %v1826_v36  ;;  %v1934_v1 = vld [vmem:[%s5158_s30 + $0x3508] sm:$0xff]  ;;  %v1933_v5 = vld [vmem:[%s5158_s30 + $0x3500] sm:$0xff] }
 0x1c9   : > { %3388 = vmatprep.subr.mxu1 %v1954_v37  ;;  %3318 = vmatpush1.msra.mxu0 %v1825_v38  ;;  %v1802_v6 = vld [vmem:[%s5158_s30 + $0x30e8] sm:$0xff]  ;;  %v1801_v13 = vld [vmem:[%s5158_s30 + $0x30e0] sm:$0xff] }
 0x1ca   : > { %3389 = vmatpush1.msra.mxu1 %v1953_v40  ;;  %3319 = vmatprep.subr.mxu0 %v1822_v41  ;;  %v1930_v8 = vld [vmem:[%s5158_s30 + $0x34e8] sm:$0xff]  ;;  %v1929_v14 = vld [vmem:[%s5158_s30 + $0x34e0] sm:$0xff] }
 0x1cb   : > { %3390 = vmatprep.subr.mxu1 %v1950_v42  ;;  %3320 = vmatpush1.msra.mxu0 %v1821_v43  ;;  %v1798_v17 = vld [vmem:[%s5158_s30 + $0x30c8] sm:$0xff]  ;;  %v1797_v22 = vld [vmem:[%s5158_s30 + $0x30c0] sm:$0xff] }
 0x1cc   : > { %3391 = vmatpush1.msra.mxu1 %v1949_v45  ;;  %3321 = vmatprep.subr.mxu0 %v1818_v46  ;;  %v1926_v21 = vld [vmem:[%s5158_s30 + $0x34c8] sm:$0xff]  ;;  %v1925_v26 = vld [vmem:[%s5158_s30 + $0x34c0] sm:$0xff] }
 0x1cd   : > { %3392 = vmatprep.subr.mxu1 %v1946_v47  ;;  %3322 = vmatpush1.msra.mxu0 %v1817_v48  ;;  %v1794_v27 = vld [vmem:[%s5158_s30 + $0x30a8] sm:$0xff]  ;;  %v1793_v31 = vld [vmem:[%s5158_s30 + $0x30a0] sm:$0xff] }
 0x1ce   : > { %3393 = vmatpush1.msra.mxu1 %v1945_v50  ;;  %3323 = vmatprep.subr.mxu0 %v1814_v51  ;;  %v1922_v30 = vld [vmem:[%s5158_s30 + $0x34a8] sm:$0xff]  ;;  %v1921_v32 = vld [vmem:[%s5158_s30 + $0x34a0] sm:$0xff] }
 0x1cf   : > { %3394 = vmatprep.subr.mxu1 %v1942_v54  ;;  %3324 = vmatpush1.msra.mxu0 %v1813_v55  ;;  %v1790_v33 = vld [vmem:[%s5158_s30 + $0x3088] sm:$0xff]  ;;  %v1789_v35 = vld [vmem:[%s5158_s30 + $0x3080] sm:$0xff] }
 0x1d0   : > { %3395 = vmatpush1.msra.mxu1 %v1941_v56  ;;  %3325 = vmatprep.subr.mxu0 %v1810_v57  ;;  %v1918_v34 = vld [vmem:[%s5158_s30 + $0x3488] sm:$0xff]  ;;  %v1917_v36 = vld [vmem:[%s5158_s30 + $0x3480] sm:$0xff] }
 0x1d1   : > { %3396 = vmatprep.subr.mxu1 %v1938_v58  ;;  %3326 = vmatpush1.msra.mxu0 %v1809_v59  ;;  %v1786_v37 = vld [vmem:[%s5158_s30 + $0x3068] sm:$0xff]  ;;  %v1785_v40 = vld [vmem:[%s5158_s30 + $0x3060] sm:$0xff] }
 0x1d2   : > { %3397 = vmatpush1.msra.mxu1 %v1937_v60  ;;  %3327 = vmatprep.subr.mxu0 %v1806_v62  ;;  %v1914_v38 = vld [vmem:[%s5158_s30 + $0x3468] sm:$0xff]  ;;  %v1913_v41 = vld [vmem:[%s5158_s30 + $0x3460] sm:$0xff] }
 0x1d3   : > { %3398 = vmatprep.subr.mxu1 %v1934_v1  ;;  %3328 = vmatpush1.msra.mxu0 %v1805_v3  ;;  %v1782_v42 = vld [vmem:[%s5158_s30 + $0x3048] sm:$0xff]  ;;  %v1781_v45 = vld [vmem:[%s5158_s30 + $0x3040] sm:$0xff] }
 0x1d4   : > { %3399 = vmatpush1.msra.mxu1 %v1933_v5  ;;  %3329 = vmatprep.subr.mxu0 %v1802_v6  ;;  %v1910_v43 = vld [vmem:[%s5158_s30 + $0x3448] sm:$0xff]  ;;  %v1909_v46 = vld [vmem:[%s5158_s30 + $0x3440] sm:$0xff] }
 0x1d5   : > { %3400 = vmatprep.subr.mxu1 %v1930_v8  ;;  %3330 = vmatpush1.msra.mxu0 %v1801_v13  ;;  %v1778_v47 = vld [vmem:[%s5158_s30 + $0x3028] sm:$0xff]  ;;  %v1777_v50 = vld [vmem:[%s5158_s30 + $0x3020] sm:$0xff] }
 0x1d6   : > { %3401 = vmatpush1.msra.mxu1 %v1929_v14  ;;  %3331 = vmatprep.subr.mxu0 %v1798_v17  ;;  %v1906_v48 = vld [vmem:[%s5158_s30 + $0x3428] sm:$0xff]  ;;  %v1905_v51 = vld [vmem:[%s5158_s30 + $0x3420] sm:$0xff] }
 0x1d7   : > { %3402 = vmatprep.subr.mxu1 %v1926_v21  ;;  %3332 = vmatpush1.msra.mxu0 %v1797_v22  ;;  %v1774_v54 = vld [vmem:[%s5158_s30 + $0x3008] sm:$0xff]  ;;  %v1773_v56 = vld [vmem:[%s5158_s30 + $0x3000] sm:$0xff] }
 0x1d8   : > { %3403 = vmatpush1.msra.mxu1 %v1925_v26  ;;  %3333 = vmatprep.subr.mxu0 %v1794_v27  ;;  %v1902_v55 = vld [vmem:[%s5158_s30 + $0x3408] sm:$0xff]  ;;  %v1901_v57 = vld [vmem:[%s5158_s30 + $0x3400] sm:$0xff] }
 0x1d9   : > { %3404 = vmatprep.subr.mxu1 %v1922_v30  ;;  %3334 = vmatpush1.msra.mxu0 %v1793_v31  ;;  %v1898_v58 = vld [vmem:[%s5158_s30 + $0x33e8] sm:$0xff]  ;;  %v1897_v60 = vld [vmem:[%s5158_s30 + $0x33e0] sm:$0xff] }
 0x1da   : > { %3405 = vmatpush1.msra.mxu1 %v1921_v32  ;;  %3335 = vmatprep.subr.mxu0 %v1790_v33  ;;  %v2026_v59 = vld [vmem:[%s5158_s30 + $0x37e8] sm:$0xff]  ;;  %v2025_v62 = vld [vmem:[%s5158_s30 + $0x37e0] sm:$0xff] }
 0x1db   : > { %3406 = vmatprep.subr.mxu1 %v1918_v34  ;;  %3336 = vmatpush1.msra.mxu0 %v1789_v35  ;;  %v1894_v1 = vld [vmem:[%s5158_s30 + $0x33c8] sm:$0xff]  ;;  %v1893_v5 = vld [vmem:[%s5158_s30 + $0x33c0] sm:$0xff] }
 0x1dc   : > { %3407 = vmatpush1.msra.mxu1 %v1917_v36  ;;  %3337 = vmatprep.subr.mxu0 %v1786_v37  ;;  %v2022_v3 = vld [vmem:[%s5158_s30 + $0x37c8] sm:$0xff]  ;;  %v2021_v6 = vld [vmem:[%s5158_s30 + $0x37c0] sm:$0xff] }
 0x1dd   : > { %3408 = vmatprep.subr.mxu1 %v1914_v38  ;;  %3338 = vmatpush1.msra.mxu0 %v1785_v40  ;;  %v1890_v8 = vld [vmem:[%s5158_s30 + $0x33a8] sm:$0xff]  ;;  %v1889_v14 = vld [vmem:[%s5158_s30 + $0x33a0] sm:$0xff] }
 0x1de   : > { %3409 = vmatpush1.msra.mxu1 %v1913_v41  ;;  %3339 = vmatprep.subr.mxu0 %v1782_v42  ;;  %v2018_v13 = vld [vmem:[%s5158_s30 + $0x37a8] sm:$0xff]  ;;  %v2017_v17 = vld [vmem:[%s5158_s30 + $0x37a0] sm:$0xff] }
 0x1df   : > { %3410 = vmatprep.subr.mxu1 %v1910_v43  ;;  %3340 = vmatpush1.msra.mxu0 %v1781_v45  ;;  %v1886_v21 = vld [vmem:[%s5158_s30 + $0x3388] sm:$0xff]  ;;  %v1885_v26 = vld [vmem:[%s5158_s30 + $0x3380] sm:$0xff] }
 0x1e0   : > { %3411 = vmatpush1.msra.mxu1 %v1909_v46  ;;  %3341 = vmatprep.subr.mxu0 %v1778_v47  ;;  %v2014_v22 = vld [vmem:[%s5158_s30 + $0x3788] sm:$0xff]  ;;  %v2013_v27 = vld [vmem:[%s5158_s30 + $0x3780] sm:$0xff] }
 0x1e1   : > { %3412 = vmatprep.subr.mxu1 %v1906_v48  ;;  %3342 = vmatpush1.msra.mxu0 %v1777_v50  ;;  %v1882_v30 = vld [vmem:[%s5158_s30 + $0x3368] sm:$0xff]  ;;  %v1881_v32 = vld [vmem:[%s5158_s30 + $0x3360] sm:$0xff] }
 0x1e2   : > { %3413 = vmatpush1.msra.mxu1 %v1905_v51  ;;  %3343 = vmatprep.subr.mxu0 %v1774_v54  ;;  %v2010_v31 = vld [vmem:[%s5158_s30 + $0x3768] sm:$0xff]  ;;  %v2009_v33 = vld [vmem:[%s5158_s30 + $0x3760] sm:$0xff] }
 0x1e3   : > { %3414 = vmatprep.subr.mxu1 %v1902_v55  ;;  %3344 = vmatpush1.msra.mxu0 %v1773_v56  ;;  %v1878_v34 = vld [vmem:[%s5158_s30 + $0x3348] sm:$0xff]  ;;  %v1877_v36 = vld [vmem:[%s5158_s30 + $0x3340] sm:$0xff] }
 0x1e4   : > { %3415 = vmatpush1.msra.mxu1 %v1901_v57  ;;  %3345 = vmatprep.subr.mxu0 %v1898_v58  ;;  %v2006_v35 = vld [vmem:[%s5158_s30 + $0x3748] sm:$0xff]  ;;  %v2005_v37 = vld [vmem:[%s5158_s30 + $0x3740] sm:$0xff] }
 0x1e5   : > { %3416 = vmatprep.subr.mxu1 %v2026_v59  ;;  %3346 = vmatpush2.msra.mxu0 %v1897_v60  ;;  %v1874_v38 = vld [vmem:[%s5158_s30 + $0x3328] sm:$0xff]  ;;  %v1873_v41 = vld [vmem:[%s5158_s30 + $0x3320] sm:$0xff] }
 0x1e6   : > { %3417 = vmatpush2.msra.mxu1 %v2025_v62  ;;  %3347 = vmatprep.subr.mxu0 %v1894_v1  ;;  %v2002_v40 = vld [vmem:[%s5158_s30 + $0x3728] sm:$0xff]  ;;  %v2001_v42 = vld [vmem:[%s5158_s30 + $0x3720] sm:$0xff] }
 0x1e7   : > { %3418 = vmatprep.subr.mxu1 %v2022_v3  ;;  %3348 = vmatpush2.msra.mxu0 %v1893_v5  ;;  %v1870_v43 = vld [vmem:[%s5158_s30 + $0x3308] sm:$0xff]  ;;  %v1869_v46 = vld [vmem:[%s5158_s30 + $0x3300] sm:$0xff]  ;;  %v235_v3 = vld [vmem:[%s5175_s25 + $0x30] sm:$0xff] }
 0x1e8   : > { %3419 = vmatpush2.msra.mxu1 %v2021_v6  ;;  %3349 = vmatprep.subr.mxu0 %v1890_v8  ;;  %v1998_v45 = vld [vmem:[%s5158_s30 + $0x3708] sm:$0xff]  ;;  %v1997_v47 = vld [vmem:[%s5158_s30 + $0x3700] sm:$0xff] }
 0x1e9   : > { %3420 = vmatprep.subr.mxu1 %v2018_v13  ;;  %3350 = vmatpush2.msra.mxu0 %v1889_v14  ;;  %v1866_v48 = vld [vmem:[%s5158_s30 + $0x32e8] sm:$0xff]  ;;  %v1865_v51 = vld [vmem:[%s5158_s30 + $0x32e0] sm:$0xff] }
 0x1ea   : > { %3421 = vmatpush2.msra.mxu1 %v2017_v17  ;;  %3351 = vmatprep.subr.mxu0 %v1886_v21  ;;  %v1994_v50 = vld [vmem:[%s5158_s30 + $0x36e8] sm:$0xff]  ;;  %v1993_v54 = vld [vmem:[%s5158_s30 + $0x36e0] sm:$0xff]  ;;  %v2395_v21 = vcombine.high %v235_v3, %v235_v3 }
 0x1eb   : > { %3422 = vmatprep.subr.mxu1 %v2014_v22  ;;  %3352 = vmatpush2.msra.mxu0 %v1885_v26  ;;  %v1862_v55 = vld [vmem:[%s5158_s30 + $0x32c8] sm:$0xff]  ;;  %v1861_v57 = vld [vmem:[%s5158_s30 + $0x32c0] sm:$0xff] }
 0x1ec   : > { %3423 = vmatpush2.msra.mxu1 %v2013_v27  ;;  %3353 = vmatprep.subr.mxu0 %v1882_v30  ;;  %v1990_v56 = vld [vmem:[%s5158_s30 + $0x36c8] sm:$0xff]  ;;  %v1989_v58 = vld [vmem:[%s5158_s30 + $0x36c0] sm:$0xff] }
 0x1ed   : > { %3424 = vmatprep.subr.mxu1 %v2010_v31  ;;  %3354 = vmatpush2.msra.mxu0 %v1881_v32  ;;  %v1858_v59 = vld [vmem:[%s5158_s30 + $0x32a8] sm:$0xff]  ;;  %v1857_v62 = vld [vmem:[%s5158_s30 + $0x32a0] sm:$0xff]  ;;  %v6183_v31 = vrot.slane %v235_v3, %v5290_v53 }
 0x1ee   : > { %3425 = vmatpush2.msra.mxu1 %v2009_v33  ;;  %3355 = vmatprep.subr.mxu0 %v1878_v34  ;;  %v1986_v60 = vld [vmem:[%s5158_s30 + $0x36a8] sm:$0xff]  ;;  %v1985_v1 = vld [vmem:[%s5158_s30 + $0x36a0] sm:$0xff] }
 0x1ef   : > { %3426 = vmatprep.subr.mxu1 %v2006_v35  ;;  %3356 = vmatpush2.msra.mxu0 %v1877_v36  ;;  %v1854_v5 = vld [vmem:[%s5158_s30 + $0x3288] sm:$0xff]  ;;  %v1853_v8 = vld [vmem:[%s5158_s30 + $0x3280] sm:$0xff]  ;;  %v6190_v36 = vrot.slane %v2395_v21, %v5290_v53 }
 0x1f0   : > { %3427 = vmatpush2.msra.mxu1 %v2005_v37  ;;  %3357 = vmatprep.subr.mxu0 %v1874_v38  ;;  %v1982_v6 = vld [vmem:[%s5158_s30 + $0x3688] sm:$0xff]  ;;  %v1981_v13 = vld [vmem:[%s5158_s30 + $0x3680] sm:$0xff] }
 0x1f1   : > { %3428 = vmatprep.subr.mxu1 %v2002_v40  ;;  %3358 = vmatpush2.msra.mxu0 %v1873_v41  ;;  %v1850_v14 = vld [vmem:[%s5158_s30 + $0x3268] sm:$0xff]  ;;  %v1849_v22 = vld [vmem:[%s5158_s30 + $0x3260] sm:$0xff] }
 0x1f2   : > { %3429 = vmatpush2.msra.mxu1 %v2001_v42  ;;  %3359 = vmatprep.subr.mxu0 %v1870_v43  ;;  %v1978_v17 = vld [vmem:[%s5158_s30 + $0x3668] sm:$0xff]  ;;  %v1977_v26 = vld [vmem:[%s5158_s30 + $0x3660] sm:$0xff]  ;;  %v6198_v42 = vcombine.high %v6183_v31, %v6183_v31 }
 0x1f3   : > { %3430 = vmatprep.subr.mxu1 %v1998_v45  ;;  %3360 = vmatpush2.msra.mxu0 %v1869_v46  ;;  %v1846_v27 = vld [vmem:[%s5158_s30 + $0x3248] sm:$0xff]  ;;  %v1845_v32 = vld [vmem:[%s5158_s30 + $0x3240] sm:$0xff]  ;;  %v6204_v46 = vcombine.high %v6190_v36, %v6190_v36 }
 0x1f4   : > { %3431 = vmatpush2.msra.mxu1 %v1997_v47  ;;  %3361 = vmatprep.subr.mxu0 %v1866_v48  ;;  %v1974_v30 = vld [vmem:[%s5158_s30 + $0x3648] sm:$0xff]  ;;  %v1973_v33 = vld [vmem:[%s5158_s30 + $0x3640] sm:$0xff] }
 0x1f5   : > { %3432 = vmatprep.subr.mxu1 %v1994_v50  ;;  %3362 = vmatpush2.msra.mxu0 %v1865_v51  ;;  %v1842_v34 = vld [vmem:[%s5158_s30 + $0x3228] sm:$0xff]  ;;  %v1841_v37 = vld [vmem:[%s5158_s30 + $0x3220] sm:$0xff] }
 0x1f6   : > { %3433 = vmatpush2.msra.mxu1 %v1993_v54  ;;  %3363 = vmatprep.subr.mxu0 %v1862_v55  ;;  %v1970_v35 = vld [vmem:[%s5158_s30 + $0x3628] sm:$0xff]  ;;  %v1969_v38 = vld [vmem:[%s5158_s30 + $0x3620] sm:$0xff] }
 0x1f7   : > { %3434 = vmatprep.subr.mxu1 %v1990_v56  ;;  %3364 = vmatpush2.msra.mxu0 %v1861_v57  ;;  %v1838_v40 = vld [vmem:[%s5158_s30 + $0x3208] sm:$0xff]  ;;  %v1837_v43 = vld [vmem:[%s5158_s30 + $0x3200] sm:$0xff] }
 0x1f8   : > { %3435 = vmatpush2.msra.mxu1 %v1989_v58  ;;  %3365 = vmatprep.subr.mxu0 %v1858_v59  ;;  %v1966_v41 = vld [vmem:[%s5158_s30 + $0x3608] sm:$0xff]  ;;  %v1965_v45 = vld [vmem:[%s5158_s30 + $0x3600] sm:$0xff] }
 0x1f9   : > { %3436 = vmatprep.subr.mxu1 %v1986_v60  ;;  %3366 = vmatpush2.msra.mxu0 %v1857_v62  ;;  %v2090_v47 = vld [vmem:[%s5158_s30 + $0x39e8] sm:$0xff]  ;;  %v2089_v50 = vld [vmem:[%s5158_s30 + $0x39e0] sm:$0xff] }
 0x1fa   : > { %3437 = vmatpush2.msra.mxu1 %v1985_v1  ;;  %3367 = vmatprep.subr.mxu0 %v1854_v5  ;;  %v2218_v48 = vld [vmem:[%s5158_s30 + $0x3de8] sm:$0xff]  ;;  %v2217_v51 = vld [vmem:[%s5158_s30 + $0x3de0] sm:$0xff] }
 0x1fb   : > { %3438 = vmatprep.subr.mxu1 %v1982_v6  ;;  %3368 = vmatpush2.msra.mxu0 %v1853_v8  ;;  %v2086_v54 = vld [vmem:[%s5158_s30 + $0x39c8] sm:$0xff]  ;;  %v2085_v56 = vld [vmem:[%s5158_s30 + $0x39c0] sm:$0xff] }
 0x1fc   : > { %3439 = vmatpush2.msra.mxu1 %v1981_v13  ;;  %3369 = vmatprep.subr.mxu0 %v1850_v14  ;;  %v2214_v55 = vld [vmem:[%s5158_s30 + $0x3dc8] sm:$0xff]  ;;  %v2213_v57 = vld [vmem:[%s5158_s30 + $0x3dc0] sm:$0xff] }
 0x1fd   : > { %3440 = vmatprep.subr.mxu1 %v1978_v17  ;;  %3370 = vmatpush2.msra.mxu0 %v1849_v22  ;;  %v2082_v58 = vld [vmem:[%s5158_s30 + $0x39a8] sm:$0xff]  ;;  %v2081_v60 = vld [vmem:[%s5158_s30 + $0x39a0] sm:$0xff] }
 0x1fe   : > { %3441 = vmatpush2.msra.mxu1 %v1977_v26  ;;  %3371 = vmatprep.subr.mxu0 %v1846_v27  ;;  %v2210_v59 = vld [vmem:[%s5158_s30 + $0x3da8] sm:$0xff]  ;;  %v2209_v62 = vld [vmem:[%s5158_s30 + $0x3da0] sm:$0xff] }
 0x1ff   : > { %3442 = vmatprep.subr.mxu1 %v1974_v30  ;;  %3372 = vmatpush2.msra.mxu0 %v1845_v32  ;;  %v2078_v1 = vld [vmem:[%s5158_s30 + $0x3988] sm:$0xff]  ;;  %v2077_v5 = vld [vmem:[%s5158_s30 + $0x3980] sm:$0xff] }
 0x200   : > { %3443 = vmatpush2.msra.mxu1 %v1973_v33  ;;  %3373 = vmatprep.subr.mxu0 %v1842_v34  ;;  %v2206_v3 = vld [vmem:[%s5158_s30 + $0x3d88] sm:$0xff]  ;;  %v2205_v6 = vld [vmem:[%s5158_s30 + $0x3d80] sm:$0xff] }
 0x201   : > { %3444 = vmatprep.subr.mxu1 %v1970_v35  ;;  %3374 = vmatpush2.msra.mxu0 %v1841_v37  ;;  %v2074_v8 = vld [vmem:[%s5158_s30 + $0x3968] sm:$0xff]  ;;  %v2073_v14 = vld [vmem:[%s5158_s30 + $0x3960] sm:$0xff] }
 0x202   : > { %3445 = vmatpush2.msra.mxu1 %v1969_v38  ;;  %3375 = vmatprep.subr.mxu0 %v1838_v40  ;;  %v2202_v13 = vld [vmem:[%s5158_s30 + $0x3d68] sm:$0xff]  ;;  %v2201_v17 = vld [vmem:[%s5158_s30 + $0x3d60] sm:$0xff] }
 0x203   : > { %3446 = vmatprep.subr.mxu1 %v1966_v41  ;;  %3376 = vmatpush2.msra.mxu0 %v1837_v43  ;;  %v2070_v21 = vld [vmem:[%s5158_s30 + $0x3948] sm:$0xff]  ;;  %v2069_v26 = vld [vmem:[%s5158_s30 + $0x3940] sm:$0xff] }
 0x204   : > { %3377 = vmatprep.mubr.f32.mxu0 %v6198_v42  ;;  %3447 = vmatpush2.msra.mxu1 %v1965_v45  ;;  %v2198_v22 = vld [vmem:[%s5158_s30 + $0x3d48] sm:$0xff]  ;;  %v2197_v27 = vld [vmem:[%s5158_s30 + $0x3d40] sm:$0xff] }
 0x205   : > { %3378 = vmatmul.mubr.f32.vlgmr.msra.gmra.mxu0 %v6183_v31  ;;  %3448 = vmatprep.mubr.f32.mxu1 %v6204_v46  ;;  %v2066_v30 = vld [vmem:[%s5158_s30 + $0x3928] sm:$0xff]  ;;  %v2065_v33 = vld [vmem:[%s5158_s30 + $0x3920] sm:$0xff] }
 0x206   : > { %3455 = vmatprep.subr.mxu0 %v2090_v47  ;;  %3526 = vmatprep.subr.mxu1 %v2218_v48  ;;  %v2194_v32 = vld [vmem:[%s5158_s30 + $0x3d28] sm:$0xff]  ;;  %v2193_v34 = vld [vmem:[%s5158_s30 + $0x3d20] sm:$0xff] }
 0x207   : > { %3449 = vmatmul.mubr.f32.vlgmr.msra.gmra.mxu1 %v6190_v36  ;;  %3456 = vmatpush1.msra.mxu0 %v2089_v50  ;;  %v2062_v35 = vld [vmem:[%s5158_s30 + $0x3908] sm:$0xff]  ;;  %v2061_v38 = vld [vmem:[%s5158_s30 + $0x3900] sm:$0xff] }
 0x208   : > { %3527 = vmatpush1.msra.mxu1 %v2217_v51  ;;  %3457 = vmatprep.subr.mxu0 %v2086_v54  ;;  %v2190_v37 = vld [vmem:[%s5158_s30 + $0x3d08] sm:$0xff]  ;;  %v2189_v40 = vld [vmem:[%s5158_s30 + $0x3d00] sm:$0xff] }
 0x209   : > { %3528 = vmatprep.subr.mxu1 %v2214_v55  ;;  %3458 = vmatpush1.msra.mxu0 %v2085_v56  ;;  %v2058_v41 = vld [vmem:[%s5158_s30 + $0x38e8] sm:$0xff]  ;;  %v2057_v45 = vld [vmem:[%s5158_s30 + $0x38e0] sm:$0xff] }
 0x20a   : > { %3529 = vmatpush1.msra.mxu1 %v2213_v57  ;;  %3459 = vmatprep.subr.mxu0 %v2082_v58  ;;  %v2186_v43 = vld [vmem:[%s5158_s30 + $0x3ce8] sm:$0xff]  ;;  %v2185_v47 = vld [vmem:[%s5158_s30 + $0x3ce0] sm:$0xff] }
 0x20b   : > { %3530 = vmatprep.subr.mxu1 %v2210_v59  ;;  %3460 = vmatpush1.msra.mxu0 %v2081_v60  ;;  %v2054_v48 = vld [vmem:[%s5158_s30 + $0x38c8] sm:$0xff]  ;;  %v2053_v51 = vld [vmem:[%s5158_s30 + $0x38c0] sm:$0xff] }
 0x20c   : > { %3531 = vmatpush1.msra.mxu1 %v2209_v62  ;;  %3461 = vmatprep.subr.mxu0 %v2078_v1  ;;  %v2182_v50 = vld [vmem:[%s5158_s30 + $0x3cc8] sm:$0xff]  ;;  %v2181_v54 = vld [vmem:[%s5158_s30 + $0x3cc0] sm:$0xff] }
 0x20d   : > { %3532 = vmatprep.subr.mxu1 %v2206_v3  ;;  %3462 = vmatpush1.msra.mxu0 %v2077_v5  ;;  %v2050_v55 = vld [vmem:[%s5158_s30 + $0x38a8] sm:$0xff]  ;;  %v2049_v57 = vld [vmem:[%s5158_s30 + $0x38a0] sm:$0xff] }
 0x20e   : > { %3533 = vmatpush1.msra.mxu1 %v2205_v6  ;;  %3463 = vmatprep.subr.mxu0 %v2074_v8  ;;  %v2178_v56 = vld [vmem:[%s5158_s30 + $0x3ca8] sm:$0xff]  ;;  %v2177_v58 = vld [vmem:[%s5158_s30 + $0x3ca0] sm:$0xff] }
 0x20f   : > { %3534 = vmatprep.subr.mxu1 %v2202_v13  ;;  %3464 = vmatpush1.msra.mxu0 %v2073_v14  ;;  %v2046_v59 = vld [vmem:[%s5158_s30 + $0x3888] sm:$0xff]  ;;  %v2045_v62 = vld [vmem:[%s5158_s30 + $0x3880] sm:$0xff] }
 0x210   : > { %3535 = vmatpush1.msra.mxu1 %v2201_v17  ;;  %3465 = vmatprep.subr.mxu0 %v2070_v21  ;;  %v2174_v60 = vld [vmem:[%s5158_s30 + $0x3c88] sm:$0xff]  ;;  %v2173_v1 = vld [vmem:[%s5158_s30 + $0x3c80] sm:$0xff] }
 0x211   : > { %3536 = vmatprep.subr.mxu1 %v2198_v22  ;;  %3466 = vmatpush1.msra.mxu0 %v2069_v26  ;;  %v2042_v3 = vld [vmem:[%s5158_s30 + $0x3868] sm:$0xff]  ;;  %v2041_v6 = vld [vmem:[%s5158_s30 + $0x3860] sm:$0xff] }
 0x212   : > { %3537 = vmatpush1.msra.mxu1 %v2197_v27  ;;  %3467 = vmatprep.subr.mxu0 %v2066_v30  ;;  %v2170_v5 = vld [vmem:[%s5158_s30 + $0x3c68] sm:$0xff]  ;;  %v2169_v8 = vld [vmem:[%s5158_s30 + $0x3c60] sm:$0xff] }
 0x213   : > { %3538 = vmatprep.subr.mxu1 %v2194_v32  ;;  %3468 = vmatpush1.msra.mxu0 %v2065_v33  ;;  %v2038_v13 = vld [vmem:[%s5158_s30 + $0x3848] sm:$0xff]  ;;  %v2037_v17 = vld [vmem:[%s5158_s30 + $0x3840] sm:$0xff] }
 0x214   : > { %3539 = vmatpush1.msra.mxu1 %v2193_v34  ;;  %3469 = vmatprep.subr.mxu0 %v2062_v35  ;;  %v2166_v14 = vld [vmem:[%s5158_s30 + $0x3c48] sm:$0xff]  ;;  %v2165_v21 = vld [vmem:[%s5158_s30 + $0x3c40] sm:$0xff] }
 0x215   : > { %3540 = vmatprep.subr.mxu1 %v2190_v37  ;;  %3470 = vmatpush1.msra.mxu0 %v2061_v38  ;;  %v2034_v22 = vld [vmem:[%s5158_s30 + $0x3828] sm:$0xff]  ;;  %v2033_v27 = vld [vmem:[%s5158_s30 + $0x3820] sm:$0xff] }
 0x216   : > { %3541 = vmatpush1.msra.mxu1 %v2189_v40  ;;  %3471 = vmatprep.subr.mxu0 %v2058_v41  ;;  %v2162_v26 = vld [vmem:[%s5158_s30 + $0x3c28] sm:$0xff]  ;;  %v2161_v30 = vld [vmem:[%s5158_s30 + $0x3c20] sm:$0xff] }
 0x217   : > { %3542 = vmatprep.subr.mxu1 %v2186_v43  ;;  %3472 = vmatpush1.msra.mxu0 %v2057_v45  ;;  %v2030_v32 = vld [vmem:[%s5158_s30 + $0x3808] sm:$0xff]  ;;  %v2029_v34 = vld [vmem:[%s5158_s30 + $0x3800] sm:$0xff] }
 0x218   : > { %3543 = vmatpush1.msra.mxu1 %v2185_v47  ;;  %3473 = vmatprep.subr.mxu0 %v2054_v48  ;;  %v2158_v33 = vld [vmem:[%s5158_s30 + $0x3c08] sm:$0xff]  ;;  %v2157_v35 = vld [vmem:[%s5158_s30 + $0x3c00] sm:$0xff] }
 0x219   : > { %3544 = vmatprep.subr.mxu1 %v2182_v50  ;;  %3474 = vmatpush1.msra.mxu0 %v2053_v51  ;;  %v2154_v37 = vld [vmem:[%s5158_s30 + $0x3be8] sm:$0xff]  ;;  %v2153_v40 = vld [vmem:[%s5158_s30 + $0x3be0] sm:$0xff] }
 0x21a   : > { %3545 = vmatpush1.msra.mxu1 %v2181_v54  ;;  %3475 = vmatprep.subr.mxu0 %v2050_v55  ;;  %v2282_v38 = vld [vmem:[%s5158_s30 + $0x3fe8] sm:$0xff]  ;;  %v2281_v41 = vld [vmem:[%s5158_s30 + $0x3fe0] sm:$0xff] }
 0x21b   : > { %3546 = vmatprep.subr.mxu1 %v2178_v56  ;;  %3476 = vmatpush1.msra.mxu0 %v2049_v57  ;;  %v2150_v43 = vld [vmem:[%s5158_s30 + $0x3bc8] sm:$0xff]  ;;  %v2149_v47 = vld [vmem:[%s5158_s30 + $0x3bc0] sm:$0xff] }
 0x21c   : > { %3547 = vmatpush1.msra.mxu1 %v2177_v58  ;;  %3477 = vmatprep.subr.mxu0 %v2046_v59  ;;  %v2278_v45 = vld [vmem:[%s5158_s30 + $0x3fc8] sm:$0xff]  ;;  %v2277_v48 = vld [vmem:[%s5158_s30 + $0x3fc0] sm:$0xff] }
 0x21d   : > { %3548 = vmatprep.subr.mxu1 %v2174_v60  ;;  %3478 = vmatpush1.msra.mxu0 %v2045_v62  ;;  %v2146_v50 = vld [vmem:[%s5158_s30 + $0x3ba8] sm:$0xff]  ;;  %v2145_v54 = vld [vmem:[%s5158_s30 + $0x3ba0] sm:$0xff] }
 0x21e   : > { %3549 = vmatpush1.msra.mxu1 %v2173_v1  ;;  %3479 = vmatprep.subr.mxu0 %v2042_v3  ;;  %v2274_v51 = vld [vmem:[%s5158_s30 + $0x3fa8] sm:$0xff]  ;;  %v2273_v55 = vld [vmem:[%s5158_s30 + $0x3fa0] sm:$0xff] }
 0x21f   : > { %3550 = vmatprep.subr.mxu1 %v2170_v5  ;;  %3480 = vmatpush1.msra.mxu0 %v2041_v6  ;;  %v2142_v56 = vld [vmem:[%s5158_s30 + $0x3b88] sm:$0xff]  ;;  %v2141_v58 = vld [vmem:[%s5158_s30 + $0x3b80] sm:$0xff] }
 0x220   : > { %3551 = vmatpush1.msra.mxu1 %v2169_v8  ;;  %3481 = vmatprep.subr.mxu0 %v2038_v13  ;;  %v2270_v57 = vld [vmem:[%s5158_s30 + $0x3f88] sm:$0xff]  ;;  %v2269_v59 = vld [vmem:[%s5158_s30 + $0x3f80] sm:$0xff] }
 0x221   : > { %3552 = vmatprep.subr.mxu1 %v2166_v14  ;;  %3482 = vmatpush1.msra.mxu0 %v2037_v17  ;;  %v2138_v60 = vld [vmem:[%s5158_s30 + $0x3b68] sm:$0xff]  ;;  %v2137_v1 = vld [vmem:[%s5158_s30 + $0x3b60] sm:$0xff] }
 0x222   : > { %3553 = vmatpush1.msra.mxu1 %v2165_v21  ;;  %3483 = vmatprep.subr.mxu0 %v2034_v22  ;;  %v2266_v62 = vld [vmem:[%s5158_s30 + $0x3f68] sm:$0xff]  ;;  %v2265_v3 = vld [vmem:[%s5158_s30 + $0x3f60] sm:$0xff] }
 0x223   : > { %3554 = vmatprep.subr.mxu1 %v2162_v26  ;;  %3484 = vmatpush1.msra.mxu0 %v2033_v27  ;;  %v2134_v5 = vld [vmem:[%s5158_s30 + $0x3b48] sm:$0xff]  ;;  %v2133_v8 = vld [vmem:[%s5158_s30 + $0x3b40] sm:$0xff] }
 0x224   : > { %3555 = vmatpush1.msra.mxu1 %v2161_v30  ;;  %3485 = vmatprep.subr.mxu0 %v2030_v32  ;;  %v2262_v6 = vld [vmem:[%s5158_s30 + $0x3f48] sm:$0xff]  ;;  %v2261_v13 = vld [vmem:[%s5158_s30 + $0x3f40] sm:$0xff] }
 0x225   : > { %3556 = vmatprep.subr.mxu1 %v2158_v33  ;;  %3486 = vmatpush1.msra.mxu0 %v2029_v34  ;;  %v2130_v14 = vld [vmem:[%s5158_s30 + $0x3b28] sm:$0xff]  ;;  %v2129_v21 = vld [vmem:[%s5158_s30 + $0x3b20] sm:$0xff] }
 0x226   : > { %3557 = vmatpush1.msra.mxu1 %v2157_v35  ;;  %3487 = vmatprep.subr.mxu0 %v2154_v37  ;;  %v2258_v17 = vld [vmem:[%s5158_s30 + $0x3f28] sm:$0xff]  ;;  %v2257_v22 = vld [vmem:[%s5158_s30 + $0x3f20] sm:$0xff] }
 0x227   : > { %3558 = vmatprep.subr.mxu1 %v2282_v38  ;;  %3488 = vmatpush2.msra.mxu0 %v2153_v40  ;;  %v2126_v26 = vld [vmem:[%s5158_s30 + $0x3b08] sm:$0xff]  ;;  %v2125_v30 = vld [vmem:[%s5158_s30 + $0x3b00] sm:$0xff] }
 0x228   : > { %3559 = vmatpush2.msra.mxu1 %v2281_v41  ;;  %3489 = vmatprep.subr.mxu0 %v2150_v43  ;;  %v2254_v27 = vld [vmem:[%s5158_s30 + $0x3f08] sm:$0xff]  ;;  %v2253_v32 = vld [vmem:[%s5158_s30 + $0x3f00] sm:$0xff] }
 0x229   : > { %3560 = vmatprep.subr.mxu1 %v2278_v45  ;;  %3490 = vmatpush2.msra.mxu0 %v2149_v47  ;;  %v2122_v33 = vld [vmem:[%s5158_s30 + $0x3ae8] sm:$0xff]  ;;  %v2121_v35 = vld [vmem:[%s5158_s30 + $0x3ae0] sm:$0xff] }
 0x22a   : > { %3561 = vmatpush2.msra.mxu1 %v2277_v48  ;;  %3491 = vmatprep.subr.mxu0 %v2146_v50  ;;  %v2250_v34 = vld [vmem:[%s5158_s30 + $0x3ee8] sm:$0xff]  ;;  %v2249_v37 = vld [vmem:[%s5158_s30 + $0x3ee0] sm:$0xff] }
 0x22b   : > { %3562 = vmatprep.subr.mxu1 %v2274_v51  ;;  %3492 = vmatpush2.msra.mxu0 %v2145_v54  ;;  %v2118_v38 = vld [vmem:[%s5158_s30 + $0x3ac8] sm:$0xff]  ;;  %v2117_v41 = vld [vmem:[%s5158_s30 + $0x3ac0] sm:$0xff]  ;;  %v236_v51 = vld [vmem:[%s5175_s25 + $0x38] sm:$0xff] }
 0x22c   : > { %3563 = vmatpush2.msra.mxu1 %v2273_v55  ;;  %3493 = vmatprep.subr.mxu0 %v2142_v56  ;;  %v2246_v40 = vld [vmem:[%s5158_s30 + $0x3ec8] sm:$0xff]  ;;  %v2245_v43 = vld [vmem:[%s5158_s30 + $0x3ec0] sm:$0xff] }
 0x22d   : > { %3564 = vmatprep.subr.mxu1 %v2270_v57  ;;  %3494 = vmatpush2.msra.mxu0 %v2141_v58  ;;  %v2114_v45 = vld [vmem:[%s5158_s30 + $0x3aa8] sm:$0xff]  ;;  %v2113_v48 = vld [vmem:[%s5158_s30 + $0x3aa0] sm:$0xff] }
 0x22e   : > { %3565 = vmatpush2.msra.mxu1 %v2269_v59  ;;  %3495 = vmatprep.subr.mxu0 %v2138_v60  ;;  %v2242_v47 = vld [vmem:[%s5158_s30 + $0x3ea8] sm:$0xff]  ;;  %v2241_v50 = vld [vmem:[%s5158_s30 + $0x3ea0] sm:$0xff]  ;;  %v2412_v60 = vcombine.high %v236_v51, %v236_v51 }
 0x22f   : > { %3566 = vmatprep.subr.mxu1 %v2266_v62  ;;  %3496 = vmatpush2.msra.mxu0 %v2137_v1  ;;  %v2110_v54 = vld [vmem:[%s5158_s30 + $0x3a88] sm:$0xff]  ;;  %v2109_v56 = vld [vmem:[%s5158_s30 + $0x3a80] sm:$0xff] }
 0x230   : > { %3567 = vmatpush2.msra.mxu1 %v2265_v3  ;;  %3497 = vmatprep.subr.mxu0 %v2134_v5  ;;  %v2238_v55 = vld [vmem:[%s5158_s30 + $0x3e88] sm:$0xff]  ;;  %v2237_v57 = vld [vmem:[%s5158_s30 + $0x3e80] sm:$0xff] }
 0x231   : > { %3568 = vmatprep.subr.mxu1 %v2262_v6  ;;  %3498 = vmatpush2.msra.mxu0 %v2133_v8  ;;  %v2106_v58 = vld [vmem:[%s5158_s30 + $0x3a68] sm:$0xff]  ;;  %v2105_v62 = vld [vmem:[%s5158_s30 + $0x3a60] sm:$0xff]  ;;  %v6330_v6 = vrot.slane %v236_v51, %v5290_v53  ;;  %v420_v51 = vld [vmem:[%s5158_s30 + $0x5b8] sm:$0xff] }
 0x232   : > { %3569 = vmatpush2.msra.mxu1 %v2261_v13  ;;  %3499 = vmatprep.subr.mxu0 %v2130_v14  ;;  %v2234_v59 = vld [vmem:[%s5158_s30 + $0x3e68] sm:$0xff]  ;;  %v2233_v1 = vld [vmem:[%s5158_s30 + $0x3e60] sm:$0xff] }
 0x233   : > { %3570 = vmatprep.subr.mxu1 %v2258_v17  ;;  %3500 = vmatpush2.msra.mxu0 %v2129_v21  ;;  %v2102_v3 = vld [vmem:[%s5158_s30 + $0x3a48] sm:$0xff]  ;;  %v2101_v8 = vld [vmem:[%s5158_s30 + $0x3a40] sm:$0xff]  ;;  %v6337_v21 = vrot.slane %v2412_v60, %v5290_v53  ;;  %v284_v60 = vld [vmem:[%s5158_s30 + $0x178] sm:$0xff] }
 0x234   : > { %3571 = vmatpush2.msra.mxu1 %v2257_v22  ;;  %3501 = vmatprep.subr.mxu0 %v2126_v26  ;;  %v2230_v5 = vld [vmem:[%s5158_s30 + $0x3e48] sm:$0xff]  ;;  %v2229_v13 = vld [vmem:[%s5158_s30 + $0x3e40] sm:$0xff] }
 0x235   : > { %3572 = vmatprep.subr.mxu1 %v2254_v27  ;;  %3502 = vmatpush2.msra.mxu0 %v2125_v30  ;;  %v2098_v14 = vld [vmem:[%s5158_s30 + $0x3a28] sm:$0xff]  ;;  %v2097_v22 = vld [vmem:[%s5158_s30 + $0x3a20] sm:$0xff] }
 0x236   : > { %3573 = vmatpush2.msra.mxu1 %v2253_v32  ;;  %3503 = vmatprep.subr.mxu0 %v2122_v33  ;;  %v2226_v17 = vld [vmem:[%s5158_s30 + $0x3e28] sm:$0xff]  ;;  %v2225_v26 = vld [vmem:[%s5158_s30 + $0x3e20] sm:$0xff]  ;;  %v6345_v32 = vcombine.high %v6330_v6, %v6330_v6 }
 0x237   : > { %3574 = vmatprep.subr.mxu1 %v2250_v34  ;;  %3504 = vmatpush2.msra.mxu0 %v2121_v35  ;;  %v2094_v27 = vld [vmem:[%s5158_s30 + $0x3a08] sm:$0xff]  ;;  %v2093_v33 = vld [vmem:[%s5158_s30 + $0x3a00] sm:$0xff]  ;;  %v6351_v35 = vcombine.high %v6337_v21, %v6337_v21 }
 0x238   : > { %3575 = vmatpush2.msra.mxu1 %v2249_v37  ;;  %3505 = vmatprep.subr.mxu0 %v2118_v38  ;;  %v2222_v30 = vld [vmem:[%s5158_s30 + $0x3e08] sm:$0xff]  ;;  %v2221_v34 = vld [vmem:[%s5158_s30 + $0x3e00] sm:$0xff]  ;;  %v300_v37 = vld [vmem:[%s5158_s30 + $0x1f8] sm:$0xff] }
 0x239   : > { %3576 = vmatprep.subr.mxu1 %v2246_v40  ;;  %3506 = vmatpush2.msra.mxu0 %v2117_v41  ;;  %v428_v38 = vld [vmem:[%s5158_s30 + $0x5f8] sm:$0xff]  ;;  %v299_v40 = vld [vmem:[%s5158_s30 + $0x1f0] sm:$0xff] }
 0x23a   : > { %3577 = vmatpush2.msra.mxu1 %v2245_v43  ;;  %3507 = vmatprep.subr.mxu0 %v2114_v45  ;;  %v427_v41 = vld [vmem:[%s5158_s30 + $0x5f0] sm:$0xff]  ;;  %v296_v43 = vld [vmem:[%s5158_s30 + $0x1d8] sm:$0xff] }
 0x23b   : > { %3578 = vmatprep.subr.mxu1 %v2242_v47  ;;  %3508 = vmatpush2.msra.mxu0 %v2113_v48  ;;  %v424_v45 = vld [vmem:[%s5158_s30 + $0x5d8] sm:$0xff]  ;;  %v295_v47 = vld [vmem:[%s5158_s30 + $0x1d0] sm:$0xff] }
 0x23c   : > { %3579 = vmatpush2.msra.mxu1 %v2241_v50  ;;  %3509 = vmatprep.subr.mxu0 %v2110_v54  ;;  %v423_v48 = vld [vmem:[%s5158_s30 + $0x5d0] sm:$0xff]  ;;  %v292_v50 = vld [vmem:[%s5158_s30 + $0x1b8] sm:$0xff] }
 0x23d   : > { %3580 = vmatprep.subr.mxu1 %v2238_v55  ;;  %3510 = vmatpush2.msra.mxu0 %v2109_v56  ;;  %v291_v54 = vld [vmem:[%s5158_s30 + $0x1b0] sm:$0xff]  ;;  %v288_v56 = vld [vmem:[%s5158_s30 + $0x198] sm:$0xff] }
 0x23e   : > { %3581 = vmatpush2.msra.mxu1 %v2237_v57  ;;  %3511 = vmatprep.subr.mxu0 %v2106_v58  ;;  %v419_v55 = vld [vmem:[%s5158_s30 + $0x5b0] sm:$0xff]  ;;  %v416_v57 = vld [vmem:[%s5158_s30 + $0x598] sm:$0xff] }
 0x23f   : > { %3582 = vmatprep.subr.mxu1 %v2234_v59  ;;  %3512 = vmatpush2.msra.mxu0 %v2105_v62  ;;  %v287_v58 = vld [vmem:[%s5158_s30 + $0x190] sm:$0xff]  ;;  %v412_v62 = vld [vmem:[%s5158_s30 + $0x578] sm:$0xff] }
 0x240   : > { %3583 = vmatpush2.msra.mxu1 %v2233_v1  ;;  %3513 = vmatprep.subr.mxu0 %v2102_v3  ;;  %v415_v59 = vld [vmem:[%s5158_s30 + $0x590] sm:$0xff] }
 0x241   : > { %3584 = vmatprep.subr.mxu1 %v2230_v5  ;;  %3514 = vmatpush2.msra.mxu0 %v2101_v8  ;;  %v283_v1 = vld [vmem:[%s5158_s30 + $0x170] sm:$0xff]  ;;  %v280_v5 = vld [vmem:[%s5158_s30 + $0x158] sm:$0xff] }
 0x242   : > { %3585 = vmatpush2.msra.mxu1 %v2229_v13  ;;  %3515 = vmatprep.subr.mxu0 %v2098_v14  ;;  %v411_v3 = vld [vmem:[%s5158_s30 + $0x570] sm:$0xff]  ;;  %v408_v8 = vld [vmem:[%s5158_s30 + $0x558] sm:$0xff] }
 0x243   : > { %3586 = vmatprep.subr.mxu1 %v2226_v17  ;;  %3516 = vmatpush2.msra.mxu0 %v2097_v22  ;;  %v279_v13 = vld [vmem:[%s5158_s30 + $0x150] sm:$0xff]  ;;  %v276_v17 = vld [vmem:[%s5158_s30 + $0x138] sm:$0xff] }
 0x244   : > { %3587 = vmatpush2.msra.mxu1 %v2225_v26  ;;  %3517 = vmatprep.subr.mxu0 %v2094_v27  ;;  %v407_v14 = vld [vmem:[%s5158_s30 + $0x550] sm:$0xff]  ;;  %v404_v22 = vld [vmem:[%s5158_s30 + $0x538] sm:$0xff] }
 0x245   : > { %3588 = vmatprep.subr.mxu1 %v2222_v30  ;;  %3518 = vmatpush2.msra.mxu0 %v2093_v33  ;;  %v275_v26 = vld [vmem:[%s5158_s30 + $0x130] sm:$0xff]  ;;  %v272_v30 = vld [vmem:[%s5158_s30 + $0x118] sm:$0xff] }
 0x246   : > { %3519 = vmatprep.mubr.f32.mxu0 %v6345_v32  ;;  %3589 = vmatpush2.msra.mxu1 %v2221_v34  ;;  %v403_v27 = vld [vmem:[%s5158_s30 + $0x530] sm:$0xff]  ;;  %v400_v33 = vld [vmem:[%s5158_s30 + $0x518] sm:$0xff] }
 0x247   : > { %3520 = vmatmul.mubr.f32.vlgmr.msra.gmra.mxu0 %v6330_v6  ;;  %3590 = vmatprep.mubr.f32.mxu1 %v6351_v35  ;;  %v271_v34 = vld [vmem:[%s5158_s30 + $0x110] sm:$0xff] }
 0x248   : > { %3597 = vmatprep.subr.mxu0 %v300_v37  ;;  %3668 = vmatprep.subr.mxu1 %v428_v38  ;;  %v399_v37 = vld [vmem:[%s5158_s30 + $0x510] sm:$0xff]  ;;  %v268_v38 = vld [vmem:[%s5158_s30 + $0xf8] sm:$0xff] }
 0x249   : > { %3591 = vmatmul.mubr.f32.vlgmr.msra.gmra.mxu1 %v6337_v21  ;;  %3598 = vmatpush1.msra.mxu0 %v299_v40  ;;  %v396_v40 = vld [vmem:[%s5158_s30 + $0x4f8] sm:$0xff] }
 0x24a   : > { %3669 = vmatpush1.msra.mxu1 %v427_v41  ;;  %3599 = vmatprep.subr.mxu0 %v296_v43  ;;  %v267_v41 = vld [vmem:[%s5158_s30 + $0xf0] sm:$0xff] }
 0x24b   : > { %3670 = vmatprep.subr.mxu1 %v424_v45  ;;  %3600 = vmatpush1.msra.mxu0 %v295_v47  ;;  %v395_v43 = vld [vmem:[%s5158_s30 + $0x4f0] sm:$0xff]  ;;  %v264_v45 = vld [vmem:[%s5158_s30 + $0xd8] sm:$0xff] }
 0x24c   : > { %3671 = vmatpush1.msra.mxu1 %v423_v48  ;;  %3601 = vmatprep.subr.mxu0 %v292_v50  ;;  %v392_v47 = vld [vmem:[%s5158_s30 + $0x4d8] sm:$0xff]  ;;  %v263_v48 = vld [vmem:[%s5158_s30 + $0xd0] sm:$0xff] }
 0x24d   : > { %3672 = vmatprep.subr.mxu1 %v420_v51  ;;  %3602 = vmatpush1.msra.mxu0 %v291_v54  ;;  %v391_v50 = vld [vmem:[%s5158_s30 + $0x4d0] sm:$0xff]  ;;  %v260_v51 = vld [vmem:[%s5158_s30 + $0xb8] sm:$0xff] }
 0x24e   : > { %3673 = vmatpush1.msra.mxu1 %v419_v55  ;;  %3603 = vmatprep.subr.mxu0 %v288_v56  ;;  %v388_v54 = vld [vmem:[%s5158_s30 + $0x4b8] sm:$0xff]  ;;  %v259_v55 = vld [vmem:[%s5158_s30 + $0xb0] sm:$0xff] }
 0x24f   : > { %3674 = vmatprep.subr.mxu1 %v416_v57  ;;  %3604 = vmatpush1.msra.mxu0 %v287_v58  ;;  %v387_v56 = vld [vmem:[%s5158_s30 + $0x4b0] sm:$0xff]  ;;  %v256_v57 = vld [vmem:[%s5158_s30 + $0x98] sm:$0xff] }
 0x250   : > { %3675 = vmatpush1.msra.mxu1 %v415_v59  ;;  %3605 = vmatprep.subr.mxu0 %v284_v60  ;;  %v384_v58 = vld [vmem:[%s5158_s30 + $0x498] sm:$0xff]  ;;  %v255_v59 = vld [vmem:[%s5158_s30 + $0x90] sm:$0xff] }
 0x251   : > { %3676 = vmatprep.subr.mxu1 %v412_v62  ;;  %3606 = vmatpush1.msra.mxu0 %v283_v1  ;;  %v383_v60 = vld [vmem:[%s5158_s30 + $0x490] sm:$0xff]  ;;  %v252_v62 = vld [vmem:[%s5158_s30 + $0x78] sm:$0xff] }
 0x252   : > { %3677 = vmatpush1.msra.mxu1 %v411_v3  ;;  %3607 = vmatprep.subr.mxu0 %v280_v5  ;;  %v380_v1 = vld [vmem:[%s5158_s30 + $0x478] sm:$0xff]  ;;  %v251_v3 = vld [vmem:[%s5158_s30 + $0x70] sm:$0xff] }
 0x253   : > { %3678 = vmatprep.subr.mxu1 %v408_v8  ;;  %3608 = vmatpush1.msra.mxu0 %v279_v13  ;;  %v379_v5 = vld [vmem:[%s5158_s30 + $0x470] sm:$0xff]  ;;  %v248_v8 = vld [vmem:[%s5158_s30 + $0x58] sm:$0xff] }
 0x254   : > { %3679 = vmatpush1.msra.mxu1 %v407_v14  ;;  %3609 = vmatprep.subr.mxu0 %v276_v17  ;;  %v376_v13 = vld [vmem:[%s5158_s30 + $0x458] sm:$0xff]  ;;  %v247_v14 = vld [vmem:[%s5158_s30 + $0x50] sm:$0xff] }
 0x255   : > { %3680 = vmatprep.subr.mxu1 %v404_v22  ;;  %3610 = vmatpush1.msra.mxu0 %v275_v26  ;;  %v375_v17 = vld [vmem:[%s5158_s30 + $0x450] sm:$0xff]  ;;  %v244_v22 = vld [vmem:[%s5158_s30 + $0x38] sm:$0xff] }
 0x256   : > { %3681 = vmatpush1.msra.mxu1 %v403_v27  ;;  %3611 = vmatprep.subr.mxu0 %v272_v30  ;;  %v372_v26 = vld [vmem:[%s5158_s30 + $0x438] sm:$0xff]  ;;  %v243_v27 = vld [vmem:[%s5158_s30 + $0x30] sm:$0xff] }
 0x257   : > { %3682 = vmatprep.subr.mxu1 %v400_v33  ;;  %3612 = vmatpush1.msra.mxu0 %v271_v34  ;;  %v371_v30 = vld [vmem:[%s5158_s30 + $0x430] sm:$0xff]  ;;  %v240_v33 = vld [vmem:[%s5158_s30 + $0x18] sm:$0xff] }
 0x258   : > { %3683 = vmatpush1.msra.mxu1 %v399_v37  ;;  %3613 = vmatprep.subr.mxu0 %v268_v38  ;;  %v368_v34 = vld [vmem:[%s5158_s30 + $0x418] sm:$0xff]  ;;  %v239_v37 = vld [vmem:[%s5158_s30 + $0x10] sm:$0xff] }
 0x259   : > { %3684 = vmatprep.subr.mxu1 %v396_v40  ;;  %3614 = vmatpush1.msra.mxu0 %v267_v41  ;;  %v367_v38 = vld [vmem:[%s5158_s30 + $0x410] sm:$0xff]  ;;  %v364_v40 = vld [vmem:[%s5158_s30 + $0x3f8] sm:$0xff] }
 0x25a   : > { %3685 = vmatpush1.msra.mxu1 %v395_v43  ;;  %3615 = vmatprep.subr.mxu0 %v264_v45  ;;  %v492_v41 = vld [vmem:[%s5158_s30 + $0x7f8] sm:$0xff]  ;;  %v363_v43 = vld [vmem:[%s5158_s30 + $0x3f0] sm:$0xff] }
 0x25b   : > { %3686 = vmatprep.subr.mxu1 %v392_v47  ;;  %3616 = vmatpush1.msra.mxu0 %v263_v48  ;;  %v491_v45 = vld [vmem:[%s5158_s30 + $0x7f0] sm:$0xff]  ;;  %v360_v47 = vld [vmem:[%s5158_s30 + $0x3d8] sm:$0xff] }
 0x25c   : > { %3687 = vmatpush1.msra.mxu1 %v391_v50  ;;  %3617 = vmatprep.subr.mxu0 %v260_v51  ;;  %v488_v48 = vld [vmem:[%s5158_s30 + $0x7d8] sm:$0xff]  ;;  %v359_v50 = vld [vmem:[%s5158_s30 + $0x3d0] sm:$0xff] }
 0x25d   : > { %3688 = vmatprep.subr.mxu1 %v388_v54  ;;  %3618 = vmatpush1.msra.mxu0 %v259_v55  ;;  %v487_v51 = vld [vmem:[%s5158_s30 + $0x7d0] sm:$0xff]  ;;  %v356_v54 = vld [vmem:[%s5158_s30 + $0x3b8] sm:$0xff] }
 0x25e   : > { %3689 = vmatpush1.msra.mxu1 %v387_v56  ;;  %3619 = vmatprep.subr.mxu0 %v256_v57  ;;  %v484_v55 = vld [vmem:[%s5158_s30 + $0x7b8] sm:$0xff]  ;;  %v355_v56 = vld [vmem:[%s5158_s30 + $0x3b0] sm:$0xff] }
 0x25f   : > { %3690 = vmatprep.subr.mxu1 %v384_v58  ;;  %3620 = vmatpush1.msra.mxu0 %v255_v59  ;;  %v483_v57 = vld [vmem:[%s5158_s30 + $0x7b0] sm:$0xff]  ;;  %v352_v58 = vld [vmem:[%s5158_s30 + $0x398] sm:$0xff] }
 0x260   : > { %3691 = vmatpush1.msra.mxu1 %v383_v60  ;;  %3621 = vmatprep.subr.mxu0 %v252_v62  ;;  %v480_v59 = vld [vmem:[%s5158_s30 + $0x798] sm:$0xff]  ;;  %v351_v60 = vld [vmem:[%s5158_s30 + $0x390] sm:$0xff] }
 0x261   : > { %3692 = vmatprep.subr.mxu1 %v380_v1  ;;  %3622 = vmatpush1.msra.mxu0 %v251_v3  ;;  %v479_v62 = vld [vmem:[%s5158_s30 + $0x790] sm:$0xff]  ;;  %v348_v1 = vld [vmem:[%s5158_s30 + $0x378] sm:$0xff] }
 0x262   : > { %3693 = vmatpush1.msra.mxu1 %v379_v5  ;;  %3623 = vmatprep.subr.mxu0 %v248_v8  ;;  %v476_v3 = vld [vmem:[%s5158_s30 + $0x778] sm:$0xff]  ;;  %v347_v5 = vld [vmem:[%s5158_s30 + $0x370] sm:$0xff] }
 0x263   : > { %3694 = vmatprep.subr.mxu1 %v376_v13  ;;  %3624 = vmatpush1.msra.mxu0 %v247_v14  ;;  %v475_v8 = vld [vmem:[%s5158_s30 + $0x770] sm:$0xff]  ;;  %v344_v13 = vld [vmem:[%s5158_s30 + $0x358] sm:$0xff] }
 0x264   : > { %3695 = vmatpush1.msra.mxu1 %v375_v17  ;;  %3625 = vmatprep.subr.mxu0 %v244_v22  ;;  %v472_v14 = vld [vmem:[%s5158_s30 + $0x758] sm:$0xff]  ;;  %v343_v17 = vld [vmem:[%s5158_s30 + $0x350] sm:$0xff] }
 0x265   : > { %3696 = vmatprep.subr.mxu1 %v372_v26  ;;  %3626 = vmatpush1.msra.mxu0 %v243_v27  ;;  %v471_v22 = vld [vmem:[%s5158_s30 + $0x750] sm:$0xff]  ;;  %v340_v26 = vld [vmem:[%s5158_s30 + $0x338] sm:$0xff] }
 0x266   : > { %3697 = vmatpush1.msra.mxu1 %v371_v30  ;;  %3627 = vmatprep.subr.mxu0 %v240_v33  ;;  %v468_v27 = vld [vmem:[%s5158_s30 + $0x738] sm:$0xff]  ;;  %v339_v30 = vld [vmem:[%s5158_s30 + $0x330] sm:$0xff] }
 0x267   : > { %3698 = vmatprep.subr.mxu1 %v368_v34  ;;  %3628 = vmatpush1.msra.mxu0 %v239_v37  ;;  %v467_v33 = vld [vmem:[%s5158_s30 + $0x730] sm:$0xff]  ;;  %v336_v34 = vld [vmem:[%s5158_s30 + $0x318] sm:$0xff] }
 0x268   : > { %3699 = vmatpush1.msra.mxu1 %v367_v38  ;;  %3629 = vmatprep.subr.mxu0 %v364_v40  ;;  %v464_v37 = vld [vmem:[%s5158_s30 + $0x718] sm:$0xff]  ;;  %v335_v38 = vld [vmem:[%s5158_s30 + $0x310] sm:$0xff] }
 0x269   : > { %3700 = vmatprep.subr.mxu1 %v492_v41  ;;  %3630 = vmatpush2.msra.mxu0 %v363_v43  ;;  %v463_v40 = vld [vmem:[%s5158_s30 + $0x710] sm:$0xff]  ;;  %v332_v41 = vld [vmem:[%s5158_s30 + $0x2f8] sm:$0xff] }
 0x26a   : > { %3701 = vmatpush2.msra.mxu1 %v491_v45  ;;  %3631 = vmatprep.subr.mxu0 %v360_v47  ;;  %v460_v43 = vld [vmem:[%s5158_s30 + $0x6f8] sm:$0xff]  ;;  %v331_v45 = vld [vmem:[%s5158_s30 + $0x2f0] sm:$0xff] }
 0x26b   : > { %3702 = vmatprep.subr.mxu1 %v488_v48  ;;  %3632 = vmatpush2.msra.mxu0 %v359_v50  ;;  %v459_v47 = vld [vmem:[%s5158_s30 + $0x6f0] sm:$0xff]  ;;  %v328_v48 = vld [vmem:[%s5158_s30 + $0x2d8] sm:$0xff] }
 0x26c   : > { %3703 = vmatpush2.msra.mxu1 %v487_v51  ;;  %3633 = vmatprep.subr.mxu0 %v356_v54  ;;  %v456_v50 = vld [vmem:[%s5158_s30 + $0x6d8] sm:$0xff]  ;;  %v327_v51 = vld [vmem:[%s5158_s30 + $0x2d0] sm:$0xff] }
 0x26d   : > { %3704 = vmatprep.subr.mxu1 %v484_v55  ;;  %3634 = vmatpush2.msra.mxu0 %v355_v56  ;;  %v455_v54 = vld [vmem:[%s5158_s30 + $0x6d0] sm:$0xff]  ;;  %v324_v55 = vld [vmem:[%s5158_s30 + $0x2b8] sm:$0xff] }
 0x26e   : > { %3705 = vmatpush2.msra.mxu1 %v483_v57  ;;  %3635 = vmatprep.subr.mxu0 %v352_v58  ;;  %v452_v56 = vld [vmem:[%s5158_s30 + $0x6b8] sm:$0xff]  ;;  %v323_v57 = vld [vmem:[%s5158_s30 + $0x2b0] sm:$0xff] }
 0x26f   : > { %3706 = vmatprep.subr.mxu1 %v480_v59  ;;  %3636 = vmatpush2.msra.mxu0 %v351_v60  ;;  %v451_v58 = vld [vmem:[%s5158_s30 + $0x6b0] sm:$0xff]  ;;  %v320_v59 = vld [vmem:[%s5158_s30 + $0x298] sm:$0xff] }
 0x270   : > { %3707 = vmatpush2.msra.mxu1 %v479_v62  ;;  %3637 = vmatprep.subr.mxu0 %v348_v1  ;;  %v448_v60 = vld [vmem:[%s5158_s30 + $0x698] sm:$0xff]  ;;  %v319_v62 = vld [vmem:[%s5158_s30 + $0x290] sm:$0xff] }
 0x271   : > { %3708 = vmatprep.subr.mxu1 %v476_v3  ;;  %3638 = vmatpush2.msra.mxu0 %v347_v5  ;;  %v447_v1 = vld [vmem:[%s5158_s30 + $0x690] sm:$0xff]  ;;  %v316_v3 = vld [vmem:[%s5158_s30 + $0x278] sm:$0xff] }
 0x272   : > { %3709 = vmatpush2.msra.mxu1 %v475_v8  ;;  %3639 = vmatprep.subr.mxu0 %v344_v13  ;;  %v444_v5 = vld [vmem:[%s5158_s30 + $0x678] sm:$0xff]  ;;  %v315_v8 = vld [vmem:[%s5158_s30 + $0x270] sm:$0xff] }
 0x273   : > { %3710 = vmatprep.subr.mxu1 %v472_v14  ;;  %3640 = vmatpush2.msra.mxu0 %v343_v17  ;;  %v443_v13 = vld [vmem:[%s5158_s30 + $0x670] sm:$0xff]  ;;  %v312_v14 = vld [vmem:[%s5158_s30 + $0x258] sm:$0xff] }
 0x274   : > { %3711 = vmatpush2.msra.mxu1 %v471_v22  ;;  %3641 = vmatprep.subr.mxu0 %v340_v26  ;;  %v440_v17 = vld [vmem:[%s5158_s30 + $0x658] sm:$0xff]  ;;  %v311_v22 = vld [vmem:[%s5158_s30 + $0x250] sm:$0xff] }
 0x275   : > { %3712 = vmatprep.subr.mxu1 %v468_v27  ;;  %3642 = vmatpush2.msra.mxu0 %v339_v30  ;;  %v439_v26 = vld [vmem:[%s5158_s30 + $0x650] sm:$0xff]  ;;  %v308_v27 = vld [vmem:[%s5158_s30 + $0x238] sm:$0xff] }
 0x276   : > { %3713 = vmatpush2.msra.mxu1 %v467_v33  ;;  %3643 = vmatprep.subr.mxu0 %v336_v34  ;;  %v436_v30 = vld [vmem:[%s5158_s30 + $0x638] sm:$0xff]  ;;  %v307_v33 = vld [vmem:[%s5158_s30 + $0x230] sm:$0xff] }
 0x277   : > { %3714 = vmatprep.subr.mxu1 %v464_v37  ;;  %3644 = vmatpush2.msra.mxu0 %v335_v38  ;;  %v435_v34 = vld [vmem:[%s5158_s30 + $0x630] sm:$0xff]  ;;  %v304_v37 = vld [vmem:[%s5158_s30 + $0x218] sm:$0xff] }
 0x278   : > { %3715 = vmatpush2.msra.mxu1 %v463_v40  ;;  %3645 = vmatprep.subr.mxu0 %v332_v41  ;;  %v432_v38 = vld [vmem:[%s5158_s30 + $0x618] sm:$0xff]  ;;  %v303_v40 = vld [vmem:[%s5158_s30 + $0x210] sm:$0xff] }
 0x279   : > { %3716 = vmatprep.subr.mxu1 %v460_v43  ;;  %3646 = vmatpush2.msra.mxu0 %v331_v45  ;;  %v431_v41 = vld [vmem:[%s5158_s30 + $0x610] sm:$0xff]  ;;  %v556_v43 = vld [vmem:[%s5158_s30 + $0x9f8] sm:$0xff] }
 0x27a   : > { %3717 = vmatpush2.msra.mxu1 %v459_v47  ;;  %3647 = vmatprep.subr.mxu0 %v328_v48  ;;  %v684_v45 = vld [vmem:[%s5158_s30 + $0xdf8] sm:$0xff]  ;;  %v555_v47 = vld [vmem:[%s5158_s30 + $0x9f0] sm:$0xff] }
 0x27b   : > { %3718 = vmatprep.subr.mxu1 %v456_v50  ;;  %3648 = vmatpush2.msra.mxu0 %v327_v51  ;;  %v683_v48 = vld [vmem:[%s5158_s30 + $0xdf0] sm:$0xff]  ;;  %v552_v50 = vld [vmem:[%s5158_s30 + $0x9d8] sm:$0xff] }
 0x27c   : > { %3719 = vmatpush2.msra.mxu1 %v455_v54  ;;  %3649 = vmatprep.subr.mxu0 %v324_v55  ;;  %v680_v51 = vld [vmem:[%s5158_s30 + $0xdd8] sm:$0xff]  ;;  %v679_v54 = vld [vmem:[%s5158_s30 + $0xdd0] sm:$0xff] }
 0x27d   : > { %3720 = vmatprep.subr.mxu1 %v452_v56  ;;  %3650 = vmatpush2.msra.mxu0 %v323_v57  ;;  %v676_v55 = vld [vmem:[%s5158_s30 + $0xdb8] sm:$0xff] }
 0x27e   : > { %3721 = vmatpush2.msra.mxu1 %v451_v58  ;;  %3651 = vmatprep.subr.mxu0 %v320_v59  ;;  %v544_v56 = vld [vmem:[%s5158_s30 + $0x998] sm:$0xff]  ;;  %v543_v58 = vld [vmem:[%s5158_s30 + $0x990] sm:$0xff] }
 0x27f   : > { %3722 = vmatprep.subr.mxu1 %v448_v60  ;;  %3652 = vmatpush2.msra.mxu0 %v319_v62  ;;  %v672_v57 = vld [vmem:[%s5158_s30 + $0xd98] sm:$0xff]  ;;  %v671_v59 = vld [vmem:[%s5158_s30 + $0xd90] sm:$0xff] }
 0x280   : > { %3723 = vmatpush2.msra.mxu1 %v447_v1  ;;  %3653 = vmatprep.subr.mxu0 %v316_v3  ;;  %v540_v60 = vld [vmem:[%s5158_s30 + $0x978] sm:$0xff]  ;;  %v539_v1 = vld [vmem:[%s5158_s30 + $0x970] sm:$0xff] }
 0x281   : > { %3724 = vmatprep.subr.mxu1 %v444_v5  ;;  %3654 = vmatpush2.msra.mxu0 %v315_v8  ;;  %v668_v62 = vld [vmem:[%s5158_s30 + $0xd78] sm:$0xff]  ;;  %v667_v3 = vld [vmem:[%s5158_s30 + $0xd70] sm:$0xff] }
 0x282   : > { %3725 = vmatpush2.msra.mxu1 %v443_v13  ;;  %3655 = vmatprep.subr.mxu0 %v312_v14  ;;  %v536_v5 = vld [vmem:[%s5158_s30 + $0x958] sm:$0xff]  ;;  %v535_v13 = vld [vmem:[%s5158_s30 + $0x950] sm:$0xff] }
 0x283   : > { %3726 = vmatprep.subr.mxu1 %v440_v17  ;;  %3656 = vmatpush2.msra.mxu0 %v311_v22  ;;  %v664_v8 = vld [vmem:[%s5158_s30 + $0xd58] sm:$0xff]  ;;  %v663_v14 = vld [vmem:[%s5158_s30 + $0xd50] sm:$0xff] }
 0x284   : > { %3727 = vmatpush2.msra.mxu1 %v439_v26  ;;  %3657 = vmatprep.subr.mxu0 %v308_v27  ;;  %v532_v17 = vld [vmem:[%s5158_s30 + $0x938] sm:$0xff]  ;;  %v531_v26 = vld [vmem:[%s5158_s30 + $0x930] sm:$0xff] }
 0x285   : > { %3728 = vmatprep.subr.mxu1 %v436_v30  ;;  %3658 = vmatpush2.msra.mxu0 %v307_v33  ;;  %v660_v22 = vld [vmem:[%s5158_s30 + $0xd38] sm:$0xff]  ;;  %v659_v27 = vld [vmem:[%s5158_s30 + $0xd30] sm:$0xff] }
 0x286   : > { %3729 = vmatpush2.msra.mxu1 %v435_v34  ;;  %3659 = vmatprep.subr.mxu0 %v304_v37  ;;  %v528_v30 = vld [vmem:[%s5158_s30 + $0x918] sm:$0xff]  ;;  %v527_v34 = vld [vmem:[%s5158_s30 + $0x910] sm:$0xff] }
 0x287   : > { %3730 = vmatprep.subr.mxu1 %v432_v38  ;;  %3660 = vmatpush2.msra.mxu0 %v303_v40  ;;  %v656_v33 = vld [vmem:[%s5158_s30 + $0xd18] sm:$0xff]  ;;  %v655_v37 = vld [vmem:[%s5158_s30 + $0xd10] sm:$0xff] }
 0x288   : > { %3661 = vmatprep.mubr.f32.mxu0 %v5316_v9  ;;  %3731 = vmatpush2.msra.mxu1 %v431_v41  ;;  %v551_v9 = vld [vmem:[%s5158_s30 + $0x9d0] sm:$0xff]  ;;  %v524_v38 = vld [vmem:[%s5158_s30 + $0x8f8] sm:$0xff] }
 0x289   : > { %3732 = vmatprep.mubr.f32.mxu1 %v5321_v11  ;;  %3662 = vmatmul.mubr.f32.vlgmr.msra.gmra.mxu0 %v5301_v63  ;;  %v548_v11 = vld [vmem:[%s5158_s30 + $0x9b8] sm:$0xff]  ;;  %v547_v63 = vld [vmem:[%s5158_s30 + $0x9b0] sm:$0xff] }
 0x28a   : > { %3733 = vmatmul.mubr.f32.vlgmr.msra.gmra.mxu1 %v5306_v2  ;;  %3739 = vmatprep.subr.mxu0 %v556_v43  ;;  %v675_v2 = vld [vmem:[%s5158_s30 + $0xdb0] sm:$0xff]  ;;  %v652_v40 = vld [vmem:[%s5158_s30 + $0xcf8] sm:$0xff] }
 0x28b   : > { %3810 = vmatprep.subr.mxu1 %v684_v45  ;;  %3740 = vmatpush1.msra.mxu0 %v555_v47  ;;  %v523_v41 = vld [vmem:[%s5158_s30 + $0x8f0] sm:$0xff]  ;;  %v520_v45 = vld [vmem:[%s5158_s30 + $0x8d8] sm:$0xff] }
 0x28c   : > { %3811 = vmatpush1.msra.mxu1 %v683_v48  ;;  %3741 = vmatprep.subr.mxu0 %v552_v50  ;;  %v651_v43 = vld [vmem:[%s5158_s30 + $0xcf0] sm:$0xff]  ;;  %v648_v47 = vld [vmem:[%s5158_s30 + $0xcd8] sm:$0xff] }
 0x28d   : > { %3812 = vmatprep.subr.mxu1 %v680_v51  ;;  %3742 = vmatpush1.msra.mxu0 %v551_v9  ;;  %v519_v48 = vld [vmem:[%s5158_s30 + $0x8d0] sm:$0xff]  ;;  %v516_v51 = vld [vmem:[%s5158_s30 + $0x8b8] sm:$0xff] }
 0x28e   : > { %3813 = vmatpush1.msra.mxu1 %v679_v54  ;;  %3743 = vmatprep.subr.mxu0 %v548_v11  ;;  %v647_v50 = vld [vmem:[%s5158_s30 + $0xcd0] sm:$0xff]  ;;  %v644_v9 = vld [vmem:[%s5158_s30 + $0xcb8] sm:$0xff] }
 0x28f   : > { %3814 = vmatprep.subr.mxu1 %v676_v55  ;;  %3744 = vmatpush1.msra.mxu0 %v547_v63  ;;  %v515_v54 = vld [vmem:[%s5158_s30 + $0x8b0] sm:$0xff]  ;;  %v512_v55 = vld [vmem:[%s5158_s30 + $0x898] sm:$0xff] }
 0x290   : > { %3815 = vmatpush1.msra.mxu1 %v675_v2  ;;  %3745 = vmatprep.subr.mxu0 %v544_v56  ;;  %v643_v11 = vld [vmem:[%s5158_s30 + $0xcb0] sm:$0xff]  ;;  %v640_v63 = vld [vmem:[%s5158_s30 + $0xc98] sm:$0xff] }
 0x291   : > { %3816 = vmatprep.subr.mxu1 %v672_v57  ;;  %3746 = vmatpush1.msra.mxu0 %v543_v58  ;;  %v511_v2 = vld [vmem:[%s5158_s30 + $0x890] sm:$0xff]  ;;  %v508_v57 = vld [vmem:[%s5158_s30 + $0x878] sm:$0xff] }
 0x292   : > { %3817 = vmatpush1.msra.mxu1 %v671_v59  ;;  %3747 = vmatprep.subr.mxu0 %v540_v60  ;;  %v639_v56 = vld [vmem:[%s5158_s30 + $0xc90] sm:$0xff]  ;;  %v636_v58 = vld [vmem:[%s5158_s30 + $0xc78] sm:$0xff] }
 0x293   : > { %3818 = vmatprep.subr.mxu1 %v668_v62  ;;  %3748 = vmatpush1.msra.mxu0 %v539_v1  ;;  %v507_v59 = vld [vmem:[%s5158_s30 + $0x870] sm:$0xff]  ;;  %v504_v62 = vld [vmem:[%s5158_s30 + $0x858] sm:$0xff] }
 0x294   : > { %3819 = vmatpush1.msra.mxu1 %v667_v3  ;;  %3749 = vmatprep.subr.mxu0 %v536_v5  ;;  %v635_v60 = vld [vmem:[%s5158_s30 + $0xc70] sm:$0xff]  ;;  %v632_v1 = vld [vmem:[%s5158_s30 + $0xc58] sm:$0xff] }
 0x295   : > { %3820 = vmatprep.subr.mxu1 %v664_v8  ;;  %3750 = vmatpush1.msra.mxu0 %v535_v13  ;;  %v503_v3 = vld [vmem:[%s5158_s30 + $0x850] sm:$0xff]  ;;  %v500_v8 = vld [vmem:[%s5158_s30 + $0x838] sm:$0xff] }
 0x296   : > { %3821 = vmatpush1.msra.mxu1 %v663_v14  ;;  %3751 = vmatprep.subr.mxu0 %v532_v17  ;;  %v631_v5 = vld [vmem:[%s5158_s30 + $0xc50] sm:$0xff]  ;;  %v628_v13 = vld [vmem:[%s5158_s30 + $0xc38] sm:$0xff] }
 0x297   : > { %3822 = vmatprep.subr.mxu1 %v660_v22  ;;  %3752 = vmatpush1.msra.mxu0 %v531_v26  ;;  %v499_v14 = vld [vmem:[%s5158_s30 + $0x830] sm:$0xff]  ;;  %v496_v22 = vld [vmem:[%s5158_s30 + $0x818] sm:$0xff] }
 0x298   : > { %3823 = vmatpush1.msra.mxu1 %v659_v27  ;;  %3753 = vmatprep.subr.mxu0 %v528_v30  ;;  %v627_v17 = vld [vmem:[%s5158_s30 + $0xc30] sm:$0xff]  ;;  %v624_v26 = vld [vmem:[%s5158_s30 + $0xc18] sm:$0xff] }
 0x299   : > { %3824 = vmatprep.subr.mxu1 %v656_v33  ;;  %3754 = vmatpush1.msra.mxu0 %v527_v34  ;;  %v495_v27 = vld [vmem:[%s5158_s30 + $0x810] sm:$0xff]  ;;  %v620_v33 = vld [vmem:[%s5158_s30 + $0xbf8] sm:$0xff] }
 0x29a   : > { %3825 = vmatpush1.msra.mxu1 %v655_v37  ;;  %3755 = vmatprep.subr.mxu0 %v524_v38  ;;  %v623_v30 = vld [vmem:[%s5158_s30 + $0xc10] sm:$0xff]  ;;  %v748_v34 = vld [vmem:[%s5158_s30 + $0xff8] sm:$0xff] }
 0x29b   : > { %3826 = vmatprep.subr.mxu1 %v652_v40  ;;  %3756 = vmatpush1.msra.mxu0 %v523_v41  ;;  %v619_v37 = vld [vmem:[%s5158_s30 + $0xbf0] sm:$0xff]  ;;  %v616_v40 = vld [vmem:[%s5158_s30 + $0xbd8] sm:$0xff] }
 0x29c   : > { %3827 = vmatpush1.msra.mxu1 %v651_v43  ;;  %3757 = vmatprep.subr.mxu0 %v520_v45  ;;  %v747_v38 = vld [vmem:[%s5158_s30 + $0xff0] sm:$0xff]  ;;  %v744_v41 = vld [vmem:[%s5158_s30 + $0xfd8] sm:$0xff] }
 0x29d   : > { %3828 = vmatprep.subr.mxu1 %v648_v47  ;;  %3758 = vmatpush1.msra.mxu0 %v519_v48  ;;  %v615_v43 = vld [vmem:[%s5158_s30 + $0xbd0] sm:$0xff]  ;;  %v612_v47 = vld [vmem:[%s5158_s30 + $0xbb8] sm:$0xff] }
 0x29e   : > { %3829 = vmatpush1.msra.mxu1 %v647_v50  ;;  %3759 = vmatprep.subr.mxu0 %v516_v51  ;;  %v743_v45 = vld [vmem:[%s5158_s30 + $0xfd0] sm:$0xff]  ;;  %v740_v48 = vld [vmem:[%s5158_s30 + $0xfb8] sm:$0xff] }
 0x29f   : > { %3830 = vmatprep.subr.mxu1 %v644_v9  ;;  %3760 = vmatpush1.msra.mxu0 %v515_v54  ;;  %v611_v50 = vld [vmem:[%s5158_s30 + $0xbb0] sm:$0xff]  ;;  %v608_v9 = vld [vmem:[%s5158_s30 + $0xb98] sm:$0xff] }
 0x2a0   : > { %3831 = vmatpush1.msra.mxu1 %v643_v11  ;;  %3761 = vmatprep.subr.mxu0 %v512_v55  ;;  %v739_v51 = vld [vmem:[%s5158_s30 + $0xfb0] sm:$0xff]  ;;  %v736_v54 = vld [vmem:[%s5158_s30 + $0xf98] sm:$0xff] }
 0x2a1   : > { %3832 = vmatprep.subr.mxu1 %v640_v63  ;;  %3762 = vmatpush1.msra.mxu0 %v511_v2  ;;  %v607_v11 = vld [vmem:[%s5158_s30 + $0xb90] sm:$0xff]  ;;  %v604_v63 = vld [vmem:[%s5158_s30 + $0xb78] sm:$0xff] }
 0x2a2   : > { %3833 = vmatpush1.msra.mxu1 %v639_v56  ;;  %3763 = vmatprep.subr.mxu0 %v508_v57  ;;  %v735_v55 = vld [vmem:[%s5158_s30 + $0xf90] sm:$0xff]  ;;  %v732_v2 = vld [vmem:[%s5158_s30 + $0xf78] sm:$0xff] }
 0x2a3   : > { %3834 = vmatprep.subr.mxu1 %v636_v58  ;;  %3764 = vmatpush1.msra.mxu0 %v507_v59  ;;  %v603_v56 = vld [vmem:[%s5158_s30 + $0xb70] sm:$0xff]  ;;  %v600_v58 = vld [vmem:[%s5158_s30 + $0xb58] sm:$0xff] }
 0x2a4   : > { %3835 = vmatpush1.msra.mxu1 %v635_v60  ;;  %3765 = vmatprep.subr.mxu0 %v504_v62  ;;  %v731_v57 = vld [vmem:[%s5158_s30 + $0xf70] sm:$0xff]  ;;  %v728_v59 = vld [vmem:[%s5158_s30 + $0xf58] sm:$0xff] }
 0x2a5   : > { %3836 = vmatprep.subr.mxu1 %v632_v1  ;;  %3766 = vmatpush1.msra.mxu0 %v503_v3  ;;  %v599_v60 = vld [vmem:[%s5158_s30 + $0xb50] sm:$0xff]  ;;  %v596_v1 = vld [vmem:[%s5158_s30 + $0xb38] sm:$0xff] }
 0x2a6   : > { %3837 = vmatpush1.msra.mxu1 %v631_v5  ;;  %3767 = vmatprep.subr.mxu0 %v500_v8  ;;  %v727_v62 = vld [vmem:[%s5158_s30 + $0xf50] sm:$0xff]  ;;  %v724_v3 = vld [vmem:[%s5158_s30 + $0xf38] sm:$0xff] }
 0x2a7   : > { %3838 = vmatprep.subr.mxu1 %v628_v13  ;;  %3768 = vmatpush1.msra.mxu0 %v499_v14  ;;  %v595_v5 = vld [vmem:[%s5158_s30 + $0xb30] sm:$0xff]  ;;  %v592_v13 = vld [vmem:[%s5158_s30 + $0xb18] sm:$0xff] }
 0x2a8   : > { %3839 = vmatpush1.msra.mxu1 %v627_v17  ;;  %3769 = vmatprep.subr.mxu0 %v496_v22  ;;  %v723_v8 = vld [vmem:[%s5158_s30 + $0xf30] sm:$0xff]  ;;  %v720_v14 = vld [vmem:[%s5158_s30 + $0xf18] sm:$0xff] }
 0x2a9   : > { %3840 = vmatprep.subr.mxu1 %v624_v26  ;;  %3770 = vmatpush1.msra.mxu0 %v495_v27  ;;  %v591_v17 = vld [vmem:[%s5158_s30 + $0xb10] sm:$0xff]  ;;  %v588_v26 = vld [vmem:[%s5158_s30 + $0xaf8] sm:$0xff] }
 0x2aa   : > { %3841 = vmatpush1.msra.mxu1 %v623_v30  ;;  %3771 = vmatprep.subr.mxu0 %v620_v33  ;;  %v719_v22 = vld [vmem:[%s5158_s30 + $0xf10] sm:$0xff]  ;;  %v716_v27 = vld [vmem:[%s5158_s30 + $0xef8] sm:$0xff] }
 0x2ab   : > { %3842 = vmatprep.subr.mxu1 %v748_v34  ;;  %3772 = vmatpush2.msra.mxu0 %v619_v37  ;;  %v587_v30 = vld [vmem:[%s5158_s30 + $0xaf0] sm:$0xff]  ;;  %v584_v34 = vld [vmem:[%s5158_s30 + $0xad8] sm:$0xff] }
 0x2ac   : > { %3843 = vmatpush2.msra.mxu1 %v747_v38  ;;  %3773 = vmatprep.subr.mxu0 %v616_v40  ;;  %v715_v33 = vld [vmem:[%s5158_s30 + $0xef0] sm:$0xff]  ;;  %v712_v37 = vld [vmem:[%s5158_s30 + $0xed8] sm:$0xff] }
 0x2ad   : > { %3844 = vmatprep.subr.mxu1 %v744_v41  ;;  %3774 = vmatpush2.msra.mxu0 %v615_v43  ;;  %v583_v38 = vld [vmem:[%s5158_s30 + $0xad0] sm:$0xff]  ;;  %v580_v41 = vld [vmem:[%s5158_s30 + $0xab8] sm:$0xff] }
 0x2ae   : > { %3845 = vmatpush2.msra.mxu1 %v743_v45  ;;  %3775 = vmatprep.subr.mxu0 %v612_v47  ;;  %v711_v40 = vld [vmem:[%s5158_s30 + $0xed0] sm:$0xff]  ;;  %v708_v43 = vld [vmem:[%s5158_s30 + $0xeb8] sm:$0xff] }
 0x2af   : > { %3846 = vmatprep.subr.mxu1 %v740_v48  ;;  %3776 = vmatpush2.msra.mxu0 %v611_v50  ;;  %v579_v45 = vld [vmem:[%s5158_s30 + $0xab0] sm:$0xff]  ;;  %v576_v48 = vld [vmem:[%s5158_s30 + $0xa98] sm:$0xff] }
 0x2b0   : > { %3847 = vmatpush2.msra.mxu1 %v739_v51  ;;  %3777 = vmatprep.subr.mxu0 %v608_v9  ;;  %v707_v47 = vld [vmem:[%s5158_s30 + $0xeb0] sm:$0xff]  ;;  %v704_v50 = vld [vmem:[%s5158_s30 + $0xe98] sm:$0xff] }
 0x2b1   : > { %3848 = vmatprep.subr.mxu1 %v736_v54  ;;  %3778 = vmatpush2.msra.mxu0 %v607_v11  ;;  %v575_v51 = vld [vmem:[%s5158_s30 + $0xa90] sm:$0xff]  ;;  %v572_v54 = vld [vmem:[%s5158_s30 + $0xa78] sm:$0xff] }
 0x2b2   : > { %3849 = vmatpush2.msra.mxu1 %v735_v55  ;;  %3779 = vmatprep.subr.mxu0 %v604_v63  ;;  %v703_v9 = vld [vmem:[%s5158_s30 + $0xe90] sm:$0xff]  ;;  %v700_v11 = vld [vmem:[%s5158_s30 + $0xe78] sm:$0xff] }
 0x2b3   : > { %3850 = vmatprep.subr.mxu1 %v732_v2  ;;  %3780 = vmatpush2.msra.mxu0 %v603_v56  ;;  %v571_v55 = vld [vmem:[%s5158_s30 + $0xa70] sm:$0xff]  ;;  %v568_v2 = vld [vmem:[%s5158_s30 + $0xa58] sm:$0xff] }
 0x2b4   : > { %3851 = vmatpush2.msra.mxu1 %v731_v57  ;;  %3781 = vmatprep.subr.mxu0 %v600_v58  ;;  %v699_v63 = vld [vmem:[%s5158_s30 + $0xe70] sm:$0xff]  ;;  %v696_v56 = vld [vmem:[%s5158_s30 + $0xe58] sm:$0xff] }
 0x2b5   : > { %3852 = vmatprep.subr.mxu1 %v728_v59  ;;  %3782 = vmatpush2.msra.mxu0 %v599_v60  ;;  %v567_v57 = vld [vmem:[%s5158_s30 + $0xa50] sm:$0xff]  ;;  %v564_v59 = vld [vmem:[%s5158_s30 + $0xa38] sm:$0xff] }
 0x2b6   : > { %3853 = vmatpush2.msra.mxu1 %v727_v62  ;;  %3783 = vmatprep.subr.mxu0 %v596_v1  ;;  %v695_v58 = vld [vmem:[%s5158_s30 + $0xe50] sm:$0xff]  ;;  %v692_v60 = vld [vmem:[%s5158_s30 + $0xe38] sm:$0xff] }
 0x2b7   : > { %3854 = vmatprep.subr.mxu1 %v724_v3  ;;  %3784 = vmatpush2.msra.mxu0 %v595_v5  ;;  %v563_v62 = vld [vmem:[%s5158_s30 + $0xa30] sm:$0xff]  ;;  %v560_v3 = vld [vmem:[%s5158_s30 + $0xa18] sm:$0xff] }
 0x2b8   : > { %3855 = vmatpush2.msra.mxu1 %v723_v8  ;;  %3785 = vmatprep.subr.mxu0 %v592_v13  ;;  %v691_v1 = vld [vmem:[%s5158_s30 + $0xe30] sm:$0xff]  ;;  %v688_v5 = vld [vmem:[%s5158_s30 + $0xe18] sm:$0xff] }
 0x2b9   : > { %3856 = vmatprep.subr.mxu1 %v720_v14  ;;  %3786 = vmatpush2.msra.mxu0 %v591_v17  ;;  %v559_v8 = vld [vmem:[%s5158_s30 + $0xa10] sm:$0xff]  ;;  %v812_v14 = vld [vmem:[%s5158_s30 + $0x11f8] sm:$0xff] }
 0x2ba   : > { %3857 = vmatpush2.msra.mxu1 %v719_v22  ;;  %3787 = vmatprep.subr.mxu0 %v588_v26  ;;  %v687_v13 = vld [vmem:[%s5158_s30 + $0xe10] sm:$0xff]  ;;  %v940_v17 = vld [vmem:[%s5158_s30 + $0x15f8] sm:$0xff] }
 0x2bb   : > { %3858 = vmatprep.subr.mxu1 %v716_v27  ;;  %3788 = vmatpush2.msra.mxu0 %v587_v30  ;;  %v811_v22 = vld [vmem:[%s5158_s30 + $0x11f0] sm:$0xff]  ;;  %v808_v27 = vld [vmem:[%s5158_s30 + $0x11d8] sm:$0xff] }
 0x2bc   : > { %3859 = vmatpush2.msra.mxu1 %v715_v33  ;;  %3789 = vmatprep.subr.mxu0 %v584_v34  ;;  %v939_v26 = vld [vmem:[%s5158_s30 + $0x15f0] sm:$0xff]  ;;  %v936_v30 = vld [vmem:[%s5158_s30 + $0x15d8] sm:$0xff] }
 0x2bd   : > { %3860 = vmatprep.subr.mxu1 %v712_v37  ;;  %3790 = vmatpush2.msra.mxu0 %v583_v38  ;;  %v935_v33 = vld [vmem:[%s5158_s30 + $0x15d0] sm:$0xff]  ;;  %v932_v34 = vld [vmem:[%s5158_s30 + $0x15b8] sm:$0xff] }
 0x2be   : > { %3861 = vmatpush2.msra.mxu1 %v711_v40  ;;  %3791 = vmatprep.subr.mxu0 %v580_v41  ;;  %v931_v37 = vld [vmem:[%s5158_s30 + $0x15b0] sm:$0xff]  ;;  %v800_v38 = vld [vmem:[%s5158_s30 + $0x1198] sm:$0xff] }
 0x2bf   : > { %3862 = vmatprep.subr.mxu1 %v708_v43  ;;  %3792 = vmatpush2.msra.mxu0 %v579_v45  ;;  %v799_v40 = vld [vmem:[%s5158_s30 + $0x1190] sm:$0xff]  ;;  %v796_v43 = vld [vmem:[%s5158_s30 + $0x1178] sm:$0xff] }
 0x2c0   : > { %3863 = vmatpush2.msra.mxu1 %v707_v47  ;;  %3793 = vmatprep.subr.mxu0 %v576_v48  ;;  %v927_v41 = vld [vmem:[%s5158_s30 + $0x1590] sm:$0xff]  ;;  %v924_v45 = vld [vmem:[%s5158_s30 + $0x1578] sm:$0xff] }
 0x2c1   : > { %3864 = vmatprep.subr.mxu1 %v704_v50  ;;  %3794 = vmatpush2.msra.mxu0 %v575_v51  ;;  %v795_v47 = vld [vmem:[%s5158_s30 + $0x1170] sm:$0xff]  ;;  %v792_v50 = vld [vmem:[%s5158_s30 + $0x1158] sm:$0xff] }
 0x2c2   : > { %3865 = vmatpush2.msra.mxu1 %v703_v9  ;;  %3795 = vmatprep.subr.mxu0 %v572_v54  ;;  %v923_v48 = vld [vmem:[%s5158_s30 + $0x1570] sm:$0xff]  ;;  %v920_v51 = vld [vmem:[%s5158_s30 + $0x1558] sm:$0xff] }
 0x2c3   : > { %3866 = vmatprep.subr.mxu1 %v700_v11  ;;  %3796 = vmatpush2.msra.mxu0 %v571_v55  ;;  %v791_v9 = vld [vmem:[%s5158_s30 + $0x1150] sm:$0xff]  ;;  %v788_v11 = vld [vmem:[%s5158_s30 + $0x1138] sm:$0xff] }
 0x2c4   : > { %3867 = vmatpush2.msra.mxu1 %v699_v63  ;;  %3797 = vmatprep.subr.mxu0 %v568_v2  ;;  %v919_v54 = vld [vmem:[%s5158_s30 + $0x1550] sm:$0xff]  ;;  %v916_v55 = vld [vmem:[%s5158_s30 + $0x1538] sm:$0xff] }
 0x2c5   : > { %3868 = vmatprep.subr.mxu1 %v696_v56  ;;  %3798 = vmatpush2.msra.mxu0 %v567_v57  ;;  %v787_v63 = vld [vmem:[%s5158_s30 + $0x1130] sm:$0xff]  ;;  %v784_v56 = vld [vmem:[%s5158_s30 + $0x1118] sm:$0xff] }
 0x2c6   : > { %3869 = vmatpush2.msra.mxu1 %v695_v58  ;;  %3799 = vmatprep.subr.mxu0 %v564_v59  ;;  %v915_v2 = vld [vmem:[%s5158_s30 + $0x1530] sm:$0xff]  ;;  %v912_v57 = vld [vmem:[%s5158_s30 + $0x1518] sm:$0xff] }
 0x2c7   : > { %3870 = vmatprep.subr.mxu1 %v692_v60  ;;  %3800 = vmatpush2.msra.mxu0 %v563_v62  ;;  %v783_v58 = vld [vmem:[%s5158_s30 + $0x1110] sm:$0xff]  ;;  %v780_v60 = vld [vmem:[%s5158_s30 + $0x10f8] sm:$0xff] }
 0x2c8   : > { %3871 = vmatpush2.msra.mxu1 %v691_v1  ;;  %3801 = vmatprep.subr.mxu0 %v560_v3  ;;  %v911_v59 = vld [vmem:[%s5158_s30 + $0x1510] sm:$0xff]  ;;  %v908_v62 = vld [vmem:[%s5158_s30 + $0x14f8] sm:$0xff] }
 0x2c9   : > { %3872 = vmatprep.subr.mxu1 %v688_v5  ;;  %3802 = vmatpush2.msra.mxu0 %v559_v8  ;;  %v779_v1 = vld [vmem:[%s5158_s30 + $0x10f0] sm:$0xff]  ;;  %v776_v5 = vld [vmem:[%s5158_s30 + $0x10d8] sm:$0xff] }
 0x2ca   : > { %3803 = vmatprep.mubr.f32.mxu0 %v5463_v25  ;;  %3873 = vmatpush2.msra.mxu1 %v687_v13  ;;  %v807_v25 = vld [vmem:[%s5158_s30 + $0x11d0] sm:$0xff]  ;;  %v904_v8 = vld [vmem:[%s5158_s30 + $0x14d8] sm:$0xff] }
 0x2cb   : > { %3804 = vmatmul.mubr.f32.vlgmr.msra.gmra.mxu0 %v5448_v15  ;;  %3874 = vmatprep.mubr.f32.mxu1 %v5469_v28  ;;  %v804_v15 = vld [vmem:[%s5158_s30 + $0x11b8] sm:$0xff]  ;;  %v803_v28 = vld [vmem:[%s5158_s30 + $0x11b0] sm:$0xff] }
 0x2cc   : > { %3881 = vmatprep.subr.mxu0 %v812_v14  ;;  %3952 = vmatprep.subr.mxu1 %v940_v17  ;;  %v907_v3 = vld [vmem:[%s5158_s30 + $0x14f0] sm:$0xff]  ;;  %v772_v17 = vld [vmem:[%s5158_s30 + $0x10b8] sm:$0xff] }
 0x2cd   : > { %3875 = vmatmul.mubr.f32.vlgmr.msra.gmra.mxu1 %v5455_v20  ;;  %3882 = vmatpush1.msra.mxu0 %v811_v22  ;;  %v928_v20 = vld [vmem:[%s5158_s30 + $0x1598] sm:$0xff]  ;;  %v775_v13 = vld [vmem:[%s5158_s30 + $0x10d0] sm:$0xff] }
 0x2ce   : > { %3953 = vmatpush1.msra.mxu1 %v939_v26  ;;  %3883 = vmatprep.subr.mxu0 %v808_v27  ;;  %v903_v14 = vld [vmem:[%s5158_s30 + $0x14d0] sm:$0xff]  ;;  %v900_v22 = vld [vmem:[%s5158_s30 + $0x14b8] sm:$0xff] }
 0x2cf   : > { %3954 = vmatprep.subr.mxu1 %v936_v30  ;;  %3884 = vmatpush1.msra.mxu0 %v807_v25  ;;  %v771_v26 = vld [vmem:[%s5158_s30 + $0x10b0] sm:$0xff]  ;;  %v768_v30 = vld [vmem:[%s5158_s30 + $0x1098] sm:$0xff] }
 0x2d0   : > { %3955 = vmatpush1.msra.mxu1 %v935_v33  ;;  %3885 = vmatprep.subr.mxu0 %v804_v15  ;;  %v899_v27 = vld [vmem:[%s5158_s30 + $0x14b0] sm:$0xff]  ;;  %v896_v25 = vld [vmem:[%s5158_s30 + $0x1498] sm:$0xff] }
 0x2d1   : > { %3956 = vmatprep.subr.mxu1 %v932_v34  ;;  %3886 = vmatpush1.msra.mxu0 %v803_v28  ;;  %v767_v33 = vld [vmem:[%s5158_s30 + $0x1090] sm:$0xff]  ;;  %v764_v34 = vld [vmem:[%s5158_s30 + $0x1078] sm:$0xff] }
 0x2d2   : > { %3957 = vmatpush1.msra.mxu1 %v931_v37  ;;  %3887 = vmatprep.subr.mxu0 %v800_v38  ;;  %v895_v15 = vld [vmem:[%s5158_s30 + $0x1490] sm:$0xff]  ;;  %v892_v28 = vld [vmem:[%s5158_s30 + $0x1478] sm:$0xff] }
 0x2d3   : > { %3958 = vmatprep.subr.mxu1 %v928_v20  ;;  %3888 = vmatpush1.msra.mxu0 %v799_v40  ;;  %v763_v37 = vld [vmem:[%s5158_s30 + $0x1070] sm:$0xff]  ;;  %v760_v20 = vld [vmem:[%s5158_s30 + $0x1058] sm:$0xff] }
 0x2d4   : > { %3959 = vmatpush1.msra.mxu1 %v927_v41  ;;  %3889 = vmatprep.subr.mxu0 %v796_v43  ;;  %v891_v38 = vld [vmem:[%s5158_s30 + $0x1470] sm:$0xff]  ;;  %v888_v40 = vld [vmem:[%s5158_s30 + $0x1458] sm:$0xff] }
 0x2d5   : > { %3960 = vmatprep.subr.mxu1 %v924_v45  ;;  %3890 = vmatpush1.msra.mxu0 %v795_v47  ;;  %v759_v41 = vld [vmem:[%s5158_s30 + $0x1050] sm:$0xff]  ;;  %v756_v45 = vld [vmem:[%s5158_s30 + $0x1038] sm:$0xff] }
 0x2d6   : > { %3961 = vmatpush1.msra.mxu1 %v923_v48  ;;  %3891 = vmatprep.subr.mxu0 %v792_v50  ;;  %v887_v43 = vld [vmem:[%s5158_s30 + $0x1450] sm:$0xff]  ;;  %v884_v47 = vld [vmem:[%s5158_s30 + $0x1438] sm:$0xff] }
 0x2d7   : > { %3962 = vmatprep.subr.mxu1 %v920_v51  ;;  %3892 = vmatpush1.msra.mxu0 %v791_v9  ;;  %v755_v48 = vld [vmem:[%s5158_s30 + $0x1030] sm:$0xff]  ;;  %v752_v51 = vld [vmem:[%s5158_s30 + $0x1018] sm:$0xff] }
 0x2d8   : > { %3963 = vmatpush1.msra.mxu1 %v919_v54  ;;  %3893 = vmatprep.subr.mxu0 %v788_v11  ;;  %v883_v50 = vld [vmem:[%s5158_s30 + $0x1430] sm:$0xff]  ;;  %v880_v9 = vld [vmem:[%s5158_s30 + $0x1418] sm:$0xff] }
 0x2d9   : > { %3964 = vmatprep.subr.mxu1 %v916_v55  ;;  %3894 = vmatpush1.msra.mxu0 %v787_v63  ;;  %v751_v54 = vld [vmem:[%s5158_s30 + $0x1010] sm:$0xff]  ;;  %v876_v55 = vld [vmem:[%s5158_s30 + $0x13f8] sm:$0xff] }
 0x2da   : > { %3965 = vmatpush1.msra.mxu1 %v915_v2  ;;  %3895 = vmatprep.subr.mxu0 %v784_v56  ;;  %v879_v11 = vld [vmem:[%s5158_s30 + $0x1410] sm:$0xff]  ;;  %v1004_v63 = vld [vmem:[%s5158_s30 + $0x17f8] sm:$0xff] }
 0x2db   : > { %3966 = vmatprep.subr.mxu1 %v912_v57  ;;  %3896 = vmatpush1.msra.mxu0 %v783_v58  ;;  %v875_v2 = vld [vmem:[%s5158_s30 + $0x13f0] sm:$0xff]  ;;  %v872_v57 = vld [vmem:[%s5158_s30 + $0x13d8] sm:$0xff] }
 0x2dc   : > { %3967 = vmatpush1.msra.mxu1 %v911_v59  ;;  %3897 = vmatprep.subr.mxu0 %v780_v60  ;;  %v1003_v56 = vld [vmem:[%s5158_s30 + $0x17f0] sm:$0xff]  ;;  %v1000_v58 = vld [vmem:[%s5158_s30 + $0x17d8] sm:$0xff] }
 0x2dd   : > { %3968 = vmatprep.subr.mxu1 %v908_v62  ;;  %3898 = vmatpush1.msra.mxu0 %v779_v1  ;;  %v871_v59 = vld [vmem:[%s5158_s30 + $0x13d0] sm:$0xff]  ;;  %v868_v62 = vld [vmem:[%s5158_s30 + $0x13b8] sm:$0xff] }
 0x2de   : > { %3969 = vmatpush1.msra.mxu1 %v907_v3  ;;  %3899 = vmatprep.subr.mxu0 %v776_v5  ;;  %v999_v60 = vld [vmem:[%s5158_s30 + $0x17d0] sm:$0xff]  ;;  %v996_v1 = vld [vmem:[%s5158_s30 + $0x17b8] sm:$0xff] }
 0x2df   : > { %3970 = vmatprep.subr.mxu1 %v904_v8  ;;  %3900 = vmatpush1.msra.mxu0 %v775_v13  ;;  %v867_v3 = vld [vmem:[%s5158_s30 + $0x13b0] sm:$0xff]  ;;  %v864_v8 = vld [vmem:[%s5158_s30 + $0x1398] sm:$0xff] }
 0x2e0   : > { %3971 = vmatpush1.msra.mxu1 %v903_v14  ;;  %3901 = vmatprep.subr.mxu0 %v772_v17  ;;  %v995_v5 = vld [vmem:[%s5158_s30 + $0x17b0] sm:$0xff]  ;;  %v992_v13 = vld [vmem:[%s5158_s30 + $0x1798] sm:$0xff] }
 0x2e1   : > { %3972 = vmatprep.subr.mxu1 %v900_v22  ;;  %3902 = vmatpush1.msra.mxu0 %v771_v26  ;;  %v863_v14 = vld [vmem:[%s5158_s30 + $0x1390] sm:$0xff]  ;;  %v860_v22 = vld [vmem:[%s5158_s30 + $0x1378] sm:$0xff] }
 0x2e2   : > { %3973 = vmatpush1.msra.mxu1 %v899_v27  ;;  %3903 = vmatprep.subr.mxu0 %v768_v30  ;;  %v991_v17 = vld [vmem:[%s5158_s30 + $0x1790] sm:$0xff]  ;;  %v988_v26 = vld [vmem:[%s5158_s30 + $0x1778] sm:$0xff] }
 0x2e3   : > { %3974 = vmatprep.subr.mxu1 %v896_v25  ;;  %3904 = vmatpush1.msra.mxu0 %v767_v33  ;;  %v859_v27 = vld [vmem:[%s5158_s30 + $0x1370] sm:$0xff]  ;;  %v856_v25 = vld [vmem:[%s5158_s30 + $0x1358] sm:$0xff] }
 0x2e4   : > { %3975 = vmatpush1.msra.mxu1 %v895_v15  ;;  %3905 = vmatprep.subr.mxu0 %v764_v34  ;;  %v987_v30 = vld [vmem:[%s5158_s30 + $0x1770] sm:$0xff]  ;;  %v984_v33 = vld [vmem:[%s5158_s30 + $0x1758] sm:$0xff] }
 0x2e5   : > { %3976 = vmatprep.subr.mxu1 %v892_v28  ;;  %3906 = vmatpush1.msra.mxu0 %v763_v37  ;;  %v855_v15 = vld [vmem:[%s5158_s30 + $0x1350] sm:$0xff]  ;;  %v852_v28 = vld [vmem:[%s5158_s30 + $0x1338] sm:$0xff] }
 0x2e6   : > { %3977 = vmatpush1.msra.mxu1 %v891_v38  ;;  %3907 = vmatprep.subr.mxu0 %v760_v20  ;;  %v983_v34 = vld [vmem:[%s5158_s30 + $0x1750] sm:$0xff]  ;;  %v980_v37 = vld [vmem:[%s5158_s30 + $0x1738] sm:$0xff] }
 0x2e7   : > { %3978 = vmatprep.subr.mxu1 %v888_v40  ;;  %3908 = vmatpush1.msra.mxu0 %v759_v41  ;;  %v851_v38 = vld [vmem:[%s5158_s30 + $0x1330] sm:$0xff]  ;;  %v848_v40 = vld [vmem:[%s5158_s30 + $0x1318] sm:$0xff] }
 0x2e8   : > { %3979 = vmatpush1.msra.mxu1 %v887_v43  ;;  %3909 = vmatprep.subr.mxu0 %v756_v45  ;;  %v979_v20 = vld [vmem:[%s5158_s30 + $0x1730] sm:$0xff]  ;;  %v976_v41 = vld [vmem:[%s5158_s30 + $0x1718] sm:$0xff] }
 0x2e9   : > { %3980 = vmatprep.subr.mxu1 %v884_v47  ;;  %3910 = vmatpush1.msra.mxu0 %v755_v48  ;;  %v847_v43 = vld [vmem:[%s5158_s30 + $0x1310] sm:$0xff]  ;;  %v844_v47 = vld [vmem:[%s5158_s30 + $0x12f8] sm:$0xff] }
 0x2ea   : > { %3981 = vmatpush1.msra.mxu1 %v883_v50  ;;  %3911 = vmatprep.subr.mxu0 %v752_v51  ;;  %v975_v45 = vld [vmem:[%s5158_s30 + $0x1710] sm:$0xff]  ;;  %v972_v48 = vld [vmem:[%s5158_s30 + $0x16f8] sm:$0xff] }
 0x2eb   : > { %3982 = vmatprep.subr.mxu1 %v880_v9  ;;  %3912 = vmatpush1.msra.mxu0 %v751_v54  ;;  %v843_v50 = vld [vmem:[%s5158_s30 + $0x12f0] sm:$0xff]  ;;  %v840_v9 = vld [vmem:[%s5158_s30 + $0x12d8] sm:$0xff] }
 0x2ec   : > { %3983 = vmatpush1.msra.mxu1 %v879_v11  ;;  %3913 = vmatprep.subr.mxu0 %v876_v55  ;;  %v971_v51 = vld [vmem:[%s5158_s30 + $0x16f0] sm:$0xff]  ;;  %v968_v54 = vld [vmem:[%s5158_s30 + $0x16d8] sm:$0xff] }
 0x2ed   : > { %3984 = vmatprep.subr.mxu1 %v1004_v63  ;;  %3914 = vmatpush2.msra.mxu0 %v875_v2  ;;  %v839_v11 = vld [vmem:[%s5158_s30 + $0x12d0] sm:$0xff]  ;;  %v836_v63 = vld [vmem:[%s5158_s30 + $0x12b8] sm:$0xff] }
 0x2ee   : > { %3985 = vmatpush2.msra.mxu1 %v1003_v56  ;;  %3915 = vmatprep.subr.mxu0 %v872_v57  ;;  %v967_v55 = vld [vmem:[%s5158_s30 + $0x16d0] sm:$0xff]  ;;  %v964_v2 = vld [vmem:[%s5158_s30 + $0x16b8] sm:$0xff] }
 0x2ef   : > { %3986 = vmatprep.subr.mxu1 %v1000_v58  ;;  %3916 = vmatpush2.msra.mxu0 %v871_v59  ;;  %v835_v56 = vld [vmem:[%s5158_s30 + $0x12b0] sm:$0xff]  ;;  %v832_v58 = vld [vmem:[%s5158_s30 + $0x1298] sm:$0xff] }
 0x2f0   : > { %3987 = vmatpush2.msra.mxu1 %v999_v60  ;;  %3917 = vmatprep.subr.mxu0 %v868_v62  ;;  %v963_v57 = vld [vmem:[%s5158_s30 + $0x16b0] sm:$0xff]  ;;  %v960_v59 = vld [vmem:[%s5158_s30 + $0x1698] sm:$0xff] }
 0x2f1   : > { %3988 = vmatprep.subr.mxu1 %v996_v1  ;;  %3918 = vmatpush2.msra.mxu0 %v867_v3  ;;  %v831_v60 = vld [vmem:[%s5158_s30 + $0x1290] sm:$0xff]  ;;  %v828_v1 = vld [vmem:[%s5158_s30 + $0x1278] sm:$0xff] }
 0x2f2   : > { %3989 = vmatpush2.msra.mxu1 %v995_v5  ;;  %3919 = vmatprep.subr.mxu0 %v864_v8  ;;  %v959_v62 = vld [vmem:[%s5158_s30 + $0x1690] sm:$0xff]  ;;  %v956_v3 = vld [vmem:[%s5158_s30 + $0x1678] sm:$0xff] }
 0x2f3   : > { %3990 = vmatprep.subr.mxu1 %v992_v13  ;;  %3920 = vmatpush2.msra.mxu0 %v863_v14  ;;  %v827_v5 = vld [vmem:[%s5158_s30 + $0x1270] sm:$0xff]  ;;  %v824_v13 = vld [vmem:[%s5158_s30 + $0x1258] sm:$0xff] }
 0x2f4   : > { %3991 = vmatpush2.msra.mxu1 %v991_v17  ;;  %3921 = vmatprep.subr.mxu0 %v860_v22  ;;  %v955_v8 = vld [vmem:[%s5158_s30 + $0x1670] sm:$0xff]  ;;  %v952_v14 = vld [vmem:[%s5158_s30 + $0x1658] sm:$0xff] }
 0x2f5   : > { %3992 = vmatprep.subr.mxu1 %v988_v26  ;;  %3922 = vmatpush2.msra.mxu0 %v859_v27  ;;  %v823_v17 = vld [vmem:[%s5158_s30 + $0x1250] sm:$0xff]  ;;  %v820_v26 = vld [vmem:[%s5158_s30 + $0x1238] sm:$0xff] }
 0x2f6   : > { %3993 = vmatpush2.msra.mxu1 %v987_v30  ;;  %3923 = vmatprep.subr.mxu0 %v856_v25  ;;  %v951_v22 = vld [vmem:[%s5158_s30 + $0x1650] sm:$0xff]  ;;  %v948_v27 = vld [vmem:[%s5158_s30 + $0x1638] sm:$0xff] }
 0x2f7   : > { %3994 = vmatprep.subr.mxu1 %v984_v33  ;;  %3924 = vmatpush2.msra.mxu0 %v855_v15  ;;  %v819_v30 = vld [vmem:[%s5158_s30 + $0x1230] sm:$0xff]  ;;  %v816_v33 = vld [vmem:[%s5158_s30 + $0x1218] sm:$0xff] }
 0x2f8   : > { %3995 = vmatpush2.msra.mxu1 %v983_v34  ;;  %3925 = vmatprep.subr.mxu0 %v852_v28  ;;  %v947_v25 = vld [vmem:[%s5158_s30 + $0x1630] sm:$0xff]  ;;  %v944_v15 = vld [vmem:[%s5158_s30 + $0x1618] sm:$0xff] }
 0x2f9   : > { %3996 = vmatprep.subr.mxu1 %v980_v37  ;;  %3926 = vmatpush2.msra.mxu0 %v851_v38  ;;  %v815_v34 = vld [vmem:[%s5158_s30 + $0x1210] sm:$0xff]  ;;  %v1068_v37 = vld [vmem:[%s5158_s30 + $0x19f8] sm:$0xff] }
 0x2fa   : > { %3997 = vmatpush2.msra.mxu1 %v979_v20  ;;  %3927 = vmatprep.subr.mxu0 %v848_v40  ;;  %v943_v28 = vld [vmem:[%s5158_s30 + $0x1610] sm:$0xff]  ;;  %v1196_v38 = vld [vmem:[%s5158_s30 + $0x1df8] sm:$0xff] }
 0x2fb   : > { %3998 = vmatprep.subr.mxu1 %v976_v41  ;;  %3928 = vmatpush2.msra.mxu0 %v847_v43  ;;  %v1067_v20 = vld [vmem:[%s5158_s30 + $0x19f0] sm:$0xff]  ;;  %v1064_v41 = vld [vmem:[%s5158_s30 + $0x19d8] sm:$0xff] }
 0x2fc   : > { %3999 = vmatpush2.msra.mxu1 %v975_v45  ;;  %3929 = vmatprep.subr.mxu0 %v844_v47  ;;  %v1195_v40 = vld [vmem:[%s5158_s30 + $0x1df0] sm:$0xff]  ;;  %v1192_v43 = vld [vmem:[%s5158_s30 + $0x1dd8] sm:$0xff] }
 0x2fd   : > { %4000 = vmatprep.subr.mxu1 %v972_v48  ;;  %3930 = vmatpush2.msra.mxu0 %v843_v50  ;;  %v1191_v45 = vld [vmem:[%s5158_s30 + $0x1dd0] sm:$0xff]  ;;  %v1188_v47 = vld [vmem:[%s5158_s30 + $0x1db8] sm:$0xff] }
 0x2fe   : > { %4001 = vmatpush2.msra.mxu1 %v971_v51  ;;  %3931 = vmatprep.subr.mxu0 %v840_v9  ;;  %v1187_v48 = vld [vmem:[%s5158_s30 + $0x1db0] sm:$0xff]  ;;  %v1056_v50 = vld [vmem:[%s5158_s30 + $0x1998] sm:$0xff] }
 0x2ff   : > { %4002 = vmatprep.subr.mxu1 %v968_v54  ;;  %3932 = vmatpush2.msra.mxu0 %v839_v11  ;;  %v1055_v51 = vld [vmem:[%s5158_s30 + $0x1990] sm:$0xff]  ;;  %v1052_v54 = vld [vmem:[%s5158_s30 + $0x1978] sm:$0xff] }
 0x300   : > { %4003 = vmatpush2.msra.mxu1 %v967_v55  ;;  %3933 = vmatprep.subr.mxu0 %v836_v63  ;;  %v1183_v9 = vld [vmem:[%s5158_s30 + $0x1d90] sm:$0xff]  ;;  %v1180_v11 = vld [vmem:[%s5158_s30 + $0x1d78] sm:$0xff] }
 0x301   : > { %4004 = vmatprep.subr.mxu1 %v964_v2  ;;  %3934 = vmatpush2.msra.mxu0 %v835_v56  ;;  %v1051_v55 = vld [vmem:[%s5158_s30 + $0x1970] sm:$0xff]  ;;  %v1048_v2 = vld [vmem:[%s5158_s30 + $0x1958] sm:$0xff] }
 0x302   : > { %4005 = vmatpush2.msra.mxu1 %v963_v57  ;;  %3935 = vmatprep.subr.mxu0 %v832_v58  ;;  %v1179_v63 = vld [vmem:[%s5158_s30 + $0x1d70] sm:$0xff]  ;;  %v1176_v56 = vld [vmem:[%s5158_s30 + $0x1d58] sm:$0xff] }
 0x303   : > { %4006 = vmatprep.subr.mxu1 %v960_v59  ;;  %3936 = vmatpush2.msra.mxu0 %v831_v60  ;;  %v1047_v57 = vld [vmem:[%s5158_s30 + $0x1950] sm:$0xff]  ;;  %v1044_v59 = vld [vmem:[%s5158_s30 + $0x1938] sm:$0xff] }
 0x304   : > { %4007 = vmatpush2.msra.mxu1 %v959_v62  ;;  %3937 = vmatprep.subr.mxu0 %v828_v1  ;;  %v1175_v58 = vld [vmem:[%s5158_s30 + $0x1d50] sm:$0xff]  ;;  %v1172_v60 = vld [vmem:[%s5158_s30 + $0x1d38] sm:$0xff] }
 0x305   : > { %4008 = vmatprep.subr.mxu1 %v956_v3  ;;  %3938 = vmatpush2.msra.mxu0 %v827_v5  ;;  %v1043_v62 = vld [vmem:[%s5158_s30 + $0x1930] sm:$0xff]  ;;  %v1040_v3 = vld [vmem:[%s5158_s30 + $0x1918] sm:$0xff] }
 0x306   : > { %4009 = vmatpush2.msra.mxu1 %v955_v8  ;;  %3939 = vmatprep.subr.mxu0 %v824_v13  ;;  %v1171_v1 = vld [vmem:[%s5158_s30 + $0x1d30] sm:$0xff]  ;;  %v1168_v5 = vld [vmem:[%s5158_s30 + $0x1d18] sm:$0xff] }
 0x307   : > { %4010 = vmatprep.subr.mxu1 %v952_v14  ;;  %3940 = vmatpush2.msra.mxu0 %v823_v17  ;;  %v1039_v8 = vld [vmem:[%s5158_s30 + $0x1910] sm:$0xff]  ;;  %v1036_v14 = vld [vmem:[%s5158_s30 + $0x18f8] sm:$0xff] }
 0x308   : > { %4011 = vmatpush2.msra.mxu1 %v951_v22  ;;  %3941 = vmatprep.subr.mxu0 %v820_v26  ;;  %v1167_v13 = vld [vmem:[%s5158_s30 + $0x1d10] sm:$0xff]  ;;  %v1164_v17 = vld [vmem:[%s5158_s30 + $0x1cf8] sm:$0xff] }
 0x309   : > { %4012 = vmatprep.subr.mxu1 %v948_v27  ;;  %3942 = vmatpush2.msra.mxu0 %v819_v30  ;;  %v1035_v22 = vld [vmem:[%s5158_s30 + $0x18f0] sm:$0xff]  ;;  %v1032_v27 = vld [vmem:[%s5158_s30 + $0x18d8] sm:$0xff] }
 0x30a   : > { %4013 = vmatpush2.msra.mxu1 %v947_v25  ;;  %3943 = vmatprep.subr.mxu0 %v816_v33  ;;  %v1163_v26 = vld [vmem:[%s5158_s30 + $0x1cf0] sm:$0xff]  ;;  %v1160_v30 = vld [vmem:[%s5158_s30 + $0x1cd8] sm:$0xff] }
 0x30b   : > { %4014 = vmatprep.subr.mxu1 %v944_v15  ;;  %3944 = vmatpush2.msra.mxu0 %v815_v34  ;;  %v1031_v25 = vld [vmem:[%s5158_s30 + $0x18d0] sm:$0xff]  ;;  %v1028_v15 = vld [vmem:[%s5158_s30 + $0x18b8] sm:$0xff] }
 0x30c   : > { %3945 = vmatprep.mubr.f32.mxu0 %v5610_v49  ;;  %4015 = vmatpush2.msra.mxu1 %v943_v28  ;;  %v1063_v49 = vld [vmem:[%s5158_s30 + $0x19d0] sm:$0xff]  ;;  %v1156_v34 = vld [vmem:[%s5158_s30 + $0x1cb8] sm:$0xff] }
 0x30d   : > { %3946 = vmatmul.mubr.f32.vlgmr.msra.gmra.mxu0 %v5595_v39  ;;  %4016 = vmatprep.mubr.f32.mxu1 %v5616_v52  ;;  %v1060_v39 = vld [vmem:[%s5158_s30 + $0x19b8] sm:$0xff]  ;;  %v1059_v52 = vld [vmem:[%s5158_s30 + $0x19b0] sm:$0xff] }
 0x30e   : > { %4023 = vmatprep.subr.mxu0 %v1068_v37  ;;  %4094 = vmatprep.subr.mxu1 %v1196_v38  ;;  %v1159_v33 = vld [vmem:[%s5158_s30 + $0x1cd0] sm:$0xff]  ;;  %v1024_v38 = vld [vmem:[%s5158_s30 + $0x1898] sm:$0xff] }
 0x30f   : > { %4017 = vmatmul.mubr.f32.vlgmr.msra.gmra.mxu1 %v5602_v44  ;;  %4024 = vmatpush1.msra.mxu0 %v1067_v20  ;;  %v1184_v44 = vld [vmem:[%s5158_s30 + $0x1d98] sm:$0xff]  ;;  %v1027_v28 = vld [vmem:[%s5158_s30 + $0x18b0] sm:$0xff] }
 0x310   : > { %4095 = vmatpush1.msra.mxu1 %v1195_v40  ;;  %4025 = vmatprep.subr.mxu0 %v1064_v41  ;;  %v1155_v37 = vld [vmem:[%s5158_s30 + $0x1cb0] sm:$0xff]  ;;  %v1152_v20 = vld [vmem:[%s5158_s30 + $0x1c98] sm:$0xff] }
 0x311   : > { %4096 = vmatprep.subr.mxu1 %v1192_v43  ;;  %4026 = vmatpush1.msra.mxu0 %v1063_v49  ;;  %v1023_v40 = vld [vmem:[%s5158_s30 + $0x1890] sm:$0xff]  ;;  %v1020_v43 = vld [vmem:[%s5158_s30 + $0x1878] sm:$0xff] }
 0x312   : > { %4097 = vmatpush1.msra.mxu1 %v1191_v45  ;;  %4027 = vmatprep.subr.mxu0 %v1060_v39  ;;  %v1151_v41 = vld [vmem:[%s5158_s30 + $0x1c90] sm:$0xff]  ;;  %v1148_v49 = vld [vmem:[%s5158_s30 + $0x1c78] sm:$0xff] }
 0x313   : > { %4098 = vmatprep.subr.mxu1 %v1188_v47  ;;  %4028 = vmatpush1.msra.mxu0 %v1059_v52  ;;  %v1019_v45 = vld [vmem:[%s5158_s30 + $0x1870] sm:$0xff]  ;;  %v1016_v47 = vld [vmem:[%s5158_s30 + $0x1858] sm:$0xff] }
 0x314   : > { %4099 = vmatpush1.msra.mxu1 %v1187_v48  ;;  %4029 = vmatprep.subr.mxu0 %v1056_v50  ;;  %v1147_v39 = vld [vmem:[%s5158_s30 + $0x1c70] sm:$0xff]  ;;  %v1144_v52 = vld [vmem:[%s5158_s30 + $0x1c58] sm:$0xff] }
 0x315   : > { %4100 = vmatprep.subr.mxu1 %v1184_v44  ;;  %4030 = vmatpush1.msra.mxu0 %v1055_v51  ;;  %v1015_v48 = vld [vmem:[%s5158_s30 + $0x1850] sm:$0xff]  ;;  %v1012_v44 = vld [vmem:[%s5158_s30 + $0x1838] sm:$0xff] }
 0x316   : > { %4101 = vmatpush1.msra.mxu1 %v1183_v9  ;;  %4031 = vmatprep.subr.mxu0 %v1052_v54  ;;  %v1143_v50 = vld [vmem:[%s5158_s30 + $0x1c50] sm:$0xff]  ;;  %v1140_v51 = vld [vmem:[%s5158_s30 + $0x1c38] sm:$0xff] }
 0x317   : > { %4102 = vmatprep.subr.mxu1 %v1180_v11  ;;  %4032 = vmatpush1.msra.mxu0 %v1051_v55  ;;  %v1011_v9 = vld [vmem:[%s5158_s30 + $0x1830] sm:$0xff]  ;;  %v1008_v11 = vld [vmem:[%s5158_s30 + $0x1818] sm:$0xff] }
 0x318   : > { %4103 = vmatpush1.msra.mxu1 %v1179_v63  ;;  %4033 = vmatprep.subr.mxu0 %v1048_v2  ;;  %v1139_v54 = vld [vmem:[%s5158_s30 + $0x1c30] sm:$0xff]  ;;  %v1136_v55 = vld [vmem:[%s5158_s30 + $0x1c18] sm:$0xff] }
 0x319   : > { %4104 = vmatprep.subr.mxu1 %v1176_v56  ;;  %4034 = vmatpush1.msra.mxu0 %v1047_v57  ;;  %v1007_v63 = vld [vmem:[%s5158_s30 + $0x1810] sm:$0xff]  ;;  %v1132_v56 = vld [vmem:[%s5158_s30 + $0x1bf8] sm:$0xff] }
 0x31a   : > { %4105 = vmatpush1.msra.mxu1 %v1175_v58  ;;  %4035 = vmatprep.subr.mxu0 %v1044_v59  ;;  %v1135_v2 = vld [vmem:[%s5158_s30 + $0x1c10] sm:$0xff]  ;;  %v1260_v57 = vld [vmem:[%s5158_s30 + $0x1ff8] sm:$0xff] }
 0x31b   : > { %4106 = vmatprep.subr.mxu1 %v1172_v60  ;;  %4036 = vmatpush1.msra.mxu0 %v1043_v62  ;;  %v1131_v58 = vld [vmem:[%s5158_s30 + $0x1bf0] sm:$0xff]  ;;  %v1128_v60 = vld [vmem:[%s5158_s30 + $0x1bd8] sm:$0xff] }
 0x31c   : > { %4107 = vmatpush1.msra.mxu1 %v1171_v1  ;;  %4037 = vmatprep.subr.mxu0 %v1040_v3  ;;  %v1259_v59 = vld [vmem:[%s5158_s30 + $0x1ff0] sm:$0xff]  ;;  %v1256_v62 = vld [vmem:[%s5158_s30 + $0x1fd8] sm:$0xff] }
 0x31d   : > { %4108 = vmatprep.subr.mxu1 %v1168_v5  ;;  %4038 = vmatpush1.msra.mxu0 %v1039_v8  ;;  %v1127_v1 = vld [vmem:[%s5158_s30 + $0x1bd0] sm:$0xff]  ;;  %v1124_v5 = vld [vmem:[%s5158_s30 + $0x1bb8] sm:$0xff] }
 0x31e   : > { %4109 = vmatpush1.msra.mxu1 %v1167_v13  ;;  %4039 = vmatprep.subr.mxu0 %v1036_v14  ;;  %v1255_v3 = vld [vmem:[%s5158_s30 + $0x1fd0] sm:$0xff]  ;;  %v1252_v8 = vld [vmem:[%s5158_s30 + $0x1fb8] sm:$0xff] }
 0x31f   : > { %4110 = vmatprep.subr.mxu1 %v1164_v17  ;;  %4040 = vmatpush1.msra.mxu0 %v1035_v22  ;;  %v1123_v13 = vld [vmem:[%s5158_s30 + $0x1bb0] sm:$0xff]  ;;  %v1120_v17 = vld [vmem:[%s5158_s30 + $0x1b98] sm:$0xff] }
 0x320   : > { %4111 = vmatpush1.msra.mxu1 %v1163_v26  ;;  %4041 = vmatprep.subr.mxu0 %v1032_v27  ;;  %v1251_v14 = vld [vmem:[%s5158_s30 + $0x1fb0] sm:$0xff]  ;;  %v1248_v22 = vld [vmem:[%s5158_s30 + $0x1f98] sm:$0xff] }
 0x321   : > { %4112 = vmatprep.subr.mxu1 %v1160_v30  ;;  %4042 = vmatpush1.msra.mxu0 %v1031_v25  ;;  %v1119_v26 = vld [vmem:[%s5158_s30 + $0x1b90] sm:$0xff]  ;;  %v1116_v30 = vld [vmem:[%s5158_s30 + $0x1b78] sm:$0xff] }
 0x322   : > { %4113 = vmatpush1.msra.mxu1 %v1159_v33  ;;  %4043 = vmatprep.subr.mxu0 %v1028_v15  ;;  %v1247_v27 = vld [vmem:[%s5158_s30 + $0x1f90] sm:$0xff]  ;;  %v1244_v25 = vld [vmem:[%s5158_s30 + $0x1f78] sm:$0xff] }
 0x323   : > { %4114 = vmatprep.subr.mxu1 %v1156_v34  ;;  %4044 = vmatpush1.msra.mxu0 %v1027_v28  ;;  %v1115_v33 = vld [vmem:[%s5158_s30 + $0x1b70] sm:$0xff]  ;;  %v1112_v34 = vld [vmem:[%s5158_s30 + $0x1b58] sm:$0xff] }
 0x324   : > { %4115 = vmatpush1.msra.mxu1 %v1155_v37  ;;  %4045 = vmatprep.subr.mxu0 %v1024_v38  ;;  %v1243_v15 = vld [vmem:[%s5158_s30 + $0x1f70] sm:$0xff]  ;;  %v1240_v28 = vld [vmem:[%s5158_s30 + $0x1f58] sm:$0xff] }
 0x325   : > { %4116 = vmatprep.subr.mxu1 %v1152_v20  ;;  %4046 = vmatpush1.msra.mxu0 %v1023_v40  ;;  %v1111_v37 = vld [vmem:[%s5158_s30 + $0x1b50] sm:$0xff]  ;;  %v1108_v20 = vld [vmem:[%s5158_s30 + $0x1b38] sm:$0xff] }
 0x326   : > { %4117 = vmatpush1.msra.mxu1 %v1151_v41  ;;  %4047 = vmatprep.subr.mxu0 %v1020_v43  ;;  %v1239_v38 = vld [vmem:[%s5158_s30 + $0x1f50] sm:$0xff]  ;;  %v1236_v40 = vld [vmem:[%s5158_s30 + $0x1f38] sm:$0xff] }
 0x327   : > { %4118 = vmatprep.subr.mxu1 %v1148_v49  ;;  %4048 = vmatpush1.msra.mxu0 %v1019_v45  ;;  %v1107_v41 = vld [vmem:[%s5158_s30 + $0x1b30] sm:$0xff]  ;;  %v1104_v49 = vld [vmem:[%s5158_s30 + $0x1b18] sm:$0xff] }
 0x328   : > { %4119 = vmatpush1.msra.mxu1 %v1147_v39  ;;  %4049 = vmatprep.subr.mxu0 %v1016_v47  ;;  %v1235_v43 = vld [vmem:[%s5158_s30 + $0x1f30] sm:$0xff]  ;;  %v1232_v45 = vld [vmem:[%s5158_s30 + $0x1f18] sm:$0xff] }
 0x329   : > { %4120 = vmatprep.subr.mxu1 %v1144_v52  ;;  %4050 = vmatpush1.msra.mxu0 %v1015_v48  ;;  %v1103_v39 = vld [vmem:[%s5158_s30 + $0x1b10] sm:$0xff]  ;;  %v1100_v52 = vld [vmem:[%s5158_s30 + $0x1af8] sm:$0xff] }
 0x32a   : > { %4121 = vmatpush1.msra.mxu1 %v1143_v50  ;;  %4051 = vmatprep.subr.mxu0 %v1012_v44  ;;  %v1231_v47 = vld [vmem:[%s5158_s30 + $0x1f10] sm:$0xff]  ;;  %v1228_v48 = vld [vmem:[%s5158_s30 + $0x1ef8] sm:$0xff] }
 0x32b   : > { %4122 = vmatprep.subr.mxu1 %v1140_v51  ;;  %4052 = vmatpush1.msra.mxu0 %v1011_v9  ;;  %v1099_v50 = vld [vmem:[%s5158_s30 + $0x1af0] sm:$0xff]  ;;  %v1096_v51 = vld [vmem:[%s5158_s30 + $0x1ad8] sm:$0xff] }
 0x32c   : > { %4123 = vmatpush1.msra.mxu1 %v1139_v54  ;;  %4053 = vmatprep.subr.mxu0 %v1008_v11  ;;  %v1227_v44 = vld [vmem:[%s5158_s30 + $0x1ef0] sm:$0xff]  ;;  %v1224_v9 = vld [vmem:[%s5158_s30 + $0x1ed8] sm:$0xff] }
 0x32d   : > { %4124 = vmatprep.subr.mxu1 %v1136_v55  ;;  %4054 = vmatpush1.msra.mxu0 %v1007_v63  ;;  %v1095_v54 = vld [vmem:[%s5158_s30 + $0x1ad0] sm:$0xff]  ;;  %v1092_v55 = vld [vmem:[%s5158_s30 + $0x1ab8] sm:$0xff] }
 0x32e   : > { %4125 = vmatpush1.msra.mxu1 %v1135_v2  ;;  %4055 = vmatprep.subr.mxu0 %v1132_v56  ;;  %v1223_v11 = vld [vmem:[%s5158_s30 + $0x1ed0] sm:$0xff]  ;;  %v1220_v63 = vld [vmem:[%s5158_s30 + $0x1eb8] sm:$0xff] }
 0x32f   : > { %4126 = vmatprep.subr.mxu1 %v1260_v57  ;;  %4056 = vmatpush2.msra.mxu0 %v1131_v58  ;;  %v1091_v2 = vld [vmem:[%s5158_s30 + $0x1ab0] sm:$0xff]  ;;  %v1088_v57 = vld [vmem:[%s5158_s30 + $0x1a98] sm:$0xff] }
 0x330   : > { %4127 = vmatpush2.msra.mxu1 %v1259_v59  ;;  %4057 = vmatprep.subr.mxu0 %v1128_v60  ;;  %v1219_v56 = vld [vmem:[%s5158_s30 + $0x1eb0] sm:$0xff]  ;;  %v1216_v58 = vld [vmem:[%s5158_s30 + $0x1e98] sm:$0xff] }
 0x331   : > { %4128 = vmatprep.subr.mxu1 %v1256_v62  ;;  %4058 = vmatpush2.msra.mxu0 %v1127_v1  ;;  %v1087_v59 = vld [vmem:[%s5158_s30 + $0x1a90] sm:$0xff]  ;;  %v1084_v62 = vld [vmem:[%s5158_s30 + $0x1a78] sm:$0xff] }
 0x332   : > { %4129 = vmatpush2.msra.mxu1 %v1255_v3  ;;  %4059 = vmatprep.subr.mxu0 %v1124_v5  ;;  %v1215_v60 = vld [vmem:[%s5158_s30 + $0x1e90] sm:$0xff]  ;;  %v1212_v1 = vld [vmem:[%s5158_s30 + $0x1e78] sm:$0xff] }
 0x333   : > { %4130 = vmatprep.subr.mxu1 %v1252_v8  ;;  %4060 = vmatpush2.msra.mxu0 %v1123_v13  ;;  %v1083_v3 = vld [vmem:[%s5158_s30 + $0x1a70] sm:$0xff]  ;;  %v1080_v8 = vld [vmem:[%s5158_s30 + $0x1a58] sm:$0xff] }
 0x334   : > { %4131 = vmatpush2.msra.mxu1 %v1251_v14  ;;  %4061 = vmatprep.subr.mxu0 %v1120_v17  ;;  %v1211_v5 = vld [vmem:[%s5158_s30 + $0x1e70] sm:$0xff]  ;;  %v1208_v13 = vld [vmem:[%s5158_s30 + $0x1e58] sm:$0xff] }
 0x335   : > { %4132 = vmatprep.subr.mxu1 %v1248_v22  ;;  %4062 = vmatpush2.msra.mxu0 %v1119_v26  ;;  %v1079_v14 = vld [vmem:[%s5158_s30 + $0x1a50] sm:$0xff]  ;;  %v1076_v22 = vld [vmem:[%s5158_s30 + $0x1a38] sm:$0xff] }
 0x336   : > { %4133 = vmatpush2.msra.mxu1 %v1247_v27  ;;  %4063 = vmatprep.subr.mxu0 %v1116_v30  ;;  %v1207_v17 = vld [vmem:[%s5158_s30 + $0x1e50] sm:$0xff]  ;;  %v1204_v26 = vld [vmem:[%s5158_s30 + $0x1e38] sm:$0xff] }
 0x337   : > { %4134 = vmatprep.subr.mxu1 %v1244_v25  ;;  %4064 = vmatpush2.msra.mxu0 %v1115_v33  ;;  %v1075_v27 = vld [vmem:[%s5158_s30 + $0x1a30] sm:$0xff]  ;;  %v1072_v25 = vld [vmem:[%s5158_s30 + $0x1a18] sm:$0xff] }
 0x338   : > { %4135 = vmatpush2.msra.mxu1 %v1243_v15  ;;  %4065 = vmatprep.subr.mxu0 %v1112_v34  ;;  %v1203_v30 = vld [vmem:[%s5158_s30 + $0x1e30] sm:$0xff]  ;;  %v1200_v33 = vld [vmem:[%s5158_s30 + $0x1e18] sm:$0xff] }
 0x339   : > { %4136 = vmatprep.subr.mxu1 %v1240_v28  ;;  %4066 = vmatpush2.msra.mxu0 %v1111_v37  ;;  %v1071_v15 = vld [vmem:[%s5158_s30 + $0x1a10] sm:$0xff]  ;;  %v1324_v28 = vld [vmem:[%s5158_s30 + $0x21f8] sm:$0xff] }
 0x33a   : > { %4137 = vmatpush2.msra.mxu1 %v1239_v38  ;;  %4067 = vmatprep.subr.mxu0 %v1108_v20  ;;  %v1199_v34 = vld [vmem:[%s5158_s30 + $0x1e10] sm:$0xff]  ;;  %v1452_v37 = vld [vmem:[%s5158_s30 + $0x25f8] sm:$0xff] }
 0x33b   : > { %4138 = vmatprep.subr.mxu1 %v1236_v40  ;;  %4068 = vmatpush2.msra.mxu0 %v1107_v41  ;;  %v1323_v38 = vld [vmem:[%s5158_s30 + $0x21f0] sm:$0xff]  ;;  %v1320_v40 = vld [vmem:[%s5158_s30 + $0x21d8] sm:$0xff] }
 0x33c   : > { %4139 = vmatpush2.msra.mxu1 %v1235_v43  ;;  %4069 = vmatprep.subr.mxu0 %v1104_v49  ;;  %v1451_v20 = vld [vmem:[%s5158_s30 + $0x25f0] sm:$0xff]  ;;  %v1448_v41 = vld [vmem:[%s5158_s30 + $0x25d8] sm:$0xff] }
 0x33d   : > { %4140 = vmatprep.subr.mxu1 %v1232_v45  ;;  %4070 = vmatpush2.msra.mxu0 %v1103_v39  ;;  %v1447_v43 = vld [vmem:[%s5158_s30 + $0x25d0] sm:$0xff]  ;;  %v1444_v49 = vld [vmem:[%s5158_s30 + $0x25b8] sm:$0xff] }
 0x33e   : > { %4141 = vmatpush2.msra.mxu1 %v1231_v47  ;;  %4071 = vmatprep.subr.mxu0 %v1100_v52  ;;  %v1443_v45 = vld [vmem:[%s5158_s30 + $0x25b0] sm:$0xff]  ;;  %v1312_v39 = vld [vmem:[%s5158_s30 + $0x2198] sm:$0xff] }
 0x33f   : > { %4142 = vmatprep.subr.mxu1 %v1228_v48  ;;  %4072 = vmatpush2.msra.mxu0 %v1099_v50  ;;  %v1311_v47 = vld [vmem:[%s5158_s30 + $0x2190] sm:$0xff]  ;;  %v1308_v48 = vld [vmem:[%s5158_s30 + $0x2178] sm:$0xff] }
 0x340   : > { %4143 = vmatpush2.msra.mxu1 %v1227_v44  ;;  %4073 = vmatprep.subr.mxu0 %v1096_v51  ;;  %v1439_v52 = vld [vmem:[%s5158_s30 + $0x2590] sm:$0xff]  ;;  %v1436_v50 = vld [vmem:[%s5158_s30 + $0x2578] sm:$0xff] }
 0x341   : > { %4144 = vmatprep.subr.mxu1 %v1224_v9  ;;  %4074 = vmatpush2.msra.mxu0 %v1095_v54  ;;  %v1307_v44 = vld [vmem:[%s5158_s30 + $0x2170] sm:$0xff]  ;;  %v1304_v9 = vld [vmem:[%s5158_s30 + $0x2158] sm:$0xff] }
 0x342   : > { %4145 = vmatpush2.msra.mxu1 %v1223_v11  ;;  %4075 = vmatprep.subr.mxu0 %v1092_v55  ;;  %v1435_v51 = vld [vmem:[%s5158_s30 + $0x2570] sm:$0xff]  ;;  %v1432_v54 = vld [vmem:[%s5158_s30 + $0x2558] sm:$0xff] }
 0x343   : > { %4146 = vmatprep.subr.mxu1 %v1220_v63  ;;  %4076 = vmatpush2.msra.mxu0 %v1091_v2  ;;  %v1303_v11 = vld [vmem:[%s5158_s30 + $0x2150] sm:$0xff]  ;;  %v1300_v63 = vld [vmem:[%s5158_s30 + $0x2138] sm:$0xff] }
 0x344   : > { %4147 = vmatpush2.msra.mxu1 %v1219_v56  ;;  %4077 = vmatprep.subr.mxu0 %v1088_v57  ;;  %v1431_v55 = vld [vmem:[%s5158_s30 + $0x2550] sm:$0xff]  ;;  %v1428_v2 = vld [vmem:[%s5158_s30 + $0x2538] sm:$0xff] }
 0x345   : > { %4148 = vmatprep.subr.mxu1 %v1216_v58  ;;  %4078 = vmatpush2.msra.mxu0 %v1087_v59  ;;  %v1299_v56 = vld [vmem:[%s5158_s30 + $0x2130] sm:$0xff]  ;;  %v1296_v58 = vld [vmem:[%s5158_s30 + $0x2118] sm:$0xff] }
 0x346   : > { %4149 = vmatpush2.msra.mxu1 %v1215_v60  ;;  %4079 = vmatprep.subr.mxu0 %v1084_v62  ;;  %v1427_v57 = vld [vmem:[%s5158_s30 + $0x2530] sm:$0xff]  ;;  %v1424_v59 = vld [vmem:[%s5158_s30 + $0x2518] sm:$0xff] }
 0x347   : > { %4150 = vmatprep.subr.mxu1 %v1212_v1  ;;  %4080 = vmatpush2.msra.mxu0 %v1083_v3  ;;  %v1295_v60 = vld [vmem:[%s5158_s30 + $0x2110] sm:$0xff]  ;;  %v1292_v1 = vld [vmem:[%s5158_s30 + $0x20f8] sm:$0xff] }
 0x348   : > { %4151 = vmatpush2.msra.mxu1 %v1211_v5  ;;  %4081 = vmatprep.subr.mxu0 %v1080_v8  ;;  %v1423_v62 = vld [vmem:[%s5158_s30 + $0x2510] sm:$0xff]  ;;  %v1420_v3 = vld [vmem:[%s5158_s30 + $0x24f8] sm:$0xff] }
 0x349   : > { %4152 = vmatprep.subr.mxu1 %v1208_v13  ;;  %4082 = vmatpush2.msra.mxu0 %v1079_v14  ;;  %v1291_v5 = vld [vmem:[%s5158_s30 + $0x20f0] sm:$0xff]  ;;  %v1288_v13 = vld [vmem:[%s5158_s30 + $0x20d8] sm:$0xff] }
 0x34a   : > { %4153 = vmatpush2.msra.mxu1 %v1207_v17  ;;  %4083 = vmatprep.subr.mxu0 %v1076_v22  ;;  %v1419_v8 = vld [vmem:[%s5158_s30 + $0x24f0] sm:$0xff]  ;;  %v1416_v14 = vld [vmem:[%s5158_s30 + $0x24d8] sm:$0xff] }
 0x34b   : > { %4154 = vmatprep.subr.mxu1 %v1204_v26  ;;  %4084 = vmatpush2.msra.mxu0 %v1075_v27  ;;  %v1287_v17 = vld [vmem:[%s5158_s30 + $0x20d0] sm:$0xff]  ;;  %v1284_v26 = vld [vmem:[%s5158_s30 + $0x20b8] sm:$0xff] }
 0x34c   : > { %4155 = vmatpush2.msra.mxu1 %v1203_v30  ;;  %4085 = vmatprep.subr.mxu0 %v1072_v25  ;;  %v1415_v22 = vld [vmem:[%s5158_s30 + $0x24d0] sm:$0xff]  ;;  %v1412_v27 = vld [vmem:[%s5158_s30 + $0x24b8] sm:$0xff] }
 0x34d   : > { %4156 = vmatprep.subr.mxu1 %v1200_v33  ;;  %4086 = vmatpush2.msra.mxu0 %v1071_v15  ;;  %v1283_v30 = vld [vmem:[%s5158_s30 + $0x20b0] sm:$0xff]  ;;  %v1280_v33 = vld [vmem:[%s5158_s30 + $0x2098] sm:$0xff] }
 0x34e   : > { %4087 = vmatprep.mubr.f32.mxu0 %v5757_v24  ;;  %4157 = vmatpush2.msra.mxu1 %v1199_v34  ;;  %v1319_v24 = vld [vmem:[%s5158_s30 + $0x21d0] sm:$0xff]  ;;  %v1408_v15 = vld [vmem:[%s5158_s30 + $0x2498] sm:$0xff] }
 0x34f   : > { %4088 = vmatmul.mubr.f32.vlgmr.msra.gmra.mxu0 %v5742_v12  ;;  %4158 = vmatprep.mubr.f32.mxu1 %v5763_v29  ;;  %v1316_v12 = vld [vmem:[%s5158_s30 + $0x21b8] sm:$0xff]  ;;  %v1315_v29 = vld [vmem:[%s5158_s30 + $0x21b0] sm:$0xff] }
 0x350   : > { %4165 = vmatprep.subr.mxu0 %v1324_v28  ;;  %4236 = vmatprep.subr.mxu1 %v1452_v37  ;;  %v1411_v25 = vld [vmem:[%s5158_s30 + $0x24b0] sm:$0xff]  ;;  %v1276_v37 = vld [vmem:[%s5158_s30 + $0x2078] sm:$0xff] }
 0x351   : > { %4159 = vmatmul.mubr.f32.vlgmr.msra.gmra.mxu1 %v5749_v18  ;;  %4166 = vmatpush1.msra.mxu0 %v1323_v38  ;;  %v1440_v18 = vld [vmem:[%s5158_s30 + $0x2598] sm:$0xff]  ;;  %v1279_v34 = vld [vmem:[%s5158_s30 + $0x2090] sm:$0xff] }
 0x352   : > { %4237 = vmatpush1.msra.mxu1 %v1451_v20  ;;  %4167 = vmatprep.subr.mxu0 %v1320_v40  ;;  %v1407_v28 = vld [vmem:[%s5158_s30 + $0x2490] sm:$0xff]  ;;  %v1404_v38 = vld [vmem:[%s5158_s30 + $0x2478] sm:$0xff] }
 0x353   : > { %4238 = vmatprep.subr.mxu1 %v1448_v41  ;;  %4168 = vmatpush1.msra.mxu0 %v1319_v24  ;;  %v1275_v20 = vld [vmem:[%s5158_s30 + $0x2070] sm:$0xff]  ;;  %v1272_v41 = vld [vmem:[%s5158_s30 + $0x2058] sm:$0xff] }
 0x354   : > { %4239 = vmatpush1.msra.mxu1 %v1447_v43  ;;  %4169 = vmatprep.subr.mxu0 %v1316_v12  ;;  %v1403_v40 = vld [vmem:[%s5158_s30 + $0x2470] sm:$0xff]  ;;  %v1400_v24 = vld [vmem:[%s5158_s30 + $0x2458] sm:$0xff] }
 0x355   : > { %4240 = vmatprep.subr.mxu1 %v1444_v49  ;;  %4170 = vmatpush1.msra.mxu0 %v1315_v29  ;;  %v1271_v43 = vld [vmem:[%s5158_s30 + $0x2050] sm:$0xff]  ;;  %v1268_v49 = vld [vmem:[%s5158_s30 + $0x2038] sm:$0xff] }
 0x356   : > { %4241 = vmatpush1.msra.mxu1 %v1443_v45  ;;  %4171 = vmatprep.subr.mxu0 %v1312_v39  ;;  %v1399_v12 = vld [vmem:[%s5158_s30 + $0x2450] sm:$0xff]  ;;  %v1396_v29 = vld [vmem:[%s5158_s30 + $0x2438] sm:$0xff] }
 0x357   : > { %4242 = vmatprep.subr.mxu1 %v1440_v18  ;;  %4172 = vmatpush1.msra.mxu0 %v1311_v47  ;;  %v1267_v45 = vld [vmem:[%s5158_s30 + $0x2030] sm:$0xff]  ;;  %v1264_v18 = vld [vmem:[%s5158_s30 + $0x2018] sm:$0xff] }
 0x358   : > { %4243 = vmatpush1.msra.mxu1 %v1439_v52  ;;  %4173 = vmatprep.subr.mxu0 %v1308_v48  ;;  %v1395_v39 = vld [vmem:[%s5158_s30 + $0x2430] sm:$0xff]  ;;  %v1392_v47 = vld [vmem:[%s5158_s30 + $0x2418] sm:$0xff] }
 0x359   : > { %4244 = vmatprep.subr.mxu1 %v1436_v50  ;;  %4174 = vmatpush1.msra.mxu0 %v1307_v44  ;;  %v1263_v52 = vld [vmem:[%s5158_s30 + $0x2010] sm:$0xff]  ;;  %v1388_v50 = vld [vmem:[%s5158_s30 + $0x23f8] sm:$0xff] }
 0x35a   : > { %4245 = vmatpush1.msra.mxu1 %v1435_v51  ;;  %4175 = vmatprep.subr.mxu0 %v1304_v9  ;;  %v1391_v48 = vld [vmem:[%s5158_s30 + $0x2410] sm:$0xff]  ;;  %v1516_v44 = vld [vmem:[%s5158_s30 + $0x27f8] sm:$0xff] }
 0x35b   : > { %4246 = vmatprep.subr.mxu1 %v1432_v54  ;;  %4176 = vmatpush1.msra.mxu0 %v1303_v11  ;;  %v1387_v51 = vld [vmem:[%s5158_s30 + $0x23f0] sm:$0xff]  ;;  %v1384_v54 = vld [vmem:[%s5158_s30 + $0x23d8] sm:$0xff] }
 0x35c   : > { %4247 = vmatpush1.msra.mxu1 %v1431_v55  ;;  %4177 = vmatprep.subr.mxu0 %v1300_v63  ;;  %v1515_v9 = vld [vmem:[%s5158_s30 + $0x27f0] sm:$0xff]  ;;  %v1512_v11 = vld [vmem:[%s5158_s30 + $0x27d8] sm:$0xff] }
 0x35d   : > { %4248 = vmatprep.subr.mxu1 %v1428_v2  ;;  %4178 = vmatpush1.msra.mxu0 %v1299_v56  ;;  %v1383_v55 = vld [vmem:[%s5158_s30 + $0x23d0] sm:$0xff]  ;;  %v1380_v2 = vld [vmem:[%s5158_s30 + $0x23b8] sm:$0xff] }
 0x35e   : > { %4249 = vmatpush1.msra.mxu1 %v1427_v57  ;;  %4179 = vmatprep.subr.mxu0 %v1296_v58  ;;  %v1511_v63 = vld [vmem:[%s5158_s30 + $0x27d0] sm:$0xff]  ;;  %v1508_v56 = vld [vmem:[%s5158_s30 + $0x27b8] sm:$0xff] }
 0x35f   : > { %4250 = vmatprep.subr.mxu1 %v1424_v59  ;;  %4180 = vmatpush1.msra.mxu0 %v1295_v60  ;;  %v1379_v57 = vld [vmem:[%s5158_s30 + $0x23b0] sm:$0xff]  ;;  %v1376_v59 = vld [vmem:[%s5158_s30 + $0x2398] sm:$0xff] }
 0x360   : > { %4251 = vmatpush1.msra.mxu1 %v1423_v62  ;;  %4181 = vmatprep.subr.mxu0 %v1292_v1  ;;  %v1507_v58 = vld [vmem:[%s5158_s30 + $0x27b0] sm:$0xff]  ;;  %v1504_v60 = vld [vmem:[%s5158_s30 + $0x2798] sm:$0xff] }
 0x361   : > { %4252 = vmatprep.subr.mxu1 %v1420_v3  ;;  %4182 = vmatpush1.msra.mxu0 %v1291_v5  ;;  %v1375_v62 = vld [vmem:[%s5158_s30 + $0x2390] sm:$0xff]  ;;  %v1372_v3 = vld [vmem:[%s5158_s30 + $0x2378] sm:$0xff] }
 0x362   : > { %4253 = vmatpush1.msra.mxu1 %v1419_v8  ;;  %4183 = vmatprep.subr.mxu0 %v1288_v13  ;;  %v1503_v1 = vld [vmem:[%s5158_s30 + $0x2790] sm:$0xff]  ;;  %v1500_v5 = vld [vmem:[%s5158_s30 + $0x2778] sm:$0xff] }
 0x363   : > { %4254 = vmatprep.subr.mxu1 %v1416_v14  ;;  %4184 = vmatpush1.msra.mxu0 %v1287_v17  ;;  %v1371_v8 = vld [vmem:[%s5158_s30 + $0x2370] sm:$0xff]  ;;  %v1368_v14 = vld [vmem:[%s5158_s30 + $0x2358] sm:$0xff] }
 0x364   : > { %4255 = vmatpush1.msra.mxu1 %v1415_v22  ;;  %4185 = vmatprep.subr.mxu0 %v1284_v26  ;;  %v1499_v13 = vld [vmem:[%s5158_s30 + $0x2770] sm:$0xff]  ;;  %v1496_v17 = vld [vmem:[%s5158_s30 + $0x2758] sm:$0xff] }
 0x365   : > { %4256 = vmatprep.subr.mxu1 %v1412_v27  ;;  %4186 = vmatpush1.msra.mxu0 %v1283_v30  ;;  %v1367_v22 = vld [vmem:[%s5158_s30 + $0x2350] sm:$0xff]  ;;  %v1364_v27 = vld [vmem:[%s5158_s30 + $0x2338] sm:$0xff] }
 0x366   : > { %4257 = vmatpush1.msra.mxu1 %v1411_v25  ;;  %4187 = vmatprep.subr.mxu0 %v1280_v33  ;;  %v1495_v26 = vld [vmem:[%s5158_s30 + $0x2750] sm:$0xff]  ;;  %v1492_v30 = vld [vmem:[%s5158_s30 + $0x2738] sm:$0xff] }
 0x367   : > { %4258 = vmatprep.subr.mxu1 %v1408_v15  ;;  %4188 = vmatpush1.msra.mxu0 %v1279_v34  ;;  %v1363_v25 = vld [vmem:[%s5158_s30 + $0x2330] sm:$0xff]  ;;  %v1360_v15 = vld [vmem:[%s5158_s30 + $0x2318] sm:$0xff] }
 0x368   : > { %4259 = vmatpush1.msra.mxu1 %v1407_v28  ;;  %4189 = vmatprep.subr.mxu0 %v1276_v37  ;;  %v1491_v33 = vld [vmem:[%s5158_s30 + $0x2730] sm:$0xff]  ;;  %v1488_v34 = vld [vmem:[%s5158_s30 + $0x2718] sm:$0xff] }
 0x369   : > { %4260 = vmatprep.subr.mxu1 %v1404_v38  ;;  %4190 = vmatpush1.msra.mxu0 %v1275_v20  ;;  %v1359_v28 = vld [vmem:[%s5158_s30 + $0x2310] sm:$0xff]  ;;  %v1356_v38 = vld [vmem:[%s5158_s30 + $0x22f8] sm:$0xff] }
 0x36a   : > { %4261 = vmatpush1.msra.mxu1 %v1403_v40  ;;  %4191 = vmatprep.subr.mxu0 %v1272_v41  ;;  %v1487_v37 = vld [vmem:[%s5158_s30 + $0x2710] sm:$0xff]  ;;  %v1484_v20 = vld [vmem:[%s5158_s30 + $0x26f8] sm:$0xff] }
 0x36b   : > { %4262 = vmatprep.subr.mxu1 %v1400_v24  ;;  %4192 = vmatpush1.msra.mxu0 %v1271_v43  ;;  %v1355_v40 = vld [vmem:[%s5158_s30 + $0x22f0] sm:$0xff]  ;;  %v1352_v24 = vld [vmem:[%s5158_s30 + $0x22d8] sm:$0xff] }
 0x36c   : > { %4263 = vmatpush1.msra.mxu1 %v1399_v12  ;;  %4193 = vmatprep.subr.mxu0 %v1268_v49  ;;  %v1483_v41 = vld [vmem:[%s5158_s30 + $0x26f0] sm:$0xff]  ;;  %v1480_v43 = vld [vmem:[%s5158_s30 + $0x26d8] sm:$0xff] }
 0x36d   : > { %4264 = vmatprep.subr.mxu1 %v1396_v29  ;;  %4194 = vmatpush1.msra.mxu0 %v1267_v45  ;;  %v1351_v12 = vld [vmem:[%s5158_s30 + $0x22d0] sm:$0xff]  ;;  %v1348_v29 = vld [vmem:[%s5158_s30 + $0x22b8] sm:$0xff] }
 0x36e   : > { %4265 = vmatpush1.msra.mxu1 %v1395_v39  ;;  %4195 = vmatprep.subr.mxu0 %v1264_v18  ;;  %v1479_v49 = vld [vmem:[%s5158_s30 + $0x26d0] sm:$0xff]  ;;  %v1476_v45 = vld [vmem:[%s5158_s30 + $0x26b8] sm:$0xff] }
 0x36f   : > { %4266 = vmatprep.subr.mxu1 %v1392_v47  ;;  %4196 = vmatpush1.msra.mxu0 %v1263_v52  ;;  %v1347_v39 = vld [vmem:[%s5158_s30 + $0x22b0] sm:$0xff]  ;;  %v1344_v47 = vld [vmem:[%s5158_s30 + $0x2298] sm:$0xff] }
 0x370   : > { %4267 = vmatpush1.msra.mxu1 %v1391_v48  ;;  %4197 = vmatprep.subr.mxu0 %v1388_v50  ;;  %v1475_v18 = vld [vmem:[%s5158_s30 + $0x26b0] sm:$0xff]  ;;  %v1472_v52 = vld [vmem:[%s5158_s30 + $0x2698] sm:$0xff] }
 0x371   : > { %4268 = vmatprep.subr.mxu1 %v1516_v44  ;;  %4198 = vmatpush2.msra.mxu0 %v1387_v51  ;;  %v1343_v48 = vld [vmem:[%s5158_s30 + $0x2290] sm:$0xff]  ;;  %v1340_v44 = vld [vmem:[%s5158_s30 + $0x2278] sm:$0xff] }
 0x372   : > { %4269 = vmatpush2.msra.mxu1 %v1515_v9  ;;  %4199 = vmatprep.subr.mxu0 %v1384_v54  ;;  %v1471_v50 = vld [vmem:[%s5158_s30 + $0x2690] sm:$0xff]  ;;  %v1468_v51 = vld [vmem:[%s5158_s30 + $0x2678] sm:$0xff] }
 0x373   : > { %4270 = vmatprep.subr.mxu1 %v1512_v11  ;;  %4200 = vmatpush2.msra.mxu0 %v1383_v55  ;;  %v1339_v9 = vld [vmem:[%s5158_s30 + $0x2270] sm:$0xff]  ;;  %v1336_v11 = vld [vmem:[%s5158_s30 + $0x2258] sm:$0xff] }
 0x374   : > { %4271 = vmatpush2.msra.mxu1 %v1511_v63  ;;  %4201 = vmatprep.subr.mxu0 %v1380_v2  ;;  %v1467_v54 = vld [vmem:[%s5158_s30 + $0x2670] sm:$0xff]  ;;  %v1464_v55 = vld [vmem:[%s5158_s30 + $0x2658] sm:$0xff] }
 0x375   : > { %4272 = vmatprep.subr.mxu1 %v1508_v56  ;;  %4202 = vmatpush2.msra.mxu0 %v1379_v57  ;;  %v1335_v63 = vld [vmem:[%s5158_s30 + $0x2250] sm:$0xff]  ;;  %v1332_v56 = vld [vmem:[%s5158_s30 + $0x2238] sm:$0xff] }
 0x376   : > { %4273 = vmatpush2.msra.mxu1 %v1507_v58  ;;  %4203 = vmatprep.subr.mxu0 %v1376_v59  ;;  %v1463_v2 = vld [vmem:[%s5158_s30 + $0x2650] sm:$0xff]  ;;  %v1460_v57 = vld [vmem:[%s5158_s30 + $0x2638] sm:$0xff] }
 0x377   : > { %4274 = vmatprep.subr.mxu1 %v1504_v60  ;;  %4204 = vmatpush2.msra.mxu0 %v1375_v62  ;;  %v1331_v58 = vld [vmem:[%s5158_s30 + $0x2230] sm:$0xff]  ;;  %v1328_v60 = vld [vmem:[%s5158_s30 + $0x2218] sm:$0xff] }
 0x378   : > { %4275 = vmatpush2.msra.mxu1 %v1503_v1  ;;  %4205 = vmatprep.subr.mxu0 %v1372_v3  ;;  %v1459_v59 = vld [vmem:[%s5158_s30 + $0x2630] sm:$0xff]  ;;  %v1456_v62 = vld [vmem:[%s5158_s30 + $0x2618] sm:$0xff] }
 0x379   : > { %4276 = vmatprep.subr.mxu1 %v1500_v5  ;;  %4206 = vmatpush2.msra.mxu0 %v1371_v8  ;;  %v1327_v1 = vld [vmem:[%s5158_s30 + $0x2210] sm:$0xff]  ;;  %v1580_v5 = vld [vmem:[%s5158_s30 + $0x29f8] sm:$0xff] }
 0x37a   : > { %4277 = vmatpush2.msra.mxu1 %v1499_v13  ;;  %4207 = vmatprep.subr.mxu0 %v1368_v14  ;;  %v1455_v3 = vld [vmem:[%s5158_s30 + $0x2610] sm:$0xff]  ;;  %v1708_v8 = vld [vmem:[%s5158_s30 + $0x2df8] sm:$0xff] }
 0x37b   : > { %4278 = vmatprep.subr.mxu1 %v1496_v17  ;;  %4208 = vmatpush2.msra.mxu0 %v1367_v22  ;;  %v1579_v13 = vld [vmem:[%s5158_s30 + $0x29f0] sm:$0xff]  ;;  %v1576_v17 = vld [vmem:[%s5158_s30 + $0x29d8] sm:$0xff] }
 0x37c   : > { %4279 = vmatpush2.msra.mxu1 %v1495_v26  ;;  %4209 = vmatprep.subr.mxu0 %v1364_v27  ;;  %v1707_v14 = vld [vmem:[%s5158_s30 + $0x2df0] sm:$0xff]  ;;  %v1704_v22 = vld [vmem:[%s5158_s30 + $0x2dd8] sm:$0xff] }
 0x37d   : > { %4280 = vmatprep.subr.mxu1 %v1492_v30  ;;  %4210 = vmatpush2.msra.mxu0 %v1363_v25  ;;  %v1703_v26 = vld [vmem:[%s5158_s30 + $0x2dd0] sm:$0xff]  ;;  %v1700_v27 = vld [vmem:[%s5158_s30 + $0x2db8] sm:$0xff] }
 0x37e   : > { %4281 = vmatpush2.msra.mxu1 %v1491_v33  ;;  %4211 = vmatprep.subr.mxu0 %v1360_v15  ;;  %v1699_v30 = vld [vmem:[%s5158_s30 + $0x2db0] sm:$0xff]  ;;  %v1568_v25 = vld [vmem:[%s5158_s30 + $0x2998] sm:$0xff] }
 0x37f   : > { %4282 = vmatprep.subr.mxu1 %v1488_v34  ;;  %4212 = vmatpush2.msra.mxu0 %v1359_v28  ;;  %v1567_v33 = vld [vmem:[%s5158_s30 + $0x2990] sm:$0xff]  ;;  %v1564_v34 = vld [vmem:[%s5158_s30 + $0x2978] sm:$0xff] }
 0x380   : > { %4283 = vmatpush2.msra.mxu1 %v1487_v37  ;;  %4213 = vmatprep.subr.mxu0 %v1356_v38  ;;  %v1695_v15 = vld [vmem:[%s5158_s30 + $0x2d90] sm:$0xff]  ;;  %v1692_v28 = vld [vmem:[%s5158_s30 + $0x2d78] sm:$0xff] }
 0x381   : > { %4284 = vmatprep.subr.mxu1 %v1484_v20  ;;  %4214 = vmatpush2.msra.mxu0 %v1355_v40  ;;  %v1563_v37 = vld [vmem:[%s5158_s30 + $0x2970] sm:$0xff]  ;;  %v1560_v20 = vld [vmem:[%s5158_s30 + $0x2958] sm:$0xff] }
 0x382   : > { %4285 = vmatpush2.msra.mxu1 %v1483_v41  ;;  %4215 = vmatprep.subr.mxu0 %v1352_v24  ;;  %v1691_v38 = vld [vmem:[%s5158_s30 + $0x2d70] sm:$0xff]  ;;  %v1688_v40 = vld [vmem:[%s5158_s30 + $0x2d58] sm:$0xff] }
 0x383   : > { %4286 = vmatprep.subr.mxu1 %v1480_v43  ;;  %4216 = vmatpush2.msra.mxu0 %v1351_v12  ;;  %v1559_v41 = vld [vmem:[%s5158_s30 + $0x2950] sm:$0xff]  ;;  %v1556_v43 = vld [vmem:[%s5158_s30 + $0x2938] sm:$0xff] }
 0x384   : > { %4287 = vmatpush2.msra.mxu1 %v1479_v49  ;;  %4217 = vmatprep.subr.mxu0 %v1348_v29  ;;  %v1687_v24 = vld [vmem:[%s5158_s30 + $0x2d50] sm:$0xff]  ;;  %v1684_v12 = vld [vmem:[%s5158_s30 + $0x2d38] sm:$0xff] }
 0x385   : > { %4288 = vmatprep.subr.mxu1 %v1476_v45  ;;  %4218 = vmatpush2.msra.mxu0 %v1347_v39  ;;  %v1555_v49 = vld [vmem:[%s5158_s30 + $0x2930] sm:$0xff]  ;;  %v1552_v45 = vld [vmem:[%s5158_s30 + $0x2918] sm:$0xff] }
 0x386   : > { %4289 = vmatpush2.msra.mxu1 %v1475_v18  ;;  %4219 = vmatprep.subr.mxu0 %v1344_v47  ;;  %v1683_v29 = vld [vmem:[%s5158_s30 + $0x2d30] sm:$0xff]  ;;  %v1680_v39 = vld [vmem:[%s5158_s30 + $0x2d18] sm:$0xff] }
 0x387   : > { %4290 = vmatprep.subr.mxu1 %v1472_v52  ;;  %4220 = vmatpush2.msra.mxu0 %v1343_v48  ;;  %v1551_v18 = vld [vmem:[%s5158_s30 + $0x2910] sm:$0xff]  ;;  %v1548_v52 = vld [vmem:[%s5158_s30 + $0x28f8] sm:$0xff] }
 0x388   : > { %4291 = vmatpush2.msra.mxu1 %v1471_v50  ;;  %4221 = vmatprep.subr.mxu0 %v1340_v44  ;;  %v1679_v47 = vld [vmem:[%s5158_s30 + $0x2d10] sm:$0xff]  ;;  %v1676_v48 = vld [vmem:[%s5158_s30 + $0x2cf8] sm:$0xff] }
 0x389   : > { %4292 = vmatprep.subr.mxu1 %v1468_v51  ;;  %4222 = vmatpush2.msra.mxu0 %v1339_v9  ;;  %v1547_v50 = vld [vmem:[%s5158_s30 + $0x28f0] sm:$0xff]  ;;  %v1544_v51 = vld [vmem:[%s5158_s30 + $0x28d8] sm:$0xff] }
 0x38a   : > { %4293 = vmatpush2.msra.mxu1 %v1467_v54  ;;  %4223 = vmatprep.subr.mxu0 %v1336_v11  ;;  %v1675_v44 = vld [vmem:[%s5158_s30 + $0x2cf0] sm:$0xff]  ;;  %v1672_v9 = vld [vmem:[%s5158_s30 + $0x2cd8] sm:$0xff] }
 0x38b   : > { %4294 = vmatprep.subr.mxu1 %v1464_v55  ;;  %4224 = vmatpush2.msra.mxu0 %v1335_v63  ;;  %v1543_v54 = vld [vmem:[%s5158_s30 + $0x28d0] sm:$0xff]  ;;  %v1540_v55 = vld [vmem:[%s5158_s30 + $0x28b8] sm:$0xff] }
 0x38c   : > { %4295 = vmatpush2.msra.mxu1 %v1463_v2  ;;  %4225 = vmatprep.subr.mxu0 %v1332_v56  ;;  %v1671_v11 = vld [vmem:[%s5158_s30 + $0x2cd0] sm:$0xff]  ;;  %v1668_v63 = vld [vmem:[%s5158_s30 + $0x2cb8] sm:$0xff] }
 0x38d   : > { %4296 = vmatprep.subr.mxu1 %v1460_v57  ;;  %4226 = vmatpush2.msra.mxu0 %v1331_v58  ;;  %v1539_v2 = vld [vmem:[%s5158_s30 + $0x28b0] sm:$0xff]  ;;  %v1536_v57 = vld [vmem:[%s5158_s30 + $0x2898] sm:$0xff] }
 0x38e   : > { %4297 = vmatpush2.msra.mxu1 %v1459_v59  ;;  %4227 = vmatprep.subr.mxu0 %v1328_v60  ;;  %v1667_v56 = vld [vmem:[%s5158_s30 + $0x2cb0] sm:$0xff]  ;;  %v1664_v58 = vld [vmem:[%s5158_s30 + $0x2c98] sm:$0xff] }
 0x38f   : > { %4298 = vmatprep.subr.mxu1 %v1456_v62  ;;  %4228 = vmatpush2.msra.mxu0 %v1327_v1  ;;  %v1535_v59 = vld [vmem:[%s5158_s30 + $0x2890] sm:$0xff]  ;;  %v1532_v62 = vld [vmem:[%s5158_s30 + $0x2878] sm:$0xff] }
 0x390   : > { %4229 = vmatprep.mubr.f32.mxu0 %v5904_v10  ;;  %4299 = vmatpush2.msra.mxu1 %v1455_v3  ;;  %v1575_v10 = vld [vmem:[%s5158_s30 + $0x29d0] sm:$0xff]  ;;  %v1660_v1 = vld [vmem:[%s5158_s30 + $0x2c78] sm:$0xff] }
 0x391   : > { %4230 = vmatmul.mubr.f32.vlgmr.msra.gmra.mxu0 %v5889_v61  ;;  %4300 = vmatprep.mubr.f32.mxu1 %v5910_v16  ;;  %v1572_v61 = vld [vmem:[%s5158_s30 + $0x29b8] sm:$0xff]  ;;  %v1571_v16 = vld [vmem:[%s5158_s30 + $0x29b0] sm:$0xff] }
 0x392   : > { %4307 = vmatprep.subr.mxu0 %v1580_v5  ;;  %4378 = vmatprep.subr.mxu1 %v1708_v8  ;;  %v1663_v60 = vld [vmem:[%s5158_s30 + $0x2c90] sm:$0xff]  ;;  %v1528_v8 = vld [vmem:[%s5158_s30 + $0x2858] sm:$0xff] }
 0x393   : > { %4301 = vmatmul.mubr.f32.vlgmr.msra.gmra.mxu1 %v5896_v4  ;;  %4308 = vmatpush1.msra.mxu0 %v1579_v13  ;;  %v1696_v4 = vld [vmem:[%s5158_s30 + $0x2d98] sm:$0xff]  ;;  %v1531_v3 = vld [vmem:[%s5158_s30 + $0x2870] sm:$0xff] }
 0x394   : > { %4379 = vmatpush1.msra.mxu1 %v1707_v14  ;;  %4309 = vmatprep.subr.mxu0 %v1576_v17  ;;  %v1659_v5 = vld [vmem:[%s5158_s30 + $0x2c70] sm:$0xff]  ;;  %v1656_v13 = vld [vmem:[%s5158_s30 + $0x2c58] sm:$0xff] }
 0x395   : > { %4380 = vmatprep.subr.mxu1 %v1704_v22  ;;  %4310 = vmatpush1.msra.mxu0 %v1575_v10  ;;  %v1527_v14 = vld [vmem:[%s5158_s30 + $0x2850] sm:$0xff]  ;;  %v1524_v22 = vld [vmem:[%s5158_s30 + $0x2838] sm:$0xff] }
 0x396   : > { %4381 = vmatpush1.msra.mxu1 %v1703_v26  ;;  %4311 = vmatprep.subr.mxu0 %v1572_v61  ;;  %v1655_v17 = vld [vmem:[%s5158_s30 + $0x2c50] sm:$0xff]  ;;  %v1652_v10 = vld [vmem:[%s5158_s30 + $0x2c38] sm:$0xff] }
 0x397   : > { %4382 = vmatprep.subr.mxu1 %v1700_v27  ;;  %4312 = vmatpush1.msra.mxu0 %v1571_v16  ;;  %v1523_v26 = vld [vmem:[%s5158_s30 + $0x2830] sm:$0xff]  ;;  %v1520_v27 = vld [vmem:[%s5158_s30 + $0x2818] sm:$0xff] }
 0x398   : > { %4383 = vmatpush1.msra.mxu1 %v1699_v30  ;;  %4313 = vmatprep.subr.mxu0 %v1568_v25  ;;  %v1651_v61 = vld [vmem:[%s5158_s30 + $0x2c30] sm:$0xff]  ;;  %v1648_v16 = vld [vmem:[%s5158_s30 + $0x2c18] sm:$0xff] }
 0x399   : > { %4384 = vmatprep.subr.mxu1 %v1696_v4  ;;  %4314 = vmatpush1.msra.mxu0 %v1567_v33  ;;  %v1519_v30 = vld [vmem:[%s5158_s30 + $0x2810] sm:$0xff]  ;;  %v1644_v4 = vld [vmem:[%s5158_s30 + $0x2bf8] sm:$0xff] }
 0x39a   : > { %4385 = vmatpush1.msra.mxu1 %v1695_v15  ;;  %4315 = vmatprep.subr.mxu0 %v1564_v34  ;;  %v1647_v25 = vld [vmem:[%s5158_s30 + $0x2c10] sm:$0xff]  ;;  %v1772_v33 = vld [vmem:[%s5158_s30 + $0x2ff8] sm:$0xff] }
 0x39b   : > { %4386 = vmatprep.subr.mxu1 %v1692_v28  ;;  %4316 = vmatpush1.msra.mxu0 %v1563_v37  ;;  %v1643_v15 = vld [vmem:[%s5158_s30 + $0x2bf0] sm:$0xff]  ;;  %v1640_v28 = vld [vmem:[%s5158_s30 + $0x2bd8] sm:$0xff] }
 0x39c   : > { %4387 = vmatpush1.msra.mxu1 %v1691_v38  ;;  %4317 = vmatprep.subr.mxu0 %v1560_v20  ;;  %v1771_v34 = vld [vmem:[%s5158_s30 + $0x2ff0] sm:$0xff]  ;;  %v1768_v37 = vld [vmem:[%s5158_s30 + $0x2fd8] sm:$0xff] }
 0x39d   : > { %4388 = vmatprep.subr.mxu1 %v1688_v40  ;;  %4318 = vmatpush1.msra.mxu0 %v1559_v41  ;;  %v1639_v38 = vld [vmem:[%s5158_s30 + $0x2bd0] sm:$0xff]  ;;  %v1636_v40 = vld [vmem:[%s5158_s30 + $0x2bb8] sm:$0xff] }
 0x39e   : > { %4389 = vmatpush1.msra.mxu1 %v1687_v24  ;;  %4319 = vmatprep.subr.mxu0 %v1556_v43  ;;  %v1767_v20 = vld [vmem:[%s5158_s30 + $0x2fd0] sm:$0xff]  ;;  %v1764_v41 = vld [vmem:[%s5158_s30 + $0x2fb8] sm:$0xff] }
 0x39f   : > { %4390 = vmatprep.subr.mxu1 %v1684_v12  ;;  %4320 = vmatpush1.msra.mxu0 %v1555_v49  ;;  %v1635_v24 = vld [vmem:[%s5158_s30 + $0x2bb0] sm:$0xff]  ;;  %v1632_v12 = vld [vmem:[%s5158_s30 + $0x2b98] sm:$0xff] }
 0x3a0   : > { %4391 = vmatpush1.msra.mxu1 %v1683_v29  ;;  %4321 = vmatprep.subr.mxu0 %v1552_v45  ;;  %v1763_v43 = vld [vmem:[%s5158_s30 + $0x2fb0] sm:$0xff]  ;;  %v1760_v49 = vld [vmem:[%s5158_s30 + $0x2f98] sm:$0xff] }
 0x3a1   : > { %4392 = vmatprep.subr.mxu1 %v1680_v39  ;;  %4322 = vmatpush1.msra.mxu0 %v1551_v18  ;;  %v1631_v29 = vld [vmem:[%s5158_s30 + $0x2b90] sm:$0xff]  ;;  %v1628_v39 = vld [vmem:[%s5158_s30 + $0x2b78] sm:$0xff] }
 0x3a2   : > { %4393 = vmatpush1.msra.mxu1 %v1679_v47  ;;  %4323 = vmatprep.subr.mxu0 %v1548_v52  ;;  %v1759_v45 = vld [vmem:[%s5158_s30 + $0x2f90] sm:$0xff]  ;;  %v1756_v18 = vld [vmem:[%s5158_s30 + $0x2f78] sm:$0xff] }
 0x3a3   : > { %4394 = vmatprep.subr.mxu1 %v1676_v48  ;;  %4324 = vmatpush1.msra.mxu0 %v1547_v50  ;;  %v1627_v47 = vld [vmem:[%s5158_s30 + $0x2b70] sm:$0xff]  ;;  %v1624_v48 = vld [vmem:[%s5158_s30 + $0x2b58] sm:$0xff] }
 0x3a4   : > { %4395 = vmatpush1.msra.mxu1 %v1675_v44  ;;  %4325 = vmatprep.subr.mxu0 %v1544_v51  ;;  %v1755_v52 = vld [vmem:[%s5158_s30 + $0x2f70] sm:$0xff]  ;;  %v1752_v50 = vld [vmem:[%s5158_s30 + $0x2f58] sm:$0xff] }
 0x3a5   : > { %4396 = vmatprep.subr.mxu1 %v1672_v9  ;;  %4326 = vmatpush1.msra.mxu0 %v1543_v54  ;;  %v1623_v44 = vld [vmem:[%s5158_s30 + $0x2b50] sm:$0xff]  ;;  %v1620_v9 = vld [vmem:[%s5158_s30 + $0x2b38] sm:$0xff] }
 0x3a6   : > { %4397 = vmatpush1.msra.mxu1 %v1671_v11  ;;  %4327 = vmatprep.subr.mxu0 %v1540_v55  ;;  %v1751_v51 = vld [vmem:[%s5158_s30 + $0x2f50] sm:$0xff]  ;;  %v1748_v54 = vld [vmem:[%s5158_s30 + $0x2f38] sm:$0xff] }
 0x3a7   : > { %4398 = vmatprep.subr.mxu1 %v1668_v63  ;;  %4328 = vmatpush1.msra.mxu0 %v1539_v2  ;;  %v1619_v11 = vld [vmem:[%s5158_s30 + $0x2b30] sm:$0xff]  ;;  %v1616_v63 = vld [vmem:[%s5158_s30 + $0x2b18] sm:$0xff] }
 0x3a8   : > { %4399 = vmatpush1.msra.mxu1 %v1667_v56  ;;  %4329 = vmatprep.subr.mxu0 %v1536_v57  ;;  %v1747_v55 = vld [vmem:[%s5158_s30 + $0x2f30] sm:$0xff]  ;;  %v1744_v2 = vld [vmem:[%s5158_s30 + $0x2f18] sm:$0xff] }
 0x3a9   : > { %4400 = vmatprep.subr.mxu1 %v1664_v58  ;;  %4330 = vmatpush1.msra.mxu0 %v1535_v59  ;;  %v1615_v56 = vld [vmem:[%s5158_s30 + $0x2b10] sm:$0xff]  ;;  %v1612_v58 = vld [vmem:[%s5158_s30 + $0x2af8] sm:$0xff] }
 0x3aa   : > { %4401 = vmatpush1.msra.mxu1 %v1663_v60  ;;  %4331 = vmatprep.subr.mxu0 %v1532_v62  ;;  %v1743_v57 = vld [vmem:[%s5158_s30 + $0x2f10] sm:$0xff]  ;;  %v1740_v59 = vld [vmem:[%s5158_s30 + $0x2ef8] sm:$0xff] }
 0x3ab   : > { %4402 = vmatprep.subr.mxu1 %v1660_v1  ;;  %4332 = vmatpush1.msra.mxu0 %v1531_v3  ;;  %v1611_v60 = vld [vmem:[%s5158_s30 + $0x2af0] sm:$0xff]  ;;  %v1608_v1 = vld [vmem:[%s5158_s30 + $0x2ad8] sm:$0xff] }
 0x3ac   : > { %4403 = vmatpush1.msra.mxu1 %v1659_v5  ;;  %4333 = vmatprep.subr.mxu0 %v1528_v8  ;;  %v1739_v62 = vld [vmem:[%s5158_s30 + $0x2ef0] sm:$0xff]  ;;  %v1736_v3 = vld [vmem:[%s5158_s30 + $0x2ed8] sm:$0xff] }
 0x3ad   : > { %4404 = vmatprep.subr.mxu1 %v1656_v13  ;;  %4334 = vmatpush1.msra.mxu0 %v1527_v14  ;;  %v1607_v5 = vld [vmem:[%s5158_s30 + $0x2ad0] sm:$0xff]  ;;  %v1604_v13 = vld [vmem:[%s5158_s30 + $0x2ab8] sm:$0xff] }
 0x3ae   : > { %4405 = vmatpush1.msra.mxu1 %v1655_v17  ;;  %4335 = vmatprep.subr.mxu0 %v1524_v22  ;;  %v1735_v8 = vld [vmem:[%s5158_s30 + $0x2ed0] sm:$0xff]  ;;  %v1732_v14 = vld [vmem:[%s5158_s30 + $0x2eb8] sm:$0xff] }
 0x3af   : > { %4406 = vmatprep.subr.mxu1 %v1652_v10  ;;  %4336 = vmatpush1.msra.mxu0 %v1523_v26  ;;  %v1603_v17 = vld [vmem:[%s5158_s30 + $0x2ab0] sm:$0xff]  ;;  %v1600_v10 = vld [vmem:[%s5158_s30 + $0x2a98] sm:$0xff] }
 0x3b0   : > { %4407 = vmatpush1.msra.mxu1 %v1651_v61  ;;  %4337 = vmatprep.subr.mxu0 %v1520_v27  ;;  %v1731_v22 = vld [vmem:[%s5158_s30 + $0x2eb0] sm:$0xff]  ;;  %v1728_v26 = vld [vmem:[%s5158_s30 + $0x2e98] sm:$0xff] }
 0x3b1   : > { %4408 = vmatprep.subr.mxu1 %v1648_v16  ;;  %4338 = vmatpush1.msra.mxu0 %v1519_v30  ;;  %v1599_v61 = vld [vmem:[%s5158_s30 + $0x2a90] sm:$0xff]  ;;  %v1596_v16 = vld [vmem:[%s5158_s30 + $0x2a78] sm:$0xff] }
 0x3b2   : > { %4409 = vmatpush1.msra.mxu1 %v1647_v25  ;;  %4339 = vmatprep.subr.mxu0 %v1644_v4  ;;  %v1727_v27 = vld [vmem:[%s5158_s30 + $0x2e90] sm:$0xff]  ;;  %v1724_v30 = vld [vmem:[%s5158_s30 + $0x2e78] sm:$0xff] }
 0x3b3   : > { %4410 = vmatprep.subr.mxu1 %v1772_v33  ;;  %4340 = vmatpush2.msra.mxu0 %v1643_v15  ;;  %v1595_v25 = vld [vmem:[%s5158_s30 + $0x2a70] sm:$0xff]  ;;  %v1592_v33 = vld [vmem:[%s5158_s30 + $0x2a58] sm:$0xff] }
 0x3b4   : > { %4411 = vmatpush2.msra.mxu1 %v1771_v34  ;;  %4341 = vmatprep.subr.mxu0 %v1640_v28  ;;  %v1723_v4 = vld [vmem:[%s5158_s30 + $0x2e70] sm:$0xff]  ;;  %v1720_v15 = vld [vmem:[%s5158_s30 + $0x2e58] sm:$0xff] }
 0x3b5   : > { %4412 = vmatprep.subr.mxu1 %v1768_v37  ;;  %4342 = vmatpush2.msra.mxu0 %v1639_v38  ;;  %v1591_v34 = vld [vmem:[%s5158_s30 + $0x2a50] sm:$0xff]  ;;  %v1588_v37 = vld [vmem:[%s5158_s30 + $0x2a38] sm:$0xff] }
 0x3b6   : > { %4413 = vmatpush2.msra.mxu1 %v1767_v20  ;;  %4343 = vmatprep.subr.mxu0 %v1636_v40  ;;  %v1719_v28 = vld [vmem:[%s5158_s30 + $0x2e50] sm:$0xff]  ;;  %v1716_v38 = vld [vmem:[%s5158_s30 + $0x2e38] sm:$0xff] }
 0x3b7   : > { %4414 = vmatprep.subr.mxu1 %v1764_v41  ;;  %4344 = vmatpush2.msra.mxu0 %v1635_v24  ;;  %v1587_v20 = vld [vmem:[%s5158_s30 + $0x2a30] sm:$0xff]  ;;  %v1584_v41 = vld [vmem:[%s5158_s30 + $0x2a18] sm:$0xff] }
 0x3b8   : > { %4415 = vmatpush2.msra.mxu1 %v1763_v43  ;;  %4345 = vmatprep.subr.mxu0 %v1632_v12  ;;  %v1715_v40 = vld [vmem:[%s5158_s30 + $0x2e30] sm:$0xff]  ;;  %v1712_v24 = vld [vmem:[%s5158_s30 + $0x2e18] sm:$0xff] }
 0x3b9   : > { %4416 = vmatprep.subr.mxu1 %v1760_v49  ;;  %4346 = vmatpush2.msra.mxu0 %v1631_v29  ;;  %v1583_v43 = vld [vmem:[%s5158_s30 + $0x2a10] sm:$0xff]  ;;  %v1836_v49 = vld [vmem:[%s5158_s30 + $0x31f8] sm:$0xff] }
 0x3ba   : > { %4417 = vmatpush2.msra.mxu1 %v1759_v45  ;;  %4347 = vmatprep.subr.mxu0 %v1628_v39  ;;  %v1711_v12 = vld [vmem:[%s5158_s30 + $0x2e10] sm:$0xff]  ;;  %v1964_v29 = vld [vmem:[%s5158_s30 + $0x35f8] sm:$0xff] }
 0x3bb   : > { %4418 = vmatprep.subr.mxu1 %v1756_v18  ;;  %4348 = vmatpush2.msra.mxu0 %v1627_v47  ;;  %v1835_v45 = vld [vmem:[%s5158_s30 + $0x31f0] sm:$0xff]  ;;  %v1832_v18 = vld [vmem:[%s5158_s30 + $0x31d8] sm:$0xff] }
 0x3bc   : > { %4419 = vmatpush2.msra.mxu1 %v1755_v52  ;;  %4349 = vmatprep.subr.mxu0 %v1624_v48  ;;  %v1963_v39 = vld [vmem:[%s5158_s30 + $0x35f0] sm:$0xff]  ;;  %v1960_v47 = vld [vmem:[%s5158_s30 + $0x35d8] sm:$0xff] }
 0x3bd   : > { %4420 = vmatprep.subr.mxu1 %v1752_v50  ;;  %4350 = vmatpush2.msra.mxu0 %v1623_v44  ;;  %v1959_v52 = vld [vmem:[%s5158_s30 + $0x35d0] sm:$0xff]  ;;  %v1956_v48 = vld [vmem:[%s5158_s30 + $0x35b8] sm:$0xff] }
 0x3be   : > { %4421 = vmatpush2.msra.mxu1 %v1751_v51  ;;  %4351 = vmatprep.subr.mxu0 %v1620_v9  ;;  %v1955_v50 = vld [vmem:[%s5158_s30 + $0x35b0] sm:$0xff]  ;;  %v1824_v44 = vld [vmem:[%s5158_s30 + $0x3198] sm:$0xff] }
 0x3bf   : > { %4422 = vmatprep.subr.mxu1 %v1748_v54  ;;  %4352 = vmatpush2.msra.mxu0 %v1619_v11  ;;  %v1823_v51 = vld [vmem:[%s5158_s30 + $0x3190] sm:$0xff]  ;;  %v1820_v54 = vld [vmem:[%s5158_s30 + $0x3178] sm:$0xff] }
 0x3c0   : > { %4423 = vmatpush2.msra.mxu1 %v1747_v55  ;;  %4353 = vmatprep.subr.mxu0 %v1616_v63  ;;  %v1951_v9 = vld [vmem:[%s5158_s30 + $0x3590] sm:$0xff]  ;;  %v1948_v11 = vld [vmem:[%s5158_s30 + $0x3578] sm:$0xff] }
 0x3c1   : > { %4424 = vmatprep.subr.mxu1 %v1744_v2  ;;  %4354 = vmatpush2.msra.mxu0 %v1615_v56  ;;  %v1819_v55 = vld [vmem:[%s5158_s30 + $0x3170] sm:$0xff]  ;;  %v1816_v2 = vld [vmem:[%s5158_s30 + $0x3158] sm:$0xff] }
 0x3c2   : > { %4425 = vmatpush2.msra.mxu1 %v1743_v57  ;;  %4355 = vmatprep.subr.mxu0 %v1612_v58  ;;  %v1947_v63 = vld [vmem:[%s5158_s30 + $0x3570] sm:$0xff]  ;;  %v1944_v56 = vld [vmem:[%s5158_s30 + $0x3558] sm:$0xff] }
 0x3c3   : > { %4426 = vmatprep.subr.mxu1 %v1740_v59  ;;  %4356 = vmatpush2.msra.mxu0 %v1611_v60  ;;  %v1815_v57 = vld [vmem:[%s5158_s30 + $0x3150] sm:$0xff]  ;;  %v1812_v59 = vld [vmem:[%s5158_s30 + $0x3138] sm:$0xff] }
 0x3c4   : > { %4427 = vmatpush2.msra.mxu1 %v1739_v62  ;;  %4357 = vmatprep.subr.mxu0 %v1608_v1  ;;  %v1943_v58 = vld [vmem:[%s5158_s30 + $0x3550] sm:$0xff]  ;;  %v1940_v60 = vld [vmem:[%s5158_s30 + $0x3538] sm:$0xff] }
 0x3c5   : > { %4428 = vmatprep.subr.mxu1 %v1736_v3  ;;  %4358 = vmatpush2.msra.mxu0 %v1607_v5  ;;  %v1811_v62 = vld [vmem:[%s5158_s30 + $0x3130] sm:$0xff]  ;;  %v1808_v3 = vld [vmem:[%s5158_s30 + $0x3118] sm:$0xff] }
 0x3c6   : > { %4429 = vmatpush2.msra.mxu1 %v1735_v8  ;;  %4359 = vmatprep.subr.mxu0 %v1604_v13  ;;  %v1939_v1 = vld [vmem:[%s5158_s30 + $0x3530] sm:$0xff]  ;;  %v1936_v5 = vld [vmem:[%s5158_s30 + $0x3518] sm:$0xff] }
 0x3c7   : > { %4430 = vmatprep.subr.mxu1 %v1732_v14  ;;  %4360 = vmatpush2.msra.mxu0 %v1603_v17  ;;  %v1807_v8 = vld [vmem:[%s5158_s30 + $0x3110] sm:$0xff]  ;;  %v1804_v14 = vld [vmem:[%s5158_s30 + $0x30f8] sm:$0xff] }
 0x3c8   : > { %4431 = vmatpush2.msra.mxu1 %v1731_v22  ;;  %4361 = vmatprep.subr.mxu0 %v1600_v10  ;;  %v1935_v13 = vld [vmem:[%s5158_s30 + $0x3510] sm:$0xff]  ;;  %v1932_v17 = vld [vmem:[%s5158_s30 + $0x34f8] sm:$0xff] }
 0x3c9   : > { %4432 = vmatprep.subr.mxu1 %v1728_v26  ;;  %4362 = vmatpush2.msra.mxu0 %v1599_v61  ;;  %v1803_v22 = vld [vmem:[%s5158_s30 + $0x30f0] sm:$0xff]  ;;  %v1800_v26 = vld [vmem:[%s5158_s30 + $0x30d8] sm:$0xff] }
 0x3ca   : > { %4433 = vmatpush2.msra.mxu1 %v1727_v27  ;;  %4363 = vmatprep.subr.mxu0 %v1596_v16  ;;  %v1931_v10 = vld [vmem:[%s5158_s30 + $0x34f0] sm:$0xff]  ;;  %v1928_v61 = vld [vmem:[%s5158_s30 + $0x34d8] sm:$0xff] }
 0x3cb   : > { %4434 = vmatprep.subr.mxu1 %v1724_v30  ;;  %4364 = vmatpush2.msra.mxu0 %v1595_v25  ;;  %v1799_v27 = vld [vmem:[%s5158_s30 + $0x30d0] sm:$0xff]  ;;  %v1796_v30 = vld [vmem:[%s5158_s30 + $0x30b8] sm:$0xff] }
 0x3cc   : > { %4435 = vmatpush2.msra.mxu1 %v1723_v4  ;;  %4365 = vmatprep.subr.mxu0 %v1592_v33  ;;  %v1927_v16 = vld [vmem:[%s5158_s30 + $0x34d0] sm:$0xff]  ;;  %v1924_v25 = vld [vmem:[%s5158_s30 + $0x34b8] sm:$0xff] }
 0x3cd   : > { %4436 = vmatprep.subr.mxu1 %v1720_v15  ;;  %4366 = vmatpush2.msra.mxu0 %v1591_v34  ;;  %v1795_v4 = vld [vmem:[%s5158_s30 + $0x30b0] sm:$0xff]  ;;  %v1792_v15 = vld [vmem:[%s5158_s30 + $0x3098] sm:$0xff] }
 0x3ce   : > { %4437 = vmatpush2.msra.mxu1 %v1719_v28  ;;  %4367 = vmatprep.subr.mxu0 %v1588_v37  ;;  %v1923_v33 = vld [vmem:[%s5158_s30 + $0x34b0] sm:$0xff]  ;;  %v1920_v34 = vld [vmem:[%s5158_s30 + $0x3498] sm:$0xff] }
 0x3cf   : > { %4438 = vmatprep.subr.mxu1 %v1716_v38  ;;  %4368 = vmatpush2.msra.mxu0 %v1587_v20  ;;  %v1791_v28 = vld [vmem:[%s5158_s30 + $0x3090] sm:$0xff]  ;;  %v1788_v38 = vld [vmem:[%s5158_s30 + $0x3078] sm:$0xff] }
 0x3d0   : > { %4439 = vmatpush2.msra.mxu1 %v1715_v40  ;;  %4369 = vmatprep.subr.mxu0 %v1584_v41  ;;  %v1919_v37 = vld [vmem:[%s5158_s30 + $0x3490] sm:$0xff]  ;;  %v1916_v20 = vld [vmem:[%s5158_s30 + $0x3478] sm:$0xff] }
 0x3d1   : > { %4440 = vmatprep.subr.mxu1 %v1712_v24  ;;  %4370 = vmatpush2.msra.mxu0 %v1583_v43  ;;  %v1787_v40 = vld [vmem:[%s5158_s30 + $0x3070] sm:$0xff]  ;;  %v1784_v24 = vld [vmem:[%s5158_s30 + $0x3058] sm:$0xff] }
 0x3d2   : > { %4371 = vmatprep.mubr.f32.mxu0 %v6051_v19  ;;  %4441 = vmatpush2.msra.mxu1 %v1711_v12  ;;  %v1831_v19 = vld [vmem:[%s5158_s30 + $0x31d0] sm:$0xff]  ;;  %v1912_v43 = vld [vmem:[%s5158_s30 + $0x3458] sm:$0xff] }
 0x3d3   : > { %4372 = vmatmul.mubr.f32.vlgmr.msra.gmra.mxu0 %v6036_v0  ;;  %4442 = vmatprep.mubr.f32.mxu1 %v6057_v23  ;;  %v1828_v0 = vld [vmem:[%s5158_s30 + $0x31b8] sm:$0xff]  ;;  %v1827_v23 = vld [vmem:[%s5158_s30 + $0x31b0] sm:$0xff] }
 0x3d4   : > { %4449 = vmatprep.subr.mxu0 %v1836_v49  ;;  %4520 = vmatprep.subr.mxu1 %v1964_v29  ;;  %v1915_v41 = vld [vmem:[%s5158_s30 + $0x3470] sm:$0xff]  ;;  %v1780_v29 = vld [vmem:[%s5158_s30 + $0x3038] sm:$0xff] }
 0x3d5   : > { %4443 = vmatmul.mubr.f32.vlgmr.msra.gmra.mxu1 %v6043_v7  ;;  %4450 = vmatpush1.msra.mxu0 %v1835_v45  ;;  %v1952_v7 = vld [vmem:[%s5158_s30 + $0x3598] sm:$0xff]  ;;  %v1783_v12 = vld [vmem:[%s5158_s30 + $0x3050] sm:$0xff] }
 0x3d6   : > { %4521 = vmatpush1.msra.mxu1 %v1963_v39  ;;  %4451 = vmatprep.subr.mxu0 %v1832_v18  ;;  %v1911_v49 = vld [vmem:[%s5158_s30 + $0x3450] sm:$0xff]  ;;  %v1908_v45 = vld [vmem:[%s5158_s30 + $0x3438] sm:$0xff] }
 0x3d7   : > { %4522 = vmatprep.subr.mxu1 %v1960_v47  ;;  %4452 = vmatpush1.msra.mxu0 %v1831_v19  ;;  %v1779_v39 = vld [vmem:[%s5158_s30 + $0x3030] sm:$0xff]  ;;  %v1776_v47 = vld [vmem:[%s5158_s30 + $0x3018] sm:$0xff] }
 0x3d8   : > { %4523 = vmatpush1.msra.mxu1 %v1959_v52  ;;  %4453 = vmatprep.subr.mxu0 %v1828_v0  ;;  %v1907_v18 = vld [vmem:[%s5158_s30 + $0x3430] sm:$0xff]  ;;  %v1904_v19 = vld [vmem:[%s5158_s30 + $0x3418] sm:$0xff] }
 0x3d9   : > { %4524 = vmatprep.subr.mxu1 %v1956_v48  ;;  %4454 = vmatpush1.msra.mxu0 %v1827_v23  ;;  %v1775_v52 = vld [vmem:[%s5158_s30 + $0x3010] sm:$0xff]  ;;  %v1900_v48 = vld [vmem:[%s5158_s30 + $0x33f8] sm:$0xff] }
 0x3da   : > { %4525 = vmatpush1.msra.mxu1 %v1955_v50  ;;  %4455 = vmatprep.subr.mxu0 %v1824_v44  ;;  %v1903_v0 = vld [vmem:[%s5158_s30 + $0x3410] sm:$0xff]  ;;  %v2028_v23 = vld [vmem:[%s5158_s30 + $0x37f8] sm:$0xff] }
 0x3db   : > { %4526 = vmatprep.subr.mxu1 %v1952_v7  ;;  %4456 = vmatpush1.msra.mxu0 %v1823_v51  ;;  %v1899_v50 = vld [vmem:[%s5158_s30 + $0x33f0] sm:$0xff]  ;;  %v1896_v7 = vld [vmem:[%s5158_s30 + $0x33d8] sm:$0xff] }
 0x3dc   : > { %4527 = vmatpush1.msra.mxu1 %v1951_v9  ;;  %4457 = vmatprep.subr.mxu0 %v1820_v54  ;;  %v2027_v44 = vld [vmem:[%s5158_s30 + $0x37f0] sm:$0xff]  ;;  %v2024_v51 = vld [vmem:[%s5158_s30 + $0x37d8] sm:$0xff] }
 0x3dd   : > { %4528 = vmatprep.subr.mxu1 %v1948_v11  ;;  %4458 = vmatpush1.msra.mxu0 %v1819_v55  ;;  %v1895_v9 = vld [vmem:[%s5158_s30 + $0x33d0] sm:$0xff]  ;;  %v1892_v11 = vld [vmem:[%s5158_s30 + $0x33b8] sm:$0xff] }
 0x3de   : > { %4529 = vmatpush1.msra.mxu1 %v1947_v63  ;;  %4459 = vmatprep.subr.mxu0 %v1816_v2  ;;  %v2023_v54 = vld [vmem:[%s5158_s30 + $0x37d0] sm:$0xff]  ;;  %v2020_v55 = vld [vmem:[%s5158_s30 + $0x37b8] sm:$0xff] }
 0x3df   : > { %4530 = vmatprep.subr.mxu1 %v1944_v56  ;;  %4460 = vmatpush1.msra.mxu0 %v1815_v57  ;;  %v1891_v63 = vld [vmem:[%s5158_s30 + $0x33b0] sm:$0xff]  ;;  %v1888_v56 = vld [vmem:[%s5158_s30 + $0x3398] sm:$0xff] }
 0x3e0   : > { %4531 = vmatpush1.msra.mxu1 %v1943_v58  ;;  %4461 = vmatprep.subr.mxu0 %v1812_v59  ;;  %v2019_v2 = vld [vmem:[%s5158_s30 + $0x37b0] sm:$0xff]  ;;  %v2016_v57 = vld [vmem:[%s5158_s30 + $0x3798] sm:$0xff] }
 0x3e1   : > { %4532 = vmatprep.subr.mxu1 %v1940_v60  ;;  %4462 = vmatpush1.msra.mxu0 %v1811_v62  ;;  %v1887_v58 = vld [vmem:[%s5158_s30 + $0x3390] sm:$0xff]  ;;  %v1884_v60 = vld [vmem:[%s5158_s30 + $0x3378] sm:$0xff] }
 0x3e2   : > { %4533 = vmatpush1.msra.mxu1 %v1939_v1  ;;  %4463 = vmatprep.subr.mxu0 %v1808_v3  ;;  %v2015_v59 = vld [vmem:[%s5158_s30 + $0x3790] sm:$0xff]  ;;  %v2012_v62 = vld [vmem:[%s5158_s30 + $0x3778] sm:$0xff] }
 0x3e3   : > { %4534 = vmatprep.subr.mxu1 %v1936_v5  ;;  %4464 = vmatpush1.msra.mxu0 %v1807_v8  ;;  %v1883_v1 = vld [vmem:[%s5158_s30 + $0x3370] sm:$0xff]  ;;  %v1880_v5 = vld [vmem:[%s5158_s30 + $0x3358] sm:$0xff] }
 0x3e4   : > { %4535 = vmatpush1.msra.mxu1 %v1935_v13  ;;  %4465 = vmatprep.subr.mxu0 %v1804_v14  ;;  %v2011_v3 = vld [vmem:[%s5158_s30 + $0x3770] sm:$0xff]  ;;  %v2008_v8 = vld [vmem:[%s5158_s30 + $0x3758] sm:$0xff] }
 0x3e5   : > { %4536 = vmatprep.subr.mxu1 %v1932_v17  ;;  %4466 = vmatpush1.msra.mxu0 %v1803_v22  ;;  %v1879_v13 = vld [vmem:[%s5158_s30 + $0x3350] sm:$0xff]  ;;  %v1876_v17 = vld [vmem:[%s5158_s30 + $0x3338] sm:$0xff] }
 0x3e6   : > { %4537 = vmatpush1.msra.mxu1 %v1931_v10  ;;  %4467 = vmatprep.subr.mxu0 %v1800_v26  ;;  %v2007_v14 = vld [vmem:[%s5158_s30 + $0x3750] sm:$0xff]  ;;  %v2004_v22 = vld [vmem:[%s5158_s30 + $0x3738] sm:$0xff] }
 0x3e7   : > { %4538 = vmatprep.subr.mxu1 %v1928_v61  ;;  %4468 = vmatpush1.msra.mxu0 %v1799_v27  ;;  %v1875_v10 = vld [vmem:[%s5158_s30 + $0x3330] sm:$0xff]  ;;  %v1872_v61 = vld [vmem:[%s5158_s30 + $0x3318] sm:$0xff] }
 0x3e8   : > { %4539 = vmatpush1.msra.mxu1 %v1927_v16  ;;  %4469 = vmatprep.subr.mxu0 %v1796_v30  ;;  %v2003_v26 = vld [vmem:[%s5158_s30 + $0x3730] sm:$0xff]  ;;  %v2000_v27 = vld [vmem:[%s5158_s30 + $0x3718] sm:$0xff] }
 0x3e9   : > { %4540 = vmatprep.subr.mxu1 %v1924_v25  ;;  %4470 = vmatpush1.msra.mxu0 %v1795_v4  ;;  %v1871_v16 = vld [vmem:[%s5158_s30 + $0x3310] sm:$0xff]  ;;  %v1868_v25 = vld [vmem:[%s5158_s30 + $0x32f8] sm:$0xff] }
 0x3ea   : > { %4541 = vmatpush1.msra.mxu1 %v1923_v33  ;;  %4471 = vmatprep.subr.mxu0 %v1792_v15  ;;  %v1999_v30 = vld [vmem:[%s5158_s30 + $0x3710] sm:$0xff]  ;;  %v1996_v4 = vld [vmem:[%s5158_s30 + $0x36f8] sm:$0xff] }
 0x3eb   : > { %4542 = vmatprep.subr.mxu1 %v1920_v34  ;;  %4472 = vmatpush1.msra.mxu0 %v1791_v28  ;;  %v1867_v33 = vld [vmem:[%s5158_s30 + $0x32f0] sm:$0xff]  ;;  %v1864_v34 = vld [vmem:[%s5158_s30 + $0x32d8] sm:$0xff] }
 0x3ec   : > { %4543 = vmatpush1.msra.mxu1 %v1919_v37  ;;  %4473 = vmatprep.subr.mxu0 %v1788_v38  ;;  %v1995_v15 = vld [vmem:[%s5158_s30 + $0x36f0] sm:$0xff]  ;;  %v1992_v28 = vld [vmem:[%s5158_s30 + $0x36d8] sm:$0xff] }
 0x3ed   : > { %4544 = vmatprep.subr.mxu1 %v1916_v20  ;;  %4474 = vmatpush1.msra.mxu0 %v1787_v40  ;;  %v1863_v37 = vld [vmem:[%s5158_s30 + $0x32d0] sm:$0xff]  ;;  %v1860_v20 = vld [vmem:[%s5158_s30 + $0x32b8] sm:$0xff] }
 0x3ee   : > { %4545 = vmatpush1.msra.mxu1 %v1915_v41  ;;  %4475 = vmatprep.subr.mxu0 %v1784_v24  ;;  %v1991_v38 = vld [vmem:[%s5158_s30 + $0x36d0] sm:$0xff]  ;;  %v1988_v40 = vld [vmem:[%s5158_s30 + $0x36b8] sm:$0xff] }
 0x3ef   : > { %4546 = vmatprep.subr.mxu1 %v1912_v43  ;;  %4476 = vmatpush1.msra.mxu0 %v1783_v12  ;;  %v1859_v41 = vld [vmem:[%s5158_s30 + $0x32b0] sm:$0xff]  ;;  %v1856_v43 = vld [vmem:[%s5158_s30 + $0x3298] sm:$0xff] }
 0x3f0   : > { %4547 = vmatpush1.msra.mxu1 %v1911_v49  ;;  %4477 = vmatprep.subr.mxu0 %v1780_v29  ;;  %v1987_v24 = vld [vmem:[%s5158_s30 + $0x36b0] sm:$0xff]  ;;  %v1984_v12 = vld [vmem:[%s5158_s30 + $0x3698] sm:$0xff] }
 0x3f1   : > { %4548 = vmatprep.subr.mxu1 %v1908_v45  ;;  %4478 = vmatpush1.msra.mxu0 %v1779_v39  ;;  %v1855_v49 = vld [vmem:[%s5158_s30 + $0x3290] sm:$0xff]  ;;  %v1852_v45 = vld [vmem:[%s5158_s30 + $0x3278] sm:$0xff] }
 0x3f2   : > { %4549 = vmatpush1.msra.mxu1 %v1907_v18  ;;  %4479 = vmatprep.subr.mxu0 %v1776_v47  ;;  %v1983_v29 = vld [vmem:[%s5158_s30 + $0x3690] sm:$0xff]  ;;  %v1980_v39 = vld [vmem:[%s5158_s30 + $0x3678] sm:$0xff] }
 0x3f3   : > { %4550 = vmatprep.subr.mxu1 %v1904_v19  ;;  %4480 = vmatpush1.msra.mxu0 %v1775_v52  ;;  %v1851_v18 = vld [vmem:[%s5158_s30 + $0x3270] sm:$0xff]  ;;  %v1848_v19 = vld [vmem:[%s5158_s30 + $0x3258] sm:$0xff] }
 0x3f4   : > { %4551 = vmatpush1.msra.mxu1 %v1903_v0  ;;  %4481 = vmatprep.subr.mxu0 %v1900_v48  ;;  %v1979_v47 = vld [vmem:[%s5158_s30 + $0x3670] sm:$0xff]  ;;  %v1976_v52 = vld [vmem:[%s5158_s30 + $0x3658] sm:$0xff] }
 0x3f5   : > { %4552 = vmatprep.subr.mxu1 %v2028_v23  ;;  %4482 = vmatpush2.msra.mxu0 %v1899_v50  ;;  %v1847_v0 = vld [vmem:[%s5158_s30 + $0x3250] sm:$0xff]  ;;  %v1844_v23 = vld [vmem:[%s5158_s30 + $0x3238] sm:$0xff] }
 0x3f6   : > { %4553 = vmatpush2.msra.mxu1 %v2027_v44  ;;  %4483 = vmatprep.subr.mxu0 %v1896_v7  ;;  %v1975_v48 = vld [vmem:[%s5158_s30 + $0x3650] sm:$0xff]  ;;  %v1972_v50 = vld [vmem:[%s5158_s30 + $0x3638] sm:$0xff] }
 0x3f7   : > { %4554 = vmatprep.subr.mxu1 %v2024_v51  ;;  %4484 = vmatpush2.msra.mxu0 %v1895_v9  ;;  %v1843_v44 = vld [vmem:[%s5158_s30 + $0x3230] sm:$0xff]  ;;  %v1840_v51 = vld [vmem:[%s5158_s30 + $0x3218] sm:$0xff] }
 0x3f8   : > { %4555 = vmatpush2.msra.mxu1 %v2023_v54  ;;  %4485 = vmatprep.subr.mxu0 %v1892_v11  ;;  %v1971_v7 = vld [vmem:[%s5158_s30 + $0x3630] sm:$0xff]  ;;  %v1968_v9 = vld [vmem:[%s5158_s30 + $0x3618] sm:$0xff] }
 0x3f9   : > { %4556 = vmatprep.subr.mxu1 %v2020_v55  ;;  %4486 = vmatpush2.msra.mxu0 %v1891_v63  ;;  %v1839_v54 = vld [vmem:[%s5158_s30 + $0x3210] sm:$0xff]  ;;  %v2092_v55 = vld [vmem:[%s5158_s30 + $0x39f8] sm:$0xff] }
 0x3fa   : > { %4557 = vmatpush2.msra.mxu1 %v2019_v2  ;;  %4487 = vmatprep.subr.mxu0 %v1888_v56  ;;  %v1967_v11 = vld [vmem:[%s5158_s30 + $0x3610] sm:$0xff]  ;;  %v2220_v63 = vld [vmem:[%s5158_s30 + $0x3df8] sm:$0xff] }
 0x3fb   : > { %4558 = vmatprep.subr.mxu1 %v2016_v57  ;;  %4488 = vmatpush2.msra.mxu0 %v1887_v58  ;;  %v2091_v2 = vld [vmem:[%s5158_s30 + $0x39f0] sm:$0xff]  ;;  %v2088_v57 = vld [vmem:[%s5158_s30 + $0x39d8] sm:$0xff] }
 0x3fc   : > { %4559 = vmatpush2.msra.mxu1 %v2015_v59  ;;  %4489 = vmatprep.subr.mxu0 %v1884_v60  ;;  %v2219_v56 = vld [vmem:[%s5158_s30 + $0x3df0] sm:$0xff]  ;;  %v2216_v58 = vld [vmem:[%s5158_s30 + $0x3dd8] sm:$0xff] }
 0x3fd   : > { %4560 = vmatprep.subr.mxu1 %v2012_v62  ;;  %4490 = vmatpush2.msra.mxu0 %v1883_v1  ;;  %v2215_v59 = vld [vmem:[%s5158_s30 + $0x3dd0] sm:$0xff]  ;;  %v2212_v60 = vld [vmem:[%s5158_s30 + $0x3db8] sm:$0xff] }
 0x3fe   : > { %4561 = vmatpush2.msra.mxu1 %v2011_v3  ;;  %4491 = vmatprep.subr.mxu0 %v1880_v5  ;;  %v2211_v62 = vld [vmem:[%s5158_s30 + $0x3db0] sm:$0xff]  ;;  %v2080_v1 = vld [vmem:[%s5158_s30 + $0x3998] sm:$0xff] }
 0x3ff   : > { %4562 = vmatprep.subr.mxu1 %v2008_v8  ;;  %4492 = vmatpush2.msra.mxu0 %v1879_v13  ;;  %v2079_v3 = vld [vmem:[%s5158_s30 + $0x3990] sm:$0xff]  ;;  %v2076_v8 = vld [vmem:[%s5158_s30 + $0x3978] sm:$0xff] }
 0x400   : > { %4563 = vmatpush2.msra.mxu1 %v2007_v14  ;;  %4493 = vmatprep.subr.mxu0 %v1876_v17  ;;  %v2207_v5 = vld [vmem:[%s5158_s30 + $0x3d90] sm:$0xff]  ;;  %v2204_v13 = vld [vmem:[%s5158_s30 + $0x3d78] sm:$0xff] }
 0x401   : > { %4564 = vmatprep.subr.mxu1 %v2004_v22  ;;  %4494 = vmatpush2.msra.mxu0 %v1875_v10  ;;  %v2075_v14 = vld [vmem:[%s5158_s30 + $0x3970] sm:$0xff]  ;;  %v2072_v22 = vld [vmem:[%s5158_s30 + $0x3958] sm:$0xff] }
 0x402   : > { %4565 = vmatpush2.msra.mxu1 %v2003_v26  ;;  %4495 = vmatprep.subr.mxu0 %v1872_v61  ;;  %v2203_v17 = vld [vmem:[%s5158_s30 + $0x3d70] sm:$0xff]  ;;  %v2200_v10 = vld [vmem:[%s5158_s30 + $0x3d58] sm:$0xff] }
 0x403   : > { %4566 = vmatprep.subr.mxu1 %v2000_v27  ;;  %4496 = vmatpush2.msra.mxu0 %v1871_v16  ;;  %v2071_v26 = vld [vmem:[%s5158_s30 + $0x3950] sm:$0xff]  ;;  %v2068_v27 = vld [vmem:[%s5158_s30 + $0x3938] sm:$0xff] }
 0x404   : > { %4567 = vmatpush2.msra.mxu1 %v1999_v30  ;;  %4497 = vmatprep.subr.mxu0 %v1868_v25  ;;  %v2199_v61 = vld [vmem:[%s5158_s30 + $0x3d50] sm:$0xff]  ;;  %v2196_v16 = vld [vmem:[%s5158_s30 + $0x3d38] sm:$0xff] }
 0x405   : > { %4568 = vmatprep.subr.mxu1 %v1996_v4  ;;  %4498 = vmatpush2.msra.mxu0 %v1867_v33  ;;  %v2067_v30 = vld [vmem:[%s5158_s30 + $0x3930] sm:$0xff]  ;;  %v2064_v4 = vld [vmem:[%s5158_s30 + $0x3918] sm:$0xff] }
 0x406   : > { %4569 = vmatpush2.msra.mxu1 %v1995_v15  ;;  %4499 = vmatprep.subr.mxu0 %v1864_v34  ;;  %v2195_v25 = vld [vmem:[%s5158_s30 + $0x3d30] sm:$0xff]  ;;  %v2192_v33 = vld [vmem:[%s5158_s30 + $0x3d18] sm:$0xff] }
 0x407   : > { %4570 = vmatprep.subr.mxu1 %v1992_v28  ;;  %4500 = vmatpush2.msra.mxu0 %v1863_v37  ;;  %v2063_v15 = vld [vmem:[%s5158_s30 + $0x3910] sm:$0xff]  ;;  %v2060_v28 = vld [vmem:[%s5158_s30 + $0x38f8] sm:$0xff] }
 0x408   : > { %4571 = vmatpush2.msra.mxu1 %v1991_v38  ;;  %4501 = vmatprep.subr.mxu0 %v1860_v20  ;;  %v2191_v34 = vld [vmem:[%s5158_s30 + $0x3d10] sm:$0xff]  ;;  %v2188_v37 = vld [vmem:[%s5158_s30 + $0x3cf8] sm:$0xff] }
 0x409   : > { %4572 = vmatprep.subr.mxu1 %v1988_v40  ;;  %4502 = vmatpush2.msra.mxu0 %v1859_v41  ;;  %v2059_v38 = vld [vmem:[%s5158_s30 + $0x38f0] sm:$0xff]  ;;  %v2056_v40 = vld [vmem:[%s5158_s30 + $0x38d8] sm:$0xff] }
 0x40a   : > { %4573 = vmatpush2.msra.mxu1 %v1987_v24  ;;  %4503 = vmatprep.subr.mxu0 %v1856_v43  ;;  %v2187_v20 = vld [vmem:[%s5158_s30 + $0x3cf0] sm:$0xff]  ;;  %v2184_v41 = vld [vmem:[%s5158_s30 + $0x3cd8] sm:$0xff] }
 0x40b   : > { %4574 = vmatprep.subr.mxu1 %v1984_v12  ;;  %4504 = vmatpush2.msra.mxu0 %v1855_v49  ;;  %v2055_v24 = vld [vmem:[%s5158_s30 + $0x38d0] sm:$0xff]  ;;  %v2052_v12 = vld [vmem:[%s5158_s30 + $0x38b8] sm:$0xff] }
 0x40c   : > { %4575 = vmatpush2.msra.mxu1 %v1983_v29  ;;  %4505 = vmatprep.subr.mxu0 %v1852_v45  ;;  %v2183_v43 = vld [vmem:[%s5158_s30 + $0x3cd0] sm:$0xff]  ;;  %v2180_v49 = vld [vmem:[%s5158_s30 + $0x3cb8] sm:$0xff] }
 0x40d   : > { %4576 = vmatprep.subr.mxu1 %v1980_v39  ;;  %4506 = vmatpush2.msra.mxu0 %v1851_v18  ;;  %v2051_v29 = vld [vmem:[%s5158_s30 + $0x38b0] sm:$0xff]  ;;  %v2048_v39 = vld [vmem:[%s5158_s30 + $0x3898] sm:$0xff] }
 0x40e   : > { %4577 = vmatpush2.msra.mxu1 %v1979_v47  ;;  %4507 = vmatprep.subr.mxu0 %v1848_v19  ;;  %v2179_v45 = vld [vmem:[%s5158_s30 + $0x3cb0] sm:$0xff]  ;;  %v2176_v18 = vld [vmem:[%s5158_s30 + $0x3c98] sm:$0xff] }
 0x40f   : > { %4578 = vmatprep.subr.mxu1 %v1976_v52  ;;  %4508 = vmatpush2.msra.mxu0 %v1847_v0  ;;  %v2047_v47 = vld [vmem:[%s5158_s30 + $0x3890] sm:$0xff]  ;;  %v2044_v52 = vld [vmem:[%s5158_s30 + $0x3878] sm:$0xff] }
 0x410   : > { %4579 = vmatpush2.msra.mxu1 %v1975_v48  ;;  %4509 = vmatprep.subr.mxu0 %v1844_v23  ;;  %v2175_v19 = vld [vmem:[%s5158_s30 + $0x3c90] sm:$0xff]  ;;  %v2172_v0 = vld [vmem:[%s5158_s30 + $0x3c78] sm:$0xff] }
 0x411   : > { %4580 = vmatprep.subr.mxu1 %v1972_v50  ;;  %4510 = vmatpush2.msra.mxu0 %v1843_v44  ;;  %v2043_v48 = vld [vmem:[%s5158_s30 + $0x3870] sm:$0xff]  ;;  %v2040_v50 = vld [vmem:[%s5158_s30 + $0x3858] sm:$0xff] }
 0x412   : > { %4581 = vmatpush2.msra.mxu1 %v1971_v7  ;;  %4511 = vmatprep.subr.mxu0 %v1840_v51  ;;  %v2171_v23 = vld [vmem:[%s5158_s30 + $0x3c70] sm:$0xff]  ;;  %v2168_v44 = vld [vmem:[%s5158_s30 + $0x3c58] sm:$0xff] }
 0x413   : > { %4582 = vmatprep.subr.mxu1 %v1968_v9  ;;  %4512 = vmatpush2.msra.mxu0 %v1839_v54  ;;  %v2039_v7 = vld [vmem:[%s5158_s30 + $0x3850] sm:$0xff]  ;;  %v2036_v9 = vld [vmem:[%s5158_s30 + $0x3838] sm:$0xff] }
 0x414   : > { %4513 = vmatprep.mubr.f32.mxu0 %v6198_v42  ;;  %4583 = vmatpush2.msra.mxu1 %v1967_v11  ;;  %v2087_v42 = vld [vmem:[%s5158_s30 + $0x39d0] sm:$0xff]  ;;  %v2164_v54 = vld [vmem:[%s5158_s30 + $0x3c38] sm:$0xff] }
 0x415   : > { %4514 = vmatmul.mubr.f32.vlgmr.msra.gmra.mxu0 %v6183_v31  ;;  %4584 = vmatprep.mubr.f32.mxu1 %v6204_v46  ;;  %v2084_v31 = vld [vmem:[%s5158_s30 + $0x39b8] sm:$0xff]  ;;  %v2083_v46 = vld [vmem:[%s5158_s30 + $0x39b0] sm:$0xff] }
 0x416   : > { %4591 = vmatprep.subr.mxu0 %v2092_v55  ;;  %4662 = vmatprep.subr.mxu1 %v2220_v63  ;;  %v2167_v51 = vld [vmem:[%s5158_s30 + $0x3c50] sm:$0xff]  ;;  %v2032_v63 = vld [vmem:[%s5158_s30 + $0x3818] sm:$0xff] }
 0x417   : > { %4585 = vmatmul.mubr.f32.vlgmr.msra.gmra.mxu1 %v6190_v36  ;;  %4592 = vmatpush1.msra.mxu0 %v2091_v2  ;;  %v2208_v36 = vld [vmem:[%s5158_s30 + $0x3d98] sm:$0xff]  ;;  %v2035_v11 = vld [vmem:[%s5158_s30 + $0x3830] sm:$0xff] }
 0x418   : > { %4663 = vmatpush1.msra.mxu1 %v2219_v56  ;;  %4593 = vmatprep.subr.mxu0 %v2088_v57  ;;  %v2163_v55 = vld [vmem:[%s5158_s30 + $0x3c30] sm:$0xff]  ;;  %v2160_v2 = vld [vmem:[%s5158_s30 + $0x3c18] sm:$0xff] }
 0x419   : > { %4664 = vmatprep.subr.mxu1 %v2216_v58  ;;  %4594 = vmatpush1.msra.mxu0 %v2087_v42  ;;  %v2031_v56 = vld [vmem:[%s5158_s30 + $0x3810] sm:$0xff]  ;;  %v2156_v58 = vld [vmem:[%s5158_s30 + $0x3bf8] sm:$0xff] }
 0x41a   : > { %4665 = vmatpush1.msra.mxu1 %v2215_v59  ;;  %4595 = vmatprep.subr.mxu0 %v2084_v31  ;;  %v2159_v57 = vld [vmem:[%s5158_s30 + $0x3c10] sm:$0xff]  ;;  %v2284_v42 = vld [vmem:[%s5158_s30 + $0x3ff8] sm:$0xff] }
 0x41b   : > { %4666 = vmatprep.subr.mxu1 %v2212_v60  ;;  %4596 = vmatpush1.msra.mxu0 %v2083_v46  ;;  %v2155_v59 = vld [vmem:[%s5158_s30 + $0x3bf0] sm:$0xff]  ;;  %v2152_v60 = vld [vmem:[%s5158_s30 + $0x3bd8] sm:$0xff] }
 0x41c   : > { %4667 = vmatpush1.msra.mxu1 %v2211_v62  ;;  %4597 = vmatprep.subr.mxu0 %v2080_v1  ;;  %v2283_v31 = vld [vmem:[%s5158_s30 + $0x3ff0] sm:$0xff]  ;;  %v2280_v46 = vld [vmem:[%s5158_s30 + $0x3fd8] sm:$0xff] }
 0x41d   : > { %4668 = vmatprep.subr.mxu1 %v2208_v36  ;;  %4598 = vmatpush1.msra.mxu0 %v2079_v3  ;;  %v2151_v62 = vld [vmem:[%s5158_s30 + $0x3bd0] sm:$0xff]  ;;  %v2148_v36 = vld [vmem:[%s5158_s30 + $0x3bb8] sm:$0xff] }
 0x41e   : > { %4669 = vmatpush1.msra.mxu1 %v2207_v5  ;;  %4599 = vmatprep.subr.mxu0 %v2076_v8  ;;  %v2279_v1 = vld [vmem:[%s5158_s30 + $0x3fd0] sm:$0xff]  ;;  %v2276_v3 = vld [vmem:[%s5158_s30 + $0x3fb8] sm:$0xff] }
 0x41f   : > { %4670 = vmatprep.subr.mxu1 %v2204_v13  ;;  %4600 = vmatpush1.msra.mxu0 %v2075_v14  ;;  %v2147_v5 = vld [vmem:[%s5158_s30 + $0x3bb0] sm:$0xff]  ;;  %v2144_v13 = vld [vmem:[%s5158_s30 + $0x3b98] sm:$0xff] }
 0x420   : > { %4671 = vmatpush1.msra.mxu1 %v2203_v17  ;;  %4601 = vmatprep.subr.mxu0 %v2072_v22  ;;  %v2275_v8 = vld [vmem:[%s5158_s30 + $0x3fb0] sm:$0xff]  ;;  %v2272_v14 = vld [vmem:[%s5158_s30 + $0x3f98] sm:$0xff] }
 0x421   : > { %4672 = vmatprep.subr.mxu1 %v2200_v10  ;;  %4602 = vmatpush1.msra.mxu0 %v2071_v26  ;;  %v2143_v17 = vld [vmem:[%s5158_s30 + $0x3b90] sm:$0xff]  ;;  %v2140_v10 = vld [vmem:[%s5158_s30 + $0x3b78] sm:$0xff] }
 0x422   : > { %4673 = vmatpush1.msra.mxu1 %v2199_v61  ;;  %4603 = vmatprep.subr.mxu0 %v2068_v27  ;;  %v2271_v22 = vld [vmem:[%s5158_s30 + $0x3f90] sm:$0xff]  ;;  %v2268_v26 = vld [vmem:[%s5158_s30 + $0x3f78] sm:$0xff] }
 0x423   : > { %4674 = vmatprep.subr.mxu1 %v2196_v16  ;;  %4604 = vmatpush1.msra.mxu0 %v2067_v30  ;;  %v2139_v61 = vld [vmem:[%s5158_s30 + $0x3b70] sm:$0xff]  ;;  %v2136_v16 = vld [vmem:[%s5158_s30 + $0x3b58] sm:$0xff] }
 0x424   : > { %4675 = vmatpush1.msra.mxu1 %v2195_v25  ;;  %4605 = vmatprep.subr.mxu0 %v2064_v4  ;;  %v2267_v27 = vld [vmem:[%s5158_s30 + $0x3f70] sm:$0xff]  ;;  %v2264_v30 = vld [vmem:[%s5158_s30 + $0x3f58] sm:$0xff] }
 0x425   : > { %4676 = vmatprep.subr.mxu1 %v2192_v33  ;;  %4606 = vmatpush1.msra.mxu0 %v2063_v15  ;;  %v2135_v25 = vld [vmem:[%s5158_s30 + $0x3b50] sm:$0xff]  ;;  %v2132_v33 = vld [vmem:[%s5158_s30 + $0x3b38] sm:$0xff] }
 0x426   : > { %4677 = vmatpush1.msra.mxu1 %v2191_v34  ;;  %4607 = vmatprep.subr.mxu0 %v2060_v28  ;;  %v2263_v4 = vld [vmem:[%s5158_s30 + $0x3f50] sm:$0xff]  ;;  %v2260_v15 = vld [vmem:[%s5158_s30 + $0x3f38] sm:$0xff] }
 0x427   : > { %4678 = vmatprep.subr.mxu1 %v2188_v37  ;;  %4608 = vmatpush1.msra.mxu0 %v2059_v38  ;;  %v2131_v34 = vld [vmem:[%s5158_s30 + $0x3b30] sm:$0xff]  ;;  %v2128_v37 = vld [vmem:[%s5158_s30 + $0x3b18] sm:$0xff] }
 0x428   : > { %4679 = vmatpush1.msra.mxu1 %v2187_v20  ;;  %4609 = vmatprep.subr.mxu0 %v2056_v40  ;;  %v2259_v28 = vld [vmem:[%s5158_s30 + $0x3f30] sm:$0xff]  ;;  %v2256_v38 = vld [vmem:[%s5158_s30 + $0x3f18] sm:$0xff] }
 0x429   : > { %4680 = vmatprep.subr.mxu1 %v2184_v41  ;;  %4610 = vmatpush1.msra.mxu0 %v2055_v24  ;;  %v2127_v20 = vld [vmem:[%s5158_s30 + $0x3b10] sm:$0xff]  ;;  %v2124_v41 = vld [vmem:[%s5158_s30 + $0x3af8] sm:$0xff] }
 0x42a   : > { %4681 = vmatpush1.msra.mxu1 %v2183_v43  ;;  %4611 = vmatprep.subr.mxu0 %v2052_v12  ;;  %v2255_v40 = vld [vmem:[%s5158_s30 + $0x3f10] sm:$0xff]  ;;  %v2252_v24 = vld [vmem:[%s5158_s30 + $0x3ef8] sm:$0xff] }
 0x42b   : > { %4682 = vmatprep.subr.mxu1 %v2180_v49  ;;  %4612 = vmatpush1.msra.mxu0 %v2051_v29  ;;  %v2123_v43 = vld [vmem:[%s5158_s30 + $0x3af0] sm:$0xff]  ;;  %v2120_v49 = vld [vmem:[%s5158_s30 + $0x3ad8] sm:$0xff] }
 0x42c   : > { %4683 = vmatpush1.msra.mxu1 %v2179_v45  ;;  %4613 = vmatprep.subr.mxu0 %v2048_v39  ;;  %v2251_v12 = vld [vmem:[%s5158_s30 + $0x3ef0] sm:$0xff]  ;;  %v2248_v29 = vld [vmem:[%s5158_s30 + $0x3ed8] sm:$0xff] }
 0x42d   : > { %4684 = vmatprep.subr.mxu1 %v2176_v18  ;;  %4614 = vmatpush1.msra.mxu0 %v2047_v47  ;;  %v2119_v45 = vld [vmem:[%s5158_s30 + $0x3ad0] sm:$0xff]  ;;  %v2116_v18 = vld [vmem:[%s5158_s30 + $0x3ab8] sm:$0xff] }
 0x42e   : > { %4685 = vmatpush1.msra.mxu1 %v2175_v19  ;;  %4615 = vmatprep.subr.mxu0 %v2044_v52  ;;  %v2247_v39 = vld [vmem:[%s5158_s30 + $0x3ed0] sm:$0xff]  ;;  %v2244_v47 = vld [vmem:[%s5158_s30 + $0x3eb8] sm:$0xff] }
 0x42f   : > { %4686 = vmatprep.subr.mxu1 %v2172_v0  ;;  %4616 = vmatpush1.msra.mxu0 %v2043_v48  ;;  %v2115_v19 = vld [vmem:[%s5158_s30 + $0x3ab0] sm:$0xff]  ;;  %v2112_v0 = vld [vmem:[%s5158_s30 + $0x3a98] sm:$0xff] }
 0x430   : > { %4687 = vmatpush1.msra.mxu1 %v2171_v23  ;;  %4617 = vmatprep.subr.mxu0 %v2040_v50  ;;  %v2243_v52 = vld [vmem:[%s5158_s30 + $0x3eb0] sm:$0xff]  ;;  %v2240_v48 = vld [vmem:[%s5158_s30 + $0x3e98] sm:$0xff] }
 0x431   : > { %4688 = vmatprep.subr.mxu1 %v2168_v44  ;;  %4618 = vmatpush1.msra.mxu0 %v2039_v7  ;;  %v2111_v23 = vld [vmem:[%s5158_s30 + $0x3a90] sm:$0xff]  ;;  %v2108_v44 = vld [vmem:[%s5158_s30 + $0x3a78] sm:$0xff] }
 0x432   : > { %4689 = vmatpush1.msra.mxu1 %v2167_v51  ;;  %4619 = vmatprep.subr.mxu0 %v2036_v9  ;;  %v2239_v50 = vld [vmem:[%s5158_s30 + $0x3e90] sm:$0xff]  ;;  %v2236_v7 = vld [vmem:[%s5158_s30 + $0x3e78] sm:$0xff] }
 0x433   : > { %4690 = vmatprep.subr.mxu1 %v2164_v54  ;;  %4620 = vmatpush1.msra.mxu0 %v2035_v11  ;;  %v2107_v51 = vld [vmem:[%s5158_s30 + $0x3a70] sm:$0xff]  ;;  %v2104_v54 = vld [vmem:[%s5158_s30 + $0x3a58] sm:$0xff] }
 0x434   : > { %4691 = vmatpush1.msra.mxu1 %v2163_v55  ;;  %4621 = vmatprep.subr.mxu0 %v2032_v63  ;;  %v2235_v9 = vld [vmem:[%s5158_s30 + $0x3e70] sm:$0xff]  ;;  %v2232_v11 = vld [vmem:[%s5158_s30 + $0x3e58] sm:$0xff] }
 0x435   : > { %4692 = vmatprep.subr.mxu1 %v2160_v2  ;;  %4622 = vmatpush1.msra.mxu0 %v2031_v56  ;;  %v2103_v55 = vld [vmem:[%s5158_s30 + $0x3a50] sm:$0xff]  ;;  %v2100_v2 = vld [vmem:[%s5158_s30 + $0x3a38] sm:$0xff] }
 0x436   : > { %4693 = vmatpush1.msra.mxu1 %v2159_v57  ;;  %4623 = vmatprep.subr.mxu0 %v2156_v58  ;;  %v2231_v63 = vld [vmem:[%s5158_s30 + $0x3e50] sm:$0xff]  ;;  %v2228_v56 = vld [vmem:[%s5158_s30 + $0x3e38] sm:$0xff] }
 0x437   : > { %4694 = vmatprep.subr.mxu1 %v2284_v42  ;;  %4624 = vmatpush2.msra.mxu0 %v2155_v59  ;;  %v2099_v57 = vld [vmem:[%s5158_s30 + $0x3a30] sm:$0xff]  ;;  %v2096_v42 = vld [vmem:[%s5158_s30 + $0x3a18] sm:$0xff] }
 0x438   : > { %4695 = vmatpush2.msra.mxu1 %v2283_v31  ;;  %4625 = vmatprep.subr.mxu0 %v2152_v60  ;;  %v2227_v58 = vld [vmem:[%s5158_s30 + $0x3e30] sm:$0xff]  ;;  %v2224_v59 = vld [vmem:[%s5158_s30 + $0x3e18] sm:$0xff] }
 0x439   : > { %4696 = vmatprep.subr.mxu1 %v2280_v46  ;;  %4626 = vmatpush2.msra.mxu0 %v2151_v62  ;;  %v2095_v31 = vld [vmem:[%s5158_s30 + $0x3a10] sm:$0xff]  ;;  %v2527_v46 = vpop.f32.mrf.mxu0  ;;  %v2598_v62 = vpop.f32.mrf.mxu1 }
 0x43a   : > { %4697 = vmatpush2.msra.mxu1 %v2279_v1  ;;  %4627 = vmatprep.subr.mxu0 %v2148_v36  ;;  %v2223_v60 = vld [vmem:[%s5158_s30 + $0x3e10] sm:$0xff] }
 0x43b   : > { %4698 = vmatprep.subr.mxu1 %v2276_v3  ;;  %4628 = vmatpush2.msra.mxu0 %v2147_v5  ;;  %v2529_v1 = vpop.f32.mrf.mxu0  ;;  %v2600_v3 = vpop.f32.mrf.mxu1 }
 0x43c   : > { %4699 = vmatpush2.msra.mxu1 %v2275_v8  ;;  %4629 = vmatprep.subr.mxu0 %v2144_v13 }
 0x43d   : > { %4700 = vmatprep.subr.mxu1 %v2272_v14  ;;  %4630 = vmatpush2.msra.mxu0 %v2143_v17  ;;  %v2669_v36 = vpop.f32.mrf.mxu0  ;;  %v2740_v5 = vpop.f32.mrf.mxu1 }
 0x43e   : > { %4701 = vmatpush2.msra.mxu1 %v2271_v22  ;;  %4631 = vmatprep.subr.mxu0 %v2140_v10 }
 0x43f   : > { %4702 = vmatprep.subr.mxu1 %v2268_v26  ;;  %4632 = vmatpush2.msra.mxu0 %v2139_v61  ;;  %v2671_v8 = vpop.f32.mrf.mxu0  ;;  %v2742_v14 = vpop.f32.mrf.mxu1 }
 0x440   : > { %4703 = vmatpush2.msra.mxu1 %v2267_v27  ;;  %4633 = vmatprep.subr.mxu0 %v2136_v16 }
 0x441   : > { %4704 = vmatprep.subr.mxu1 %v2264_v30  ;;  %4634 = vmatpush2.msra.mxu0 %v2135_v25  ;;  %v2811_v13 = vpop.f32.mrf.mxu0  ;;  %v2882_v17 = vpop.f32.mrf.mxu1 }
 0x442   : > { %4705 = vmatpush2.msra.mxu1 %v2263_v4  ;;  %4635 = vmatprep.subr.mxu0 %v2132_v33 }
 0x443   : > { %4706 = vmatprep.subr.mxu1 %v2260_v15  ;;  %4636 = vmatpush2.msra.mxu0 %v2131_v34  ;;  %v2813_v22 = vpop.f32.mrf.mxu0 }
 0x444   : > { %4707 = vmatpush2.msra.mxu1 %v2259_v28  ;;  %4637 = vmatprep.subr.mxu0 %v2128_v37 }
 0x445   : > { %4708 = vmatprep.subr.mxu1 %v2256_v38  ;;  %4638 = vmatpush2.msra.mxu0 %v2127_v20  ;;  %v2953_v10 = vpop.f32.mrf.mxu0 }
 0x446   : > { %4709 = vmatpush2.msra.mxu1 %v2255_v40  ;;  %4639 = vmatprep.subr.mxu0 %v2124_v41 }
 0x447   : > { %4710 = vmatprep.subr.mxu1 %v2252_v24  ;;  %4640 = vmatpush2.msra.mxu0 %v2123_v43  ;;  %v2955_v61 = vpop.f32.mrf.mxu0 }
 0x448   : > { %4711 = vmatpush2.msra.mxu1 %v2251_v12  ;;  %4641 = vmatprep.subr.mxu0 %v2120_v49  ;;  %v2601_v49 = vadd.f32 %v2600_v3, %v2529_v1 }
 0x449   : > { %4712 = vmatprep.subr.mxu1 %v2248_v29  ;;  %4642 = vmatpush2.msra.mxu0 %v2119_v45  ;;  %v2599_v45 = vadd.f32 %v2598_v62, %v2527_v46 }
 0x44a   : > { %4713 = vmatpush2.msra.mxu1 %v2247_v39  ;;  %4643 = vmatprep.subr.mxu0 %v2116_v18  ;;  %v2672_v39 = vadd.f32 %v2671_v8, %v2601_v49 }
 0x44b   : > { %4714 = vmatprep.subr.mxu1 %v2244_v47  ;;  %4644 = vmatpush2.msra.mxu0 %v2115_v19  ;;  %v2670_v47 = vadd.f32 %v2669_v36, %v2599_v45 }
 0x44c   : > { %4715 = vmatpush2.msra.mxu1 %v2243_v52  ;;  %4645 = vmatprep.subr.mxu0 %v2112_v0 }
 0x44d   : > { %4716 = vmatprep.subr.mxu1 %v2240_v48  ;;  %4646 = vmatpush2.msra.mxu0 %v2111_v23  ;;  %v2743_v48 = vadd.f32 %v2742_v14, %v2672_v39 }
 0x44e   : > { %4717 = vmatpush2.msra.mxu1 %v2239_v50  ;;  %4647 = vmatprep.subr.mxu0 %v2108_v44 }
 0x44f   : > { %4718 = vmatprep.subr.mxu1 %v2236_v7  ;;  %4648 = vmatpush2.msra.mxu0 %v2107_v51  ;;  %v2741_v7 = vadd.f32 %v2740_v5, %v2670_v47  ;;  %v2814_v51 = vadd.f32 %v2813_v22, %v2743_v48 }
 0x450   : > { %4719 = vmatpush2.msra.mxu1 %v2235_v9  ;;  %4649 = vmatprep.subr.mxu0 %v2104_v54 }
 0x451   : > { %4720 = vmatprep.subr.mxu1 %v2232_v11  ;;  %4650 = vmatpush2.msra.mxu0 %v2103_v55  ;;  %v2812_v11 = vadd.f32 %v2811_v13, %v2741_v7 }
 0x452   : > { %4721 = vmatpush2.msra.mxu1 %v2231_v63  ;;  %4651 = vmatprep.subr.mxu0 %v2100_v2 }
 0x453   : > { %4722 = vmatprep.subr.mxu1 %v2228_v56  ;;  %4652 = vmatpush2.msra.mxu0 %v2099_v57 }
 0x454   : > { %4723 = vmatpush2.msra.mxu1 %v2227_v58  ;;  %4653 = vmatprep.subr.mxu0 %v2096_v42 }
 0x455   : > { %4724 = vmatprep.subr.mxu1 %v2224_v59  ;;  %4654 = vmatpush2.msra.mxu0 %v2095_v31  ;;  %v2883_v59 = vadd.f32 %v2882_v17, %v2812_v11 }
 0x456   : > { %4655 = vmatprep.mubr.f32.mxu0 %v6345_v32  ;;  %4725 = vmatpush2.msra.mxu1 %v2223_v60  ;;  %v2884_v32 = vpop.f32.mrf.mxu1 }
 0x457   : > { %4726 = vmatprep.mubr.f32.mxu1 %v6351_v35  ;;  %4656 = vmatmul.mubr.f32.vlgmr.msra.gmra.mxu0 %v6330_v6  ;;  %v3095_v35 = vpop.f32.mrf.mxu0  ;;  %v2885_v56 = vadd.f32 %v2884_v32, %v2814_v51  ;;  %v2954_v62 = vadd.f32 %v2953_v10, %v2883_v59 }
 0x458   : > { %4727 = vmatmul.mubr.f32.vlgmr.msra.gmra.mxu1 %v6337_v21  ;;  %v3024_v26 = vpop.f32.mrf.mxu1 }
 0x459   : > { %v3097_v21 = vpop.f32.mrf.mxu0  ;;  %v2956_v31 = vadd.f32 %v2955_v61, %v2885_v56  ;;  %v3025_v13 = vadd.f32 %v3024_v26, %v2954_v62 }
 0x45a   : > { %v3026_v27 = vpop.f32.mrf.mxu1 }
 0x45b   : > { %v7415_v16 = vpop.f32.mrf.mxu0  ;;  %v3027_v5 = vadd.f32 %v3026_v27, %v2956_v31  ;;  %v3096_v32 = vadd.f32 %v3095_v35, %v3025_v13 }
 0x45c   : > { %v7413_v6 = vpop.f32.mrf.mxu1 }
 0x45d   : > { %v7419_v4 = vpop.f32.mrf.mxu0  ;;  %v3167_v10 = vadd.f32 %v7413_v6, %v3096_v32 }
 0x45e   : > { %v3168_v30 = vpop.f32.mrf.mxu1 }
 0x45f   : > { %v7421_v33 = vpop.f32.mrf.mxu0 }
 0x460   : > { %v7417_v25 = vpop.f32.mrf.mxu1 }
 0x461   : > { %v7427_v28 = vpop.f32.mrf.mxu0 }
 0x462   : > { %v7423_v15 = vpop.f32.mrf.mxu1 }
 0x463   : > { %v7429_v37 = vpop.f32.mrf.mxu0 }
 0x464   : > { %v7425_v34 = vpop.f32.mrf.mxu1 }
 0x465   : > { %v7435_v40 = vpop.f32.mrf.mxu0 }
 0x466   : > { %v7431_v38 = vpop.f32.mrf.mxu1 }
 0x467   : > { %v3663_v41 = vpop.f32.mrf.mxu0 }
 0x468   : > { %v7433_v20 = vpop.f32.mrf.mxu1 }
 0x469   : > { %v3665_v12 = vpop.f32.mrf.mxu0 }
 0x46a   : > { %v7437_v24 = vpop.f32.mrf.mxu1 }
 0x46b   : > { %v3805_v29 = vpop.f32.mrf.mxu0 }
 0x46c   : > { %v3734_v43 = vpop.f32.mrf.mxu1 }
 0x46d   : > { %v3735_v19 = vadd.f32 %v3734_v43, %v3663_v41  ;;  %v3807_v0 = vpop.f32.mrf.mxu0  ;;  %v3098_v41 = vadd.f32 %v3097_v21, %v3027_v5 }
 0x46e   : > { %v3736_v18 = vpop.f32.mrf.mxu1 }
 0x46f   : > { %v3737_v23 = vadd.f32 %v3736_v18, %v3665_v12  ;;  %v3806_v50 = vadd.f32 %v3805_v29, %v3735_v19  ;;  %v3947_v44 = vpop.f32.mrf.mxu0  ;;  %v3169_v17 = vadd.f32 %v3168_v30, %v3098_v41 }
 0x470   : > { %v3876_v52 = vpop.f32.mrf.mxu1 }
 0x471   : > { %v3808_v9 = vadd.f32 %v3807_v0, %v3737_v23  ;;  %v3877_v55 = vadd.f32 %v3876_v52, %v3806_v50  ;;  %v3949_v2 = vpop.f32.mrf.mxu0  ;;  %v3240_v47 = vadd.f32 %v7419_v4, %v3169_v17  ;;  %v3238_v52 = vadd.f32 %v7415_v16, %v3167_v10 }
 0x472   : > { %v3878_v54 = vpop.f32.mrf.mxu1 }
 0x473   : > { %v3879_v57 = vadd.f32 %v3878_v54, %v3808_v9  ;;  %v3948_v58 = vadd.f32 %v3947_v44, %v3877_v55  ;;  %v4089_v42 = vpop.f32.mrf.mxu0  ;;  %v3311_v35 = vadd.f32 %v7423_v15, %v3240_v47  ;;  %v3309_v30 = vadd.f32 %v7417_v25, %v3238_v52 }
 0x474   : > { %v4018_v63 = vpop.f32.mrf.mxu1 }
 0x475   : > { %v3950_v60 = vadd.f32 %v3949_v2, %v3879_v57  ;;  %v4019_v1 = vadd.f32 %v4018_v63, %v3948_v58  ;;  %v4091_v3 = vpop.f32.mrf.mxu0  ;;  %v3382_v44 = vadd.f32 %v7427_v28, %v3311_v35  ;;  %v3380_v4 = vadd.f32 %v7421_v33, %v3309_v30 }
 0x476   : > { %v4020_v46 = vpop.f32.mrf.mxu1 }
 0x477   : > { %v4021_v8 = vadd.f32 %v4020_v46, %v3950_v60  ;;  %v4090_v14 = vadd.f32 %v4089_v42, %v4019_v1  ;;  %v4231_v22 = vpop.f32.mrf.mxu0  ;;  %v3453_v16 = vadd.f32 %v7431_v38, %v3382_v44  ;;  %v3451_v15 = vadd.f32 %v7425_v34, %v3380_v4 }
 0x478   : > { %v4160_v36 = vpop.f32.mrf.mxu1 }
 0x479   : > { %v4092_v43 = vadd.f32 %v4091_v3, %v4021_v8  ;;  %v4161_v49 = vadd.f32 %v4160_v36, %v4090_v14  ;;  %v4233_v45 = vpop.f32.mrf.mxu0  ;;  %v3524_v63 = vadd.f32 %v7435_v40, %v3453_v16  ;;  %v3522_v25 = vadd.f32 %v7429_v37, %v3451_v15  ;;  %v228_v3 = vld [vmem:[%s5170_s21] sm:$0xff] }
 0x47a   : > { %v4162_v12 = vpop.f32.mrf.mxu1 }
 0x47b   : > { %v4163_v61 = vadd.f32 %v4162_v12, %v4092_v43  ;;  %v4232_v39 = vadd.f32 %v4231_v22, %v4161_v49  ;;  %v3595_v33 = vadd.f32 %v7437_v24, %v3524_v63  ;;  %v3593_v31 = vadd.f32 %v7433_v20, %v3522_v25 }
 0x47c   : > { %v4302_v29 = vpop.f32.mrf.mxu1 }
 0x47d   : > { %v4234_v27 = vadd.f32 %v4233_v45, %v4163_v61  ;;  %v4303_v26 = vadd.f32 %v4302_v29, %v4232_v39  ;;  %v4737_v46 = vcombine.low %v3593_v31, %v3595_v33 }
 0x47e   : > { %v4304_v19 = vpop.f32.mrf.mxu1 }
 0x47f   : > { %v4305_v48 = vadd.f32 %v4304_v19, %v4234_v27  ;;  %v4745_v37 = vrot.slane %v4737_v46, %v5290_v53 }
 0x493   : > { %v4373_v18 = vpop.f32.mrf.mxu0 }
 0x494   : > { %v4374_v23 = vadd.f32 %v4373_v18, %v4303_v26 }
 0x495   : > { %v4444_v21 = vpop.f32.mrf.mxu1  ;;  %v4375_v0 = vpop.f32.mrf.mxu0 }
 0x496   : > { %v4376_v7 = vadd.f32 %v4375_v0, %v4305_v48  ;;  %v4445_v51 = vadd.f32 %v4444_v21, %v4374_v23 }
 0x497   : > { %v4446_v6 = vpop.f32.mrf.mxu1 }
 0x498   : > { %v4447_v11 = vadd.f32 %v4446_v6, %v4376_v7 }
 0x4d5   : > { %v4515_v50 = vpop.f32.mrf.mxu0 }
 0x4d6   : > { %v4516_v55 = vadd.f32 %v4515_v50, %v4445_v51 }
 0x4d7   : > { %v4586_v9 = vpop.f32.mrf.mxu1  ;;  %v4517_v54 = vpop.f32.mrf.mxu0 }
 0x4d8   : > { %v4518_v2 = vadd.f32 %v4517_v54, %v4447_v11  ;;  %v4587_v28 = vadd.f32 %v4586_v9, %v4516_v55 }
 0x4d9   : > { %v4588_v56 = vpop.f32.mrf.mxu1 }
 0x4da   : > { %v4589_v42 = vadd.f32 %v4588_v56, %v4518_v2 }
 0x517   : > { %v4657_v57 = vpop.f32.mrf.mxu0 }
 0x518   : > { %v4728_v58 = vpop.f32.mrf.mxu1  ;;  %v4658_v59 = vadd.f32 %v4657_v57, %v4587_v28 }
 0x519   : > { %v4659_v38 = vpop.f32.mrf.mxu0 }
 0x51a   : > { %v4660_v60 = vadd.f32 %v4659_v38, %v4589_v42  ;;  %v4730_v34 = vpop.f32.mrf.mxu1  ;;  %v4729_v40 = vadd.f32 %v4728_v58, %v4658_v59 }
 0x51c   : > { %v4731_v62 = vadd.f32 %v4730_v34, %v4660_v60 }
 0x51e   : > { %v4738_v1 = vcombine.low %v4729_v40, %v4731_v62 }
 0x520   : > { %v4752_v36 = vrot.slane %v4738_v1, %v5290_v53 }
 0x522   : > { %v4753_v5 = vcombine.low %v4745_v37, %v4752_v36 }
 0x524   : > { %v4755_v8 = vadd.f32 %v4753_v5, %v228_v3 }
 0x526   : > { %4756 = vst [vmem:[%s5170_s21] sm:$0xff] %v4755_v8 }
 0x527 PF: > { %s15_s16 = sadd.s32 1, %s5052_s16   ;;  %s7486_s9 = smov %s5028_s10 }
 0x528   : > { %p12_p11 = scmp.ge.s32.totalorder %s15_s16, 18   ;;  %s7487_s10 = smov %s5032_s11 }
 0x529   : > { %s7488_s11 = smov %s5140_s3  ;;  %s7489_s12 = smov %s5044_s14 }
 0x52a   : > { %s7490_s13 = smov %s5048_s15  ;;  %s7491_s14 = smov %s7494_s18 }
 0x52b   : > { %s7492_s15 = smov %s7498_s19  ;;  %14 = sbr.rel (!%p12_p11) target bundleno = 5 (0x5), region = 75 }
 0x530   :  { %4779 = vsyncpa [#allocation3], 1 }
 0x531   :  { %4781 = vsyncpa [#allocation3 + $0x1], 1 }

</bundles_post_ra>
